<compile_context>
chip_gen: v7x
topology: tpu7x:2x2x1
jax: 0.10.0
libtpu: 0.0.40
codegen_flags: <defaults>
</compile_context>

<pallas_src>
import functools
import math
import re

import jax
import jax.numpy as jnp
from jax.experimental import pallas as pl
from jax.experimental.pallas import tpu as pltpu

# MXU input dtype.  Accumulation is always f32.
MXU_DTYPE = jnp.bfloat16


# ---------------- generation-gated tiling constants ----------------

def _tpu_generation():
    try:
        kind = jax.devices()[0].device_kind
    except Exception:
        return 0
    m = re.search(r"(\d+)", kind)
    return int(m.group(1)) if m else 0


_GEN = _tpu_generation()

if _GEN >= 7:        # v7x: 2x256x256 MXU, 64 MiB VMEM, 2 TCs/chip
    _TM, _TN, _TK = 256, 256, 512
    _VMEM_LIMIT = 48 * 1024 * 1024
elif _GEN == 6:      # v6e: 2x256x256 MXU, 128 MiB VMEM
    _TM, _TN, _TK = 256, 256, 512
    _VMEM_LIMIT = 64 * 1024 * 1024
elif _GEN == 5:      # v5e: 4x128x128 MXU -> 128 tiles; spend VMEM on pipelining
    _TM, _TN, _TK = 128, 128, 256
    _VMEM_LIMIT = 96 * 1024 * 1024
else:                # unknown / v4 and older: conservative defaults
    _TM, _TN, _TK = 128, 128, 256
    _VMEM_LIMIT = 32 * 1024 * 1024

_ATTN_VMEM_BUDGET = (3 * _VMEM_LIMIT) // 4
_LN_TM = 256


def _round_up(x, m):
    return ((x + m - 1) // m) * m


def _pick_tile(dim, tile, align):
    """Return (padded_dim, tile_size): full-dim block if small, else pad+tile."""
    if dim > tile:
        return _round_up(dim, tile), tile
    d = _round_up(dim, align)
    return d, d


# ---------------- one-time in-kernel GELU (erf) capability probe ----------------

_GELU_IN_KERNEL = None


def _gelu_kernel_ok():
    """Probe (outside any jit trace) whether exact-erf GELU lowers in Mosaic."""
    global _GELU_IN_KERNEL
    if _GELU_IN_KERNEL is None:
        def _probe(x_ref, o_ref):
            o_ref[...] = jax.nn.gelu(x_ref[...], approximate=False)
        try:
            x = jnp.zeros((8, 128), jnp.float32)
            out = pl.pallas_call(
                _probe, out_shape=jax.ShapeDtypeStruct((8, 128), jnp.float32))(x)
            jax.block_until_ready(out)
            _GELU_IN_KERNEL = True
        except Exception:
            _GELU_IN_KERNEL = False
    return _GELU_IN_KERNEL


# ---------------- prepped (padded / bf16) linear weights ----------------

@jax.tree_util.register_pytree_node_class
class PrepLinear:
    """Linear weights pre-padded to kernel tiles and pre-cast to bf16 (hoisted
    out of the forward pass so no per-call pad/transpose/cast XLA ops remain)."""

    def __init__(self, w, b, k_in, n_out):
        self.w, self.b, self.k_in, self.n_out = w, b, k_in, n_out

    def tree_flatten(self):
        return (self.w, self.b), (self.k_in, self.n_out)

    @classmethod
    def tree_unflatten(cls, aux, children):
        return cls(children[0], children[1], *aux)


def prep_linear(w, b):
    K, N = w.shape
    Kp, _ = _pick_tile(K, _TK, 16)     # 16: bf16 sublane packing
    Np, _ = _pick_tile(N, _TN, 128)    # 128: lane-dense output stores
    wp = jnp.pad(w.astype(MXU_DTYPE), ((0, Kp - K), (0, Np - N)))
    bp = jnp.pad(b.astype(jnp.float32), (0, Np - N)).reshape(1, Np)
    return PrepLinear(wp, bp, K, N)


# ---------------- Pallas kernels ----------------

def _linear_kernel(activation, x_ref, w_ref, b_ref, o_ref, acc_ref):
    k = pl.program_id(2)

    @pl.when(k == 0)
    def _():
        acc_ref[...] = jnp.zeros_like(acc_ref)

    acc_ref[...] += jnp.dot(x_ref[...], w_ref[...],
                            preferred_element_type=jnp.float32)

    @pl.when(k == pl.num_programs(2) - 1)
    def _():
        y = acc_ref[...] + b_ref[...]
        if activation == "gelu":
            # exact-erf GELU fused into the flush; erf runs on the EUP slot,
            # which is idle in a matmul kernel.
            y = jax.nn.gelu(y, approximate=False)
        o_ref[...] = y.astype(o_ref.dtype)


def pallas_linear(x2d, lin, out_dtype=jnp.float32, activation=None):
    """y = x @ W + b with W/b from a PrepLinear (padded + bf16), optional fused GELU."""
    M, K = x2d.shape
    Kp, Np = lin.w.shape
    assert K == lin.k_in, (K, lin.k_in)

    fuse_act = (activation == "gelu") and (_GELU_IN_KERNEL is True)
    kdtype = out_dtype if (activation is None or fuse_act) else jnp.float32

    Mp, tm = _pick_tile(M, _TM, 16)
    tk = _TK if Kp > _TK else Kp
    tn = _TN if Np > _TN else Np
    # v7x has 2 TensorCores: make sure the parallel axes have >=2 blocks when possible.
    if _GEN >= 7 and (Mp // tm) * (Np // tn) < 2 and Np % 256 == 0:
        tn = Np // 2

    xp = x2d.astype(MXU_DTYPE)                      # cast BEFORE the call: halves DMA bytes
    if Mp != M or Kp != K:
        xp = jnp.pad(xp, ((0, Mp - M), (0, Kp - K)))

    grid = (Mp // tm, Np // tn, Kp // tk)
    ce = pl.CostEstimate(flops=2 * M * K * lin.n_out, transcendentals=0,
                         bytes_accessed=2 * (M * K + K * lin.n_out) + 4 * M * lin.n_out)

    out = pl.pallas_call(
        functools.partial(_linear_kernel, "gelu" if fuse_act else None),
        out_shape=jax.ShapeDtypeStruct((Mp, Np), kdtype),
        grid=grid,
        in_specs=[
            pl.BlockSpec((tm, tk), lambda i, j, k: (i, k)),
            pl.BlockSpec((tk, tn), lambda i, j, k: (k, j)),
            pl.BlockSpec((1, tn), lambda i, j, k: (0, j)),
        ],
        out_specs=pl.BlockSpec((tm, tn), lambda i, j, k: (i, j)),
        scratch_shapes=[pltpu.VMEM((tm, tn), jnp.float32)],
        compiler_params=pltpu.CompilerParams(
            dimension_semantics=("parallel", "parallel", "arbitrary"),
            vmem_limit_bytes=_VMEM_LIMIT),
        cost_estimate=ce,
    )(xp, lin.w, lin.b)

    if Mp != M or Np != lin.n_out:
        out = out[:M, :lin.n_out]
    if activation == "gelu" and not fuse_act:
        # TODO(synk): erf lowering unavailable in this Mosaic build; GELU falls back to XLA glue.
        out = jax.nn.gelu(out, approximate=False).astype(out_dtype)
    return out


def _attn_kernel(scale, gh, dh, q_ref, k_ref, v_ref, o_ref, m_sc, l_sc, acc_sc):
    # q_ref: (1, tq, gh*dh) bf16 ; k_ref/v_ref: (1, tkv, gh*dh) bf16
    # o_ref: (1, tq, gh*dh)      ; scratch: m/l (gh, tq, 1) f32, acc (gh, tq, dh) f32
    ki = pl.program_id(3)

    @pl.when(ki == 0)
    def _():
        m_sc[...] = jnp.full_like(m_sc, -jnp.inf)
        l_sc[...] = jnp.zeros_like(l_sc)
        acc_sc[...] = jnp.zeros_like(acc_sc)

    q = q_ref[0] * scale        # pre-scale q: gh*tq*dh mults instead of gh*tq*tkv
    k = k_ref[0]
    v = v_ref[0]

    for h in range(gh):         # static unroll over the heads in this group
        cols = slice(h * dh, (h + 1) * dh)
        s = jax.lax.dot_general(q[:, cols], k[:, cols],
                                (((1,), (1,)), ((), ())),
                                preferred_element_type=jnp.float32)     # (tq, tkv)
        m_prev = m_sc[h]
        m_new = jnp.maximum(m_prev, jnp.max(s, axis=-1, keepdims=True))
        alpha = jnp.exp(m_prev - m_new)
        p = jnp.exp(s - m_new)
        l_sc[h] = alpha * l_sc[h] + jnp.sum(p, axis=-1, keepdims=True)
        acc_sc[h] = alpha * acc_sc[h] + jnp.dot(
            p.astype(v.dtype), v[:, cols], preferred_element_type=jnp.float32)
        m_sc[h] = m_new

    @pl.when(ki == pl.num_programs(3) - 1)
    def _():
        for h in range(gh):
            cols = slice(h * dh, (h + 1) * dh)
            # exact normalization (review correctness note: no approx reciprocal)
            o_ref[0, :, cols] = (acc_sc[h] / l_sc[h]).astype(o_ref.dtype)


def _attn_seq_tile(N):
    for t in (1024, 512, 256, 128):
        if N % t == 0 and N > t:
            return t
    # TODO(synk): ragged N with N > budget would need kv-padding + masking; here we
    # fall back to full-length kv blocks and bound VMEM via the head-group size.
    return N


def _pick_head_group(H, dh, tq, tkv, other_parallel):
    """Largest legal head-group whose per-step VMEM footprint fits the budget."""
    def footprint(g):
        f32, bf16 = 4, 2
        scores = 2 * g * tq * tkv * f32                 # s and p coexist
        scratch = g * tq * (2 + dh) * f32               # m, l, acc
        flush = g * tq * dh * f32
        bufs = 2 * (tq + 2 * tkv) * g * dh * bf16       # double-buffered q, k, v
        outs = 2 * tq * g * dh * bf16
        return scores + scratch + flush + bufs + outs

    legal = [g for g in range(1, H + 1)
             if H % g == 0 and ((g * dh) % 128 == 0 or g == H)]
    pick = legal[0]
    for g in legal:                                     # ascending -> largest that fits
        if footprint(g) <= _ATTN_VMEM_BUDGET:
            pick = g
    # v7x: keep >=2 parallel blocks so both TensorCores get work.
    if _GEN >= 7 and other_parallel * (H // pick) < 2:
        for g in legal:
            if H // g >= 2 and footprint(g) <= _ATTN_VMEM_BUDGET:
                pick = g
    return pick


def pallas_attention(qkv, num_heads):
    """Flash-style attention reading q/k/v from the fused (B, N, 3D) qkv activation
    and writing a lane-dense (B, N, D) output (no head transposes in XLA)."""
    B, N, threeD = qkv.shape
    D = threeD // 3
    assert threeD == 3 * D and D % num_heads == 0
    H = num_heads
    dh = D // H
    scale = float(dh) ** -0.5

    tq = tkv = _attn_seq_tile(N)
    nq, nkv = N // tq, N // tkv
    gh = _pick_head_group(H, dh, tq, tkv, B * nq)
    hg = H // gh

    grid = (B, hg, nq, nkv)
    out_spec = pl.BlockSpec((1, tq, gh * dh), lambda b, g, qi, ki: (b, qi, g))
    scratch = [pltpu.VMEM((gh, tq, 1), jnp.float32),
               pltpu.VMEM((gh, tq, 1), jnp.float32),
               pltpu.VMEM((gh, tq, dh), jnp.float32)]
    cparams = pltpu.CompilerParams(
        dimension_semantics=("parallel", "parallel", "parallel", "arbitrary"),
        vmem_limit_bytes=_VMEM_LIMIT)
    ce = pl.CostEstimate(flops=4 * B * H * N * N * dh,
                         transcendentals=B * H * N * N,
                         bytes_accessed=2 * 4 * B * N * D)

    if (gh * dh) % 128 == 0:
        # Direct path: index the q/k/v column blocks straight out of the fused qkv
        # tensor (no slice copies, no transposes).
        q_spec = pl.BlockSpec((1, tq, gh * dh), lambda b, g, qi, ki: (b, qi, g))
        k_spec = pl.BlockSpec((1, tkv, gh * dh), lambda b, g, qi, ki: (b, ki, hg + g))
        v_spec = pl.BlockSpec((1, tkv, gh * dh), lambda b, g, qi, ki: (b, ki, 2 * hg + g))
        args = (qkv, qkv, qkv)
    else:
        # Small-dim fallback (e.g. the toy config): cheap last-dim slices (still no
        # (B,N,3,H,dh) transpose chain), full-D head group so blocks stay legal.
        q = qkv[:, :, :D]
        k = qkv[:, :, D:2 * D]
        v = qkv[:, :, 2 * D:]
        q_spec = pl.BlockSpec((1, tq, gh * dh), lambda b, g, qi, ki: (b, qi, g))
        k_spec = pl.BlockSpec((1, tkv, gh * dh), lambda b, g, qi, ki: (b, ki, g))
        v_spec = pl.BlockSpec((1, tkv, gh * dh), lambda b, g, qi, ki: (b, ki, g))
        args = (q, k, v)

    return pl.pallas_call(
        functools.partial(_attn_kernel, scale, gh, dh),
        out_shape=jax.ShapeDtypeStruct((B, N, D), MXU_DTYPE),
        grid=grid,
        in_specs=[q_spec, k_spec, v_spec],
        out_specs=out_spec,
        scratch_shapes=scratch,
        compiler_params=cparams,
        cost_estimate=ce,
    )(*args)


def _ln_kernel(eps, x_ref, g_ref, b_ref, o_ref):
    x = x_ref[...]
    mu = jnp.mean(x, axis=-1, keepdims=True)
    var = jnp.mean((x - mu) ** 2, axis=-1, keepdims=True)
    y = (x - mu) * jax.lax.rsqrt(var + eps) * g_ref[...] + b_ref[...]
    o_ref[...] = y.astype(o_ref.dtype)


def pallas_layernorm(x2d, g, b, eps=1e-6, out_dtype=jnp.float32):
    # eps=1e-6 matches the reference: partial(nn.LayerNorm, eps=1e-06) everywhere.
    M, D = x2d.shape
    Mp, tm = _pick_tile(M, _LN_TM, 8)
    xp = x2d if Mp == M else jnp.pad(x2d, ((0, Mp - M), (0, 0)))
    out = pl.pallas_call(
        functools.partial(_ln_kernel, eps),
        out_shape=jax.ShapeDtypeStruct((Mp, D), out_dtype),
        grid=(Mp // tm,),
        in_specs=[
            pl.BlockSpec((tm, D), lambda i: (i, 0)),
            pl.BlockSpec((1, D), lambda i: (0, 0)),
            pl.BlockSpec((1, D), lambda i: (0, 0)),
        ],
        out_specs=pl.BlockSpec((tm, D), lambda i: (i, 0)),
        compiler_params=pltpu.CompilerParams(dimension_semantics=("parallel",)),
    )(xp, g.reshape(1, D), b.reshape(1, D))
    return out if Mp == M else out[:M]


def _gconv_kernel(kk, p_ref, w_ref, b_ref, o_ref):
    # p_ref: (1, C, KK, P), w_ref: (C, m, KK), b_ref: (C, m, 1), o_ref: (1, C, m, P)
    pv = p_ref[0]          # (C, KK, P) -- spatial P on lanes
    wv = w_ref[...]        # (C, m, KK)
    acc = pv[:, 0:1, :] * wv[:, :, 0:1]                      # (C, m, P)
    for t in range(1, kk):                                   # static KK-tap accumulation
        acc = acc + pv[:, t:t + 1, :] * wv[:, :, t:t + 1]
    o_ref[0] = acc + b_ref[...]


def pallas_grouped_conv(patches, w3, b3):
    # patches: (B, C_in, KK, P); w3: (C_in, m, KK); b3: (C_in, m, 1)
    B, C, KK, P = patches.shape
    m = w3.shape[1]
    Pp = _round_up(P, 128)                                   # lane-dense stores
    if Pp != P:
        patches = jnp.pad(patches, ((0, 0), (0, 0), (0, 0), (0, Pp - P)))
    out = pl.pallas_call(
        functools.partial(_gconv_kernel, KK),
        out_shape=jax.ShapeDtypeStruct((B, C, m, Pp), jnp.float32),
        grid=(B,),
        in_specs=[
            pl.BlockSpec((1, C, KK, Pp), lambda i: (i, 0, 0, 0)),
            pl.BlockSpec((C, m, KK), lambda i: (0, 0, 0)),
            pl.BlockSpec((C, m, 1), lambda i: (0, 0, 0)),
        ],
        out_specs=pl.BlockSpec((1, C, m, Pp), lambda i: (i, 0, 0, 0)),
        compiler_params=pltpu.CompilerParams(dimension_semantics=("parallel",)),
    )(patches, w3, b3)
    return out[..., :P] if Pp != P else out


def _lca_combine_kernel(q_ref, k_ref, v_ref, pb_ref, o_ref):
    q = q_ref[...]    # (B, n, D)
    k = k_ref[...]
    v = v_ref[...]
    pb = pb_ref[...]  # (n, n)
    n = q.shape[1]
    outs = []
    for i in range(n):                       # n is tiny & static (n=1 here)
        z = k + pb[i].reshape(1, n, 1)       # z[b,j,d] = k[b,j,d] + pb[i,j]
        # exact stabilization: the per-(b,d) max over j cancels in num/den
        z = z - jnp.max(z, axis=1, keepdims=True)
        w = jnp.exp(z)
        num = jnp.sum(w * v, axis=1)         # (B, D)
        den = jnp.sum(w, axis=1)             # (B, D)
        outs.append(jax.nn.sigmoid(q[:, i, :]) * (num / den))   # exact division
    o_ref[...] = jnp.stack(outs, axis=1)


def pallas_lca_combine(q, k, v, pb):
    B, n, D = q.shape
    return pl.pallas_call(
        _lca_combine_kernel,
        out_shape=jax.ShapeDtypeStruct((B, n, D), jnp.float32),
        grid=(1,),
        in_specs=[
            pl.BlockSpec((B, n, D), lambda i: (0, 0, 0)),
            pl.BlockSpec((B, n, D), lambda i: (0, 0, 0)),
            pl.BlockSpec((B, n, D), lambda i: (0, 0, 0)),
            pl.BlockSpec((n, n), lambda i: (0, 0)),
        ],
        out_specs=pl.BlockSpec((B, n, D), lambda i: (0, 0, 0)),
    )(q, k, v, pb)


# ---------------- model glue (plain JAX) ----------------

def extract_patches(x, k, stride, pad):
    # x: (B, C, H, W) -> (B, C, k*k, oh, ow), tap order (kh, kw)
    if pad > 0:
        x = jnp.pad(x, ((0, 0), (0, 0), (pad, pad), (pad, pad)))
    B, C, H, W = x.shape
    oh = (H - k) // stride + 1
    ow = (W - k) // stride + 1
    cols = []
    for di in range(k):
        for dj in range(k):
            cols.append(x[:, :, di:di + stride * (oh - 1) + 1:stride,
                              dj:dj + stride * (ow - 1) + 1:stride])
    return jnp.stack(cols, axis=2), oh, ow


def patch_embed(x, lin, patch, stride):
    # conv_embedding: Conv2d(in, out, kernel=patch, stride, pad=0) via im2col + matmul
    patches, oh, ow = extract_patches(x, patch, stride, 0)   # (B, C, KK, oh, ow)
    B, C, KK, _, _ = patches.shape
    p2 = patches.transpose(0, 3, 4, 1, 2).reshape(B * oh * ow, C * KK)
    y = pallas_linear(p2, lin)                               # weight pre-transposed at prep
    c_out = lin.n_out
    return y.reshape(B, oh, ow, c_out).transpose(0, 3, 1, 2)


def transformer_block(x, p, num_heads):
    # timm ViT block: x + attn(norm1(x)); x + mlp(norm2(x)); drop rates = 0
    B, N, D = x.shape
    h = pallas_layernorm(x.reshape(B * N, D), p["ln1_g"], p["ln1_b"],
                         out_dtype=MXU_DTYPE)
    qkv = pallas_linear(h, p["qkv"], out_dtype=MXU_DTYPE).reshape(B, N, 3 * D)
    o = pallas_attention(qkv, num_heads)                     # (B, N, D), no head transposes
    o = pallas_linear(o.reshape(B * N, D), p["proj"]).reshape(B, N, D)
    x = x + o
    # TODO(synk): the residual add + LayerNorm below could be fused into one kernel to
    # save one HBM round trip of the residual stream.
    h = pallas_layernorm(x.reshape(B * N, D), p["ln2_g"], p["ln2_b"],
                         out_dtype=MXU_DTYPE)
    h = pallas_linear(h, p["fc1"], out_dtype=MXU_DTYPE, activation="gelu")  # GELU fused in flush
    h = pallas_linear(h, p["fc2"]).reshape(B, N, D)
    return x + h


def transformer_stage(x, cls_tokens, blocks, num_heads):
    B, C, H, W = x.shape
    tokens = x.reshape(B, C, H * W).transpose(0, 2, 1)       # 'b c h w -> b (h w) c'
    t = cls_tokens.shape[1]
    tokens = jnp.concatenate([cls_tokens, tokens], axis=1)
    for bp in blocks:
        tokens = transformer_block(tokens, bp, num_heads)
    cls_out = tokens[:, :t]
    x_out = tokens[:, t:].transpose(0, 2, 1).reshape(B, C, H, W)
    return x_out, cls_out


def conv_head_pooling(x, cls_token, pool_p, stride=2):
    # grouped conv: groups = C_in, kernel = stride+1, pad = stride//2
    B, c_in, H, W = x.shape
    k = stride + 1
    pad = stride // 2
    patches, oh, ow = extract_patches(x, k, stride, pad)     # (B, C_in, k*k, oh, ow)
    w3, b3 = pool_p["conv_w"], pool_p["conv_b"]              # (C_in, m, KK), (C_in, m, 1)
    m = w3.shape[1]
    patches = patches.reshape(B, c_in, k * k, oh * ow)
    y = pallas_grouped_conv(patches, w3, b3)                 # (B, C_in, m, P)
    y = y.reshape(B, c_in * m, oh, ow)                       # group-major channel order
    Bc, T, D = cls_token.shape
    cls_out = pallas_linear(cls_token.reshape(Bc * T, D), pool_p["fc"])
    cls_out = cls_out.reshape(Bc, T, pool_p["fc"].n_out)
    return y, cls_out


def lca_forward(x, p):
    B, n, D = x.shape
    x2 = x.reshape(B * n, D)
    q = pallas_linear(x2, p["q"]).reshape(B, n, D)
    k = pallas_linear(x2, p["k"]).reshape(B, n, D)
    v = pallas_linear(x2, p["v"]).reshape(B, n, D)
    return pallas_lca_combine(q, k, v, p["pos_biases"])


def pooling_transformer_forward(cfg, params, x):
    heads = cfg["heads"]
    B = x.shape[0]

    x = patch_embed(x, params["patch"], cfg["patch_size"], cfg["stride"])
    x = x + params["pos_embed"]                # pos_drop(p=0) == identity
    D0 = params["cls_token"].shape[-1]
    cls_tokens = jnp.broadcast_to(params["cls_token"], (B, 1, D0))

    n_stages = len(cfg["depth"])
    for s in range(n_stages - 1):
        x, cls_tokens = transformer_stage(x, cls_tokens, params["stages"][s], heads[s])
        x, cls_tokens = conv_head_pooling(x, cls_tokens, params["pools"][s], stride=2)
    x, cls_tokens = transformer_stage(x, cls_tokens, params["stages"][-1], heads[-1])

    Bc, T, D = cls_tokens.shape
    cls_tokens = pallas_layernorm(cls_tokens.reshape(Bc * T, D),
                                  params["norm_g"], params["norm_b"]).reshape(Bc, T, D)

    x1 = lca_forward(cls_tokens, params["lca"])
    cls_tokens = cls_tokens + x1
    out = pallas_linear(cls_tokens[:, 0], params["head_hash"])   # head∘hash fused at prep
    return out


# ---------------- one-time parameter preparation (hoisted out of the forward) ----------------

def prepare_params(params, cfg):
    _gelu_kernel_ok()   # resolve the in-kernel GELU capability probe outside any jit trace

    pp = {
        "patch": prep_linear(params["patch_w"].T, params["patch_b"]),   # pre-transposed
        "pos_embed": params["pos_embed"],
        "cls_token": params["cls_token"],
        "norm_g": params["norm_g"],
        "norm_b": params["norm_b"],
    }

    pp["stages"] = [[{
        "ln1_g": bp["ln1_g"], "ln1_b": bp["ln1_b"],
        "ln2_g": bp["ln2_g"], "ln2_b": bp["ln2_b"],
        "qkv": prep_linear(bp["qkv_w"], bp["qkv_b"]),
        "proj": prep_linear(bp["proj_w"], bp["proj_b"]),
        "fc1": prep_linear(bp["fc1_w"], bp["fc1_b"]),
        "fc2": prep_linear(bp["fc2_w"], bp["fc2_b"]),
    } for bp in stage] for stage in params["stages"]]

    dims = [cfg["base_dims"][s] * cfg["heads"][s] for s in range(len(cfg["depth"]))]
    pools = []
    for s, pq in enumerate(params["pools"]):
        cin, cout = dims[s], dims[s + 1]
        m = cout // cin
        kk = pq["conv_w"].shape[-1]
        # PyTorch groups=C_in: output channel oc = cin*m + j uses input channel cin.
        pools.append({
            "conv_w": pq["conv_w"].reshape(cin, m, kk).astype(jnp.float32),
            "conv_b": pq["conv_b"].reshape(cin, m, 1).astype(jnp.float32),
            "fc": prep_linear(pq["fc_w"], pq["fc_b"]),
        })
    pp["pools"] = pools

    pp["lca"] = {
        "q": prep_linear(params["lca"]["q_w"], params["lca"]["q_b"]),
        "k": prep_linear(params["lca"]["k_w"], params["lca"]["k_b"]),
        "v": prep_linear(params["lca"]["v_w"], params["lca"]["v_b"]),
        "pos_biases": params["lca"]["pos_biases"],
    }

    # head + hash are two stacked linears -> fold into one fused linear once.
    fused_w = jnp.dot(params["head_w"], params["hash_w"])                      # (D, bit)
    fused_b = jnp.dot(params["head_b"], params["hash_w"]) + params["hash_b"]   # (bit,)
    pp["head_hash"] = prep_linear(fused_w, fused_b)
    return pp


# ---------------- deterministic parameter init ----------------

def init_params(key, cfg):
    kiter = iter(jax.random.split(key, 512))

    def nrm(shape, std=0.02):
        return std * jax.random.normal(next(kiter), shape, dtype=jnp.float32)

    in_chans = cfg["in_chans"]
    base_dims = cfg["base_dims"]
    heads = cfg["heads"]
    depth = cfg["depth"]
    mlp_ratio = cfg["mlp_ratio"]
    patch = cfg["patch_size"]
    stride = cfg["stride"]
    width = math.floor((cfg["image_size"] - patch) / stride + 1)
    dims = [base_dims[s] * heads[s] for s in range(len(depth))]

    params = {
        "patch_w": nrm((dims[0], in_chans * patch * patch)),
        "patch_b": jnp.zeros((dims[0],), jnp.float32),
        "pos_embed": nrm((1, dims[0], width, width)),       # trunc_normal(std=0.02) approx
        "cls_token": nrm((1, 1, dims[0])),
    }

    def block_params(D):
        H = D * mlp_ratio
        return {
            "ln1_g": jnp.ones((D,), jnp.float32), "ln1_b": jnp.zeros((D,), jnp.float32),
            "qkv_w": nrm((D, 3 * D)), "qkv_b": jnp.zeros((3 * D,), jnp.float32),
            "proj_w": nrm((D, D)), "proj_b": jnp.zeros((D,), jnp.float32),
            "ln2_g": jnp.ones((D,), jnp.float32), "ln2_b": jnp.zeros((D,), jnp.float32),
            "fc1_w": nrm((D, H)), "fc1_b": jnp.zeros((H,), jnp.float32),
            "fc2_w": nrm((H, D)), "fc2_b": jnp.zeros((D,), jnp.float32),
        }

    params["stages"] = [[block_params(dims[s]) for _ in range(depth[s])]
                        for s in range(len(depth))]

    pools = []
    for s in range(len(heads) - 1):
        cin, cout = dims[s], dims[s + 1]
        k = 2 + 1  # pooling stride 2 -> kernel 3
        pools.append({
            "conv_w": nrm((cout, k * k)),
            "conv_b": jnp.zeros((cout,), jnp.float32),
            "fc_w": nrm((cin, cout)),
            "fc_b": jnp.zeros((cout,), jnp.float32),
        })
    params["pools"] = pools

    D_last = dims[-1]
    params["norm_g"] = jnp.ones((D_last,), jnp.float32)
    params["norm_b"] = jnp.zeros((D_last,), jnp.float32)

    # LCA (d_model matched to cls-token dim instead of the hard-coded 576; n = 1)
    params["lca"] = {
        "q_w": nrm((D_last, D_last), std=0.001), "q_b": jnp.zeros((D_last,), jnp.float32),
        "k_w": nrm((D_last, D_last), std=0.001), "k_b": jnp.zeros((D_last,), jnp.float32),
        "v_w": nrm((D_last, D_last), std=0.001), "v_b": jnp.zeros((D_last,), jnp.float32),
        "pos_biases": jnp.ones((1, 1), jnp.float32),
    }

    nc = cfg["num_classes"]
    params["head_w"] = nrm((D_last, nc))
    params["head_b"] = jnp.zeros((nc,), jnp.float32)
    params["hash_w"] = nrm((nc, cfg["bit"]))
    params["hash_b"] = jnp.zeros((cfg["bit"],), jnp.float32)
    return params


if __name__ == "__main__":
    cfg = dict(image_size=16, patch_size=4, stride=4, base_dims=[8, 8],
               depth=[1, 1], heads=[2, 4], mlp_ratio=2, num_classes=32,
               bit=8, in_chans=3)
    key = jax.random.PRNGKey(0)
    pkey, xkey = jax.random.split(key)
    params = init_params(pkey, cfg)
    prepped = prepare_params(params, cfg)   # one-time pad / bf16-cast / fuse (outside jit)
    x = jax.random.normal(
        xkey, (2, cfg["in_chans"], cfg["image_size"], cfg["image_size"]),
        dtype=jnp.float32)

    fwd = jax.jit(functools.partial(pooling_transformer_forward, cfg))
    out = fwd(prepped, x)
    jax.block_until_ready(out)
    assert out.shape == (2, cfg["bit"]), out.shape
    assert bool(jnp.all(jnp.isfinite(out)))
    print("KERNEL_OK")
</pallas_src>

<mosaic_0001>
module attributes {stable_mosaic.version = 11 : i64} {
  func.func @_linear_kernel(%arg0: i32, %arg1: i32, %arg2: i32, %arg3: memref<32x48xbf16, #tpu.memory_space<vmem>>, %arg4: memref<48x128xbf16, #tpu.memory_space<vmem>>, %arg5: memref<1x128xf32, #tpu.memory_space<vmem>>, %arg6: memref<32x128xf32, #tpu.memory_space<vmem>>, %arg7: memref<32x128xf32, #tpu.memory_space<vmem>>) attributes {dimension_semantics = [#tpu.dimension_semantics<parallel>, #tpu.dimension_semantics<parallel>, #tpu.dimension_semantics<arbitrary>], iteration_bounds = array<i64: 1, 1, 1>, scalar_prefetch = 0 : i64, scratch_operands = 1 : i64, tpu.core_type = #tpu.core_type<tc>, window_params = [{transform_indices = @transform_0, window_bounds = array<i64: 32, 48>}, {transform_indices = @transform_1, window_bounds = array<i64: 48, 128>}, {transform_indices = @transform_2, window_bounds = array<i64: 1, 128>}, {transform_indices = @transform_3, window_bounds = array<i64: 32, 128>}]} {
    %c0_i32 = arith.constant 0 : i32
    %0 = arith.cmpi eq, %arg2, %c0_i32 : i32
    %1 = arith.extui %0 : i1 to i32
    %c0_i32_0 = arith.constant 0 : i32
    %2 = arith.cmpi ne, %1, %c0_i32_0 : i32
    scf.if %2 {
      %cst_10 = arith.constant 0.000000e+00 : f32
      %12 = vector.broadcast %cst_10 : f32 to vector<32x128xf32>
      %c0_11 = arith.constant 0 : index
      %c0_12 = arith.constant 0 : index
      %13 = vector.load %arg7[%c0_11, %c0_12] : memref<32x128xf32, #tpu.memory_space<vmem>>, vector<32x128xf32>
      tpu.vector_store %arg7[%c0_11, %c0_12], %12 {strides = array<i32>} : memref<32x128xf32, #tpu.memory_space<vmem>>, vector<32x128xf32>,
    } else {
    }
    %c0 = arith.constant 0 : index
    %c0_1 = arith.constant 0 : index
    %3 = vector.load %arg7[%c0, %c0_1] : memref<32x128xf32, #tpu.memory_space<vmem>>, vector<32x128xf32>
    %c0_2 = arith.constant 0 : index
    %c0_3 = arith.constant 0 : index
    %4 = vector.load %arg3[%c0_2, %c0_3] : memref<32x48xbf16, #tpu.memory_space<vmem>>, vector<32x48xbf16>
    %c0_4 = arith.constant 0 : index
    %c0_5 = arith.constant 0 : index
    %5 = vector.load %arg4[%c0_4, %c0_5] : memref<48x128xbf16, #tpu.memory_space<vmem>>, vector<48x128xbf16>
    %cst = arith.constant dense<0.000000e+00> : vector<32x128xf32>
    %6 = tpu.matmul %4, %5, %cst {dimension_numbers = #tpu.dot_dimension_numbers<[1], [0], [0], [1], [0, 0, 1, 1], [], []>} : vector<32x48xbf16>, vector<48x128xbf16>, vector<32x128xf32> -> vector<32x128xf32>
    %7 = arith.addf %3, %6 : vector<32x128xf32>
    %c0_6 = arith.constant 0 : index
    %c0_7 = arith.constant 0 : index
    %8 = vector.load %arg7[%c0_6, %c0_7] : memref<32x128xf32, #tpu.memory_space<vmem>>, vector<32x128xf32>
    tpu.vector_store %arg7[%c0_6, %c0_7], %7 {strides = array<i32>} : memref<32x128xf32, #tpu.memory_space<vmem>>, vector<32x128xf32>,
    %c0_i32_8 = arith.constant 0 : i32
    %9 = arith.cmpi eq, %arg2, %c0_i32_8 : i32
    %10 = arith.extui %9 : i1 to i32
    %c0_i32_9 = arith.constant 0 : i32
    %11 = arith.cmpi ne, %10, %c0_i32_9 : i32
    scf.if %11 {
      %c0_10 = arith.constant 0 : index
      %c0_11 = arith.constant 0 : index
      %12 = vector.load %arg7[%c0_10, %c0_11] : memref<32x128xf32, #tpu.memory_space<vmem>>, vector<32x128xf32>
      %c0_12 = arith.constant 0 : index
      %c0_13 = arith.constant 0 : index
      %13 = vector.load %arg5[%c0_12, %c0_13] : memref<1x128xf32, #tpu.memory_space<vmem>>, vector<1x128xf32>
      %14 = vector.broadcast %13 : vector<1x128xf32> to vector<32x128xf32>
      %15 = arith.addf %12, %14 : vector<32x128xf32>
      %c0_14 = arith.constant 0 : index
      %c0_15 = arith.constant 0 : index
      %16 = vector.load %arg6[%c0_14, %c0_15] : memref<32x128xf32, #tpu.memory_space<vmem>>, vector<32x128xf32>
      tpu.vector_store %arg6[%c0_14, %c0_15], %15 {strides = array<i32>} : memref<32x128xf32, #tpu.memory_space<vmem>>, vector<32x128xf32>,
    } else {
    }
    return
  }
  func.func @transform_0(%arg0: i32, %arg1: i32, %arg2: i32) -> (i32, i32) {
    %c0_i32 = arith.constant 0 : i32
    return %arg0, %arg2 : i32, i32
  }
  func.func @transform_1(%arg0: i32, %arg1: i32, %arg2: i32) -> (i32, i32) {
    %c0_i32 = arith.constant 0 : i32
    return %arg2, %arg1 : i32, i32
  }
  func.func @transform_2(%arg0: i32, %arg1: i32, %arg2: i32) -> (i32, i32) {
    %c0_i32 = arith.constant 0 : i32
    %c0_i32_0 = arith.constant 0 : i32
    return %c0_i32, %arg1 : i32, i32
  }
  func.func @transform_3(%arg0: i32, %arg1: i32, %arg2: i32) -> (i32, i32) {
    %c0_i32 = arith.constant 0 : i32
    return %arg0, %arg1 : i32, i32
  }
}

module attributes {stable_mosaic.version = 11 : i64} {
  func.func @_ln_kernel(%arg0: i32, %arg1: memref<40x16xf32, #tpu.memory_space<vmem>>, %arg2: memref<1x16xf32, #tpu.memory_space<vmem>>, %arg3: memref<1x16xf32, #tpu.memory_space<vmem>>, %arg4: memref<40x16xbf16, #tpu.memory_space<vmem>>) attributes {dimension_semantics = [#tpu.dimension_semantics<parallel>], iteration_bounds = array<i64: 1>, scalar_prefetch = 0 : i64, scratch_operands = 0 : i64, tpu.core_type = #tpu.core_type<tc>, window_params = [{transform_indices = @transform_0, window_bounds = array<i64: 40, 16>}, {pipeline_mode = #tpu.pipeline_mode<synchronous>, transform_indices = @transform_1, window_bounds = array<i64: 1, 16>}, {pipeline_mode = #tpu.pipeline_mode<synchronous>, transform_indices = @transform_2, window_bounds = array<i64: 1, 16>}, {transform_indices = @transform_3, window_bounds = array<i64: 40, 16>}]} {
    %c0 = arith.constant 0 : index
    %c0_0 = arith.constant 0 : index
    %0 = vector.load %arg1[%c0, %c0_0] : memref<40x16xf32, #tpu.memory_space<vmem>>, vector<40x16xf32>
    %cst = arith.constant dense<0.000000e+00> : vector<40xf32>
    %1 = vector.multi_reduction <add>, %0, %cst [1] : vector<40x16xf32> to vector<40xf32>
    %2 = vector.shape_cast %1 : vector<40xf32> to vector<40x1xf32>
    %cst_1 = arith.constant 1.600000e+01 : f32
    %3 = vector.broadcast %cst_1 : f32 to vector<40x1xf32>
    %4 = arith.divf %2, %3 : vector<40x1xf32>
    %5 = vector.broadcast %4 : vector<40x1xf32> to vector<40x16xf32>
    %6 = arith.subf %0, %5 : vector<40x16xf32>
    %7 = arith.mulf %6, %6 : vector<40x16xf32>
    %cst_2 = arith.constant dense<0.000000e+00> : vector<40xf32>
    %8 = vector.multi_reduction <add>, %7, %cst_2 [1] : vector<40x16xf32> to vector<40xf32>
    %9 = vector.shape_cast %8 : vector<40xf32> to vector<40x1xf32>
    %cst_3 = arith.constant 1.600000e+01 : f32
    %10 = vector.broadcast %cst_3 : f32 to vector<40x1xf32>
    %11 = arith.divf %9, %10 : vector<40x1xf32>
    %12 = vector.broadcast %4 : vector<40x1xf32> to vector<40x16xf32>
    %13 = arith.subf %0, %12 : vector<40x16xf32>
    %cst_4 = arith.constant 9.99999997E-7 : f32
    %14 = vector.broadcast %cst_4 : f32 to vector<40x1xf32>
    %15 = arith.addf %11, %14 : vector<40x1xf32>
    %16 = math.rsqrt %15 : vector<40x1xf32>
    %17 = vector.broadcast %16 : vector<40x1xf32> to vector<40x16xf32>
    %18 = arith.mulf %13, %17 : vector<40x16xf32>
    %c0_5 = arith.constant 0 : index
    %c0_6 = arith.constant 0 : index
    %19 = vector.load %arg2[%c0_5, %c0_6] : memref<1x16xf32, #tpu.memory_space<vmem>>, vector<1x16xf32>
    %20 = vector.broadcast %19 : vector<1x16xf32> to vector<40x16xf32>
    %21 = arith.mulf %18, %20 : vector<40x16xf32>
    %c0_7 = arith.constant 0 : index
    %c0_8 = arith.constant 0 : index
    %22 = vector.load %arg3[%c0_7, %c0_8] : memref<1x16xf32, #tpu.memory_space<vmem>>, vector<1x16xf32>
    %23 = vector.broadcast %22 : vector<1x16xf32> to vector<40x16xf32>
    %24 = arith.addf %21, %23 : vector<40x16xf32>
    %25 = arith.truncf %24 : vector<40x16xf32> to vector<40x16xbf16>
    %c0_9 = arith.constant 0 : index
    %c0_10 = arith.constant 0 : index
    %26 = vector.load %arg4[%c0_9, %c0_10] : memref<40x16xbf16, #tpu.memory_space<vmem>>, vector<40x16xbf16>
    tpu.vector_store %arg4[%c0_9, %c0_10], %25 {strides = array<i32>} : memref<40x16xbf16, #tpu.memory_space<vmem>>, vector<40x16xbf16>,
    return
  }
  func.func @transform_0(%arg0: i32) -> (i32, i32) {
    %c0_i32 = arith.constant 0 : i32
    %c0_i32_0 = arith.constant 0 : i32
    return %arg0, %c0_i32 : i32, i32
  }
  func.func @transform_1(%arg0: i32) -> (i32, i32) {
    %c0_i32 = arith.constant 0 : i32
    %c0_i32_0 = arith.constant 0 : i32
    %c0_i32_1 = arith.constant 0 : i32
    return %c0_i32, %c0_i32_0 : i32, i32
  }
  func.func @transform_2(%arg0: i32) -> (i32, i32) {
    %c0_i32 = arith.constant 0 : i32
    %c0_i32_0 = arith.constant 0 : i32
    %c0_i32_1 = arith.constant 0 : i32
    return %c0_i32, %c0_i32_0 : i32, i32
  }
  func.func @transform_3(%arg0: i32) -> (i32, i32) {
    %c0_i32 = arith.constant 0 : i32
    %c0_i32_0 = arith.constant 0 : i32
    return %arg0, %c0_i32 : i32, i32
  }
}

module attributes {stable_mosaic.version = 11 : i64} {
  func.func @_linear_kernel(%arg0: i32, %arg1: i32, %arg2: i32, %arg3: memref<48x16xbf16, #tpu.memory_space<vmem>>, %arg4: memref<16x128xbf16, #tpu.memory_space<vmem>>, %arg5: memref<1x128xf32, #tpu.memory_space<vmem>>, %arg6: memref<48x128xbf16, #tpu.memory_space<vmem>>, %arg7: memref<48x128xf32, #tpu.memory_space<vmem>>) attributes {dimension_semantics = [#tpu.dimension_semantics<parallel>, #tpu.dimension_semantics<parallel>, #tpu.dimension_semantics<arbitrary>], iteration_bounds = array<i64: 1, 1, 1>, scalar_prefetch = 0 : i64, scratch_operands = 1 : i64, tpu.core_type = #tpu.core_type<tc>, window_params = [{transform_indices = @transform_0, window_bounds = array<i64: 48, 16>}, {transform_indices = @transform_1, window_bounds = array<i64: 16, 128>}, {transform_indices = @transform_2, window_bounds = array<i64: 1, 128>}, {transform_indices = @transform_3, window_bounds = array<i64: 48, 128>}]} {
    %c0_i32 = arith.constant 0 : i32
    %0 = arith.cmpi eq, %arg2, %c0_i32 : i32
    %1 = arith.extui %0 : i1 to i32
    %c0_i32_0 = arith.constant 0 : i32
    %2 = arith.cmpi ne, %1, %c0_i32_0 : i32
    scf.if %2 {
      %cst_10 = arith.constant 0.000000e+00 : f32
      %12 = vector.broadcast %cst_10 : f32 to vector<48x128xf32>
      %c0_11 = arith.constant 0 : index
      %c0_12 = arith.constant 0 : index
      %13 = vector.load %arg7[%c0_11, %c0_12] : memref<48x128xf32, #tpu.memory_space<vmem>>, vector<48x128xf32>
      tpu.vector_store %arg7[%c0_11, %c0_12], %12 {strides = array<i32>} : memref<48x128xf32, #tpu.memory_space<vmem>>, vector<48x128xf32>,
    } else {
    }
    %c0 = arith.constant 0 : index
    %c0_1 = arith.constant 0 : index
    %3 = vector.load %arg7[%c0, %c0_1] : memref<48x128xf32, #tpu.memory_space<vmem>>, vector<48x128xf32>
    %c0_2 = arith.constant 0 : index
    %c0_3 = arith.constant 0 : index
    %4 = vector.load %arg3[%c0_2, %c0_3] : memref<48x16xbf16, #tpu.memory_space<vmem>>, vector<48x16xbf16>
    %c0_4 = arith.constant 0 : index
    %c0_5 = arith.constant 0 : index
    %5 = vector.load %arg4[%c0_4, %c0_5] : memref<16x128xbf16, #tpu.memory_space<vmem>>, vector<16x128xbf16>
    %cst = arith.constant dense<0.000000e+00> : vector<48x128xf32>
    %6 = tpu.matmul %4, %5, %cst {dimension_numbers = #tpu.dot_dimension_numbers<[1], [0], [0], [1], [0, 0, 1, 1], [], []>} : vector<48x16xbf16>, vector<16x128xbf16>, vector<48x128xf32> -> vector<48x128xf32>
    %7 = arith.addf %3, %6 : vector<48x128xf32>
    %c0_6 = arith.constant 0 : index
    %c0_7 = arith.constant 0 : index
    %8 = vector.load %arg7[%c0_6, %c0_7] : memref<48x128xf32, #tpu.memory_space<vmem>>, vector<48x128xf32>
    tpu.vector_store %arg7[%c0_6, %c0_7], %7 {strides = array<i32>} : memref<48x128xf32, #tpu.memory_space<vmem>>, vector<48x128xf32>,
    %c0_i32_8 = arith.constant 0 : i32
    %9 = arith.cmpi eq, %arg2, %c0_i32_8 : i32
    %10 = arith.extui %9 : i1 to i32
    %c0_i32_9 = arith.constant 0 : i32
    %11 = arith.cmpi ne, %10, %c0_i32_9 : i32
    scf.if %11 {
      %c0_10 = arith.constant 0 : index
      %c0_11 = arith.constant 0 : index
      %12 = vector.load %arg7[%c0_10, %c0_11] : memref<48x128xf32, #tpu.memory_space<vmem>>, vector<48x128xf32>
      %c0_12 = arith.constant 0 : index
      %c0_13 = arith.constant 0 : index
      %13 = vector.load %arg5[%c0_12, %c0_13] : memref<1x128xf32, #tpu.memory_space<vmem>>, vector<1x128xf32>
      %14 = vector.broadcast %13 : vector<1x128xf32> to vector<48x128xf32>
      %15 = arith.addf %12, %14 : vector<48x128xf32>
      %16 = arith.truncf %15 : vector<48x128xf32> to vector<48x128xbf16>
      %c0_14 = arith.constant 0 : index
      %c0_15 = arith.constant 0 : index
      %17 = vector.load %arg6[%c0_14, %c0_15] : memref<48x128xbf16, #tpu.memory_space<vmem>>, vector<48x128xbf16>
      tpu.vector_store %arg6[%c0_14, %c0_15], %16 {strides = array<i32>} : memref<48x128xbf16, #tpu.memory_space<vmem>>, vector<48x128xbf16>,
    } else {
    }
    return
  }
  func.func @transform_0(%arg0: i32, %arg1: i32, %arg2: i32) -> (i32, i32) {
    %c0_i32 = arith.constant 0 : i32
    return %arg0, %arg2 : i32, i32
  }
  func.func @transform_1(%arg0: i32, %arg1: i32, %arg2: i32) -> (i32, i32) {
    %c0_i32 = arith.constant 0 : i32
    return %arg2, %arg1 : i32, i32
  }
  func.func @transform_2(%arg0: i32, %arg1: i32, %arg2: i32) -> (i32, i32) {
    %c0_i32 = arith.constant 0 : i32
    %c0_i32_0 = arith.constant 0 : i32
    return %c0_i32, %arg1 : i32, i32
  }
  func.func @transform_3(%arg0: i32, %arg1: i32, %arg2: i32) -> (i32, i32) {
    %c0_i32 = arith.constant 0 : i32
    return %arg0, %arg1 : i32, i32
  }
}

module attributes {stable_mosaic.version = 11 : i64} {
  func.func @_attn_kernel(%arg0: i32, %arg1: i32, %arg2: i32, %arg3: i32, %arg4: memref<1x17x16xbf16, #tpu.memory_space<vmem>>, %arg5: memref<1x17x16xbf16, #tpu.memory_space<vmem>>, %arg6: memref<1x17x16xbf16, #tpu.memory_space<vmem>>, %arg7: memref<1x17x16xbf16, #tpu.memory_space<vmem>>, %arg8: memref<2x17x1xf32, #tpu.memory_space<vmem>>, %arg9: memref<2x17x1xf32, #tpu.memory_space<vmem>>, %arg10: memref<2x17x8xf32, #tpu.memory_space<vmem>>) attributes {dimension_semantics = [#tpu.dimension_semantics<parallel>, #tpu.dimension_semantics<parallel>, #tpu.dimension_semantics<parallel>, #tpu.dimension_semantics<arbitrary>], iteration_bounds = array<i64: 2, 1, 1, 1>, scalar_prefetch = 0 : i64, scratch_operands = 3 : i64, tpu.core_type = #tpu.core_type<tc>, window_params = [{transform_indices = @transform_0, window_bounds = array<i64: 1, 17, 16>}, {transform_indices = @transform_1, window_bounds = array<i64: 1, 17, 16>}, {transform_indices = @transform_2, window_bounds = array<i64: 1, 17, 16>}, {transform_indices = @transform_3, window_bounds = array<i64: 1, 17, 16>}]} {
    %c0_i32 = arith.constant 0 : i32
    %0 = arith.cmpi eq, %arg3, %c0_i32 : i32
    %1 = arith.extui %0 : i1 to i32
    %c0_i32_0 = arith.constant 0 : i32
    %2 = arith.cmpi ne, %1, %c0_i32_0 : i32
    scf.if %2 {
      %cst_54 = arith.constant 0xFF800000 : f32
      %86 = vector.broadcast %cst_54 : f32 to vector<2x17x1xf32>
      %c0_55 = arith.constant 0 : index
      %c0_56 = arith.constant 0 : index
      %c0_57 = arith.constant 0 : index
      %87 = vector.load %arg8[%c0_55, %c0_56, %c0_57] : memref<2x17x1xf32, #tpu.memory_space<vmem>>, vector<2x17x1xf32>
      tpu.vector_store %arg8[%c0_55, %c0_56, %c0_57], %86 {strides = array<i32>} : memref<2x17x1xf32, #tpu.memory_space<vmem>>, vector<2x17x1xf32>,
      %cst_58 = arith.constant 0.000000e+00 : f32
      %88 = vector.broadcast %cst_58 : f32 to vector<2x17x1xf32>
      %c0_59 = arith.constant 0 : index
      %c0_60 = arith.constant 0 : index
      %c0_61 = arith.constant 0 : index
      %89 = vector.load %arg9[%c0_59, %c0_60, %c0_61] : memref<2x17x1xf32, #tpu.memory_space<vmem>>, vector<2x17x1xf32>
      tpu.vector_store %arg9[%c0_59, %c0_60, %c0_61], %88 {strides = array<i32>} : memref<2x17x1xf32, #tpu.memory_space<vmem>>, vector<2x17x1xf32>,
      %cst_62 = arith.constant 0.000000e+00 : f32
      %90 = vector.broadcast %cst_62 : f32 to vector<2x17x8xf32>
      %c0_63 = arith.constant 0 : index
      %c0_64 = arith.constant 0 : index
      %c0_65 = arith.constant 0 : index
      %91 = vector.load %arg10[%c0_63, %c0_64, %c0_65] : memref<2x17x8xf32, #tpu.memory_space<vmem>>, vector<2x17x8xf32>
      tpu.vector_store %arg10[%c0_63, %c0_64, %c0_65], %90 {strides = array<i32>} : memref<2x17x8xf32, #tpu.memory_space<vmem>>, vector<2x17x8xf32>,
    } else {
    }
    %c0 = arith.constant 0 : index
    %c0_1 = arith.constant 0 : index
    %c0_2 = arith.constant 0 : index
    %3 = vector.load %arg4[%c0, %c0_1, %c0_2] : memref<1x17x16xbf16, #tpu.memory_space<vmem>>, vector<1x17x16xbf16>
    %4 = vector.shape_cast %3 : vector<1x17x16xbf16> to vector<17x16xbf16>
    %cst = arith.constant 3.535160e-01 : bf16
    %5 = vector.broadcast %cst : bf16 to vector<17x16xbf16>
    %6 = arith.mulf %4, %5 : vector<17x16xbf16>
    %c0_3 = arith.constant 0 : index
    %c0_4 = arith.constant 0 : index
    %c0_5 = arith.constant 0 : index
    %7 = vector.load %arg5[%c0_3, %c0_4, %c0_5] : memref<1x17x16xbf16, #tpu.memory_space<vmem>>, vector<1x17x16xbf16>
    %8 = vector.shape_cast %7 : vector<1x17x16xbf16> to vector<17x16xbf16>
    %c0_6 = arith.constant 0 : index
    %c0_7 = arith.constant 0 : index
    %c0_8 = arith.constant 0 : index
    %9 = vector.load %arg6[%c0_6, %c0_7, %c0_8] : memref<1x17x16xbf16, #tpu.memory_space<vmem>>, vector<1x17x16xbf16>
    %10 = vector.shape_cast %9 : vector<1x17x16xbf16> to vector<17x16xbf16>
    %11 = vector.extract_strided_slice %6 {offsets = [0, 0], sizes = [17, 8], strides = [1, 1]} : vector<17x16xbf16> to vector<17x8xbf16>
    %12 = vector.extract_strided_slice %8 {offsets = [0, 0], sizes = [17, 8], strides = [1, 1]} : vector<17x16xbf16> to vector<17x8xbf16>
    %cst_9 = arith.constant dense<0.000000e+00> : vector<17x17xf32>
    %13 = tpu.matmul %11, %12, %cst_9 {dimension_numbers = #tpu.dot_dimension_numbers<[1], [1], [0], [0], [0, 0, 1, 0], [], []>} : vector<17x8xbf16>, vector<17x8xbf16>, vector<17x17xf32> -> vector<17x17xf32>
    %c0_10 = arith.constant 0 : index
    %c0_11 = arith.constant 0 : index
    %c0_12 = arith.constant 0 : index
    %14 = vector.load %arg8[%c0_10, %c0_11, %c0_12] : memref<2x17x1xf32, #tpu.memory_space<vmem>>, vector<1x17x1xf32>
    %15 = vector.shape_cast %14 : vector<1x17x1xf32> to vector<17x1xf32>
    %cst_13 = arith.constant dense<0xFF800000> : vector<17xf32>
    %16 = vector.multi_reduction <maximumf>, %13, %cst_13 [1] : vector<17x17xf32> to vector<17xf32>
    %17 = vector.shape_cast %16 : vector<17xf32> to vector<17x1xf32>
    %18 = arith.maximumf %15, %17 : vector<17x1xf32>
    %19 = arith.subf %15, %18 : vector<17x1xf32>
    %20 = math.exp %19 : vector<17x1xf32>
    %21 = vector.broadcast %18 : vector<17x1xf32> to vector<17x17xf32>
    %22 = arith.subf %13, %21 : vector<17x17xf32>
    %23 = math.exp %22 : vector<17x17xf32>
    %c0_14 = arith.constant 0 : index
    %c0_15 = arith.constant 0 : index
    %c0_16 = arith.constant 0 : index
    %24 = vector.load %arg9[%c0_14, %c0_15, %c0_16] : memref<2x17x1xf32, #tpu.memory_space<vmem>>, vector<1x17x1xf32>
    %25 = vector.shape_cast %24 : vector<1x17x1xf32> to vector<17x1xf32>
    %26 = arith.mulf %20, %25 : vector<17x1xf32>
    %cst_17 = arith.constant dense<0.000000e+00> : vector<17xf32>
    %27 = vector.multi_reduction <add>, %23, %cst_17 [1] : vector<17x17xf32> to vector<17xf32>
    %28 = vector.shape_cast %27 : vector<17xf32> to vector<17x1xf32>
    %29 = arith.addf %26, %28 : vector<17x1xf32>
    %c0_18 = arith.constant 0 : index
    %c0_19 = arith.constant 0 : index
    %c0_20 = arith.constant 0 : index
    %30 = vector.load %arg9[%c0_18, %c0_19, %c0_20] : memref<2x17x1xf32, #tpu.memory_space<vmem>>, vector<1x17x1xf32>
    %31 = vector.shape_cast %30 : vector<1x17x1xf32> to vector<17x1xf32>
    %32 = vector.shape_cast %29 : vector<17x1xf32> to vector<1x17x1xf32>
    tpu.vector_store %arg9[%c0_18, %c0_19, %c0_20], %32 {strides = array<i32>} : memref<2x17x1xf32, #tpu.memory_space<vmem>>, vector<1x17x1xf32>,
    %c0_21 = arith.constant 0 : index
    %c0_22 = arith.constant 0 : index
    %c0_23 = arith.constant 0 : index
    %33 = vector.load %arg10[%c0_21, %c0_22, %c0_23] : memref<2x17x8xf32, #tpu.memory_space<vmem>>, vector<1x17x8xf32>
    %34 = vector.shape_cast %33 : vector<1x17x8xf32> to vector<17x8xf32>
    %35 = vector.broadcast %20 : vector<17x1xf32> to vector<17x8xf32>
    %36 = arith.mulf %35, %34 : vector<17x8xf32>
    %37 = arith.truncf %23 : vector<17x17xf32> to vector<17x17xbf16>
    %38 = vector.extract_strided_slice %10 {offsets = [0, 0], sizes = [17, 8], strides = [1, 1]} : vector<17x16xbf16> to vector<17x8xbf16>
    %cst_24 = arith.constant dense<0.000000e+00> : vector<17x8xf32>
    %39 = tpu.matmul %37, %38, %cst_24 {dimension_numbers = #tpu.dot_dimension_numbers<[1], [0], [0], [1], [0, 0, 1, 1], [], []>} : vector<17x17xbf16>, vector<17x8xbf16>, vector<17x8xf32> -> vector<17x8xf32>
    %40 = arith.addf %36, %39 : vector<17x8xf32>
    %c0_25 = arith.constant 0 : index
    %c0_26 = arith.constant 0 : index
    %c0_27 = arith.constant 0 : index
    %41 = vector.load %arg10[%c0_25, %c0_26, %c0_27] : memref<2x17x8xf32, #tpu.memory_space<vmem>>, vector<1x17x8xf32>
    %42 = vector.shape_cast %41 : vector<1x17x8xf32> to vector<17x8xf32>
    %43 = vector.shape_cast %40 : vector<17x8xf32> to vector<1x17x8xf32>
    tpu.vector_store %arg10[%c0_25, %c0_26, %c0_27], %43 {strides = array<i32>} : memref<2x17x8xf32, #tpu.memory_space<vmem>>, vector<1x17x8xf32>,
    %c0_28 = arith.constant 0 : index
    %c0_29 = arith.constant 0 : index
    %c0_30 = arith.constant 0 : index
    %44 = vector.load %arg8[%c0_28, %c0_29, %c0_30] : memref<2x17x1xf32, #tpu.memory_space<vmem>>, vector<1x17x1xf32>
    %45 = vector.shape_cast %44 : vector<1x17x1xf32> to vector<17x1xf32>
    %46 = vector.shape_cast %18 : vector<17x1xf32> to vector<1x17x1xf32>
    tpu.vector_store %arg8[%c0_28, %c0_29, %c0_30], %46 {strides = array<i32>} : memref<2x17x1xf32, #tpu.memory_space<vmem>>, vector<1x17x1xf32>,
    %47 = vector.extract_strided_slice %6 {offsets = [0, 8], sizes = [17, 8], strides = [1, 1]} : vector<17x16xbf16> to vector<17x8xbf16>
    %48 = vector.extract_strided_slice %8 {offsets = [0, 8], sizes = [17, 8], strides = [1, 1]} : vector<17x16xbf16> to vector<17x8xbf16>
    %cst_31 = arith.constant dense<0.000000e+00> : vector<17x17xf32>
    %49 = tpu.matmul %47, %48, %cst_31 {dimension_numbers = #tpu.dot_dimension_numbers<[1], [1], [0], [0], [0, 0, 1, 0], [], []>} : vector<17x8xbf16>, vector<17x8xbf16>, vector<17x17xf32> -> vector<17x17xf32>
    %c1 = arith.constant 1 : index
    %c0_32 = arith.constant 0 : index
    %c0_33 = arith.constant 0 : index
    %50 = vector.load %arg8[%c1, %c0_32, %c0_33] : memref<2x17x1xf32, #tpu.memory_space<vmem>>, vector<1x17x1xf32>
    %51 = vector.shape_cast %50 : vector<1x17x1xf32> to vector<17x1xf32>
    %cst_34 = arith.constant dense<0xFF800000> : vector<17xf32>
    %52 = vector.multi_reduction <maximumf>, %49, %cst_34 [1] : vector<17x17xf32> to vector<17xf32>
    %53 = vector.shape_cast %52 : vector<17xf32> to vector<17x1xf32>
    %54 = arith.maximumf %51, %53 : vector<17x1xf32>
    %55 = arith.subf %51, %54 : vector<17x1xf32>
    %56 = math.exp %55 : vector<17x1xf32>
    %57 = vector.broadcast %54 : vector<17x1xf32> to vector<17x17xf32>
    %58 = arith.subf %49, %57 : vector<17x17xf32>
    %59 = math.exp %58 : vector<17x17xf32>
    %c1_35 = arith.constant 1 : index
    %c0_36 = arith.constant 0 : index
    %c0_37 = arith.constant 0 : index
    %60 = vector.load %arg9[%c1_35, %c0_36, %c0_37] : memref<2x17x1xf32, #tpu.memory_space<vmem>>, vector<1x17x1xf32>
    %61 = vector.shape_cast %60 : vector<1x17x1xf32> to vector<17x1xf32>
    %62 = arith.mulf %56, %61 : vector<17x1xf32>
    %cst_38 = arith.constant dense<0.000000e+00> : vector<17xf32>
    %63 = vector.multi_reduction <add>, %59, %cst_38 [1] : vector<17x17xf32> to vector<17xf32>
    %64 = vector.shape_cast %63 : vector<17xf32> to vector<17x1xf32>
    %65 = arith.addf %62, %64 : vector<17x1xf32>
    %c1_39 = arith.constant 1 : index
    %c0_40 = arith.constant 0 : index
    %c0_41 = arith.constant 0 : index
    %66 = vector.load %arg9[%c1_39, %c0_40, %c0_41] : memref<2x17x1xf32, #tpu.memory_space<vmem>>, vector<1x17x1xf32>
    %67 = vector.shape_cast %66 : vector<1x17x1xf32> to vector<17x1xf32>
    %68 = vector.shape_cast %65 : vector<17x1xf32> to vector<1x17x1xf32>
    tpu.vector_store %arg9[%c1_39, %c0_40, %c0_41], %68 {strides = array<i32>} : memref<2x17x1xf32, #tpu.memory_space<vmem>>, vector<1x17x1xf32>,
    %c1_42 = arith.constant 1 : index
    %c0_43 = arith.constant 0 : index
    %c0_44 = arith.constant 0 : index
    %69 = vector.load %arg10[%c1_42, %c0_43, %c0_44] : memref<2x17x8xf32, #tpu.memory_space<vmem>>, vector<1x17x8xf32>
    %70 = vector.shape_cast %69 : vector<1x17x8xf32> to vector<17x8xf32>
    %71 = vector.broadcast %56 : vector<17x1xf32> to vector<17x8xf32>
    %72 = arith.mulf %71, %70 : vector<17x8xf32>
    %73 = arith.truncf %59 : vector<17x17xf32> to vector<17x17xbf16>
    %74 = vector.extract_strided_slice %10 {offsets = [0, 8], sizes = [17, 8], strides = [1, 1]} : vector<17x16xbf16> to vector<17x8xbf16>
    %cst_45 = arith.constant dense<0.000000e+00> : vector<17x8xf32>
    %75 = tpu.matmul %73, %74, %cst_45 {dimension_numbers = #tpu.dot_dimension_numbers<[1], [0], [0], [1], [0, 0, 1, 1], [], []>} : vector<17x17xbf16>, vector<17x8xbf16>, vector<17x8xf32> -> vector<17x8xf32>
    %76 = arith.addf %72, %75 : vector<17x8xf32>
    %c1_46 = arith.constant 1 : index
    %c0_47 = arith.constant 0 : index
    %c0_48 = arith.constant 0 : index
    %77 = vector.load %arg10[%c1_46, %c0_47, %c0_48] : memref<2x17x8xf32, #tpu.memory_space<vmem>>, vector<1x17x8xf32>
    %78 = vector.shape_cast %77 : vector<1x17x8xf32> to vector<17x8xf32>
    %79 = vector.shape_cast %76 : vector<17x8xf32> to vector<1x17x8xf32>
    tpu.vector_store %arg10[%c1_46, %c0_47, %c0_48], %79 {strides = array<i32>} : memref<2x17x8xf32, #tpu.memory_space<vmem>>, vector<1x17x8xf32>,
    %c1_49 = arith.constant 1 : index
    %c0_50 = arith.constant 0 : index
    %c0_51 = arith.constant 0 : index
    %80 = vector.load %arg8[%c1_49, %c0_50, %c0_51] : memref<2x17x1xf32, #tpu.memory_space<vmem>>, vector<1x17x1xf32>
    %81 = vector.shape_cast %80 : vector<1x17x1xf32> to vector<17x1xf32>
    %82 = vector.shape_cast %54 : vector<17x1xf32> to vector<1x17x1xf32>
    tpu.vector_store %arg8[%c1_49, %c0_50, %c0_51], %82 {strides = array<i32>} : memref<2x17x1xf32, #tpu.memory_space<vmem>>, vector<1x17x1xf32>,
    %c0_i32_52 = arith.constant 0 : i32
    %83 = arith.cmpi eq, %arg3, %c0_i32_52 : i32
    %84 = arith.extui %83 : i1 to i32
    %c0_i32_53 = arith.constant 0 : i32
    %85 = arith.cmpi ne, %84, %c0_i32_53 : i32
    scf.if %85 {
      %c0_54 = arith.constant 0 : index
      %c0_55 = arith.constant 0 : index
      %c0_56 = arith.constant 0 : index
      %86 = vector.load %arg10[%c0_54, %c0_55, %c0_56] : memref<2x17x8xf32, #tpu.memory_space<vmem>>, vector<1x17x8xf32>
      %87 = vector.shape_cast %86 : vector<1x17x8xf32> to vector<17x8xf32>
      %c0_57 = arith.constant 0 : index
      %c0_58 = arith.constant 0 : index
      %c0_59 = arith.constant 0 : index
      %88 = vector.load %arg9[%c0_57, %c0_58, %c0_59] : memref<2x17x1xf32, #tpu.memory_space<vmem>>, vector<1x17x1xf32>
      %89 = vector.shape_cast %88 : vector<1x17x1xf32> to vector<17x1xf32>
      %90 = vector.broadcast %89 : vector<17x1xf32> to vector<17x8xf32>
      %91 = arith.divf %87, %90 : vector<17x8xf32>
      %92 = arith.truncf %91 : vector<17x8xf32> to vector<17x8xbf16>
      %c0_60 = arith.constant 0 : index
      %c0_61 = arith.constant 0 : index
      %c0_62 = arith.constant 0 : index
      %93 = vector.load %arg7[%c0_60, %c0_61, %c0_62] : memref<1x17x16xbf16, #tpu.memory_space<vmem>>, vector<1x17x8xbf16>
      %94 = vector.shape_cast %93 : vector<1x17x8xbf16> to vector<17x8xbf16>
      %95 = vector.shape_cast %92 : vector<17x8xbf16> to vector<1x17x8xbf16>
      tpu.vector_store %arg7[%c0_60, %c0_61, %c0_62], %95 {strides = array<i32>} : memref<1x17x16xbf16, #tpu.memory_space<vmem>>, vector<1x17x8xbf16>,
      %c1_63 = arith.constant 1 : index
      %c0_64 = arith.constant 0 : index
      %c0_65 = arith.constant 0 : index
      %96 = vector.load %arg10[%c1_63, %c0_64, %c0_65] : memref<2x17x8xf32, #tpu.memory_space<vmem>>, vector<1x17x8xf32>
      %97 = vector.shape_cast %96 : vector<1x17x8xf32> to vector<17x8xf32>
      %c1_66 = arith.constant 1 : index
      %c0_67 = arith.constant 0 : index
      %c0_68 = arith.constant 0 : index
      %98 = vector.load %arg9[%c1_66, %c0_67, %c0_68] : memref<2x17x1xf32, #tpu.memory_space<vmem>>, vector<1x17x1xf32>
      %99 = vector.shape_cast %98 : vector<1x17x1xf32> to vector<17x1xf32>
      %100 = vector.broadcast %99 : vector<17x1xf32> to vector<17x8xf32>
      %101 = arith.divf %97, %100 : vector<17x8xf32>
      %102 = arith.truncf %101 : vector<17x8xf32> to vector<17x8xbf16>
      %c0_69 = arith.constant 0 : index
      %c0_70 = arith.constant 0 : index
      %c8 = arith.constant 8 : index
      %103 = vector.load %arg7[%c0_69, %c0_70, %c8] : memref<1x17x16xbf16, #tpu.memory_space<vmem>>, vector<1x17x8xbf16>
      %104 = vector.shape_cast %103 : vector<1x17x8xbf16> to vector<17x8xbf16>
      %105 = vector.shape_cast %102 : vector<17x8xbf16> to vector<1x17x8xbf16>
      tpu.vector_store %arg7[%c0_69, %c0_70, %c8], %105 {strides = array<i32>} : memref<1x17x16xbf16, #tpu.memory_space<vmem>>, vector<1x17x8xbf16>,
    } else {
    }
    return
  }
  func.func @transform_0(%arg0: i32, %arg1: i32, %arg2: i32, %arg3: i32) -> (i32, i32, i32) {
    %c0_i32 = arith.constant 0 : i32
    return %arg0, %arg2, %arg1 : i32, i32, i32
  }
  func.func @transform_1(%arg0: i32, %arg1: i32, %arg2: i32, %arg3: i32) -> (i32, i32, i32) {
    %c0_i32 = arith.constant 0 : i32
    return %arg0, %arg3, %arg1 : i32, i32, i32
  }
  func.func @transform_2(%arg0: i32, %arg1: i32, %arg2: i32, %arg3: i32) -> (i32, i32, i32) {
    %c0_i32 = arith.constant 0 : i32
    return %arg0, %arg3, %arg1 : i32, i32, i32
  }
  func.func @transform_3(%arg0: i32, %arg1: i32, %arg2: i32, %arg3: i32) -> (i32, i32, i32) {
    %c0_i32 = arith.constant 0 : i32
    return %arg0, %arg2, %arg1 : i32, i32, i32
  }
}

module attributes {stable_mosaic.version = 11 : i64} {
  func.func @_linear_kernel(%arg0: i32, %arg1: i32, %arg2: i32, %arg3: memref<48x16xbf16, #tpu.memory_space<vmem>>, %arg4: memref<16x128xbf16, #tpu.memory_space<vmem>>, %arg5: memref<1x128xf32, #tpu.memory_space<vmem>>, %arg6: memref<48x128xf32, #tpu.memory_space<vmem>>, %arg7: memref<48x128xf32, #tpu.memory_space<vmem>>) attributes {dimension_semantics = [#tpu.dimension_semantics<parallel>, #tpu.dimension_semantics<parallel>, #tpu.dimension_semantics<arbitrary>], iteration_bounds = array<i64: 1, 1, 1>, scalar_prefetch = 0 : i64, scratch_operands = 1 : i64, tpu.core_type = #tpu.core_type<tc>, window_params = [{transform_indices = @transform_0, window_bounds = array<i64: 48, 16>}, {transform_indices = @transform_1, window_bounds = array<i64: 16, 128>}, {transform_indices = @transform_2, window_bounds = array<i64: 1, 128>}, {transform_indices = @transform_3, window_bounds = array<i64: 48, 128>}]} {
    %c0_i32 = arith.constant 0 : i32
    %0 = arith.cmpi eq, %arg2, %c0_i32 : i32
    %1 = arith.extui %0 : i1 to i32
    %c0_i32_0 = arith.constant 0 : i32
    %2 = arith.cmpi ne, %1, %c0_i32_0 : i32
    scf.if %2 {
      %cst_10 = arith.constant 0.000000e+00 : f32
      %12 = vector.broadcast %cst_10 : f32 to vector<48x128xf32>
      %c0_11 = arith.constant 0 : index
      %c0_12 = arith.constant 0 : index
      %13 = vector.load %arg7[%c0_11, %c0_12] : memref<48x128xf32, #tpu.memory_space<vmem>>, vector<48x128xf32>
      tpu.vector_store %arg7[%c0_11, %c0_12], %12 {strides = array<i32>} : memref<48x128xf32, #tpu.memory_space<vmem>>, vector<48x128xf32>,
    } else {
    }
    %c0 = arith.constant 0 : index
    %c0_1 = arith.constant 0 : index
    %3 = vector.load %arg7[%c0, %c0_1] : memref<48x128xf32, #tpu.memory_space<vmem>>, vector<48x128xf32>
    %c0_2 = arith.constant 0 : index
    %c0_3 = arith.constant 0 : index
    %4 = vector.load %arg3[%c0_2, %c0_3] : memref<48x16xbf16, #tpu.memory_space<vmem>>, vector<48x16xbf16>
    %c0_4 = arith.constant 0 : index
    %c0_5 = arith.constant 0 : index
    %5 = vector.load %arg4[%c0_4, %c0_5] : memref<16x128xbf16, #tpu.memory_space<vmem>>, vector<16x128xbf16>
    %cst = arith.constant dense<0.000000e+00> : vector<48x128xf32>
    %6 = tpu.matmul %4, %5, %cst {dimension_numbers = #tpu.dot_dimension_numbers<[1], [0], [0], [1], [0, 0, 1, 1], [], []>} : vector<48x16xbf16>, vector<16x128xbf16>, vector<48x128xf32> -> vector<48x128xf32>
    %7 = arith.addf %3, %6 : vector<48x128xf32>
    %c0_6 = arith.constant 0 : index
    %c0_7 = arith.constant 0 : index
    %8 = vector.load %arg7[%c0_6, %c0_7] : memref<48x128xf32, #tpu.memory_space<vmem>>, vector<48x128xf32>
    tpu.vector_store %arg7[%c0_6, %c0_7], %7 {strides = array<i32>} : memref<48x128xf32, #tpu.memory_space<vmem>>, vector<48x128xf32>,
    %c0_i32_8 = arith.constant 0 : i32
    %9 = arith.cmpi eq, %arg2, %c0_i32_8 : i32
    %10 = arith.extui %9 : i1 to i32
    %c0_i32_9 = arith.constant 0 : i32
    %11 = arith.cmpi ne, %10, %c0_i32_9 : i32
    scf.if %11 {
      %c0_10 = arith.constant 0 : index
      %c0_11 = arith.constant 0 : index
      %12 = vector.load %arg7[%c0_10, %c0_11] : memref<48x128xf32, #tpu.memory_space<vmem>>, vector<48x128xf32>
      %c0_12 = arith.constant 0 : index
      %c0_13 = arith.constant 0 : index
      %13 = vector.load %arg5[%c0_12, %c0_13] : memref<1x128xf32, #tpu.memory_space<vmem>>, vector<1x128xf32>
      %14 = vector.broadcast %13 : vector<1x128xf32> to vector<48x128xf32>
      %15 = arith.addf %12, %14 : vector<48x128xf32>
      %c0_14 = arith.constant 0 : index
      %c0_15 = arith.constant 0 : index
      %16 = vector.load %arg6[%c0_14, %c0_15] : memref<48x128xf32, #tpu.memory_space<vmem>>, vector<48x128xf32>
      tpu.vector_store %arg6[%c0_14, %c0_15], %15 {strides = array<i32>} : memref<48x128xf32, #tpu.memory_space<vmem>>, vector<48x128xf32>,
    } else {
    }
    return
  }
  func.func @transform_0(%arg0: i32, %arg1: i32, %arg2: i32) -> (i32, i32) {
    %c0_i32 = arith.constant 0 : i32
    return %arg0, %arg2 : i32, i32
  }
  func.func @transform_1(%arg0: i32, %arg1: i32, %arg2: i32) -> (i32, i32) {
    %c0_i32 = arith.constant 0 : i32
    return %arg2, %arg1 : i32, i32
  }
  func.func @transform_2(%arg0: i32, %arg1: i32, %arg2: i32) -> (i32, i32) {
    %c0_i32 = arith.constant 0 : i32
    %c0_i32_0 = arith.constant 0 : i32
    return %c0_i32, %arg1 : i32, i32
  }
  func.func @transform_3(%arg0: i32, %arg1: i32, %arg2: i32) -> (i32, i32) {
    %c0_i32 = arith.constant 0 : i32
    return %arg0, %arg1 : i32, i32
  }
}

module attributes {stable_mosaic.version = 11 : i64} {
  func.func @_linear_kernel(%arg0: i32, %arg1: i32, %arg2: i32, %arg3: memref<48x16xbf16, #tpu.memory_space<vmem>>, %arg4: memref<16x128xbf16, #tpu.memory_space<vmem>>, %arg5: memref<1x128xf32, #tpu.memory_space<vmem>>, %arg6: memref<48x128xf32, #tpu.memory_space<vmem>>, %arg7: memref<48x128xf32, #tpu.memory_space<vmem>>) attributes {dimension_semantics = [#tpu.dimension_semantics<parallel>, #tpu.dimension_semantics<parallel>, #tpu.dimension_semantics<arbitrary>], iteration_bounds = array<i64: 1, 1, 1>, scalar_prefetch = 0 : i64, scratch_operands = 1 : i64, tpu.core_type = #tpu.core_type<tc>, window_params = [{transform_indices = @transform_0, window_bounds = array<i64: 48, 16>}, {transform_indices = @transform_1, window_bounds = array<i64: 16, 128>}, {transform_indices = @transform_2, window_bounds = array<i64: 1, 128>}, {transform_indices = @transform_3, window_bounds = array<i64: 48, 128>}]} {
    %c0_i32 = arith.constant 0 : i32
    %0 = arith.cmpi eq, %arg2, %c0_i32 : i32
    %1 = arith.extui %0 : i1 to i32
    %c0_i32_0 = arith.constant 0 : i32
    %2 = arith.cmpi ne, %1, %c0_i32_0 : i32
    scf.if %2 {
      %cst_10 = arith.constant 0.000000e+00 : f32
      %12 = vector.broadcast %cst_10 : f32 to vector<48x128xf32>
      %c0_11 = arith.constant 0 : index
      %c0_12 = arith.constant 0 : index
      %13 = vector.load %arg7[%c0_11, %c0_12] : memref<48x128xf32, #tpu.memory_space<vmem>>, vector<48x128xf32>
      tpu.vector_store %arg7[%c0_11, %c0_12], %12 {strides = array<i32>} : memref<48x128xf32, #tpu.memory_space<vmem>>, vector<48x128xf32>,
    } else {
    }
    %c0 = arith.constant 0 : index
    %c0_1 = arith.constant 0 : index
    %3 = vector.load %arg7[%c0, %c0_1] : memref<48x128xf32, #tpu.memory_space<vmem>>, vector<48x128xf32>
    %c0_2 = arith.constant 0 : index
    %c0_3 = arith.constant 0 : index
    %4 = vector.load %arg3[%c0_2, %c0_3] : memref<48x16xbf16, #tpu.memory_space<vmem>>, vector<48x16xbf16>
    %c0_4 = arith.constant 0 : index
    %c0_5 = arith.constant 0 : index
    %5 = vector.load %arg4[%c0_4, %c0_5] : memref<16x128xbf16, #tpu.memory_space<vmem>>, vector<16x128xbf16>
    %cst = arith.constant dense<0.000000e+00> : vector<48x128xf32>
    %6 = tpu.matmul %4, %5, %cst {dimension_numbers = #tpu.dot_dimension_numbers<[1], [0], [0], [1], [0, 0, 1, 1], [], []>} : vector<48x16xbf16>, vector<16x128xbf16>, vector<48x128xf32> -> vector<48x128xf32>
    %7 = arith.addf %3, %6 : vector<48x128xf32>
    %c0_6 = arith.constant 0 : index
    %c0_7 = arith.constant 0 : index
    %8 = vector.load %arg7[%c0_6, %c0_7] : memref<48x128xf32, #tpu.memory_space<vmem>>, vector<48x128xf32>
    tpu.vector_store %arg7[%c0_6, %c0_7], %7 {strides = array<i32>} : memref<48x128xf32, #tpu.memory_space<vmem>>, vector<48x128xf32>,
    %c0_i32_8 = arith.constant 0 : i32
    %9 = arith.cmpi eq, %arg2, %c0_i32_8 : i32
    %10 = arith.extui %9 : i1 to i32
    %c0_i32_9 = arith.constant 0 : i32
    %11 = arith.cmpi ne, %10, %c0_i32_9 : i32
    scf.if %11 {
      %c0_10 = arith.constant 0 : index
      %c0_11 = arith.constant 0 : index
      %12 = vector.load %arg7[%c0_10, %c0_11] : memref<48x128xf32, #tpu.memory_space<vmem>>, vector<48x128xf32>
      %c0_12 = arith.constant 0 : index
      %c0_13 = arith.constant 0 : index
      %13 = vector.load %arg5[%c0_12, %c0_13] : memref<1x128xf32, #tpu.memory_space<vmem>>, vector<1x128xf32>
      %14 = vector.broadcast %13 : vector<1x128xf32> to vector<48x128xf32>
      %15 = arith.addf %12, %14 : vector<48x128xf32>
      %c0_14 = arith.constant 0 : index
      %c0_15 = arith.constant 0 : index
      %16 = vector.load %arg6[%c0_14, %c0_15] : memref<48x128xf32, #tpu.memory_space<vmem>>, vector<48x128xf32>
      tpu.vector_store %arg6[%c0_14, %c0_15], %15 {strides = array<i32>} : memref<48x128xf32, #tpu.memory_space<vmem>>, vector<48x128xf32>,
    } else {
    }
    return
  }
  func.func @transform_0(%arg0: i32, %arg1: i32, %arg2: i32) -> (i32, i32) {
    %c0_i32 = arith.constant 0 : i32
    return %arg0, %arg2 : i32, i32
  }
  func.func @transform_1(%arg0: i32, %arg1: i32, %arg2: i32) -> (i32, i32) {
    %c0_i32 = arith.constant 0 : i32
    return %arg2, %arg1 : i32, i32
  }
  func.func @transform_2(%arg0: i32, %arg1: i32, %arg2: i32) -> (i32, i32) {
    %c0_i32 = arith.constant 0 : i32
    %c0_i32_0 = arith.constant 0 : i32
    return %c0_i32, %arg1 : i32, i32
  }
  func.func @transform_3(%arg0: i32, %arg1: i32, %arg2: i32) -> (i32, i32) {
    %c0_i32 = arith.constant 0 : i32
    return %arg0, %arg1 : i32, i32
  }
}

module attributes {stable_mosaic.version = 11 : i64} {
  func.func @_linear_kernel(%arg0: i32, %arg1: i32, %arg2: i32, %arg3: memref<48x32xbf16, #tpu.memory_space<vmem>>, %arg4: memref<32x128xbf16, #tpu.memory_space<vmem>>, %arg5: memref<1x128xf32, #tpu.memory_space<vmem>>, %arg6: memref<48x128xf32, #tpu.memory_space<vmem>>, %arg7: memref<48x128xf32, #tpu.memory_space<vmem>>) attributes {dimension_semantics = [#tpu.dimension_semantics<parallel>, #tpu.dimension_semantics<parallel>, #tpu.dimension_semantics<arbitrary>], iteration_bounds = array<i64: 1, 1, 1>, scalar_prefetch = 0 : i64, scratch_operands = 1 : i64, tpu.core_type = #tpu.core_type<tc>, window_params = [{transform_indices = @transform_0, window_bounds = array<i64: 48, 32>}, {transform_indices = @transform_1, window_bounds = array<i64: 32, 128>}, {transform_indices = @transform_2, window_bounds = array<i64: 1, 128>}, {transform_indices = @transform_3, window_bounds = array<i64: 48, 128>}]} {
    %c0_i32 = arith.constant 0 : i32
    %0 = arith.cmpi eq, %arg2, %c0_i32 : i32
    %1 = arith.extui %0 : i1 to i32
    %c0_i32_0 = arith.constant 0 : i32
    %2 = arith.cmpi ne, %1, %c0_i32_0 : i32
    scf.if %2 {
      %cst_10 = arith.constant 0.000000e+00 : f32
      %12 = vector.broadcast %cst_10 : f32 to vector<48x128xf32>
      %c0_11 = arith.constant 0 : index
      %c0_12 = arith.constant 0 : index
      %13 = vector.load %arg7[%c0_11, %c0_12] : memref<48x128xf32, #tpu.memory_space<vmem>>, vector<48x128xf32>
      tpu.vector_store %arg7[%c0_11, %c0_12], %12 {strides = array<i32>} : memref<48x128xf32, #tpu.memory_space<vmem>>, vector<48x128xf32>,
    } else {
    }
    %c0 = arith.constant 0 : index
    %c0_1 = arith.constant 0 : index
    %3 = vector.load %arg7[%c0, %c0_1] : memref<48x128xf32, #tpu.memory_space<vmem>>, vector<48x128xf32>
    %c0_2 = arith.constant 0 : index
    %c0_3 = arith.constant 0 : index
    %4 = vector.load %arg3[%c0_2, %c0_3] : memref<48x32xbf16, #tpu.memory_space<vmem>>, vector<48x32xbf16>
    %c0_4 = arith.constant 0 : index
    %c0_5 = arith.constant 0 : index
    %5 = vector.load %arg4[%c0_4, %c0_5] : memref<32x128xbf16, #tpu.memory_space<vmem>>, vector<32x128xbf16>
    %cst = arith.constant dense<0.000000e+00> : vector<48x128xf32>
    %6 = tpu.matmul %4, %5, %cst {dimension_numbers = #tpu.dot_dimension_numbers<[1], [0], [0], [1], [0, 0, 1, 1], [], []>} : vector<48x32xbf16>, vector<32x128xbf16>, vector<48x128xf32> -> vector<48x128xf32>
    %7 = arith.addf %3, %6 : vector<48x128xf32>
    %c0_6 = arith.constant 0 : index
    %c0_7 = arith.constant 0 : index
    %8 = vector.load %arg7[%c0_6, %c0_7] : memref<48x128xf32, #tpu.memory_space<vmem>>, vector<48x128xf32>
    tpu.vector_store %arg7[%c0_6, %c0_7], %7 {strides = array<i32>} : memref<48x128xf32, #tpu.memory_space<vmem>>, vector<48x128xf32>,
    %c0_i32_8 = arith.constant 0 : i32
    %9 = arith.cmpi eq, %arg2, %c0_i32_8 : i32
    %10 = arith.extui %9 : i1 to i32
    %c0_i32_9 = arith.constant 0 : i32
    %11 = arith.cmpi ne, %10, %c0_i32_9 : i32
    scf.if %11 {
      %c0_10 = arith.constant 0 : index
      %c0_11 = arith.constant 0 : index
      %12 = vector.load %arg7[%c0_10, %c0_11] : memref<48x128xf32, #tpu.memory_space<vmem>>, vector<48x128xf32>
      %c0_12 = arith.constant 0 : index
      %c0_13 = arith.constant 0 : index
      %13 = vector.load %arg5[%c0_12, %c0_13] : memref<1x128xf32, #tpu.memory_space<vmem>>, vector<1x128xf32>
      %14 = vector.broadcast %13 : vector<1x128xf32> to vector<48x128xf32>
      %15 = arith.addf %12, %14 : vector<48x128xf32>
      %c0_14 = arith.constant 0 : index
      %c0_15 = arith.constant 0 : index
      %16 = vector.load %arg6[%c0_14, %c0_15] : memref<48x128xf32, #tpu.memory_space<vmem>>, vector<48x128xf32>
      tpu.vector_store %arg6[%c0_14, %c0_15], %15 {strides = array<i32>} : memref<48x128xf32, #tpu.memory_space<vmem>>, vector<48x128xf32>,
    } else {
    }
    return
  }
  func.func @transform_0(%arg0: i32, %arg1: i32, %arg2: i32) -> (i32, i32) {
    %c0_i32 = arith.constant 0 : i32
    return %arg0, %arg2 : i32, i32
  }
  func.func @transform_1(%arg0: i32, %arg1: i32, %arg2: i32) -> (i32, i32) {
    %c0_i32 = arith.constant 0 : i32
    return %arg2, %arg1 : i32, i32
  }
  func.func @transform_2(%arg0: i32, %arg1: i32, %arg2: i32) -> (i32, i32) {
    %c0_i32 = arith.constant 0 : i32
    %c0_i32_0 = arith.constant 0 : i32
    return %c0_i32, %arg1 : i32, i32
  }
  func.func @transform_3(%arg0: i32, %arg1: i32, %arg2: i32) -> (i32, i32) {
    %c0_i32 = arith.constant 0 : i32
    return %arg0, %arg1 : i32, i32
  }
}

module attributes {stable_mosaic.version = 11 : i64} {
  func.func @_linear_kernel(%arg0: i32, %arg1: i32, %arg2: i32, %arg3: memref<16x16xbf16, #tpu.memory_space<vmem>>, %arg4: memref<16x128xbf16, #tpu.memory_space<vmem>>, %arg5: memref<1x128xf32, #tpu.memory_space<vmem>>, %arg6: memref<16x128xf32, #tpu.memory_space<vmem>>, %arg7: memref<16x128xf32, #tpu.memory_space<vmem>>) attributes {dimension_semantics = [#tpu.dimension_semantics<parallel>, #tpu.dimension_semantics<parallel>, #tpu.dimension_semantics<arbitrary>], iteration_bounds = array<i64: 1, 1, 1>, scalar_prefetch = 0 : i64, scratch_operands = 1 : i64, tpu.core_type = #tpu.core_type<tc>, window_params = [{transform_indices = @transform_0, window_bounds = array<i64: 16, 16>}, {transform_indices = @transform_1, window_bounds = array<i64: 16, 128>}, {transform_indices = @transform_2, window_bounds = array<i64: 1, 128>}, {transform_indices = @transform_3, window_bounds = array<i64: 16, 128>}]} {
    %c0_i32 = arith.constant 0 : i32
    %0 = arith.cmpi eq, %arg2, %c0_i32 : i32
    %1 = arith.extui %0 : i1 to i32
    %c0_i32_0 = arith.constant 0 : i32
    %2 = arith.cmpi ne, %1, %c0_i32_0 : i32
    scf.if %2 {
      %cst_10 = arith.constant 0.000000e+00 : f32
      %12 = vector.broadcast %cst_10 : f32 to vector<16x128xf32>
      %c0_11 = arith.constant 0 : index
      %c0_12 = arith.constant 0 : index
      %13 = vector.load %arg7[%c0_11, %c0_12] : memref<16x128xf32, #tpu.memory_space<vmem>>, vector<16x128xf32>
      tpu.vector_store %arg7[%c0_11, %c0_12], %12 {strides = array<i32>} : memref<16x128xf32, #tpu.memory_space<vmem>>, vector<16x128xf32>,
    } else {
    }
    %c0 = arith.constant 0 : index
    %c0_1 = arith.constant 0 : index
    %3 = vector.load %arg7[%c0, %c0_1] : memref<16x128xf32, #tpu.memory_space<vmem>>, vector<16x128xf32>
    %c0_2 = arith.constant 0 : index
    %c0_3 = arith.constant 0 : index
    %4 = vector.load %arg3[%c0_2, %c0_3] : memref<16x16xbf16, #tpu.memory_space<vmem>>, vector<16x16xbf16>
    %c0_4 = arith.constant 0 : index
    %c0_5 = arith.constant 0 : index
    %5 = vector.load %arg4[%c0_4, %c0_5] : memref<16x128xbf16, #tpu.memory_space<vmem>>, vector<16x128xbf16>
    %cst = arith.constant dense<0.000000e+00> : vector<16x128xf32>
    %6 = tpu.matmul %4, %5, %cst {dimension_numbers = #tpu.dot_dimension_numbers<[1], [0], [0], [1], [0, 0, 1, 1], [], []>} : vector<16x16xbf16>, vector<16x128xbf16>, vector<16x128xf32> -> vector<16x128xf32>
    %7 = arith.addf %3, %6 : vector<16x128xf32>
    %c0_6 = arith.constant 0 : index
    %c0_7 = arith.constant 0 : index
    %8 = vector.load %arg7[%c0_6, %c0_7] : memref<16x128xf32, #tpu.memory_space<vmem>>, vector<16x128xf32>
    tpu.vector_store %arg7[%c0_6, %c0_7], %7 {strides = array<i32>} : memref<16x128xf32, #tpu.memory_space<vmem>>, vector<16x128xf32>,
    %c0_i32_8 = arith.constant 0 : i32
    %9 = arith.cmpi eq, %arg2, %c0_i32_8 : i32
    %10 = arith.extui %9 : i1 to i32
    %c0_i32_9 = arith.constant 0 : i32
    %11 = arith.cmpi ne, %10, %c0_i32_9 : i32
    scf.if %11 {
      %c0_10 = arith.constant 0 : index
      %c0_11 = arith.constant 0 : index
      %12 = vector.load %arg7[%c0_10, %c0_11] : memref<16x128xf32, #tpu.memory_space<vmem>>, vector<16x128xf32>
      %c0_12 = arith.constant 0 : index
      %c0_13 = arith.constant 0 : index
      %13 = vector.load %arg5[%c0_12, %c0_13] : memref<1x128xf32, #tpu.memory_space<vmem>>, vector<1x128xf32>
      %14 = vector.broadcast %13 : vector<1x128xf32> to vector<16x128xf32>
      %15 = arith.addf %12, %14 : vector<16x128xf32>
      %c0_14 = arith.constant 0 : index
      %c0_15 = arith.constant 0 : index
      %16 = vector.load %arg6[%c0_14, %c0_15] : memref<16x128xf32, #tpu.memory_space<vmem>>, vector<16x128xf32>
      tpu.vector_store %arg6[%c0_14, %c0_15], %15 {strides = array<i32>} : memref<16x128xf32, #tpu.memory_space<vmem>>, vector<16x128xf32>,
    } else {
    }
    return
  }
  func.func @transform_0(%arg0: i32, %arg1: i32, %arg2: i32) -> (i32, i32) {
    %c0_i32 = arith.constant 0 : i32
    return %arg0, %arg2 : i32, i32
  }
  func.func @transform_1(%arg0: i32, %arg1: i32, %arg2: i32) -> (i32, i32) {
    %c0_i32 = arith.constant 0 : i32
    return %arg2, %arg1 : i32, i32
  }
  func.func @transform_2(%arg0: i32, %arg1: i32, %arg2: i32) -> (i32, i32) {
    %c0_i32 = arith.constant 0 : i32
    %c0_i32_0 = arith.constant 0 : i32
    return %c0_i32, %arg1 : i32, i32
  }
  func.func @transform_3(%arg0: i32, %arg1: i32, %arg2: i32) -> (i32, i32) {
    %c0_i32 = arith.constant 0 : i32
    return %arg0, %arg1 : i32, i32
  }
}

module attributes {stable_mosaic.version = 11 : i64} {
  func.func @_ln_kernel(%arg0: i32, %arg1: memref<16x32xf32, #tpu.memory_space<vmem>>, %arg2: memref<1x32xf32, #tpu.memory_space<vmem>>, %arg3: memref<1x32xf32, #tpu.memory_space<vmem>>, %arg4: memref<16x32xbf16, #tpu.memory_space<vmem>>) attributes {dimension_semantics = [#tpu.dimension_semantics<parallel>], iteration_bounds = array<i64: 1>, scalar_prefetch = 0 : i64, scratch_operands = 0 : i64, tpu.core_type = #tpu.core_type<tc>, window_params = [{transform_indices = @transform_0, window_bounds = array<i64: 16, 32>}, {pipeline_mode = #tpu.pipeline_mode<synchronous>, transform_indices = @transform_1, window_bounds = array<i64: 1, 32>}, {pipeline_mode = #tpu.pipeline_mode<synchronous>, transform_indices = @transform_2, window_bounds = array<i64: 1, 32>}, {transform_indices = @transform_3, window_bounds = array<i64: 16, 32>}]} {
    %c0 = arith.constant 0 : index
    %c0_0 = arith.constant 0 : index
    %0 = vector.load %arg1[%c0, %c0_0] : memref<16x32xf32, #tpu.memory_space<vmem>>, vector<16x32xf32>
    %cst = arith.constant dense<0.000000e+00> : vector<16xf32>
    %1 = vector.multi_reduction <add>, %0, %cst [1] : vector<16x32xf32> to vector<16xf32>
    %2 = vector.shape_cast %1 : vector<16xf32> to vector<16x1xf32>
    %cst_1 = arith.constant 3.200000e+01 : f32
    %3 = vector.broadcast %cst_1 : f32 to vector<16x1xf32>
    %4 = arith.divf %2, %3 : vector<16x1xf32>
    %5 = vector.broadcast %4 : vector<16x1xf32> to vector<16x32xf32>
    %6 = arith.subf %0, %5 : vector<16x32xf32>
    %7 = arith.mulf %6, %6 : vector<16x32xf32>
    %cst_2 = arith.constant dense<0.000000e+00> : vector<16xf32>
    %8 = vector.multi_reduction <add>, %7, %cst_2 [1] : vector<16x32xf32> to vector<16xf32>
    %9 = vector.shape_cast %8 : vector<16xf32> to vector<16x1xf32>
    %cst_3 = arith.constant 3.200000e+01 : f32
    %10 = vector.broadcast %cst_3 : f32 to vector<16x1xf32>
    %11 = arith.divf %9, %10 : vector<16x1xf32>
    %12 = vector.broadcast %4 : vector<16x1xf32> to vector<16x32xf32>
    %13 = arith.subf %0, %12 : vector<16x32xf32>
    %cst_4 = arith.constant 9.99999997E-7 : f32
    %14 = vector.broadcast %cst_4 : f32 to vector<16x1xf32>
    %15 = arith.addf %11, %14 : vector<16x1xf32>
    %16 = math.rsqrt %15 : vector<16x1xf32>
    %17 = vector.broadcast %16 : vector<16x1xf32> to vector<16x32xf32>
    %18 = arith.mulf %13, %17 : vector<16x32xf32>
    %c0_5 = arith.constant 0 : index
    %c0_6 = arith.constant 0 : index
    %19 = vector.load %arg2[%c0_5, %c0_6] : memref<1x32xf32, #tpu.memory_space<vmem>>, vector<1x32xf32>
    %20 = vector.broadcast %19 : vector<1x32xf32> to vector<16x32xf32>
    %21 = arith.mulf %18, %20 : vector<16x32xf32>
    %c0_7 = arith.constant 0 : index
    %c0_8 = arith.constant 0 : index
    %22 = vector.load %arg3[%c0_7, %c0_8] : memref<1x32xf32, #tpu.memory_space<vmem>>, vector<1x32xf32>
    %23 = vector.broadcast %22 : vector<1x32xf32> to vector<16x32xf32>
    %24 = arith.addf %21, %23 : vector<16x32xf32>
    %25 = arith.truncf %24 : vector<16x32xf32> to vector<16x32xbf16>
    %c0_9 = arith.constant 0 : index
    %c0_10 = arith.constant 0 : index
    %26 = vector.load %arg4[%c0_9, %c0_10] : memref<16x32xbf16, #tpu.memory_space<vmem>>, vector<16x32xbf16>
    tpu.vector_store %arg4[%c0_9, %c0_10], %25 {strides = array<i32>} : memref<16x32xbf16, #tpu.memory_space<vmem>>, vector<16x32xbf16>,
    return
  }
  func.func @transform_0(%arg0: i32) -> (i32, i32) {
    %c0_i32 = arith.constant 0 : i32
    %c0_i32_0 = arith.constant 0 : i32
    return %arg0, %c0_i32 : i32, i32
  }
  func.func @transform_1(%arg0: i32) -> (i32, i32) {
    %c0_i32 = arith.constant 0 : i32
    %c0_i32_0 = arith.constant 0 : i32
    %c0_i32_1 = arith.constant 0 : i32
    return %c0_i32, %c0_i32_0 : i32, i32
  }
  func.func @transform_2(%arg0: i32) -> (i32, i32) {
    %c0_i32 = arith.constant 0 : i32
    %c0_i32_0 = arith.constant 0 : i32
    %c0_i32_1 = arith.constant 0 : i32
    return %c0_i32, %c0_i32_0 : i32, i32
  }
  func.func @transform_3(%arg0: i32) -> (i32, i32) {
    %c0_i32 = arith.constant 0 : i32
    %c0_i32_0 = arith.constant 0 : i32
    return %arg0, %c0_i32 : i32, i32
  }
}

module attributes {stable_mosaic.version = 11 : i64} {
  func.func @_gconv_kernel(%arg0: i32, %arg1: memref<1x16x9x128xf32, #tpu.memory_space<vmem>>, %arg2: memref<16x2x9xf32, #tpu.memory_space<vmem>>, %arg3: memref<16x2x1xf32, #tpu.memory_space<vmem>>, %arg4: memref<1x16x2x128xf32, #tpu.memory_space<vmem>>) attributes {dimension_semantics = [#tpu.dimension_semantics<parallel>], iteration_bounds = array<i64: 2>, scalar_prefetch = 0 : i64, scratch_operands = 0 : i64, tpu.core_type = #tpu.core_type<tc>, window_params = [{transform_indices = @transform_0, window_bounds = array<i64: 1, 16, 9, 128>}, {pipeline_mode = #tpu.pipeline_mode<synchronous>, transform_indices = @transform_1, window_bounds = array<i64: 16, 2, 9>}, {pipeline_mode = #tpu.pipeline_mode<synchronous>, transform_indices = @transform_2, window_bounds = array<i64: 16, 2, 1>}, {transform_indices = @transform_3, window_bounds = array<i64: 1, 16, 2, 128>}]} {
    %c0 = arith.constant 0 : index
    %c0_0 = arith.constant 0 : index
    %c0_1 = arith.constant 0 : index
    %c0_2 = arith.constant 0 : index
    %0 = vector.load %arg1[%c0, %c0_0, %c0_1, %c0_2] : memref<1x16x9x128xf32, #tpu.memory_space<vmem>>, vector<1x16x9x128xf32>
    %1 = vector.shape_cast %0 : vector<1x16x9x128xf32> to vector<16x9x128xf32>
    %c0_3 = arith.constant 0 : index
    %c0_4 = arith.constant 0 : index
    %c0_5 = arith.constant 0 : index
    %2 = vector.load %arg2[%c0_3, %c0_4, %c0_5] : memref<16x2x9xf32, #tpu.memory_space<vmem>>, vector<16x2x9xf32>
    %3 = vector.extract_strided_slice %1 {offsets = [0, 0, 0], sizes = [16, 1, 128], strides = [1, 1, 1]} : vector<16x9x128xf32> to vector<16x1x128xf32>
    %4 = vector.extract_strided_slice %2 {offsets = [0, 0, 0], sizes = [16, 2, 1], strides = [1, 1, 1]} : vector<16x2x9xf32> to vector<16x2x1xf32>
    %5 = vector.broadcast %3 : vector<16x1x128xf32> to vector<16x2x128xf32>
    %6 = vector.broadcast %4 : vector<16x2x1xf32> to vector<16x2x128xf32>
    %7 = arith.mulf %5, %6 : vector<16x2x128xf32>
    %8 = vector.extract_strided_slice %1 {offsets = [0, 1, 0], sizes = [16, 1, 128], strides = [1, 1, 1]} : vector<16x9x128xf32> to vector<16x1x128xf32>
    %9 = vector.extract_strided_slice %2 {offsets = [0, 0, 1], sizes = [16, 2, 1], strides = [1, 1, 1]} : vector<16x2x9xf32> to vector<16x2x1xf32>
    %10 = vector.broadcast %8 : vector<16x1x128xf32> to vector<16x2x128xf32>
    %11 = vector.broadcast %9 : vector<16x2x1xf32> to vector<16x2x128xf32>
    %12 = arith.mulf %10, %11 : vector<16x2x128xf32>
    %13 = arith.addf %7, %12 : vector<16x2x128xf32>
    %14 = vector.extract_strided_slice %1 {offsets = [0, 2, 0], sizes = [16, 1, 128], strides = [1, 1, 1]} : vector<16x9x128xf32> to vector<16x1x128xf32>
    %15 = vector.extract_strided_slice %2 {offsets = [0, 0, 2], sizes = [16, 2, 1], strides = [1, 1, 1]} : vector<16x2x9xf32> to vector<16x2x1xf32>
    %16 = vector.broadcast %14 : vector<16x1x128xf32> to vector<16x2x128xf32>
    %17 = vector.broadcast %15 : vector<16x2x1xf32> to vector<16x2x128xf32>
    %18 = arith.mulf %16, %17 : vector<16x2x128xf32>
    %19 = arith.addf %13, %18 : vector<16x2x128xf32>
    %20 = vector.extract_strided_slice %1 {offsets = [0, 3, 0], sizes = [16, 1, 128], strides = [1, 1, 1]} : vector<16x9x128xf32> to vector<16x1x128xf32>
    %21 = vector.extract_strided_slice %2 {offsets = [0, 0, 3], sizes = [16, 2, 1], strides = [1, 1, 1]} : vector<16x2x9xf32> to vector<16x2x1xf32>
    %22 = vector.broadcast %20 : vector<16x1x128xf32> to vector<16x2x128xf32>
    %23 = vector.broadcast %21 : vector<16x2x1xf32> to vector<16x2x128xf32>
    %24 = arith.mulf %22, %23 : vector<16x2x128xf32>
    %25 = arith.addf %19, %24 : vector<16x2x128xf32>
    %26 = vector.extract_strided_slice %1 {offsets = [0, 4, 0], sizes = [16, 1, 128], strides = [1, 1, 1]} : vector<16x9x128xf32> to vector<16x1x128xf32>
    %27 = vector.extract_strided_slice %2 {offsets = [0, 0, 4], sizes = [16, 2, 1], strides = [1, 1, 1]} : vector<16x2x9xf32> to vector<16x2x1xf32>
    %28 = vector.broadcast %26 : vector<16x1x128xf32> to vector<16x2x128xf32>
    %29 = vector.broadcast %27 : vector<16x2x1xf32> to vector<16x2x128xf32>
    %30 = arith.mulf %28, %29 : vector<16x2x128xf32>
    %31 = arith.addf %25, %30 : vector<16x2x128xf32>
    %32 = vector.extract_strided_slice %1 {offsets = [0, 5, 0], sizes = [16, 1, 128], strides = [1, 1, 1]} : vector<16x9x128xf32> to vector<16x1x128xf32>
    %33 = vector.extract_strided_slice %2 {offsets = [0, 0, 5], sizes = [16, 2, 1], strides = [1, 1, 1]} : vector<16x2x9xf32> to vector<16x2x1xf32>
    %34 = vector.broadcast %32 : vector<16x1x128xf32> to vector<16x2x128xf32>
    %35 = vector.broadcast %33 : vector<16x2x1xf32> to vector<16x2x128xf32>
    %36 = arith.mulf %34, %35 : vector<16x2x128xf32>
    %37 = arith.addf %31, %36 : vector<16x2x128xf32>
    %38 = vector.extract_strided_slice %1 {offsets = [0, 6, 0], sizes = [16, 1, 128], strides = [1, 1, 1]} : vector<16x9x128xf32> to vector<16x1x128xf32>
    %39 = vector.extract_strided_slice %2 {offsets = [0, 0, 6], sizes = [16, 2, 1], strides = [1, 1, 1]} : vector<16x2x9xf32> to vector<16x2x1xf32>
    %40 = vector.broadcast %38 : vector<16x1x128xf32> to vector<16x2x128xf32>
    %41 = vector.broadcast %39 : vector<16x2x1xf32> to vector<16x2x128xf32>
    %42 = arith.mulf %40, %41 : vector<16x2x128xf32>
    %43 = arith.addf %37, %42 : vector<16x2x128xf32>
    %44 = vector.extract_strided_slice %1 {offsets = [0, 7, 0], sizes = [16, 1, 128], strides = [1, 1, 1]} : vector<16x9x128xf32> to vector<16x1x128xf32>
    %45 = vector.extract_strided_slice %2 {offsets = [0, 0, 7], sizes = [16, 2, 1], strides = [1, 1, 1]} : vector<16x2x9xf32> to vector<16x2x1xf32>
    %46 = vector.broadcast %44 : vector<16x1x128xf32> to vector<16x2x128xf32>
    %47 = vector.broadcast %45 : vector<16x2x1xf32> to vector<16x2x128xf32>
    %48 = arith.mulf %46, %47 : vector<16x2x128xf32>
    %49 = arith.addf %43, %48 : vector<16x2x128xf32>
    %50 = vector.extract_strided_slice %1 {offsets = [0, 8, 0], sizes = [16, 1, 128], strides = [1, 1, 1]} : vector<16x9x128xf32> to vector<16x1x128xf32>
    %51 = vector.extract_strided_slice %2 {offsets = [0, 0, 8], sizes = [16, 2, 1], strides = [1, 1, 1]} : vector<16x2x9xf32> to vector<16x2x1xf32>
    %52 = vector.broadcast %50 : vector<16x1x128xf32> to vector<16x2x128xf32>
    %53 = vector.broadcast %51 : vector<16x2x1xf32> to vector<16x2x128xf32>
    %54 = arith.mulf %52, %53 : vector<16x2x128xf32>
    %55 = arith.addf %49, %54 : vector<16x2x128xf32>
    %c0_6 = arith.constant 0 : index
    %c0_7 = arith.constant 0 : index
    %c0_8 = arith.constant 0 : index
    %56 = vector.load %arg3[%c0_6, %c0_7, %c0_8] : memref<16x2x1xf32, #tpu.memory_space<vmem>>, vector<16x2x1xf32>
    %57 = vector.broadcast %56 : vector<16x2x1xf32> to vector<16x2x128xf32>
    %58 = arith.addf %55, %57 : vector<16x2x128xf32>
    %c0_9 = arith.constant 0 : index
    %c0_10 = arith.constant 0 : index
    %c0_11 = arith.constant 0 : index
    %c0_12 = arith.constant 0 : index
    %59 = vector.load %arg4[%c0_9, %c0_10, %c0_11, %c0_12] : memref<1x16x2x128xf32, #tpu.memory_space<vmem>>, vector<1x16x2x128xf32>
    %60 = vector.shape_cast %59 : vector<1x16x2x128xf32> to vector<16x2x128xf32>
    %61 = vector.shape_cast %58 : vector<16x2x128xf32> to vector<1x16x2x128xf32>
    tpu.vector_store %arg4[%c0_9, %c0_10, %c0_11, %c0_12], %61 {strides = array<i32>} : memref<1x16x2x128xf32, #tpu.memory_space<vmem>>, vector<1x16x2x128xf32>,
    return
  }
  func.func @transform_0(%arg0: i32) -> (i32, i32, i32, i32) {
    %c0_i32 = arith.constant 0 : i32
    %c0_i32_0 = arith.constant 0 : i32
    %c0_i32_1 = arith.constant 0 : i32
    %c0_i32_2 = arith.constant 0 : i32
    return %arg0, %c0_i32, %c0_i32_0, %c0_i32_1 : i32, i32, i32, i32
  }
  func.func @transform_1(%arg0: i32) -> (i32, i32, i32) {
    %c0_i32 = arith.constant 0 : i32
    %c0_i32_0 = arith.constant 0 : i32
    %c0_i32_1 = arith.constant 0 : i32
    %c0_i32_2 = arith.constant 0 : i32
    return %c0_i32, %c0_i32_0, %c0_i32_1 : i32, i32, i32
  }
  func.func @transform_2(%arg0: i32) -> (i32, i32, i32) {
    %c0_i32 = arith.constant 0 : i32
    %c0_i32_0 = arith.constant 0 : i32
    %c0_i32_1 = arith.constant 0 : i32
    %c0_i32_2 = arith.constant 0 : i32
    return %c0_i32, %c0_i32_0, %c0_i32_1 : i32, i32, i32
  }
  func.func @transform_3(%arg0: i32) -> (i32, i32, i32, i32) {
    %c0_i32 = arith.constant 0 : i32
    %c0_i32_0 = arith.constant 0 : i32
    %c0_i32_1 = arith.constant 0 : i32
    %c0_i32_2 = arith.constant 0 : i32
    return %arg0, %c0_i32, %c0_i32_0, %c0_i32_1 : i32, i32, i32, i32
  }
}

module attributes {stable_mosaic.version = 11 : i64} {
  func.func @_linear_kernel(%arg0: i32, %arg1: i32, %arg2: i32, %arg3: memref<16x32xbf16, #tpu.memory_space<vmem>>, %arg4: memref<32x128xbf16, #tpu.memory_space<vmem>>, %arg5: memref<1x128xf32, #tpu.memory_space<vmem>>, %arg6: memref<16x128xbf16, #tpu.memory_space<vmem>>, %arg7: memref<16x128xf32, #tpu.memory_space<vmem>>) attributes {dimension_semantics = [#tpu.dimension_semantics<parallel>, #tpu.dimension_semantics<parallel>, #tpu.dimension_semantics<arbitrary>], iteration_bounds = array<i64: 1, 1, 1>, scalar_prefetch = 0 : i64, scratch_operands = 1 : i64, tpu.core_type = #tpu.core_type<tc>, window_params = [{transform_indices = @transform_0, window_bounds = array<i64: 16, 32>}, {transform_indices = @transform_1, window_bounds = array<i64: 32, 128>}, {transform_indices = @transform_2, window_bounds = array<i64: 1, 128>}, {transform_indices = @transform_3, window_bounds = array<i64: 16, 128>}]} {
    %c0_i32 = arith.constant 0 : i32
    %0 = arith.cmpi eq, %arg2, %c0_i32 : i32
    %1 = arith.extui %0 : i1 to i32
    %c0_i32_0 = arith.constant 0 : i32
    %2 = arith.cmpi ne, %1, %c0_i32_0 : i32
    scf.if %2 {
      %cst_10 = arith.constant 0.000000e+00 : f32
      %12 = vector.broadcast %cst_10 : f32 to vector<16x128xf32>
      %c0_11 = arith.constant 0 : index
      %c0_12 = arith.constant 0 : index
      %13 = vector.load %arg7[%c0_11, %c0_12] : memref<16x128xf32, #tpu.memory_space<vmem>>, vector<16x128xf32>
      tpu.vector_store %arg7[%c0_11, %c0_12], %12 {strides = array<i32>} : memref<16x128xf32, #tpu.memory_space<vmem>>, vector<16x128xf32>,
    } else {
    }
    %c0 = arith.constant 0 : index
    %c0_1 = arith.constant 0 : index
    %3 = vector.load %arg7[%c0, %c0_1] : memref<16x128xf32, #tpu.memory_space<vmem>>, vector<16x128xf32>
    %c0_2 = arith.constant 0 : index
    %c0_3 = arith.constant 0 : index
    %4 = vector.load %arg3[%c0_2, %c0_3] : memref<16x32xbf16, #tpu.memory_space<vmem>>, vector<16x32xbf16>
    %c0_4 = arith.constant 0 : index
    %c0_5 = arith.constant 0 : index
    %5 = vector.load %arg4[%c0_4, %c0_5] : memref<32x128xbf16, #tpu.memory_space<vmem>>, vector<32x128xbf16>
    %cst = arith.constant dense<0.000000e+00> : vector<16x128xf32>
    %6 = tpu.matmul %4, %5, %cst {dimension_numbers = #tpu.dot_dimension_numbers<[1], [0], [0], [1], [0, 0, 1, 1], [], []>} : vector<16x32xbf16>, vector<32x128xbf16>, vector<16x128xf32> -> vector<16x128xf32>
    %7 = arith.addf %3, %6 : vector<16x128xf32>
    %c0_6 = arith.constant 0 : index
    %c0_7 = arith.constant 0 : index
    %8 = vector.load %arg7[%c0_6, %c0_7] : memref<16x128xf32, #tpu.memory_space<vmem>>, vector<16x128xf32>
    tpu.vector_store %arg7[%c0_6, %c0_7], %7 {strides = array<i32>} : memref<16x128xf32, #tpu.memory_space<vmem>>, vector<16x128xf32>,
    %c0_i32_8 = arith.constant 0 : i32
    %9 = arith.cmpi eq, %arg2, %c0_i32_8 : i32
    %10 = arith.extui %9 : i1 to i32
    %c0_i32_9 = arith.constant 0 : i32
    %11 = arith.cmpi ne, %10, %c0_i32_9 : i32
    scf.if %11 {
      %c0_10 = arith.constant 0 : index
      %c0_11 = arith.constant 0 : index
      %12 = vector.load %arg7[%c0_10, %c0_11] : memref<16x128xf32, #tpu.memory_space<vmem>>, vector<16x128xf32>
      %c0_12 = arith.constant 0 : index
      %c0_13 = arith.constant 0 : index
      %13 = vector.load %arg5[%c0_12, %c0_13] : memref<1x128xf32, #tpu.memory_space<vmem>>, vector<1x128xf32>
      %14 = vector.broadcast %13 : vector<1x128xf32> to vector<16x128xf32>
      %15 = arith.addf %12, %14 : vector<16x128xf32>
      %16 = arith.truncf %15 : vector<16x128xf32> to vector<16x128xbf16>
      %c0_14 = arith.constant 0 : index
      %c0_15 = arith.constant 0 : index
      %17 = vector.load %arg6[%c0_14, %c0_15] : memref<16x128xbf16, #tpu.memory_space<vmem>>, vector<16x128xbf16>
      tpu.vector_store %arg6[%c0_14, %c0_15], %16 {strides = array<i32>} : memref<16x128xbf16, #tpu.memory_space<vmem>>, vector<16x128xbf16>,
    } else {
    }
    return
  }
  func.func @transform_0(%arg0: i32, %arg1: i32, %arg2: i32) -> (i32, i32) {
    %c0_i32 = arith.constant 0 : i32
    return %arg0, %arg2 : i32, i32
  }
  func.func @transform_1(%arg0: i32, %arg1: i32, %arg2: i32) -> (i32, i32) {
    %c0_i32 = arith.constant 0 : i32
    return %arg2, %arg1 : i32, i32
  }
  func.func @transform_2(%arg0: i32, %arg1: i32, %arg2: i32) -> (i32, i32) {
    %c0_i32 = arith.constant 0 : i32
    %c0_i32_0 = arith.constant 0 : i32
    return %c0_i32, %arg1 : i32, i32
  }
  func.func @transform_3(%arg0: i32, %arg1: i32, %arg2: i32) -> (i32, i32) {
    %c0_i32 = arith.constant 0 : i32
    return %arg0, %arg1 : i32, i32
  }
}

module attributes {stable_mosaic.version = 11 : i64} {
  func.func @_attn_kernel(%arg0: i32, %arg1: i32, %arg2: i32, %arg3: i32, %arg4: memref<1x5x32xbf16, #tpu.memory_space<vmem>>, %arg5: memref<1x5x32xbf16, #tpu.memory_space<vmem>>, %arg6: memref<1x5x32xbf16, #tpu.memory_space<vmem>>, %arg7: memref<1x5x32xbf16, #tpu.memory_space<vmem>>, %arg8: memref<4x5x1xf32, #tpu.memory_space<vmem>>, %arg9: memref<4x5x1xf32, #tpu.memory_space<vmem>>, %arg10: memref<4x5x8xf32, #tpu.memory_space<vmem>>) attributes {dimension_semantics = [#tpu.dimension_semantics<parallel>, #tpu.dimension_semantics<parallel>, #tpu.dimension_semantics<parallel>, #tpu.dimension_semantics<arbitrary>], iteration_bounds = array<i64: 2, 1, 1, 1>, scalar_prefetch = 0 : i64, scratch_operands = 3 : i64, tpu.core_type = #tpu.core_type<tc>, window_params = [{transform_indices = @transform_0, window_bounds = array<i64: 1, 5, 32>}, {transform_indices = @transform_1, window_bounds = array<i64: 1, 5, 32>}, {transform_indices = @transform_2, window_bounds = array<i64: 1, 5, 32>}, {transform_indices = @transform_3, window_bounds = array<i64: 1, 5, 32>}]} {
    %c0_i32 = arith.constant 0 : i32
    %0 = arith.cmpi eq, %arg3, %c0_i32 : i32
    %1 = arith.extui %0 : i1 to i32
    %c0_i32_0 = arith.constant 0 : i32
    %2 = arith.cmpi ne, %1, %c0_i32_0 : i32
    scf.if %2 {
      %cst_96 = arith.constant 0xFF800000 : f32
      %158 = vector.broadcast %cst_96 : f32 to vector<4x5x1xf32>
      %c0_97 = arith.constant 0 : index
      %c0_98 = arith.constant 0 : index
      %c0_99 = arith.constant 0 : index
      %159 = vector.load %arg8[%c0_97, %c0_98, %c0_99] : memref<4x5x1xf32, #tpu.memory_space<vmem>>, vector<4x5x1xf32>
      tpu.vector_store %arg8[%c0_97, %c0_98, %c0_99], %158 {strides = array<i32>} : memref<4x5x1xf32, #tpu.memory_space<vmem>>, vector<4x5x1xf32>,
      %cst_100 = arith.constant 0.000000e+00 : f32
      %160 = vector.broadcast %cst_100 : f32 to vector<4x5x1xf32>
      %c0_101 = arith.constant 0 : index
      %c0_102 = arith.constant 0 : index
      %c0_103 = arith.constant 0 : index
      %161 = vector.load %arg9[%c0_101, %c0_102, %c0_103] : memref<4x5x1xf32, #tpu.memory_space<vmem>>, vector<4x5x1xf32>
      tpu.vector_store %arg9[%c0_101, %c0_102, %c0_103], %160 {strides = array<i32>} : memref<4x5x1xf32, #tpu.memory_space<vmem>>, vector<4x5x1xf32>,
      %cst_104 = arith.constant 0.000000e+00 : f32
      %162 = vector.broadcast %cst_104 : f32 to vector<4x5x8xf32>
      %c0_105 = arith.constant 0 : index
      %c0_106 = arith.constant 0 : index
      %c0_107 = arith.constant 0 : index
      %163 = vector.load %arg10[%c0_105, %c0_106, %c0_107] : memref<4x5x8xf32, #tpu.memory_space<vmem>>, vector<4x5x8xf32>
      tpu.vector_store %arg10[%c0_105, %c0_106, %c0_107], %162 {strides = array<i32>} : memref<4x5x8xf32, #tpu.memory_space<vmem>>, vector<4x5x8xf32>,
    } else {
    }
    %c0 = arith.constant 0 : index
    %c0_1 = arith.constant 0 : index
    %c0_2 = arith.constant 0 : index
    %3 = vector.load %arg4[%c0, %c0_1, %c0_2] : memref<1x5x32xbf16, #tpu.memory_space<vmem>>, vector<1x5x32xbf16>
    %4 = vector.shape_cast %3 : vector<1x5x32xbf16> to vector<5x32xbf16>
    %cst = arith.constant 3.535160e-01 : bf16
    %5 = vector.broadcast %cst : bf16 to vector<5x32xbf16>
    %6 = arith.mulf %4, %5 : vector<5x32xbf16>
    %c0_3 = arith.constant 0 : index
    %c0_4 = arith.constant 0 : index
    %c0_5 = arith.constant 0 : index
    %7 = vector.load %arg5[%c0_3, %c0_4, %c0_5] : memref<1x5x32xbf16, #tpu.memory_space<vmem>>, vector<1x5x32xbf16>
    %8 = vector.shape_cast %7 : vector<1x5x32xbf16> to vector<5x32xbf16>
    %c0_6 = arith.constant 0 : index
    %c0_7 = arith.constant 0 : index
    %c0_8 = arith.constant 0 : index
    %9 = vector.load %arg6[%c0_6, %c0_7, %c0_8] : memref<1x5x32xbf16, #tpu.memory_space<vmem>>, vector<1x5x32xbf16>
    %10 = vector.shape_cast %9 : vector<1x5x32xbf16> to vector<5x32xbf16>
    %11 = vector.extract_strided_slice %6 {offsets = [0, 0], sizes = [5, 8], strides = [1, 1]} : vector<5x32xbf16> to vector<5x8xbf16>
    %12 = vector.extract_strided_slice %8 {offsets = [0, 0], sizes = [5, 8], strides = [1, 1]} : vector<5x32xbf16> to vector<5x8xbf16>
    %cst_9 = arith.constant dense<0.000000e+00> : vector<5x5xf32>
    %13 = tpu.matmul %11, %12, %cst_9 {dimension_numbers = #tpu.dot_dimension_numbers<[1], [1], [0], [0], [0, 0, 1, 0], [], []>} : vector<5x8xbf16>, vector<5x8xbf16>, vector<5x5xf32> -> vector<5x5xf32>
    %c0_10 = arith.constant 0 : index
    %c0_11 = arith.constant 0 : index
    %c0_12 = arith.constant 0 : index
    %14 = vector.load %arg8[%c0_10, %c0_11, %c0_12] : memref<4x5x1xf32, #tpu.memory_space<vmem>>, vector<1x5x1xf32>
    %15 = vector.shape_cast %14 : vector<1x5x1xf32> to vector<5x1xf32>
    %cst_13 = arith.constant dense<0xFF800000> : vector<5xf32>
    %16 = vector.multi_reduction <maximumf>, %13, %cst_13 [1] : vector<5x5xf32> to vector<5xf32>
    %17 = vector.shape_cast %16 : vector<5xf32> to vector<5x1xf32>
    %18 = arith.maximumf %15, %17 : vector<5x1xf32>
    %19 = arith.subf %15, %18 : vector<5x1xf32>
    %20 = math.exp %19 : vector<5x1xf32>
    %21 = vector.broadcast %18 : vector<5x1xf32> to vector<5x5xf32>
    %22 = arith.subf %13, %21 : vector<5x5xf32>
    %23 = math.exp %22 : vector<5x5xf32>
    %c0_14 = arith.constant 0 : index
    %c0_15 = arith.constant 0 : index
    %c0_16 = arith.constant 0 : index
    %24 = vector.load %arg9[%c0_14, %c0_15, %c0_16] : memref<4x5x1xf32, #tpu.memory_space<vmem>>, vector<1x5x1xf32>
    %25 = vector.shape_cast %24 : vector<1x5x1xf32> to vector<5x1xf32>
    %26 = arith.mulf %20, %25 : vector<5x1xf32>
    %cst_17 = arith.constant dense<0.000000e+00> : vector<5xf32>
    %27 = vector.multi_reduction <add>, %23, %cst_17 [1] : vector<5x5xf32> to vector<5xf32>
    %28 = vector.shape_cast %27 : vector<5xf32> to vector<5x1xf32>
    %29 = arith.addf %26, %28 : vector<5x1xf32>
    %c0_18 = arith.constant 0 : index
    %c0_19 = arith.constant 0 : index
    %c0_20 = arith.constant 0 : index
    %30 = vector.load %arg9[%c0_18, %c0_19, %c0_20] : memref<4x5x1xf32, #tpu.memory_space<vmem>>, vector<1x5x1xf32>
    %31 = vector.shape_cast %30 : vector<1x5x1xf32> to vector<5x1xf32>
    %32 = vector.shape_cast %29 : vector<5x1xf32> to vector<1x5x1xf32>
    tpu.vector_store %arg9[%c0_18, %c0_19, %c0_20], %32 {strides = array<i32>} : memref<4x5x1xf32, #tpu.memory_space<vmem>>, vector<1x5x1xf32>,
    %c0_21 = arith.constant 0 : index
    %c0_22 = arith.constant 0 : index
    %c0_23 = arith.constant 0 : index
    %33 = vector.load %arg10[%c0_21, %c0_22, %c0_23] : memref<4x5x8xf32, #tpu.memory_space<vmem>>, vector<1x5x8xf32>
    %34 = vector.shape_cast %33 : vector<1x5x8xf32> to vector<5x8xf32>
    %35 = vector.broadcast %20 : vector<5x1xf32> to vector<5x8xf32>
    %36 = arith.mulf %35, %34 : vector<5x8xf32>
    %37 = arith.truncf %23 : vector<5x5xf32> to vector<5x5xbf16>
    %38 = vector.extract_strided_slice %10 {offsets = [0, 0], sizes = [5, 8], strides = [1, 1]} : vector<5x32xbf16> to vector<5x8xbf16>
    %cst_24 = arith.constant dense<0.000000e+00> : vector<5x8xf32>
    %39 = tpu.matmul %37, %38, %cst_24 {dimension_numbers = #tpu.dot_dimension_numbers<[1], [0], [0], [1], [0, 0, 1, 1], [], []>} : vector<5x5xbf16>, vector<5x8xbf16>, vector<5x8xf32> -> vector<5x8xf32>
    %40 = arith.addf %36, %39 : vector<5x8xf32>
    %c0_25 = arith.constant 0 : index
    %c0_26 = arith.constant 0 : index
    %c0_27 = arith.constant 0 : index
    %41 = vector.load %arg10[%c0_25, %c0_26, %c0_27] : memref<4x5x8xf32, #tpu.memory_space<vmem>>, vector<1x5x8xf32>
    %42 = vector.shape_cast %41 : vector<1x5x8xf32> to vector<5x8xf32>
    %43 = vector.shape_cast %40 : vector<5x8xf32> to vector<1x5x8xf32>
    tpu.vector_store %arg10[%c0_25, %c0_26, %c0_27], %43 {strides = array<i32>} : memref<4x5x8xf32, #tpu.memory_space<vmem>>, vector<1x5x8xf32>,
    %c0_28 = arith.constant 0 : index
    %c0_29 = arith.constant 0 : index
    %c0_30 = arith.constant 0 : index
    %44 = vector.load %arg8[%c0_28, %c0_29, %c0_30] : memref<4x5x1xf32, #tpu.memory_space<vmem>>, vector<1x5x1xf32>
    %45 = vector.shape_cast %44 : vector<1x5x1xf32> to vector<5x1xf32>
    %46 = vector.shape_cast %18 : vector<5x1xf32> to vector<1x5x1xf32>
    tpu.vector_store %arg8[%c0_28, %c0_29, %c0_30], %46 {strides = array<i32>} : memref<4x5x1xf32, #tpu.memory_space<vmem>>, vector<1x5x1xf32>,
    %47 = vector.extract_strided_slice %6 {offsets = [0, 8], sizes = [5, 8], strides = [1, 1]} : vector<5x32xbf16> to vector<5x8xbf16>
    %48 = vector.extract_strided_slice %8 {offsets = [0, 8], sizes = [5, 8], strides = [1, 1]} : vector<5x32xbf16> to vector<5x8xbf16>
    %cst_31 = arith.constant dense<0.000000e+00> : vector<5x5xf32>
    %49 = tpu.matmul %47, %48, %cst_31 {dimension_numbers = #tpu.dot_dimension_numbers<[1], [1], [0], [0], [0, 0, 1, 0], [], []>} : vector<5x8xbf16>, vector<5x8xbf16>, vector<5x5xf32> -> vector<5x5xf32>
    %c1 = arith.constant 1 : index
    %c0_32 = arith.constant 0 : index
    %c0_33 = arith.constant 0 : index
    %50 = vector.load %arg8[%c1, %c0_32, %c0_33] : memref<4x5x1xf32, #tpu.memory_space<vmem>>, vector<1x5x1xf32>
    %51 = vector.shape_cast %50 : vector<1x5x1xf32> to vector<5x1xf32>
    %cst_34 = arith.constant dense<0xFF800000> : vector<5xf32>
    %52 = vector.multi_reduction <maximumf>, %49, %cst_34 [1] : vector<5x5xf32> to vector<5xf32>
    %53 = vector.shape_cast %52 : vector<5xf32> to vector<5x1xf32>
    %54 = arith.maximumf %51, %53 : vector<5x1xf32>
    %55 = arith.subf %51, %54 : vector<5x1xf32>
    %56 = math.exp %55 : vector<5x1xf32>
    %57 = vector.broadcast %54 : vector<5x1xf32> to vector<5x5xf32>
    %58 = arith.subf %49, %57 : vector<5x5xf32>
    %59 = math.exp %58 : vector<5x5xf32>
    %c1_35 = arith.constant 1 : index
    %c0_36 = arith.constant 0 : index
    %c0_37 = arith.constant 0 : index
    %60 = vector.load %arg9[%c1_35, %c0_36, %c0_37] : memref<4x5x1xf32, #tpu.memory_space<vmem>>, vector<1x5x1xf32>
    %61 = vector.shape_cast %60 : vector<1x5x1xf32> to vector<5x1xf32>
    %62 = arith.mulf %56, %61 : vector<5x1xf32>
    %cst_38 = arith.constant dense<0.000000e+00> : vector<5xf32>
    %63 = vector.multi_reduction <add>, %59, %cst_38 [1] : vector<5x5xf32> to vector<5xf32>
    %64 = vector.shape_cast %63 : vector<5xf32> to vector<5x1xf32>
    %65 = arith.addf %62, %64 : vector<5x1xf32>
    %c1_39 = arith.constant 1 : index
    %c0_40 = arith.constant 0 : index
    %c0_41 = arith.constant 0 : index
    %66 = vector.load %arg9[%c1_39, %c0_40, %c0_41] : memref<4x5x1xf32, #tpu.memory_space<vmem>>, vector<1x5x1xf32>
    %67 = vector.shape_cast %66 : vector<1x5x1xf32> to vector<5x1xf32>
    %68 = vector.shape_cast %65 : vector<5x1xf32> to vector<1x5x1xf32>
    tpu.vector_store %arg9[%c1_39, %c0_40, %c0_41], %68 {strides = array<i32>} : memref<4x5x1xf32, #tpu.memory_space<vmem>>, vector<1x5x1xf32>,
    %c1_42 = arith.constant 1 : index
    %c0_43 = arith.constant 0 : index
    %c0_44 = arith.constant 0 : index
    %69 = vector.load %arg10[%c1_42, %c0_43, %c0_44] : memref<4x5x8xf32, #tpu.memory_space<vmem>>, vector<1x5x8xf32>
    %70 = vector.shape_cast %69 : vector<1x5x8xf32> to vector<5x8xf32>
    %71 = vector.broadcast %56 : vector<5x1xf32> to vector<5x8xf32>
    %72 = arith.mulf %71, %70 : vector<5x8xf32>
    %73 = arith.truncf %59 : vector<5x5xf32> to vector<5x5xbf16>
    %74 = vector.extract_strided_slice %10 {offsets = [0, 8], sizes = [5, 8], strides = [1, 1]} : vector<5x32xbf16> to vector<5x8xbf16>
    %cst_45 = arith.constant dense<0.000000e+00> : vector<5x8xf32>
    %75 = tpu.matmul %73, %74, %cst_45 {dimension_numbers = #tpu.dot_dimension_numbers<[1], [0], [0], [1], [0, 0, 1, 1], [], []>} : vector<5x5xbf16>, vector<5x8xbf16>, vector<5x8xf32> -> vector<5x8xf32>
    %76 = arith.addf %72, %75 : vector<5x8xf32>
    %c1_46 = arith.constant 1 : index
    %c0_47 = arith.constant 0 : index
    %c0_48 = arith.constant 0 : index
    %77 = vector.load %arg10[%c1_46, %c0_47, %c0_48] : memref<4x5x8xf32, #tpu.memory_space<vmem>>, vector<1x5x8xf32>
    %78 = vector.shape_cast %77 : vector<1x5x8xf32> to vector<5x8xf32>
    %79 = vector.shape_cast %76 : vector<5x8xf32> to vector<1x5x8xf32>
    tpu.vector_store %arg10[%c1_46, %c0_47, %c0_48], %79 {strides = array<i32>} : memref<4x5x8xf32, #tpu.memory_space<vmem>>, vector<1x5x8xf32>,
    %c1_49 = arith.constant 1 : index
    %c0_50 = arith.constant 0 : index
    %c0_51 = arith.constant 0 : index
    %80 = vector.load %arg8[%c1_49, %c0_50, %c0_51] : memref<4x5x1xf32, #tpu.memory_space<vmem>>, vector<1x5x1xf32>
    %81 = vector.shape_cast %80 : vector<1x5x1xf32> to vector<5x1xf32>
    %82 = vector.shape_cast %54 : vector<5x1xf32> to vector<1x5x1xf32>
    tpu.vector_store %arg8[%c1_49, %c0_50, %c0_51], %82 {strides = array<i32>} : memref<4x5x1xf32, #tpu.memory_space<vmem>>, vector<1x5x1xf32>,
    %83 = vector.extract_strided_slice %6 {offsets = [0, 16], sizes = [5, 8], strides = [1, 1]} : vector<5x32xbf16> to vector<5x8xbf16>
    %84 = vector.extract_strided_slice %8 {offsets = [0, 16], sizes = [5, 8], strides = [1, 1]} : vector<5x32xbf16> to vector<5x8xbf16>
    %cst_52 = arith.constant dense<0.000000e+00> : vector<5x5xf32>
    %85 = tpu.matmul %83, %84, %cst_52 {dimension_numbers = #tpu.dot_dimension_numbers<[1], [1], [0], [0], [0, 0, 1, 0], [], []>} : vector<5x8xbf16>, vector<5x8xbf16>, vector<5x5xf32> -> vector<5x5xf32>
    %c2 = arith.constant 2 : index
    %c0_53 = arith.constant 0 : index
    %c0_54 = arith.constant 0 : index
    %86 = vector.load %arg8[%c2, %c0_53, %c0_54] : memref<4x5x1xf32, #tpu.memory_space<vmem>>, vector<1x5x1xf32>
    %87 = vector.shape_cast %86 : vector<1x5x1xf32> to vector<5x1xf32>
    %cst_55 = arith.constant dense<0xFF800000> : vector<5xf32>
    %88 = vector.multi_reduction <maximumf>, %85, %cst_55 [1] : vector<5x5xf32> to vector<5xf32>
    %89 = vector.shape_cast %88 : vector<5xf32> to vector<5x1xf32>
    %90 = arith.maximumf %87, %89 : vector<5x1xf32>
    %91 = arith.subf %87, %90 : vector<5x1xf32>
    %92 = math.exp %91 : vector<5x1xf32>
    %93 = vector.broadcast %90 : vector<5x1xf32> to vector<5x5xf32>
    %94 = arith.subf %85, %93 : vector<5x5xf32>
    %95 = math.exp %94 : vector<5x5xf32>
    %c2_56 = arith.constant 2 : index
    %c0_57 = arith.constant 0 : index
    %c0_58 = arith.constant 0 : index
    %96 = vector.load %arg9[%c2_56, %c0_57, %c0_58] : memref<4x5x1xf32, #tpu.memory_space<vmem>>, vector<1x5x1xf32>
    %97 = vector.shape_cast %96 : vector<1x5x1xf32> to vector<5x1xf32>
    %98 = arith.mulf %92, %97 : vector<5x1xf32>
    %cst_59 = arith.constant dense<0.000000e+00> : vector<5xf32>
    %99 = vector.multi_reduction <add>, %95, %cst_59 [1] : vector<5x5xf32> to vector<5xf32>
    %100 = vector.shape_cast %99 : vector<5xf32> to vector<5x1xf32>
    %101 = arith.addf %98, %100 : vector<5x1xf32>
    %c2_60 = arith.constant 2 : index
    %c0_61 = arith.constant 0 : index
    %c0_62 = arith.constant 0 : index
    %102 = vector.load %arg9[%c2_60, %c0_61, %c0_62] : memref<4x5x1xf32, #tpu.memory_space<vmem>>, vector<1x5x1xf32>
    %103 = vector.shape_cast %102 : vector<1x5x1xf32> to vector<5x1xf32>
    %104 = vector.shape_cast %101 : vector<5x1xf32> to vector<1x5x1xf32>
    tpu.vector_store %arg9[%c2_60, %c0_61, %c0_62], %104 {strides = array<i32>} : memref<4x5x1xf32, #tpu.memory_space<vmem>>, vector<1x5x1xf32>,
    %c2_63 = arith.constant 2 : index
    %c0_64 = arith.constant 0 : index
    %c0_65 = arith.constant 0 : index
    %105 = vector.load %arg10[%c2_63, %c0_64, %c0_65] : memref<4x5x8xf32, #tpu.memory_space<vmem>>, vector<1x5x8xf32>
    %106 = vector.shape_cast %105 : vector<1x5x8xf32> to vector<5x8xf32>
    %107 = vector.broadcast %92 : vector<5x1xf32> to vector<5x8xf32>
    %108 = arith.mulf %107, %106 : vector<5x8xf32>
    %109 = arith.truncf %95 : vector<5x5xf32> to vector<5x5xbf16>
    %110 = vector.extract_strided_slice %10 {offsets = [0, 16], sizes = [5, 8], strides = [1, 1]} : vector<5x32xbf16> to vector<5x8xbf16>
    %cst_66 = arith.constant dense<0.000000e+00> : vector<5x8xf32>
    %111 = tpu.matmul %109, %110, %cst_66 {dimension_numbers = #tpu.dot_dimension_numbers<[1], [0], [0], [1], [0, 0, 1, 1], [], []>} : vector<5x5xbf16>, vector<5x8xbf16>, vector<5x8xf32> -> vector<5x8xf32>
    %112 = arith.addf %108, %111 : vector<5x8xf32>
    %c2_67 = arith.constant 2 : index
    %c0_68 = arith.constant 0 : index
    %c0_69 = arith.constant 0 : index
    %113 = vector.load %arg10[%c2_67, %c0_68, %c0_69] : memref<4x5x8xf32, #tpu.memory_space<vmem>>, vector<1x5x8xf32>
    %114 = vector.shape_cast %113 : vector<1x5x8xf32> to vector<5x8xf32>
    %115 = vector.shape_cast %112 : vector<5x8xf32> to vector<1x5x8xf32>
    tpu.vector_store %arg10[%c2_67, %c0_68, %c0_69], %115 {strides = array<i32>} : memref<4x5x8xf32, #tpu.memory_space<vmem>>, vector<1x5x8xf32>,
    %c2_70 = arith.constant 2 : index
    %c0_71 = arith.constant 0 : index
    %c0_72 = arith.constant 0 : index
    %116 = vector.load %arg8[%c2_70, %c0_71, %c0_72] : memref<4x5x1xf32, #tpu.memory_space<vmem>>, vector<1x5x1xf32>
    %117 = vector.shape_cast %116 : vector<1x5x1xf32> to vector<5x1xf32>
    %118 = vector.shape_cast %90 : vector<5x1xf32> to vector<1x5x1xf32>
    tpu.vector_store %arg8[%c2_70, %c0_71, %c0_72], %118 {strides = array<i32>} : memref<4x5x1xf32, #tpu.memory_space<vmem>>, vector<1x5x1xf32>,
    %119 = vector.extract_strided_slice %6 {offsets = [0, 24], sizes = [5, 8], strides = [1, 1]} : vector<5x32xbf16> to vector<5x8xbf16>
    %120 = vector.extract_strided_slice %8 {offsets = [0, 24], sizes = [5, 8], strides = [1, 1]} : vector<5x32xbf16> to vector<5x8xbf16>
    %cst_73 = arith.constant dense<0.000000e+00> : vector<5x5xf32>
    %121 = tpu.matmul %119, %120, %cst_73 {dimension_numbers = #tpu.dot_dimension_numbers<[1], [1], [0], [0], [0, 0, 1, 0], [], []>} : vector<5x8xbf16>, vector<5x8xbf16>, vector<5x5xf32> -> vector<5x5xf32>
    %c3 = arith.constant 3 : index
    %c0_74 = arith.constant 0 : index
    %c0_75 = arith.constant 0 : index
    %122 = vector.load %arg8[%c3, %c0_74, %c0_75] : memref<4x5x1xf32, #tpu.memory_space<vmem>>, vector<1x5x1xf32>
    %123 = vector.shape_cast %122 : vector<1x5x1xf32> to vector<5x1xf32>
    %cst_76 = arith.constant dense<0xFF800000> : vector<5xf32>
    %124 = vector.multi_reduction <maximumf>, %121, %cst_76 [1] : vector<5x5xf32> to vector<5xf32>
    %125 = vector.shape_cast %124 : vector<5xf32> to vector<5x1xf32>
    %126 = arith.maximumf %123, %125 : vector<5x1xf32>
    %127 = arith.subf %123, %126 : vector<5x1xf32>
    %128 = math.exp %127 : vector<5x1xf32>
    %129 = vector.broadcast %126 : vector<5x1xf32> to vector<5x5xf32>
    %130 = arith.subf %121, %129 : vector<5x5xf32>
    %131 = math.exp %130 : vector<5x5xf32>
    %c3_77 = arith.constant 3 : index
    %c0_78 = arith.constant 0 : index
    %c0_79 = arith.constant 0 : index
    %132 = vector.load %arg9[%c3_77, %c0_78, %c0_79] : memref<4x5x1xf32, #tpu.memory_space<vmem>>, vector<1x5x1xf32>
    %133 = vector.shape_cast %132 : vector<1x5x1xf32> to vector<5x1xf32>
    %134 = arith.mulf %128, %133 : vector<5x1xf32>
    %cst_80 = arith.constant dense<0.000000e+00> : vector<5xf32>
    %135 = vector.multi_reduction <add>, %131, %cst_80 [1] : vector<5x5xf32> to vector<5xf32>
    %136 = vector.shape_cast %135 : vector<5xf32> to vector<5x1xf32>
    %137 = arith.addf %134, %136 : vector<5x1xf32>
    %c3_81 = arith.constant 3 : index
    %c0_82 = arith.constant 0 : index
    %c0_83 = arith.constant 0 : index
    %138 = vector.load %arg9[%c3_81, %c0_82, %c0_83] : memref<4x5x1xf32, #tpu.memory_space<vmem>>, vector<1x5x1xf32>
    %139 = vector.shape_cast %138 : vector<1x5x1xf32> to vector<5x1xf32>
    %140 = vector.shape_cast %137 : vector<5x1xf32> to vector<1x5x1xf32>
    tpu.vector_store %arg9[%c3_81, %c0_82, %c0_83], %140 {strides = array<i32>} : memref<4x5x1xf32, #tpu.memory_space<vmem>>, vector<1x5x1xf32>,
    %c3_84 = arith.constant 3 : index
    %c0_85 = arith.constant 0 : index
    %c0_86 = arith.constant 0 : index
    %141 = vector.load %arg10[%c3_84, %c0_85, %c0_86] : memref<4x5x8xf32, #tpu.memory_space<vmem>>, vector<1x5x8xf32>
    %142 = vector.shape_cast %141 : vector<1x5x8xf32> to vector<5x8xf32>
    %143 = vector.broadcast %128 : vector<5x1xf32> to vector<5x8xf32>
    %144 = arith.mulf %143, %142 : vector<5x8xf32>
    %145 = arith.truncf %131 : vector<5x5xf32> to vector<5x5xbf16>
    %146 = vector.extract_strided_slice %10 {offsets = [0, 24], sizes = [5, 8], strides = [1, 1]} : vector<5x32xbf16> to vector<5x8xbf16>
    %cst_87 = arith.constant dense<0.000000e+00> : vector<5x8xf32>
    %147 = tpu.matmul %145, %146, %cst_87 {dimension_numbers = #tpu.dot_dimension_numbers<[1], [0], [0], [1], [0, 0, 1, 1], [], []>} : vector<5x5xbf16>, vector<5x8xbf16>, vector<5x8xf32> -> vector<5x8xf32>
    %148 = arith.addf %144, %147 : vector<5x8xf32>
    %c3_88 = arith.constant 3 : index
    %c0_89 = arith.constant 0 : index
    %c0_90 = arith.constant 0 : index
    %149 = vector.load %arg10[%c3_88, %c0_89, %c0_90] : memref<4x5x8xf32, #tpu.memory_space<vmem>>, vector<1x5x8xf32>
    %150 = vector.shape_cast %149 : vector<1x5x8xf32> to vector<5x8xf32>
    %151 = vector.shape_cast %148 : vector<5x8xf32> to vector<1x5x8xf32>
    tpu.vector_store %arg10[%c3_88, %c0_89, %c0_90], %151 {strides = array<i32>} : memref<4x5x8xf32, #tpu.memory_space<vmem>>, vector<1x5x8xf32>,
    %c3_91 = arith.constant 3 : index
    %c0_92 = arith.constant 0 : index
    %c0_93 = arith.constant 0 : index
    %152 = vector.load %arg8[%c3_91, %c0_92, %c0_93] : memref<4x5x1xf32, #tpu.memory_space<vmem>>, vector<1x5x1xf32>
    %153 = vector.shape_cast %152 : vector<1x5x1xf32> to vector<5x1xf32>
    %154 = vector.shape_cast %126 : vector<5x1xf32> to vector<1x5x1xf32>
    tpu.vector_store %arg8[%c3_91, %c0_92, %c0_93], %154 {strides = array<i32>} : memref<4x5x1xf32, #tpu.memory_space<vmem>>, vector<1x5x1xf32>,
    %c0_i32_94 = arith.constant 0 : i32
    %155 = arith.cmpi eq, %arg3, %c0_i32_94 : i32
    %156 = arith.extui %155 : i1 to i32
    %c0_i32_95 = arith.constant 0 : i32
    %157 = arith.cmpi ne, %156, %c0_i32_95 : i32
    scf.if %157 {
      %c0_96 = arith.constant 0 : index
      %c0_97 = arith.constant 0 : index
      %c0_98 = arith.constant 0 : index
      %158 = vector.load %arg10[%c0_96, %c0_97, %c0_98] : memref<4x5x8xf32, #tpu.memory_space<vmem>>, vector<1x5x8xf32>
      %159 = vector.shape_cast %158 : vector<1x5x8xf32> to vector<5x8xf32>
      %c0_99 = arith.constant 0 : index
      %c0_100 = arith.constant 0 : index
      %c0_101 = arith.constant 0 : index
      %160 = vector.load %arg9[%c0_99, %c0_100, %c0_101] : memref<4x5x1xf32, #tpu.memory_space<vmem>>, vector<1x5x1xf32>
      %161 = vector.shape_cast %160 : vector<1x5x1xf32> to vector<5x1xf32>
      %162 = vector.broadcast %161 : vector<5x1xf32> to vector<5x8xf32>
      %163 = arith.divf %159, %162 : vector<5x8xf32>
      %164 = arith.truncf %163 : vector<5x8xf32> to vector<5x8xbf16>
      %c0_102 = arith.constant 0 : index
      %c0_103 = arith.constant 0 : index
      %c0_104 = arith.constant 0 : index
      %165 = vector.load %arg7[%c0_102, %c0_103, %c0_104] : memref<1x5x32xbf16, #tpu.memory_space<vmem>>, vector<1x5x8xbf16>
      %166 = vector.shape_cast %165 : vector<1x5x8xbf16> to vector<5x8xbf16>
      %167 = vector.shape_cast %164 : vector<5x8xbf16> to vector<1x5x8xbf16>
      tpu.vector_store %arg7[%c0_102, %c0_103, %c0_104], %167 {strides = array<i32>} : memref<1x5x32xbf16, #tpu.memory_space<vmem>>, vector<1x5x8xbf16>,
      %c1_105 = arith.constant 1 : index
      %c0_106 = arith.constant 0 : index
      %c0_107 = arith.constant 0 : index
      %168 = vector.load %arg10[%c1_105, %c0_106, %c0_107] : memref<4x5x8xf32, #tpu.memory_space<vmem>>, vector<1x5x8xf32>
      %169 = vector.shape_cast %168 : vector<1x5x8xf32> to vector<5x8xf32>
      %c1_108 = arith.constant 1 : index
      %c0_109 = arith.constant 0 : index
      %c0_110 = arith.constant 0 : index
      %170 = vector.load %arg9[%c1_108, %c0_109, %c0_110] : memref<4x5x1xf32, #tpu.memory_space<vmem>>, vector<1x5x1xf32>
      %171 = vector.shape_cast %170 : vector<1x5x1xf32> to vector<5x1xf32>
      %172 = vector.broadcast %171 : vector<5x1xf32> to vector<5x8xf32>
      %173 = arith.divf %169, %172 : vector<5x8xf32>
      %174 = arith.truncf %173 : vector<5x8xf32> to vector<5x8xbf16>
      %c0_111 = arith.constant 0 : index
      %c0_112 = arith.constant 0 : index
      %c8 = arith.constant 8 : index
      %175 = vector.load %arg7[%c0_111, %c0_112, %c8] : memref<1x5x32xbf16, #tpu.memory_space<vmem>>, vector<1x5x8xbf16>
      %176 = vector.shape_cast %175 : vector<1x5x8xbf16> to vector<5x8xbf16>
      %177 = vector.shape_cast %174 : vector<5x8xbf16> to vector<1x5x8xbf16>
      tpu.vector_store %arg7[%c0_111, %c0_112, %c8], %177 {strides = array<i32>} : memref<1x5x32xbf16, #tpu.memory_space<vmem>>, vector<1x5x8xbf16>,
      %c2_113 = arith.constant 2 : index
      %c0_114 = arith.constant 0 : index
      %c0_115 = arith.constant 0 : index
      %178 = vector.load %arg10[%c2_113, %c0_114, %c0_115] : memref<4x5x8xf32, #tpu.memory_space<vmem>>, vector<1x5x8xf32>
      %179 = vector.shape_cast %178 : vector<1x5x8xf32> to vector<5x8xf32>
      %c2_116 = arith.constant 2 : index
      %c0_117 = arith.constant 0 : index
      %c0_118 = arith.constant 0 : index
      %180 = vector.load %arg9[%c2_116, %c0_117, %c0_118] : memref<4x5x1xf32, #tpu.memory_space<vmem>>, vector<1x5x1xf32>
      %181 = vector.shape_cast %180 : vector<1x5x1xf32> to vector<5x1xf32>
      %182 = vector.broadcast %181 : vector<5x1xf32> to vector<5x8xf32>
      %183 = arith.divf %179, %182 : vector<5x8xf32>
      %184 = arith.truncf %183 : vector<5x8xf32> to vector<5x8xbf16>
      %c0_119 = arith.constant 0 : index
      %c0_120 = arith.constant 0 : index
      %c16 = arith.constant 16 : index
      %185 = vector.load %arg7[%c0_119, %c0_120, %c16] : memref<1x5x32xbf16, #tpu.memory_space<vmem>>, vector<1x5x8xbf16>
      %186 = vector.shape_cast %185 : vector<1x5x8xbf16> to vector<5x8xbf16>
      %187 = vector.shape_cast %184 : vector<5x8xbf16> to vector<1x5x8xbf16>
      tpu.vector_store %arg7[%c0_119, %c0_120, %c16], %187 {strides = array<i32>} : memref<1x5x32xbf16, #tpu.memory_space<vmem>>, vector<1x5x8xbf16>,
      %c3_121 = arith.constant 3 : index
      %c0_122 = arith.constant 0 : index
      %c0_123 = arith.constant 0 : index
      %188 = vector.load %arg10[%c3_121, %c0_122, %c0_123] : memref<4x5x8xf32, #tpu.memory_space<vmem>>, vector<1x5x8xf32>
      %189 = vector.shape_cast %188 : vector<1x5x8xf32> to vector<5x8xf32>
      %c3_124 = arith.constant 3 : index
      %c0_125 = arith.constant 0 : index
      %c0_126 = arith.constant 0 : index
      %190 = vector.load %arg9[%c3_124, %c0_125, %c0_126] : memref<4x5x1xf32, #tpu.memory_space<vmem>>, vector<1x5x1xf32>
      %191 = vector.shape_cast %190 : vector<1x5x1xf32> to vector<5x1xf32>
      %192 = vector.broadcast %191 : vector<5x1xf32> to vector<5x8xf32>
      %193 = arith.divf %189, %192 : vector<5x8xf32>
      %194 = arith.truncf %193 : vector<5x8xf32> to vector<5x8xbf16>
      %c0_127 = arith.constant 0 : index
      %c0_128 = arith.constant 0 : index
      %c24 = arith.constant 24 : index
      %195 = vector.load %arg7[%c0_127, %c0_128, %c24] : memref<1x5x32xbf16, #tpu.memory_space<vmem>>, vector<1x5x8xbf16>
      %196 = vector.shape_cast %195 : vector<1x5x8xbf16> to vector<5x8xbf16>
      %197 = vector.shape_cast %194 : vector<5x8xbf16> to vector<1x5x8xbf16>
      tpu.vector_store %arg7[%c0_127, %c0_128, %c24], %197 {strides = array<i32>} : memref<1x5x32xbf16, #tpu.memory_space<vmem>>, vector<1x5x8xbf16>,
    } else {
    }
    return
  }
  func.func @transform_0(%arg0: i32, %arg1: i32, %arg2: i32, %arg3: i32) -> (i32, i32, i32) {
    %c0_i32 = arith.constant 0 : i32
    return %arg0, %arg2, %arg1 : i32, i32, i32
  }
  func.func @transform_1(%arg0: i32, %arg1: i32, %arg2: i32, %arg3: i32) -> (i32, i32, i32) {
    %c0_i32 = arith.constant 0 : i32
    return %arg0, %arg3, %arg1 : i32, i32, i32
  }
  func.func @transform_2(%arg0: i32, %arg1: i32, %arg2: i32, %arg3: i32) -> (i32, i32, i32) {
    %c0_i32 = arith.constant 0 : i32
    return %arg0, %arg3, %arg1 : i32, i32, i32
  }
  func.func @transform_3(%arg0: i32, %arg1: i32, %arg2: i32, %arg3: i32) -> (i32, i32, i32) {
    %c0_i32 = arith.constant 0 : i32
    return %arg0, %arg2, %arg1 : i32, i32, i32
  }
}

module attributes {stable_mosaic.version = 11 : i64} {
  func.func @_linear_kernel(%arg0: i32, %arg1: i32, %arg2: i32, %arg3: memref<16x32xbf16, #tpu.memory_space<vmem>>, %arg4: memref<32x128xbf16, #tpu.memory_space<vmem>>, %arg5: memref<1x128xf32, #tpu.memory_space<vmem>>, %arg6: memref<16x128xf32, #tpu.memory_space<vmem>>, %arg7: memref<16x128xf32, #tpu.memory_space<vmem>>) attributes {dimension_semantics = [#tpu.dimension_semantics<parallel>, #tpu.dimension_semantics<parallel>, #tpu.dimension_semantics<arbitrary>], iteration_bounds = array<i64: 1, 1, 1>, scalar_prefetch = 0 : i64, scratch_operands = 1 : i64, tpu.core_type = #tpu.core_type<tc>, window_params = [{transform_indices = @transform_0, window_bounds = array<i64: 16, 32>}, {transform_indices = @transform_1, window_bounds = array<i64: 32, 128>}, {transform_indices = @transform_2, window_bounds = array<i64: 1, 128>}, {transform_indices = @transform_3, window_bounds = array<i64: 16, 128>}]} {
    %c0_i32 = arith.constant 0 : i32
    %0 = arith.cmpi eq, %arg2, %c0_i32 : i32
    %1 = arith.extui %0 : i1 to i32
    %c0_i32_0 = arith.constant 0 : i32
    %2 = arith.cmpi ne, %1, %c0_i32_0 : i32
    scf.if %2 {
      %cst_10 = arith.constant 0.000000e+00 : f32
      %12 = vector.broadcast %cst_10 : f32 to vector<16x128xf32>
      %c0_11 = arith.constant 0 : index
      %c0_12 = arith.constant 0 : index
      %13 = vector.load %arg7[%c0_11, %c0_12] : memref<16x128xf32, #tpu.memory_space<vmem>>, vector<16x128xf32>
      tpu.vector_store %arg7[%c0_11, %c0_12], %12 {strides = array<i32>} : memref<16x128xf32, #tpu.memory_space<vmem>>, vector<16x128xf32>,
    } else {
    }
    %c0 = arith.constant 0 : index
    %c0_1 = arith.constant 0 : index
    %3 = vector.load %arg7[%c0, %c0_1] : memref<16x128xf32, #tpu.memory_space<vmem>>, vector<16x128xf32>
    %c0_2 = arith.constant 0 : index
    %c0_3 = arith.constant 0 : index
    %4 = vector.load %arg3[%c0_2, %c0_3] : memref<16x32xbf16, #tpu.memory_space<vmem>>, vector<16x32xbf16>
    %c0_4 = arith.constant 0 : index
    %c0_5 = arith.constant 0 : index
    %5 = vector.load %arg4[%c0_4, %c0_5] : memref<32x128xbf16, #tpu.memory_space<vmem>>, vector<32x128xbf16>
    %cst = arith.constant dense<0.000000e+00> : vector<16x128xf32>
    %6 = tpu.matmul %4, %5, %cst {dimension_numbers = #tpu.dot_dimension_numbers<[1], [0], [0], [1], [0, 0, 1, 1], [], []>} : vector<16x32xbf16>, vector<32x128xbf16>, vector<16x128xf32> -> vector<16x128xf32>
    %7 = arith.addf %3, %6 : vector<16x128xf32>
    %c0_6 = arith.constant 0 : index
    %c0_7 = arith.constant 0 : index
    %8 = vector.load %arg7[%c0_6, %c0_7] : memref<16x128xf32, #tpu.memory_space<vmem>>, vector<16x128xf32>
    tpu.vector_store %arg7[%c0_6, %c0_7], %7 {strides = array<i32>} : memref<16x128xf32, #tpu.memory_space<vmem>>, vector<16x128xf32>,
    %c0_i32_8 = arith.constant 0 : i32
    %9 = arith.cmpi eq, %arg2, %c0_i32_8 : i32
    %10 = arith.extui %9 : i1 to i32
    %c0_i32_9 = arith.constant 0 : i32
    %11 = arith.cmpi ne, %10, %c0_i32_9 : i32
    scf.if %11 {
      %c0_10 = arith.constant 0 : index
      %c0_11 = arith.constant 0 : index
      %12 = vector.load %arg7[%c0_10, %c0_11] : memref<16x128xf32, #tpu.memory_space<vmem>>, vector<16x128xf32>
      %c0_12 = arith.constant 0 : index
      %c0_13 = arith.constant 0 : index
      %13 = vector.load %arg5[%c0_12, %c0_13] : memref<1x128xf32, #tpu.memory_space<vmem>>, vector<1x128xf32>
      %14 = vector.broadcast %13 : vector<1x128xf32> to vector<16x128xf32>
      %15 = arith.addf %12, %14 : vector<16x128xf32>
      %c0_14 = arith.constant 0 : index
      %c0_15 = arith.constant 0 : index
      %16 = vector.load %arg6[%c0_14, %c0_15] : memref<16x128xf32, #tpu.memory_space<vmem>>, vector<16x128xf32>
      tpu.vector_store %arg6[%c0_14, %c0_15], %15 {strides = array<i32>} : memref<16x128xf32, #tpu.memory_space<vmem>>, vector<16x128xf32>,
    } else {
    }
    return
  }
  func.func @transform_0(%arg0: i32, %arg1: i32, %arg2: i32) -> (i32, i32) {
    %c0_i32 = arith.constant 0 : i32
    return %arg0, %arg2 : i32, i32
  }
  func.func @transform_1(%arg0: i32, %arg1: i32, %arg2: i32) -> (i32, i32) {
    %c0_i32 = arith.constant 0 : i32
    return %arg2, %arg1 : i32, i32
  }
  func.func @transform_2(%arg0: i32, %arg1: i32, %arg2: i32) -> (i32, i32) {
    %c0_i32 = arith.constant 0 : i32
    %c0_i32_0 = arith.constant 0 : i32
    return %c0_i32, %arg1 : i32, i32
  }
  func.func @transform_3(%arg0: i32, %arg1: i32, %arg2: i32) -> (i32, i32) {
    %c0_i32 = arith.constant 0 : i32
    return %arg0, %arg1 : i32, i32
  }
}

module attributes {stable_mosaic.version = 11 : i64} {
  func.func @_linear_kernel(%arg0: i32, %arg1: i32, %arg2: i32, %arg3: memref<16x32xbf16, #tpu.memory_space<vmem>>, %arg4: memref<32x128xbf16, #tpu.memory_space<vmem>>, %arg5: memref<1x128xf32, #tpu.memory_space<vmem>>, %arg6: memref<16x128xf32, #tpu.memory_space<vmem>>, %arg7: memref<16x128xf32, #tpu.memory_space<vmem>>) attributes {dimension_semantics = [#tpu.dimension_semantics<parallel>, #tpu.dimension_semantics<parallel>, #tpu.dimension_semantics<arbitrary>], iteration_bounds = array<i64: 1, 1, 1>, scalar_prefetch = 0 : i64, scratch_operands = 1 : i64, tpu.core_type = #tpu.core_type<tc>, window_params = [{transform_indices = @transform_0, window_bounds = array<i64: 16, 32>}, {transform_indices = @transform_1, window_bounds = array<i64: 32, 128>}, {transform_indices = @transform_2, window_bounds = array<i64: 1, 128>}, {transform_indices = @transform_3, window_bounds = array<i64: 16, 128>}]} {
    %c0_i32 = arith.constant 0 : i32
    %0 = arith.cmpi eq, %arg2, %c0_i32 : i32
    %1 = arith.extui %0 : i1 to i32
    %c0_i32_0 = arith.constant 0 : i32
    %2 = arith.cmpi ne, %1, %c0_i32_0 : i32
    scf.if %2 {
      %cst_10 = arith.constant 0.000000e+00 : f32
      %12 = vector.broadcast %cst_10 : f32 to vector<16x128xf32>
      %c0_11 = arith.constant 0 : index
      %c0_12 = arith.constant 0 : index
      %13 = vector.load %arg7[%c0_11, %c0_12] : memref<16x128xf32, #tpu.memory_space<vmem>>, vector<16x128xf32>
      tpu.vector_store %arg7[%c0_11, %c0_12], %12 {strides = array<i32>} : memref<16x128xf32, #tpu.memory_space<vmem>>, vector<16x128xf32>,
    } else {
    }
    %c0 = arith.constant 0 : index
    %c0_1 = arith.constant 0 : index
    %3 = vector.load %arg7[%c0, %c0_1] : memref<16x128xf32, #tpu.memory_space<vmem>>, vector<16x128xf32>
    %c0_2 = arith.constant 0 : index
    %c0_3 = arith.constant 0 : index
    %4 = vector.load %arg3[%c0_2, %c0_3] : memref<16x32xbf16, #tpu.memory_space<vmem>>, vector<16x32xbf16>
    %c0_4 = arith.constant 0 : index
    %c0_5 = arith.constant 0 : index
    %5 = vector.load %arg4[%c0_4, %c0_5] : memref<32x128xbf16, #tpu.memory_space<vmem>>, vector<32x128xbf16>
    %cst = arith.constant dense<0.000000e+00> : vector<16x128xf32>
    %6 = tpu.matmul %4, %5, %cst {dimension_numbers = #tpu.dot_dimension_numbers<[1], [0], [0], [1], [0, 0, 1, 1], [], []>} : vector<16x32xbf16>, vector<32x128xbf16>, vector<16x128xf32> -> vector<16x128xf32>
    %7 = arith.addf %3, %6 : vector<16x128xf32>
    %c0_6 = arith.constant 0 : index
    %c0_7 = arith.constant 0 : index
    %8 = vector.load %arg7[%c0_6, %c0_7] : memref<16x128xf32, #tpu.memory_space<vmem>>, vector<16x128xf32>
    tpu.vector_store %arg7[%c0_6, %c0_7], %7 {strides = array<i32>} : memref<16x128xf32, #tpu.memory_space<vmem>>, vector<16x128xf32>,
    %c0_i32_8 = arith.constant 0 : i32
    %9 = arith.cmpi eq, %arg2, %c0_i32_8 : i32
    %10 = arith.extui %9 : i1 to i32
    %c0_i32_9 = arith.constant 0 : i32
    %11 = arith.cmpi ne, %10, %c0_i32_9 : i32
    scf.if %11 {
      %c0_10 = arith.constant 0 : index
      %c0_11 = arith.constant 0 : index
      %12 = vector.load %arg7[%c0_10, %c0_11] : memref<16x128xf32, #tpu.memory_space<vmem>>, vector<16x128xf32>
      %c0_12 = arith.constant 0 : index
      %c0_13 = arith.constant 0 : index
      %13 = vector.load %arg5[%c0_12, %c0_13] : memref<1x128xf32, #tpu.memory_space<vmem>>, vector<1x128xf32>
      %14 = vector.broadcast %13 : vector<1x128xf32> to vector<16x128xf32>
      %15 = arith.addf %12, %14 : vector<16x128xf32>
      %c0_14 = arith.constant 0 : index
      %c0_15 = arith.constant 0 : index
      %16 = vector.load %arg6[%c0_14, %c0_15] : memref<16x128xf32, #tpu.memory_space<vmem>>, vector<16x128xf32>
      tpu.vector_store %arg6[%c0_14, %c0_15], %15 {strides = array<i32>} : memref<16x128xf32, #tpu.memory_space<vmem>>, vector<16x128xf32>,
    } else {
    }
    return
  }
  func.func @transform_0(%arg0: i32, %arg1: i32, %arg2: i32) -> (i32, i32) {
    %c0_i32 = arith.constant 0 : i32
    return %arg0, %arg2 : i32, i32
  }
  func.func @transform_1(%arg0: i32, %arg1: i32, %arg2: i32) -> (i32, i32) {
    %c0_i32 = arith.constant 0 : i32
    return %arg2, %arg1 : i32, i32
  }
  func.func @transform_2(%arg0: i32, %arg1: i32, %arg2: i32) -> (i32, i32) {
    %c0_i32 = arith.constant 0 : i32
    %c0_i32_0 = arith.constant 0 : i32
    return %c0_i32, %arg1 : i32, i32
  }
  func.func @transform_3(%arg0: i32, %arg1: i32, %arg2: i32) -> (i32, i32) {
    %c0_i32 = arith.constant 0 : i32
    return %arg0, %arg1 : i32, i32
  }
}

module attributes {stable_mosaic.version = 11 : i64} {
  func.func @_linear_kernel(%arg0: i32, %arg1: i32, %arg2: i32, %arg3: memref<16x64xbf16, #tpu.memory_space<vmem>>, %arg4: memref<64x128xbf16, #tpu.memory_space<vmem>>, %arg5: memref<1x128xf32, #tpu.memory_space<vmem>>, %arg6: memref<16x128xf32, #tpu.memory_space<vmem>>, %arg7: memref<16x128xf32, #tpu.memory_space<vmem>>) attributes {dimension_semantics = [#tpu.dimension_semantics<parallel>, #tpu.dimension_semantics<parallel>, #tpu.dimension_semantics<arbitrary>], iteration_bounds = array<i64: 1, 1, 1>, scalar_prefetch = 0 : i64, scratch_operands = 1 : i64, tpu.core_type = #tpu.core_type<tc>, window_params = [{transform_indices = @transform_0, window_bounds = array<i64: 16, 64>}, {transform_indices = @transform_1, window_bounds = array<i64: 64, 128>}, {transform_indices = @transform_2, window_bounds = array<i64: 1, 128>}, {transform_indices = @transform_3, window_bounds = array<i64: 16, 128>}]} {
    %c0_i32 = arith.constant 0 : i32
    %0 = arith.cmpi eq, %arg2, %c0_i32 : i32
    %1 = arith.extui %0 : i1 to i32
    %c0_i32_0 = arith.constant 0 : i32
    %2 = arith.cmpi ne, %1, %c0_i32_0 : i32
    scf.if %2 {
      %cst_10 = arith.constant 0.000000e+00 : f32
      %12 = vector.broadcast %cst_10 : f32 to vector<16x128xf32>
      %c0_11 = arith.constant 0 : index
      %c0_12 = arith.constant 0 : index
      %13 = vector.load %arg7[%c0_11, %c0_12] : memref<16x128xf32, #tpu.memory_space<vmem>>, vector<16x128xf32>
      tpu.vector_store %arg7[%c0_11, %c0_12], %12 {strides = array<i32>} : memref<16x128xf32, #tpu.memory_space<vmem>>, vector<16x128xf32>,
    } else {
    }
    %c0 = arith.constant 0 : index
    %c0_1 = arith.constant 0 : index
    %3 = vector.load %arg7[%c0, %c0_1] : memref<16x128xf32, #tpu.memory_space<vmem>>, vector<16x128xf32>
    %c0_2 = arith.constant 0 : index
    %c0_3 = arith.constant 0 : index
    %4 = vector.load %arg3[%c0_2, %c0_3] : memref<16x64xbf16, #tpu.memory_space<vmem>>, vector<16x64xbf16>
    %c0_4 = arith.constant 0 : index
    %c0_5 = arith.constant 0 : index
    %5 = vector.load %arg4[%c0_4, %c0_5] : memref<64x128xbf16, #tpu.memory_space<vmem>>, vector<64x128xbf16>
    %cst = arith.constant dense<0.000000e+00> : vector<16x128xf32>
    %6 = tpu.matmul %4, %5, %cst {dimension_numbers = #tpu.dot_dimension_numbers<[1], [0], [0], [1], [0, 0, 1, 1], [], []>} : vector<16x64xbf16>, vector<64x128xbf16>, vector<16x128xf32> -> vector<16x128xf32>
    %7 = arith.addf %3, %6 : vector<16x128xf32>
    %c0_6 = arith.constant 0 : index
    %c0_7 = arith.constant 0 : index
    %8 = vector.load %arg7[%c0_6, %c0_7] : memref<16x128xf32, #tpu.memory_space<vmem>>, vector<16x128xf32>
    tpu.vector_store %arg7[%c0_6, %c0_7], %7 {strides = array<i32>} : memref<16x128xf32, #tpu.memory_space<vmem>>, vector<16x128xf32>,
    %c0_i32_8 = arith.constant 0 : i32
    %9 = arith.cmpi eq, %arg2, %c0_i32_8 : i32
    %10 = arith.extui %9 : i1 to i32
    %c0_i32_9 = arith.constant 0 : i32
    %11 = arith.cmpi ne, %10, %c0_i32_9 : i32
    scf.if %11 {
      %c0_10 = arith.constant 0 : index
      %c0_11 = arith.constant 0 : index
      %12 = vector.load %arg7[%c0_10, %c0_11] : memref<16x128xf32, #tpu.memory_space<vmem>>, vector<16x128xf32>
      %c0_12 = arith.constant 0 : index
      %c0_13 = arith.constant 0 : index
      %13 = vector.load %arg5[%c0_12, %c0_13] : memref<1x128xf32, #tpu.memory_space<vmem>>, vector<1x128xf32>
      %14 = vector.broadcast %13 : vector<1x128xf32> to vector<16x128xf32>
      %15 = arith.addf %12, %14 : vector<16x128xf32>
      %c0_14 = arith.constant 0 : index
      %c0_15 = arith.constant 0 : index
      %16 = vector.load %arg6[%c0_14, %c0_15] : memref<16x128xf32, #tpu.memory_space<vmem>>, vector<16x128xf32>
      tpu.vector_store %arg6[%c0_14, %c0_15], %15 {strides = array<i32>} : memref<16x128xf32, #tpu.memory_space<vmem>>, vector<16x128xf32>,
    } else {
    }
    return
  }
  func.func @transform_0(%arg0: i32, %arg1: i32, %arg2: i32) -> (i32, i32) {
    %c0_i32 = arith.constant 0 : i32
    return %arg0, %arg2 : i32, i32
  }
  func.func @transform_1(%arg0: i32, %arg1: i32, %arg2: i32) -> (i32, i32) {
    %c0_i32 = arith.constant 0 : i32
    return %arg2, %arg1 : i32, i32
  }
  func.func @transform_2(%arg0: i32, %arg1: i32, %arg2: i32) -> (i32, i32) {
    %c0_i32 = arith.constant 0 : i32
    %c0_i32_0 = arith.constant 0 : i32
    return %c0_i32, %arg1 : i32, i32
  }
  func.func @transform_3(%arg0: i32, %arg1: i32, %arg2: i32) -> (i32, i32) {
    %c0_i32 = arith.constant 0 : i32
    return %arg0, %arg1 : i32, i32
  }
}

module attributes {stable_mosaic.version = 11 : i64} {
  func.func @_ln_kernel(%arg0: i32, %arg1: memref<8x32xf32, #tpu.memory_space<vmem>>, %arg2: memref<1x32xf32, #tpu.memory_space<vmem>>, %arg3: memref<1x32xf32, #tpu.memory_space<vmem>>, %arg4: memref<8x32xf32, #tpu.memory_space<vmem>>) attributes {dimension_semantics = [#tpu.dimension_semantics<parallel>], iteration_bounds = array<i64: 1>, scalar_prefetch = 0 : i64, scratch_operands = 0 : i64, tpu.core_type = #tpu.core_type<tc>, window_params = [{transform_indices = @transform_0, window_bounds = array<i64: 8, 32>}, {pipeline_mode = #tpu.pipeline_mode<synchronous>, transform_indices = @transform_1, window_bounds = array<i64: 1, 32>}, {pipeline_mode = #tpu.pipeline_mode<synchronous>, transform_indices = @transform_2, window_bounds = array<i64: 1, 32>}, {transform_indices = @transform_3, window_bounds = array<i64: 8, 32>}]} {
    %c0 = arith.constant 0 : index
    %c0_0 = arith.constant 0 : index
    %0 = vector.load %arg1[%c0, %c0_0] : memref<8x32xf32, #tpu.memory_space<vmem>>, vector<8x32xf32>
    %cst = arith.constant dense<0.000000e+00> : vector<8xf32>
    %1 = vector.multi_reduction <add>, %0, %cst [1] : vector<8x32xf32> to vector<8xf32>
    %2 = vector.shape_cast %1 : vector<8xf32> to vector<8x1xf32>
    %cst_1 = arith.constant 3.200000e+01 : f32
    %3 = vector.broadcast %cst_1 : f32 to vector<8x1xf32>
    %4 = arith.divf %2, %3 : vector<8x1xf32>
    %5 = vector.broadcast %4 : vector<8x1xf32> to vector<8x32xf32>
    %6 = arith.subf %0, %5 : vector<8x32xf32>
    %7 = arith.mulf %6, %6 : vector<8x32xf32>
    %cst_2 = arith.constant dense<0.000000e+00> : vector<8xf32>
    %8 = vector.multi_reduction <add>, %7, %cst_2 [1] : vector<8x32xf32> to vector<8xf32>
    %9 = vector.shape_cast %8 : vector<8xf32> to vector<8x1xf32>
    %cst_3 = arith.constant 3.200000e+01 : f32
    %10 = vector.broadcast %cst_3 : f32 to vector<8x1xf32>
    %11 = arith.divf %9, %10 : vector<8x1xf32>
    %12 = vector.broadcast %4 : vector<8x1xf32> to vector<8x32xf32>
    %13 = arith.subf %0, %12 : vector<8x32xf32>
    %cst_4 = arith.constant 9.99999997E-7 : f32
    %14 = vector.broadcast %cst_4 : f32 to vector<8x1xf32>
    %15 = arith.addf %11, %14 : vector<8x1xf32>
    %16 = math.rsqrt %15 : vector<8x1xf32>
    %17 = vector.broadcast %16 : vector<8x1xf32> to vector<8x32xf32>
    %18 = arith.mulf %13, %17 : vector<8x32xf32>
    %c0_5 = arith.constant 0 : index
    %c0_6 = arith.constant 0 : index
    %19 = vector.load %arg2[%c0_5, %c0_6] : memref<1x32xf32, #tpu.memory_space<vmem>>, vector<1x32xf32>
    %20 = vector.broadcast %19 : vector<1x32xf32> to vector<8x32xf32>
    %21 = arith.mulf %18, %20 : vector<8x32xf32>
    %c0_7 = arith.constant 0 : index
    %c0_8 = arith.constant 0 : index
    %22 = vector.load %arg3[%c0_7, %c0_8] : memref<1x32xf32, #tpu.memory_space<vmem>>, vector<1x32xf32>
    %23 = vector.broadcast %22 : vector<1x32xf32> to vector<8x32xf32>
    %24 = arith.addf %21, %23 : vector<8x32xf32>
    %c0_9 = arith.constant 0 : index
    %c0_10 = arith.constant 0 : index
    %25 = vector.load %arg4[%c0_9, %c0_10] : memref<8x32xf32, #tpu.memory_space<vmem>>, vector<8x32xf32>
    tpu.vector_store %arg4[%c0_9, %c0_10], %24 {strides = array<i32>} : memref<8x32xf32, #tpu.memory_space<vmem>>, vector<8x32xf32>,
    return
  }
  func.func @transform_0(%arg0: i32) -> (i32, i32) {
    %c0_i32 = arith.constant 0 : i32
    %c0_i32_0 = arith.constant 0 : i32
    return %arg0, %c0_i32 : i32, i32
  }
  func.func @transform_1(%arg0: i32) -> (i32, i32) {
    %c0_i32 = arith.constant 0 : i32
    %c0_i32_0 = arith.constant 0 : i32
    %c0_i32_1 = arith.constant 0 : i32
    return %c0_i32, %c0_i32_0 : i32, i32
  }
  func.func @transform_2(%arg0: i32) -> (i32, i32) {
    %c0_i32 = arith.constant 0 : i32
    %c0_i32_0 = arith.constant 0 : i32
    %c0_i32_1 = arith.constant 0 : i32
    return %c0_i32, %c0_i32_0 : i32, i32
  }
  func.func @transform_3(%arg0: i32) -> (i32, i32) {
    %c0_i32 = arith.constant 0 : i32
    %c0_i32_0 = arith.constant 0 : i32
    return %arg0, %c0_i32 : i32, i32
  }
}

module attributes {stable_mosaic.version = 11 : i64} {
  func.func @_linear_kernel(%arg0: i32, %arg1: i32, %arg2: i32, %arg3: memref<16x32xbf16, #tpu.memory_space<vmem>>, %arg4: memref<32x128xbf16, #tpu.memory_space<vmem>>, %arg5: memref<1x128xf32, #tpu.memory_space<vmem>>, %arg6: memref<16x128xf32, #tpu.memory_space<vmem>>, %arg7: memref<16x128xf32, #tpu.memory_space<vmem>>) attributes {dimension_semantics = [#tpu.dimension_semantics<parallel>, #tpu.dimension_semantics<parallel>, #tpu.dimension_semantics<arbitrary>], iteration_bounds = array<i64: 1, 1, 1>, scalar_prefetch = 0 : i64, scratch_operands = 1 : i64, tpu.core_type = #tpu.core_type<tc>, window_params = [{transform_indices = @transform_0, window_bounds = array<i64: 16, 32>}, {transform_indices = @transform_1, window_bounds = array<i64: 32, 128>}, {transform_indices = @transform_2, window_bounds = array<i64: 1, 128>}, {transform_indices = @transform_3, window_bounds = array<i64: 16, 128>}]} {
    %c0_i32 = arith.constant 0 : i32
    %0 = arith.cmpi eq, %arg2, %c0_i32 : i32
    %1 = arith.extui %0 : i1 to i32
    %c0_i32_0 = arith.constant 0 : i32
    %2 = arith.cmpi ne, %1, %c0_i32_0 : i32
    scf.if %2 {
      %cst_10 = arith.constant 0.000000e+00 : f32
      %12 = vector.broadcast %cst_10 : f32 to vector<16x128xf32>
      %c0_11 = arith.constant 0 : index
      %c0_12 = arith.constant 0 : index
      %13 = vector.load %arg7[%c0_11, %c0_12] : memref<16x128xf32, #tpu.memory_space<vmem>>, vector<16x128xf32>
      tpu.vector_store %arg7[%c0_11, %c0_12], %12 {strides = array<i32>} : memref<16x128xf32, #tpu.memory_space<vmem>>, vector<16x128xf32>,
    } else {
    }
    %c0 = arith.constant 0 : index
    %c0_1 = arith.constant 0 : index
    %3 = vector.load %arg7[%c0, %c0_1] : memref<16x128xf32, #tpu.memory_space<vmem>>, vector<16x128xf32>
    %c0_2 = arith.constant 0 : index
    %c0_3 = arith.constant 0 : index
    %4 = vector.load %arg3[%c0_2, %c0_3] : memref<16x32xbf16, #tpu.memory_space<vmem>>, vector<16x32xbf16>
    %c0_4 = arith.constant 0 : index
    %c0_5 = arith.constant 0 : index
    %5 = vector.load %arg4[%c0_4, %c0_5] : memref<32x128xbf16, #tpu.memory_space<vmem>>, vector<32x128xbf16>
    %cst = arith.constant dense<0.000000e+00> : vector<16x128xf32>
    %6 = tpu.matmul %4, %5, %cst {dimension_numbers = #tpu.dot_dimension_numbers<[1], [0], [0], [1], [0, 0, 1, 1], [], []>} : vector<16x32xbf16>, vector<32x128xbf16>, vector<16x128xf32> -> vector<16x128xf32>
    %7 = arith.addf %3, %6 : vector<16x128xf32>
    %c0_6 = arith.constant 0 : index
    %c0_7 = arith.constant 0 : index
    %8 = vector.load %arg7[%c0_6, %c0_7] : memref<16x128xf32, #tpu.memory_space<vmem>>, vector<16x128xf32>
    tpu.vector_store %arg7[%c0_6, %c0_7], %7 {strides = array<i32>} : memref<16x128xf32, #tpu.memory_space<vmem>>, vector<16x128xf32>,
    %c0_i32_8 = arith.constant 0 : i32
    %9 = arith.cmpi eq, %arg2, %c0_i32_8 : i32
    %10 = arith.extui %9 : i1 to i32
    %c0_i32_9 = arith.constant 0 : i32
    %11 = arith.cmpi ne, %10, %c0_i32_9 : i32
    scf.if %11 {
      %c0_10 = arith.constant 0 : index
      %c0_11 = arith.constant 0 : index
      %12 = vector.load %arg7[%c0_10, %c0_11] : memref<16x128xf32, #tpu.memory_space<vmem>>, vector<16x128xf32>
      %c0_12 = arith.constant 0 : index
      %c0_13 = arith.constant 0 : index
      %13 = vector.load %arg5[%c0_12, %c0_13] : memref<1x128xf32, #tpu.memory_space<vmem>>, vector<1x128xf32>
      %14 = vector.broadcast %13 : vector<1x128xf32> to vector<16x128xf32>
      %15 = arith.addf %12, %14 : vector<16x128xf32>
      %c0_14 = arith.constant 0 : index
      %c0_15 = arith.constant 0 : index
      %16 = vector.load %arg6[%c0_14, %c0_15] : memref<16x128xf32, #tpu.memory_space<vmem>>, vector<16x128xf32>
      tpu.vector_store %arg6[%c0_14, %c0_15], %15 {strides = array<i32>} : memref<16x128xf32, #tpu.memory_space<vmem>>, vector<16x128xf32>,
    } else {
    }
    return
  }
  func.func @transform_0(%arg0: i32, %arg1: i32, %arg2: i32) -> (i32, i32) {
    %c0_i32 = arith.constant 0 : i32
    return %arg0, %arg2 : i32, i32
  }
  func.func @transform_1(%arg0: i32, %arg1: i32, %arg2: i32) -> (i32, i32) {
    %c0_i32 = arith.constant 0 : i32
    return %arg2, %arg1 : i32, i32
  }
  func.func @transform_2(%arg0: i32, %arg1: i32, %arg2: i32) -> (i32, i32) {
    %c0_i32 = arith.constant 0 : i32
    %c0_i32_0 = arith.constant 0 : i32
    return %c0_i32, %arg1 : i32, i32
  }
  func.func @transform_3(%arg0: i32, %arg1: i32, %arg2: i32) -> (i32, i32) {
    %c0_i32 = arith.constant 0 : i32
    return %arg0, %arg1 : i32, i32
  }
}

module attributes {stable_mosaic.version = 11 : i64} {
  func.func @_lca_combine_kernel(%arg0: i32, %arg1: memref<2x1x32xf32, #tpu.memory_space<vmem>>, %arg2: memref<2x1x32xf32, #tpu.memory_space<vmem>>, %arg3: memref<2x1x32xf32, #tpu.memory_space<vmem>>, %arg4: memref<1x1xf32, #tpu.memory_space<vmem>>, %arg5: memref<2x1x32xf32, #tpu.memory_space<vmem>>) attributes {dimension_semantics = [#tpu.dimension_semantics<arbitrary>], iteration_bounds = array<i64: 1>, scalar_prefetch = 0 : i64, scratch_operands = 0 : i64, tpu.core_type = #tpu.core_type<tc>, window_params = [{pipeline_mode = #tpu.pipeline_mode<synchronous>, transform_indices = @transform_0, window_bounds = array<i64: 2, 1, 32>}, {pipeline_mode = #tpu.pipeline_mode<synchronous>, transform_indices = @transform_1, window_bounds = array<i64: 2, 1, 32>}, {pipeline_mode = #tpu.pipeline_mode<synchronous>, transform_indices = @transform_2, window_bounds = array<i64: 2, 1, 32>}, {pipeline_mode = #tpu.pipeline_mode<synchronous>, transform_indices = @transform_3, window_bounds = array<i64: 1, 1>}, {pipeline_mode = #tpu.pipeline_mode<synchronous>, transform_indices = @transform_4, window_bounds = array<i64: 2, 1, 32>}]} {
    %c0 = arith.constant 0 : index
    %c0_0 = arith.constant 0 : index
    %c0_1 = arith.constant 0 : index
    %0 = vector.load %arg1[%c0, %c0_0, %c0_1] : memref<2x1x32xf32, #tpu.memory_space<vmem>>, vector<2x1x32xf32>
    %c0_2 = arith.constant 0 : index
    %c0_3 = arith.constant 0 : index
    %c0_4 = arith.constant 0 : index
    %1 = vector.load %arg2[%c0_2, %c0_3, %c0_4] : memref<2x1x32xf32, #tpu.memory_space<vmem>>, vector<2x1x32xf32>
    %c0_5 = arith.constant 0 : index
    %c0_6 = arith.constant 0 : index
    %c0_7 = arith.constant 0 : index
    %2 = vector.load %arg3[%c0_5, %c0_6, %c0_7] : memref<2x1x32xf32, #tpu.memory_space<vmem>>, vector<2x1x32xf32>
    %c0_8 = arith.constant 0 : index
    %c0_9 = arith.constant 0 : index
    %3 = vector.load %arg4[%c0_8, %c0_9] : memref<1x1xf32, #tpu.memory_space<vmem>>, vector<1x1xf32>
    %4 = vector.shape_cast %3 : vector<1x1xf32> to vector<1xf32>
    %5 = vector.shape_cast %4 : vector<1xf32> to vector<1x1x1xf32>
    %6 = vector.broadcast %5 : vector<1x1x1xf32> to vector<2x1x32xf32>
    %7 = arith.addf %1, %6 : vector<2x1x32xf32>
    %cst = arith.constant dense<0xFF800000> : vector<2x32xf32>
    %8 = vector.multi_reduction <maximumf>, %7, %cst [1] : vector<2x1x32xf32> to vector<2x32xf32>
    %9 = vector.shape_cast %8 : vector<2x32xf32> to vector<2x1x32xf32>
    %10 = arith.subf %7, %9 : vector<2x1x32xf32>
    %11 = math.exp %10 : vector<2x1x32xf32>
    %12 = arith.mulf %11, %2 : vector<2x1x32xf32>
    %cst_10 = arith.constant dense<0.000000e+00> : vector<2x32xf32>
    %13 = vector.multi_reduction <add>, %12, %cst_10 [1] : vector<2x1x32xf32> to vector<2x32xf32>
    %cst_11 = arith.constant dense<0.000000e+00> : vector<2x32xf32>
    %14 = vector.multi_reduction <add>, %11, %cst_11 [1] : vector<2x1x32xf32> to vector<2x32xf32>
    %15 = vector.shape_cast %0 : vector<2x1x32xf32> to vector<2x32xf32>
    %16 = arith.negf %15 : vector<2x32xf32>
    %17 = math.exp %16 : vector<2x32xf32>
    %cst_12 = arith.constant 1.000000e+00 : f32
    %18 = vector.broadcast %cst_12 : f32 to vector<2x32xf32>
    %19 = arith.addf %18, %17 : vector<2x32xf32>
    %20 = arith.divf %18, %19 : vector<2x32xf32>
    %21 = arith.divf %13, %14 : vector<2x32xf32>
    %22 = arith.mulf %20, %21 : vector<2x32xf32>
    %23 = vector.shape_cast %22 : vector<2x32xf32> to vector<2x1x32xf32>
    %c0_13 = arith.constant 0 : index
    %c0_14 = arith.constant 0 : index
    %c0_15 = arith.constant 0 : index
    %24 = vector.load %arg5[%c0_13, %c0_14, %c0_15] : memref<2x1x32xf32, #tpu.memory_space<vmem>>, vector<2x1x32xf32>
    tpu.vector_store %arg5[%c0_13, %c0_14, %c0_15], %23 {strides = array<i32>} : memref<2x1x32xf32, #tpu.memory_space<vmem>>, vector<2x1x32xf32>,
    return
  }
  func.func @transform_0(%arg0: i32) -> (i32, i32, i32) {
    %c0_i32 = arith.constant 0 : i32
    %c0_i32_0 = arith.constant 0 : i32
    %c0_i32_1 = arith.constant 0 : i32
    %c0_i32_2 = arith.constant 0 : i32
    return %c0_i32, %c0_i32_0, %c0_i32_1 : i32, i32, i32
  }
  func.func @transform_1(%arg0: i32) -> (i32, i32, i32) {
    %c0_i32 = arith.constant 0 : i32
    %c0_i32_0 = arith.constant 0 : i32
    %c0_i32_1 = arith.constant 0 : i32
    %c0_i32_2 = arith.constant 0 : i32
    return %c0_i32, %c0_i32_0, %c0_i32_1 : i32, i32, i32
  }
  func.func @transform_2(%arg0: i32) -> (i32, i32, i32) {
    %c0_i32 = arith.constant 0 : i32
    %c0_i32_0 = arith.constant 0 : i32
    %c0_i32_1 = arith.constant 0 : i32
    %c0_i32_2 = arith.constant 0 : i32
    return %c0_i32, %c0_i32_0, %c0_i32_1 : i32, i32, i32
  }
  func.func @transform_3(%arg0: i32) -> (i32, i32) {
    %c0_i32 = arith.constant 0 : i32
    %c0_i32_0 = arith.constant 0 : i32
    %c0_i32_1 = arith.constant 0 : i32
    return %c0_i32, %c0_i32_0 : i32, i32
  }
  func.func @transform_4(%arg0: i32) -> (i32, i32, i32) {
    %c0_i32 = arith.constant 0 : i32
    %c0_i32_0 = arith.constant 0 : i32
    %c0_i32_1 = arith.constant 0 : i32
    %c0_i32_2 = arith.constant 0 : i32
    return %c0_i32, %c0_i32_0, %c0_i32_1 : i32, i32, i32
  }
}

module attributes {stable_mosaic.version = 11 : i64} {
  func.func @_linear_kernel(%arg0: i32, %arg1: i32, %arg2: i32, %arg3: memref<16x32xbf16, #tpu.memory_space<vmem>>, %arg4: memref<32x128xbf16, #tpu.memory_space<vmem>>, %arg5: memref<1x128xf32, #tpu.memory_space<vmem>>, %arg6: memref<16x128xf32, #tpu.memory_space<vmem>>, %arg7: memref<16x128xf32, #tpu.memory_space<vmem>>) attributes {dimension_semantics = [#tpu.dimension_semantics<parallel>, #tpu.dimension_semantics<parallel>, #tpu.dimension_semantics<arbitrary>], iteration_bounds = array<i64: 1, 1, 1>, scalar_prefetch = 0 : i64, scratch_operands = 1 : i64, tpu.core_type = #tpu.core_type<tc>, window_params = [{transform_indices = @transform_0, window_bounds = array<i64: 16, 32>}, {transform_indices = @transform_1, window_bounds = array<i64: 32, 128>}, {transform_indices = @transform_2, window_bounds = array<i64: 1, 128>}, {transform_indices = @transform_3, window_bounds = array<i64: 16, 128>}]} {
    %c0_i32 = arith.constant 0 : i32
    %0 = arith.cmpi eq, %arg2, %c0_i32 : i32
    %1 = arith.extui %0 : i1 to i32
    %c0_i32_0 = arith.constant 0 : i32
    %2 = arith.cmpi ne, %1, %c0_i32_0 : i32
    scf.if %2 {
      %cst_10 = arith.constant 0.000000e+00 : f32
      %12 = vector.broadcast %cst_10 : f32 to vector<16x128xf32>
      %c0_11 = arith.constant 0 : index
      %c0_12 = arith.constant 0 : index
      %13 = vector.load %arg7[%c0_11, %c0_12] : memref<16x128xf32, #tpu.memory_space<vmem>>, vector<16x128xf32>
      tpu.vector_store %arg7[%c0_11, %c0_12], %12 {strides = array<i32>} : memref<16x128xf32, #tpu.memory_space<vmem>>, vector<16x128xf32>,
    } else {
    }
    %c0 = arith.constant 0 : index
    %c0_1 = arith.constant 0 : index
    %3 = vector.load %arg7[%c0, %c0_1] : memref<16x128xf32, #tpu.memory_space<vmem>>, vector<16x128xf32>
    %c0_2 = arith.constant 0 : index
    %c0_3 = arith.constant 0 : index
    %4 = vector.load %arg3[%c0_2, %c0_3] : memref<16x32xbf16, #tpu.memory_space<vmem>>, vector<16x32xbf16>
    %c0_4 = arith.constant 0 : index
    %c0_5 = arith.constant 0 : index
    %5 = vector.load %arg4[%c0_4, %c0_5] : memref<32x128xbf16, #tpu.memory_space<vmem>>, vector<32x128xbf16>
    %cst = arith.constant dense<0.000000e+00> : vector<16x128xf32>
    %6 = tpu.matmul %4, %5, %cst {dimension_numbers = #tpu.dot_dimension_numbers<[1], [0], [0], [1], [0, 0, 1, 1], [], []>} : vector<16x32xbf16>, vector<32x128xbf16>, vector<16x128xf32> -> vector<16x128xf32>
    %7 = arith.addf %3, %6 : vector<16x128xf32>
    %c0_6 = arith.constant 0 : index
    %c0_7 = arith.constant 0 : index
    %8 = vector.load %arg7[%c0_6, %c0_7] : memref<16x128xf32, #tpu.memory_space<vmem>>, vector<16x128xf32>
    tpu.vector_store %arg7[%c0_6, %c0_7], %7 {strides = array<i32>} : memref<16x128xf32, #tpu.memory_space<vmem>>, vector<16x128xf32>,
    %c0_i32_8 = arith.constant 0 : i32
    %9 = arith.cmpi eq, %arg2, %c0_i32_8 : i32
    %10 = arith.extui %9 : i1 to i32
    %c0_i32_9 = arith.constant 0 : i32
    %11 = arith.cmpi ne, %10, %c0_i32_9 : i32
    scf.if %11 {
      %c0_10 = arith.constant 0 : index
      %c0_11 = arith.constant 0 : index
      %12 = vector.load %arg7[%c0_10, %c0_11] : memref<16x128xf32, #tpu.memory_space<vmem>>, vector<16x128xf32>
      %c0_12 = arith.constant 0 : index
      %c0_13 = arith.constant 0 : index
      %13 = vector.load %arg5[%c0_12, %c0_13] : memref<1x128xf32, #tpu.memory_space<vmem>>, vector<1x128xf32>
      %14 = vector.broadcast %13 : vector<1x128xf32> to vector<16x128xf32>
      %15 = arith.addf %12, %14 : vector<16x128xf32>
      %c0_14 = arith.constant 0 : index
      %c0_15 = arith.constant 0 : index
      %16 = vector.load %arg6[%c0_14, %c0_15] : memref<16x128xf32, #tpu.memory_space<vmem>>, vector<16x128xf32>
      tpu.vector_store %arg6[%c0_14, %c0_15], %15 {strides = array<i32>} : memref<16x128xf32, #tpu.memory_space<vmem>>, vector<16x128xf32>,
    } else {
    }
    return
  }
  func.func @transform_0(%arg0: i32, %arg1: i32, %arg2: i32) -> (i32, i32) {
    %c0_i32 = arith.constant 0 : i32
    return %arg0, %arg2 : i32, i32
  }
  func.func @transform_1(%arg0: i32, %arg1: i32, %arg2: i32) -> (i32, i32) {
    %c0_i32 = arith.constant 0 : i32
    return %arg2, %arg1 : i32, i32
  }
  func.func @transform_2(%arg0: i32, %arg1: i32, %arg2: i32) -> (i32, i32) {
    %c0_i32 = arith.constant 0 : i32
    %c0_i32_0 = arith.constant 0 : i32
    return %c0_i32, %arg1 : i32, i32
  }
  func.func @transform_3(%arg0: i32, %arg1: i32, %arg2: i32) -> (i32, i32) {
    %c0_i32 = arith.constant 0 : i32
    return %arg0, %arg1 : i32, i32
  }
}

</mosaic_0001>

<bundles_post_ra>
// kernel: pooling_transformer_forward.24
= control target key start
LH: loop header
LB: loop body
LE: loop exit
PB: predicated region body
PF: predicated region fallthrough
CT: control target
= control target key end

     0   :  { %vm19_vm0 = vcmask 130048   ;;  %vm131_vm1 = vcmask 125952   ;;  %s234_s0 = inlined_call_operand.vmem [shape: f32[40,16], index: 0, kind: input, shape index: {}]   ;;  %s235_s1 = inlined_call_operand.vmem [shape: f32[1,16], index: 1, kind: input, shape index: {}]   ;;  %s236_s2 = inlined_call_operand.vmem [shape: f32[1,16], index: 2, kind: input, shape index: {}]   ;;  %s237_s3 = inlined_call_operand.vmem [shape: bf16[40,16], index: 3, kind: output, shape index: {}]  }
   0x1   :  { %v14_v0 = vld [vmem:[%s234_s0] sm:$0xff]  ;;  %v16_v1 = vld [vmem:[%s234_s0 + $0x10] sm:$0xff]  ;;  %v15_v2 = vld [vmem:[%s234_s0 + $0x8] sm:$0xff] }
   0x2   :  { %v20_v3 = vsel %vm19_vm0, %v14_v0, 0.0  ;;  %v26_v4 = vsel %vm19_vm0, %v16_v1, 0.0  ;;  %v17_v5 = vld [vmem:[%s234_s0 + $0x18] sm:$0xff]  ;;  %v23_v6 = vsel %vm19_vm0, %v15_v2, 0.0  ;;  %v18_v8 = vld [vmem:[%s234_s0 + $0x20] sm:$0xff] }
   0x3   :  { %21 = vadd.xlane.f32.xlu0 %v20_v3  ;;  %27 = vadd.xlane.f32.xlu1 %v26_v4  ;;  %v29_v7 = vsel %vm19_vm0, %v17_v5, 0.0  ;;  %v32_v9 = vsel %vm19_vm0, %v18_v8, 0.0  ;;  %v141_v51 = vld [vmem:[%s235_s1] ss:$0 sm:$0xff] }
   0x4   :  { %v142_v53 = vld [vmem:[%s236_s2] ss:$0 sm:$0xff] }
   0x7   :  { %24 = vadd.xlane.f32.xlu0 %v23_v6  ;;  %30 = vadd.xlane.f32.xlu1 %v29_v7 }
   0xb   :  { %33 = vadd.xlane.f32.xlu0 %v32_v9 }
  0x90   :  { %v22_v10 = vpop.xlane.xlu0 %21  ;;  %v28_v11 = vpop.xlane.xlu1 %27 }
  0x91   :  { %v36_v12 = vmul.f32 0.0625, %v22_v10  ;;  %v38_v13 = vmul.f32 0.0625, %v28_v11 }
  0x93   :  { %v41_v14 = vsub.f32 %v14_v0, %v36_v12  ;;  %v43_v15 = vsub.f32 %v16_v1, %v38_v13 }
  0x94   :  { %v25_v16 = vpop.xlane.xlu0 %24  ;;  %v31_v17 = vpop.xlane.xlu1 %30 }
  0x95   :  { %v37_v18 = vmul.f32 0.0625, %v25_v16  ;;  %v39_v19 = vmul.f32 0.0625, %v31_v17  ;;  %v46_v20 = vmul.f32 %v41_v14, %v41_v14  ;;  %v48_v21 = vmul.f32 %v43_v15, %v43_v15 }
  0x97   :  { %v42_v22 = vsub.f32 %v15_v2, %v37_v18  ;;  %v44_v23 = vsub.f32 %v17_v5, %v39_v19  ;;  %v51_v24 = vsel %vm19_vm0, %v46_v20, 0.0  ;;  %v57_v27 = vsel %vm19_vm0, %v48_v21, 0.0 }
  0x98   :  { %52 = vadd.xlane.f32.xlu1 %v51_v24  ;;  %v34_v25 = vpop.xlane.xlu0 %33 }
  0x99   :  { %v40_v26 = vmul.f32 0.0625, %v34_v25  ;;  %v47_v28 = vmul.f32 %v42_v22, %v42_v22  ;;  %v49_v29 = vmul.f32 %v44_v23, %v44_v23 }
  0x9b   :  { %v45_v30 = vsub.f32 %v18_v8, %v40_v26  ;;  %v54_v31 = vsel %vm19_vm0, %v47_v28, 0.0  ;;  %v60_v32 = vsel %vm19_vm0, %v49_v29, 0.0 }
  0x9c   :  { %58 = vadd.xlane.f32.xlu1 %v57_v27  ;;  %55 = vadd.xlane.f32.xlu0 %v54_v31 }
  0x9d   :  { %v50_v33 = vmul.f32 %v45_v30, %v45_v30 }
  0x9f   :  { %v63_v34 = vsel %vm19_vm0, %v50_v33, 0.0 }
  0xa0   :  { %61 = vadd.xlane.f32.xlu0 %v60_v32  ;;  %64 = vadd.xlane.f32.xlu1 %v63_v34 }
 0x125   :  { %v53_v35 = vpop.xlane.xlu1 %52 }
 0x126   :  { %v66_v36 = vmul.f32 0.0625, %v53_v35 }
 0x128   :  { %v71_v37 = vadd.f32 1e-06, %v66_v36 }
 0x129   :  { %v59_v38 = vpop.xlane.xlu1 %58  ;;  %v56_v39 = vpop.xlane.xlu0 %55 }
 0x12a   :  { %153 = vrsqrt.f32 %v71_v37  ;;  %v68_v40 = vmul.f32 0.0625, %v59_v38  ;;  %v67_v41 = vmul.f32 0.0625, %v56_v39 }
 0x12c   :  { %v73_v42 = vadd.f32 1e-06, %v68_v40  ;;  %v72_v43 = vadd.f32 1e-06, %v67_v41 }
 0x12d   :  { %v65_v44 = vpop.xlane.xlu1 %64  ;;  %v62_v45 = vpop.xlane.xlu0 %61 }
 0x12e   :  { %155 = vrsqrt.f32 %v73_v42  ;;  %v70_v46 = vmul.f32 0.0625, %v65_v44  ;;  %v69_v47 = vmul.f32 0.0625, %v62_v45 }
 0x12f   :  { %157 = vrsqrt.f32 %v72_v43 }
 0x130   :  { %v75_v48 = vadd.f32 1e-06, %v70_v46  ;;  %v74_v49 = vadd.f32 1e-06, %v69_v47 }
 0x132   :  { %159 = vrsqrt.f32 %v75_v48 }
 0x133   :  { %161 = vrsqrt.f32 %v74_v49 }
 0x134   :  { %v154_v50 = vpop.eup %153 }
 0x135   :  { %v81_v52 = vmul.f32 %v154_v50, %v41_v14 }
 0x137   :  { %v93_v54 = vmul.f32 %v141_v51, %v81_v52 }
 0x138   :  { %v156_v55 = vpop.eup %155 }
 0x139   :  { %v158_v56 = vpop.eup %157  ;;  %v105_v57 = vadd.f32 %v142_v53, %v93_v54  ;;  %v83_v58 = vmul.f32 %v156_v55, %v43_v15 }
 0x13a   :  { %v82_v59 = vmul.f32 %v158_v56, %v42_v22 }
 0x13b   :  { %v148_v60 = vpack.c.bf16 %v105_v57, %v105_v57  ;;  %v95_v61 = vmul.f32 %v141_v51, %v83_v58 }
 0x13c   :  { %v160_v62 = vpop.eup %159  ;;  %v94_v63 = vmul.f32 %v141_v51, %v82_v59 }
 0x13d   :  { %v162_v0 = vpop.eup %161  ;;  %132 = vst.msk [vmem:[%s237_s3] sm:$0xf] %vm131_vm1, %v148_v60  ;;  %v107_v1 = vadd.f32 %v142_v53, %v95_v61  ;;  %v85_v2 = vmul.f32 %v160_v62, %v45_v30 }
 0x13e   :  { %v106_v3 = vadd.f32 %v142_v53, %v94_v63  ;;  %v84_v4 = vmul.f32 %v162_v0, %v44_v23 }
 0x13f   :  { %v150_v5 = vpack.c.bf16 %v107_v1, %v107_v1  ;;  %v97_v6 = vmul.f32 %v141_v51, %v85_v2 }
 0x140   :  { %v149_v7 = vpack.c.bf16 %v106_v3, %v106_v3  ;;  %v96_v8 = vmul.f32 %v141_v51, %v84_v4 }
 0x141   :  { %134 = vst.msk [vmem:[%s237_s3 + $0x8] sm:$0xf] %vm131_vm1, %v150_v5  ;;  %v109_v9 = vadd.f32 %v142_v53, %v97_v6 }
 0x142   :  { %133 = vst.msk [vmem:[%s237_s3 + $0x4] sm:$0xf] %vm131_vm1, %v149_v7  ;;  %v108_v10 = vadd.f32 %v142_v53, %v96_v8 }
 0x143   :  { %v152_v11 = vpack.c.bf16 %v109_v9, %v109_v9 }
 0x144   :  { %v151_v12 = vpack.c.bf16 %v108_v10, %v108_v10 }
 0x145   :  { %136 = vst.msk [vmem:[%s237_s3 + $0x10] sm:$0xf] %vm131_vm1, %v152_v11 }
 0x146   :  { %135 = vst.msk [vmem:[%s237_s3 + $0xc] sm:$0xf] %vm131_vm1, %v151_v12 }

// kernel: pooling_transformer_forward.23
= control target key start
LH: loop header
LB: loop body
LE: loop exit
PB: predicated region body
PF: predicated region fallthrough
CT: control target
= control target key end

     0   :  { %vm65_vm0 = vcmask 392192   ;;  %s233_s1 = inlined_call_operand.vmem [shape: bf16[48,128], index: 1, kind: input, shape index: {}]   ;;  %s234_s0 = inlined_call_operand.vmem [shape: bf16[32,48], index: 0, kind: input, shape index: {}]   ;;  %s235_s2 = inlined_call_operand.vmem [shape: f32[1,128], index: 2, kind: input, shape index: {}]   ;;  %s236_s3 = inlined_call_operand.vmem [shape: f32[32,128], index: 3, kind: output, shape index: {}]  }
   0x1   :  { %v178_v0 = vld [vmem:[%s233_s1] sm:$0xff]   ;;  %v179_v1 = vld [vmem:[%s233_s1 + $0x8] sm:$0xff]   ;;  %v180_v3 = vld [vmem:[%s233_s1 + $0x10] sm:$0xff]  }
   0x2   :  { %168 = vmatprep.subr.bf16.mxu0 %v178_v0  ;;  %v181_v2 = vld [vmem:[%s234_s0] sm:$0xff]   ;;  %v182_v4 = vld [vmem:[%s234_s0 + $0x8] sm:$0xff]  }
   0x3   :  { %169 = vmatpush3.bf16.msra.mxu0 %v178_v0  ;;  %174 = vmatprep.mubr.msk.bf16.mxu0 %vm65_vm0, %v181_v2  ;;  %v162_v5 = vld [vmem:[%s235_s2] ss:$0 sm:$0xff] }
   0x4   :  { %170 = vmatprep.subr.bf16.mxu0 %v179_v1 }
   0x7   :  { %171 = vmatpush3.bf16.msra.mxu0 %v179_v1 }
   0x8   :  { %172 = vmatprep.subr.bf16.mxu0 %v180_v3 }
   0xb   :  { %173 = vmatpush3.bf16.msra.mxu0 %v180_v3 }
   0xe   :  { %175 = vmatmul.mubr.msk.bf16.vlgmr.msra.gmra.mrb[0].mxu0 %vm65_vm0, %v182_v4 }
  0xe1   :  { %v176_v6 = vpop.f32.mrb[0].mxu0 }
  0xe2   :  { %v145_v7 = vadd.f32 %v176_v6, %v162_v5  ;;  %v106_v8 = vpop.f32.mrb[1].mxu0 }
  0xe3   :  { %v143_v9 = vadd.f32 %v162_v5, %v106_v8  ;;  %v177_v10 = vpop.f32.mrb[2].mxu0 }
  0xe4   :  { %149 = vst [vmem:[%s236_s3 + $0x10] sm:$0xff] %v145_v7  ;;  %v146_v11 = vadd.f32 %v177_v10, %v162_v5  ;;  %v109_v12 = vpop.f32.mrb[3].mxu0 }
  0xe5   :  { %147 = vst [vmem:[%s236_s3] sm:$0xff] %v143_v9  ;;  %v144_v13 = vadd.f32 %v162_v5, %v109_v12 }
  0xe6   :  { %150 = vst [vmem:[%s236_s3 + $0x18] sm:$0xff] %v146_v11 }
  0xe7   :  { %148 = vst [vmem:[%s236_s3 + $0x8] sm:$0xff] %v144_v13 }

// kernel: pooling_transformer_forward.25
= control target key start
LH: loop header
LB: loop body
LE: loop exit
PB: predicated region body
PF: predicated region fallthrough
CT: control target
= control target key end

     0   :  { %v258_v0 = vmov 0.0   ;;  %vm259_vm0 = vmmov 0   ;;  %vm60_vm1 = vcmask 130048   ;;  %s304_s1 = inlined_call_operand.vmem [shape: bf16[16,128], index: 1, kind: input, shape index: {}]   ;;  %s305_s0 = inlined_call_operand.vmem [shape: bf16[48,16], index: 0, kind: input, shape index: {}]   ;;  %s306_s2 = inlined_call_operand.vmem [shape: f32[1,128], index: 2, kind: input, shape index: {}]   ;;  %s307_s3 = inlined_call_operand.vmem [shape: bf16[48,128], index: 3, kind: output, shape index: {}]  }
   0x1   :  { %250 = vmatprep.subr.bf16.mxu1 %v258_v0  ;;  %v254_v1 = vld [vmem:[%s304_s1] sm:$0xff]   ;;  %242 = vmatprep.mubr.msk.bf16.mxu1 %vm259_vm0, %v258_v0  ;;  %v255_v2 = vld [vmem:[%s305_s0 + $0x8] sm:$0xff]   ;;  %v257_v4 = vld [vmem:[%s305_s0 + $0x10] sm:$0xff]  }
   0x2   :  { %236 = vmatprep.subr.bf16.mxu0 %v258_v0  ;;  %238 = vmatprep.mubr.msk.bf16.mxu0 %vm259_vm0, %v258_v0  ;;  %v256_v3 = vld [vmem:[%s305_s0] sm:$0xff]  }
   0x3   :  { %251 = vmatpush3.bf16.msra.mxu1 %v254_v1  ;;  %237 = vmatpush3.bf16.msra.mxu0 %v254_v1  ;;  %v202_v6 = vld [vmem:[%s306_s2] ss:$0 sm:$0xff] }
   0x6   :  { %243 = vmatmul.mubr.msk.bf16.vlgmr.msra.gmra.mrb[0].mxu1 %vm60_vm1, %v255_v2  ;;  %239 = vmatmul.mubr.msk.bf16.vlgmr.msra.gmra.mrb[0].mxu0 %vm60_vm1, %v256_v3 }
   0x7   :  { %246 = vmatprep.mubr.msk.bf16.mxu1 %vm259_vm0, %v258_v0 }
   0xe   :  { %247 = vmatmul.mubr.msk.bf16.gmra.mrb[4].mxu1 %vm60_vm1, %v257_v4 }
  0xd9   :  { %v112_v5 = vpop.f32.mrb[0].mxu1  ;;  %v104_v7 = vpop.f32.mrb[0].mxu0 }
  0xda   :  { %v244_v8 = vpop.f32.mrb[1].mxu1  ;;  %v155_v9 = vadd.f32 %v202_v6, %v104_v7  ;;  %v240_v10 = vpop.f32.mrb[1].mxu0  ;;  %v157_v13 = vadd.f32 %v202_v6, %v112_v5 }
  0xdb   :  { %v115_v11 = vpop.f32.mrb[2].mxu1  ;;  %v107_v12 = vpop.f32.mrb[2].mxu0 }
  0xdc   :  { %v158_v14 = vadd.f32 %v202_v6, %v115_v11  ;;  %v245_v15 = vpop.f32.mrb[3].mxu1  ;;  %v156_v16 = vadd.f32 %v202_v6, %v107_v12  ;;  %v241_v17 = vpop.f32.mrb[3].mxu0 }
  0xde   :  { %v223_v18 = vpack.c.bf16 %v158_v14, %v157_v13  ;;  %v218_v19 = vpack.c.bf16 %v156_v16, %v155_v9 }
  0xe0   :  { %230 = vst [vmem:[%s307_s3 + $0x8] sm:$0xff] %v223_v18   ;;  %219 = vst [vmem:[%s307_s3] sm:$0xff] %v218_v19  }
  0xe1   :  { %v120_v20 = vpop.f32.mrb[4].mxu1 }
  0xe2   :  { %v248_v21 = vpop.f32.mrb[5].mxu1  ;;  %v159_v23 = vadd.f32 %v202_v6, %v120_v20 }
  0xe3   :  { %v123_v22 = vpop.f32.mrb[6].mxu1 }
  0xe4   :  { %v160_v24 = vadd.f32 %v202_v6, %v123_v22  ;;  %v249_v25 = vpop.f32.mrb[7].mxu1 }
  0xe6   :  { %v228_v26 = vpack.c.bf16 %v160_v24, %v159_v23 }
  0xe8   :  { %231 = vst [vmem:[%s307_s3 + $0x10] sm:$0xff] %v228_v26  }

// kernel: pooling_transformer_forward.27
= control target key start
LH: loop header
LB: loop body
LE: loop exit
PB: predicated region body
PF: predicated region fallthrough
CT: control target
= control target key end

     0   :  { %v205_v0 = vmov 0.0   ;;  %vm206_vm0 = vmmov 0   ;;  %vm60_vm1 = vcmask 130048   ;;  %s260_s1 = inlined_call_operand.vmem [shape: bf16[16,128], index: 1, kind: input, shape index: {}]   ;;  %s261_s0 = inlined_call_operand.vmem [shape: bf16[48,16], index: 0, kind: input, shape index: {}]   ;;  %s262_s2 = inlined_call_operand.vmem [shape: f32[1,128], index: 2, kind: input, shape index: {}]   ;;  %s263_s3 = inlined_call_operand.vmem [shape: f32[48,128], index: 3, kind: output, shape index: {}]  }
   0x1   :  { %197 = vmatprep.subr.bf16.mxu1 %v205_v0  ;;  %v201_v1 = vld [vmem:[%s260_s1] sm:$0xff]   ;;  %189 = vmatprep.mubr.msk.bf16.mxu1 %vm206_vm0, %v205_v0  ;;  %v202_v2 = vld [vmem:[%s261_s0 + $0x8] sm:$0xff]   ;;  %v204_v4 = vld [vmem:[%s261_s0 + $0x10] sm:$0xff]  }
   0x2   :  { %183 = vmatprep.subr.bf16.mxu0 %v205_v0  ;;  %185 = vmatprep.mubr.msk.bf16.mxu0 %vm206_vm0, %v205_v0  ;;  %v203_v3 = vld [vmem:[%s261_s0] sm:$0xff]  }
   0x3   :  { %198 = vmatpush3.bf16.msra.mxu1 %v201_v1  ;;  %184 = vmatpush3.bf16.msra.mxu0 %v201_v1  ;;  %v178_v5 = vld [vmem:[%s262_s2] ss:$0 sm:$0xff] }
   0x6   :  { %190 = vmatmul.mubr.msk.bf16.vlgmr.msra.gmra.mrb[0].mxu1 %vm60_vm1, %v202_v2  ;;  %186 = vmatmul.mubr.msk.bf16.vlgmr.msra.gmra.mrb[0].mxu0 %vm60_vm1, %v203_v3 }
   0x7   :  { %193 = vmatprep.mubr.msk.bf16.mxu1 %vm206_vm0, %v205_v0 }
   0xe   :  { %194 = vmatmul.mubr.msk.bf16.gmra.mrb[4].mxu1 %vm60_vm1, %v204_v4 }
  0xd9   :  { %v112_v6 = vpop.f32.mrb[0].mxu1  ;;  %v104_v7 = vpop.f32.mrb[0].mxu0 }
  0xda   :  { %v157_v8 = vadd.f32 %v178_v5, %v112_v6  ;;  %v191_v9 = vpop.f32.mrb[1].mxu1  ;;  %v155_v10 = vadd.f32 %v178_v5, %v104_v7  ;;  %v187_v11 = vpop.f32.mrb[1].mxu0 }
  0xdb   :  { %v115_v12 = vpop.f32.mrb[2].mxu1  ;;  %v107_v13 = vpop.f32.mrb[2].mxu0 }
  0xdc   :  { %163 = vst [vmem:[%s263_s3 + $0x10] sm:$0xff] %v157_v8  ;;  %v158_v14 = vadd.f32 %v178_v5, %v115_v12  ;;  %v192_v15 = vpop.f32.mrb[3].mxu1  ;;  %161 = vst [vmem:[%s263_s3] sm:$0xff] %v155_v10  ;;  %v156_v16 = vadd.f32 %v178_v5, %v107_v13  ;;  %v188_v17 = vpop.f32.mrb[3].mxu0 }
  0xde   :  { %164 = vst [vmem:[%s263_s3 + $0x18] sm:$0xff] %v158_v14  ;;  %162 = vst [vmem:[%s263_s3 + $0x8] sm:$0xff] %v156_v16 }
  0xe1   :  { %v120_v18 = vpop.f32.mrb[4].mxu1 }
  0xe2   :  { %v159_v19 = vadd.f32 %v178_v5, %v120_v18  ;;  %v195_v20 = vpop.f32.mrb[5].mxu1 }
  0xe3   :  { %v123_v21 = vpop.f32.mrb[6].mxu1 }
  0xe4   :  { %165 = vst [vmem:[%s263_s3 + $0x20] sm:$0xff] %v159_v19  ;;  %v160_v22 = vadd.f32 %v178_v5, %v123_v21  ;;  %v196_v23 = vpop.f32.mrb[7].mxu1 }
  0xe6   :  { %166 = vst [vmem:[%s263_s3 + $0x28] sm:$0xff] %v160_v22 }

// kernel: pooling_transformer_forward.29
= control target key start
LH: loop header
LB: loop body
LE: loop exit
PB: predicated region body
PF: predicated region fallthrough
CT: control target
= control target key end

     0   :  { %v205_v0 = vmov 0.0   ;;  %vm206_vm0 = vmmov 0   ;;  %vm60_vm1 = vcmask 130048   ;;  %s260_s1 = inlined_call_operand.vmem [shape: bf16[16,128], index: 1, kind: input, shape index: {}]   ;;  %s261_s0 = inlined_call_operand.vmem [shape: bf16[48,16], index: 0, kind: input, shape index: {}]   ;;  %s262_s2 = inlined_call_operand.vmem [shape: f32[1,128], index: 2, kind: input, shape index: {}]   ;;  %s263_s3 = inlined_call_operand.vmem [shape: f32[48,128], index: 3, kind: output, shape index: {}]  }
   0x1   :  { %197 = vmatprep.subr.bf16.mxu1 %v205_v0  ;;  %v201_v1 = vld [vmem:[%s260_s1] sm:$0xff]   ;;  %189 = vmatprep.mubr.msk.bf16.mxu1 %vm206_vm0, %v205_v0  ;;  %v202_v2 = vld [vmem:[%s261_s0 + $0x8] sm:$0xff]   ;;  %v204_v4 = vld [vmem:[%s261_s0 + $0x10] sm:$0xff]  }
   0x2   :  { %183 = vmatprep.subr.bf16.mxu0 %v205_v0  ;;  %185 = vmatprep.mubr.msk.bf16.mxu0 %vm206_vm0, %v205_v0  ;;  %v203_v3 = vld [vmem:[%s261_s0] sm:$0xff]  }
   0x3   :  { %198 = vmatpush3.bf16.msra.mxu1 %v201_v1  ;;  %184 = vmatpush3.bf16.msra.mxu0 %v201_v1  ;;  %v178_v5 = vld [vmem:[%s262_s2] ss:$0 sm:$0xff] }
   0x6   :  { %190 = vmatmul.mubr.msk.bf16.vlgmr.msra.gmra.mrb[0].mxu1 %vm60_vm1, %v202_v2  ;;  %186 = vmatmul.mubr.msk.bf16.vlgmr.msra.gmra.mrb[0].mxu0 %vm60_vm1, %v203_v3 }
   0x7   :  { %193 = vmatprep.mubr.msk.bf16.mxu1 %vm206_vm0, %v205_v0 }
   0xe   :  { %194 = vmatmul.mubr.msk.bf16.gmra.mrb[4].mxu1 %vm60_vm1, %v204_v4 }
  0xd9   :  { %v112_v6 = vpop.f32.mrb[0].mxu1  ;;  %v104_v7 = vpop.f32.mrb[0].mxu0 }
  0xda   :  { %v157_v8 = vadd.f32 %v178_v5, %v112_v6  ;;  %v191_v9 = vpop.f32.mrb[1].mxu1  ;;  %v155_v10 = vadd.f32 %v178_v5, %v104_v7  ;;  %v187_v11 = vpop.f32.mrb[1].mxu0 }
  0xdb   :  { %v115_v12 = vpop.f32.mrb[2].mxu1  ;;  %v107_v13 = vpop.f32.mrb[2].mxu0 }
  0xdc   :  { %163 = vst [vmem:[%s263_s3 + $0x10] sm:$0xff] %v157_v8  ;;  %v158_v14 = vadd.f32 %v178_v5, %v115_v12  ;;  %v192_v15 = vpop.f32.mrb[3].mxu1  ;;  %161 = vst [vmem:[%s263_s3] sm:$0xff] %v155_v10  ;;  %v156_v16 = vadd.f32 %v178_v5, %v107_v13  ;;  %v188_v17 = vpop.f32.mrb[3].mxu0 }
  0xde   :  { %164 = vst [vmem:[%s263_s3 + $0x18] sm:$0xff] %v158_v14  ;;  %162 = vst [vmem:[%s263_s3 + $0x8] sm:$0xff] %v156_v16 }
  0xe1   :  { %v120_v18 = vpop.f32.mrb[4].mxu1 }
  0xe2   :  { %v159_v19 = vadd.f32 %v178_v5, %v120_v18  ;;  %v195_v20 = vpop.f32.mrb[5].mxu1 }
  0xe3   :  { %v123_v21 = vpop.f32.mrb[6].mxu1 }
  0xe4   :  { %165 = vst [vmem:[%s263_s3 + $0x20] sm:$0xff] %v159_v19  ;;  %v160_v22 = vadd.f32 %v178_v5, %v123_v21  ;;  %v196_v23 = vpop.f32.mrb[7].mxu1 }
  0xe6   :  { %166 = vst [vmem:[%s263_s3 + $0x28] sm:$0xff] %v160_v22 }

// kernel: pooling_transformer_forward.26
= control target key start
LH: loop header
LB: loop body
LE: loop exit
PB: predicated region body
PF: predicated region fallthrough
CT: control target
= control target key end

     0   :  { %s1327_s12 = smov 0   ;;  %s1329_s13 = smov 0   ;;  %s1568_s0 = inlined_call_operand.vmem [shape: bf16[2,17,16], index: 0, kind: input, shape index: {}]   ;;  %s1569_s1 = inlined_call_operand.vmem [shape: bf16[2,17,16], index: 1, kind: input, shape index: {}]   ;;  %s1570_s2 = inlined_call_operand.vmem [shape: bf16[2,17,16], index: 2, kind: input, shape index: {}]   ;;  %s1571_s3 = inlined_call_operand.vmem [shape: bf16[2,17,16], index: 3, kind: output, shape index: {}]  }
   0x1   :  { %s1331_s14 = smov 0  }
   0x2 LB: > { %s39_s15 = sadd.s32 1, %s1296_s13  ;;  %p1121_p0 = scmp.ge.s32.totalorder %s1300_s14, 1  ;;  %s1300_s14 = sphi %s1331_s14, %s13_s14   ;;  %s1296_s13 = sphi %s1329_s13, %s1573_s13   ;;  %s1292_s12 = sphi %s1327_s12, %s1572_s12  }
   0x3   : > { %p41_p1 = scmp.ge.s32.totalorder %s39_s15, 2  ;;  %p223_p2 = scmp.lt.s32.totalorder %s1300_s14, 3 }
   0x5   : > { %s1575_s15 = smov (%p41_p1, %s39_s15), 0  ;;  %p224_p3 = pnand %p1121_p0, %p223_p2 }
   0x6   : > { %p286_p4 = scmp.lt.s32.totalorder (!%p224_p3), %s1292_s12, 1  ;;  %vm357_vm0 = vcmask (!%p224_p3), 64512   ;;  %vm346_vm1 = vcmask (!%p224_p3), 0   ;;  %v1302_v12 = vmov (!%p224_p3), -inf   ;;  %vm464_vm2 = vcmask (!%p224_p3), 131072   ;;  %s1305_s26 = smov (!%p224_p3), 120  }
   0x7   : > { %227 = sbr.rel (%p224_p3) target bundleno = 1481 (0x5c9), region = 32  ;;  %347 = vst.msk [vmem:[#allocation2 + $0x10] sm:$0x1] (!%p224_p3), %vm346_vm1, %v1302_v12  ;;  %350 = vst.msk [vmem:[#allocation2 + $0x28] sm:$0x1] (!%p224_p3), %vm346_vm1, %v1302_v12  ;;  %vm457_vm3 = vcmask (!%p224_p3), 138240  }
   0x8   : > { %vm343_vm4 = vcmask (!%p224_p3), 7168   ;;  %v1303_v20 = vmov (!%p224_p3), 0   ;;  %v1304_v21 = vmov (!%p224_p3), 0.0   ;;  %vm565_vm5 = vcmask (!%p224_p3), 1040384   ;;  %s1306_s27 = smov (!%p224_p3), 8  }
   0x9   : > { %344 = vst.msk [vmem:[#allocation2] sm:$0xff] (!%p224_p3), %vm343_vm4, %v1302_v12  ;;  %345 = vst.msk [vmem:[#allocation2 + $0x8] sm:$0xff] (!%p224_p3), %vm343_vm4, %v1302_v12  ;;  %1236 = vset.pattern.permute.xlu1 (!%p224_p3), %v1303_v20  ;;  %1237 = vset.pattern.permute.xlu0 (!%p224_p3), %v1303_v20  ;;  %v1449_v35 = vsel (!%p224_p3), %vm565_vm5, 65535, %v1303_v20  ;;  %vm360_vm6 = vcmask (!%p224_p3), 57344   ;;  %vm910_vm7 = vsmask.f32 (!%p224_p3), 256 }
   0xa   : > { %348 = vst.msk [vmem:[#allocation2 + $0x18] sm:$0xff] (!%p224_p3), %vm343_vm4, %v1302_v12  ;;  %349 = vst.msk [vmem:[#allocation2 + $0x20] sm:$0xff] (!%p224_p3), %vm343_vm4, %v1302_v12  ;;  %vm906_vm9 = vcmask (!%p224_p3), 60416   ;;  %vm961_vm10 = vcmask (!%p224_p3), 126016   ;;  %vm964_vm11 = vcmask (!%p224_p3), 122944  }
   0xb   : > { %354 = vst.msk [vmem:[#allocation3 + $0x18] sm:$0xff] (!%p224_p3), %vm343_vm4, %v1304_v21  ;;  %351 = vst.msk [vmem:[#allocation3] sm:$0xff] (!%p224_p3), %vm343_vm4, %v1304_v21 }
   0xc   : > { %352 = vst.msk [vmem:[#allocation3 + $0x8] sm:$0xff] (!%p224_p3), %vm343_vm4, %v1304_v21  ;;  %355 = vst.msk [vmem:[#allocation3 + $0x20] sm:$0xff] (!%p224_p3), %vm343_vm4, %v1304_v21 }
   0xd   : > { %353 = vst.msk [vmem:[#allocation3 + $0x10] sm:$0x1] (!%p224_p3), %vm346_vm1, %v1304_v21  ;;  %356 = vst.msk [vmem:[#allocation3 + $0x28] sm:$0x1] (!%p224_p3), %vm346_vm1, %v1304_v21 }
   0xe   : > { %s1577_s12 = smov (!%p286_p4, %s1292_s12), 1  ;;  %358 = vst.msk [vmem:[#allocation4] sm:$0xff] %vm357_vm0, %v1304_v21  ;;  %359 = vst.msk [vmem:[#allocation4 + $0x8] sm:$0xff] %vm357_vm0, %v1304_v21  ;;  %v1413_v22 = vld [vmem:[#allocation2 + $0x10] sm:$0x1] }
   0xf   : > { %s1345_s16 = smul.u32 12, %s1577_s12  ;;  %362 = vst.msk [vmem:[#allocation4 + $0x18] sm:$0xff] %vm357_vm0, %v1304_v21  ;;  %363 = vst.msk [vmem:[#allocation4 + $0x20] sm:$0xff] %vm357_vm0, %v1304_v21 }
  0x10   : > { %v1415_v23 = vld [vmem:[#allocation2] sm:$0xff]  ;;  %v1427_v29 = vld [vmem:[#allocation2 + $0x8] sm:$0xff]  ;;  %364 = vst.msk [vmem:[#allocation4 + $0x28] sm:$0x1] %vm360_vm6, %v1304_v21  ;;  %361 = vst.msk [vmem:[#allocation4 + $0x10] sm:$0x1] %vm360_vm6, %v1304_v21 }
  0x11   : > { %s309_s19 = scalar_lea.vmem %s1569_s1, %s1345_s16  ;;  %s296_s22 = scalar_lea.vmem %s1568_s0, %s1345_s16  ;;  %vm911_vm8 = vmand %vm360_vm6, %vm910_vm7 }
  0x12   : > { %v1355_v0 = vld [vmem:[%s309_s19] sm:$0xff]   ;;  %v1357_v1 = vld [vmem:[%s309_s19 + $0x8] ss:$0 sps:$4 sm:$0x11]   ;;  %s322_s25 = scalar_lea.vmem %s1570_s2, %s1345_s16  ;;  %s1546_s30 = scalar_lea.vmem %s1571_s3, %s1345_s16  ;;  %vm965_vm12 = vmand %vm964_vm11, %vm910_vm7 }
  0x13   : > { %1202 = vmatprep.subr.msk.bf16.mxu0 %vm357_vm0, %v1355_v0  ;;  %v401_v2 = vsel %vm357_vm0, %v1355_v0, 0  ;;  %v365_v3 = vld [vmem:[%s296_s22] sm:$0xf]  ;;  %v366_v4 = vld [vmem:[%s296_s22 + $0x4] sm:$0xf]  ;;  %v404_v9 = vsel %vm357_vm0, %v1357_v1, 0 }
  0x14   : > { %1171 = vmatpush3.bf16.xpose.msra.mxu0 %v401_v2  ;;  %v368_v5 = vmul.bf16 1052065461, %v365_v3  ;;  %v369_v6 = vmul.bf16 1052065461, %v366_v4  ;;  %v367_v8 = vld [vmem:[%s296_s22 + $0x8] sm:$0x1] }
  0x15   : > { %1203 = vmatprep.subr.msk.bf16.mxu0 %vm357_vm0, %v1357_v1  ;;  %v370_v10 = vmul.bf16 1052065461, %v367_v8  ;;  %v1447_v34 = vld [vmem:[%s322_s25] sm:$0xff]   ;;  %v1454_v36 = vld [vmem:[%s322_s25 + $0x8] ss:$0 sps:$4 sm:$0x11]  }
  0x16   : > { %v1365_v7 = vcombine.low %v368_v5, %v369_v6  ;;  %1178 = vmatprep.subr.bf16.mxu1 %v1447_v34  ;;  %v569_v37 = vand.u32 %v1454_v36, %v1449_v35  ;;  %v698_v5 = vld [vmem:[#allocation2 + $0x18] sm:$0xff] }
  0x17   : > { %v1371_v11 = vcombine.low %v370_v10, %v370_v10  ;;  %1179 = vmatpush3.bf16.msra.mxu1 %v1447_v34  ;;  %v700_v10 = vld [vmem:[#allocation2 + $0x28] sm:$0x1] }
  0x18   : > { %1174 = vmatprep.mubr.msk.bf16.mxu0 %vm357_vm0, %v1365_v7  ;;  %1180 = vmatprep.subr.bf16.mxu1 %v569_v37 }
  0x1b   : > { %1181 = vmatpush3.bf16.msra.mxu1 %v569_v37 }
  0x1c   : > { %1173 = vmatpush3.bf16.xpose.msra.mxu0 %v404_v9 }
  0x23   : > { %1175 = vmatmul.mubr.msk.bf16.vlgmr.msra.gmra.mrb[0].mxu0 %vm357_vm0, %v1371_v11 }
  0xf6   : > { %v1377_v13 = vpop.f32.mrb[0].mxu0 }
  0xf7   : > { %v1379_v14 = vpop.f32.mrb[1].mxu0  ;;  %v465_v15 = vsel %vm464_vm2, %v1377_v13, -inf }
  0xf8   : > { %466 = vmax.xlane.f32.xlu1 %v465_v15  ;;  %v1177_v16 = vpop.f32.mrb[2].mxu0  ;;  %v458_v17 = vsel %vm457_vm3, %v1379_v14, -inf }
  0xf9   : > { %459 = vmax.xlane.f32.xlu0 %v458_v17  ;;  %v1385_v18 = vpop.f32.mrb[3].mxu0 }
  0xfa   : > { %v461_v19 = vsel %vm457_vm3, %v1385_v18, -inf }
  0xfd   : > { %462 = vmax.xlane.f32.xlu0 %v461_v19 }
 0x185   : > { %v467_v24 = vpop.xlane.xlu1 %466 }
 0x186   : > { %v1418_v25 = vmax.f32 %v1413_v22, %v467_v24  ;;  %v460_v26 = vpop.xlane.xlu0 %459 }
 0x187   : > { %v1421_v27 = vmax.f32 %v1415_v23, %v460_v26 }
 0x188   : > { %v473_v28 = vsub.f32 %v1413_v22, %v1418_v25  ;;  %628 = vst.msk [vmem:[#allocation2 + $0x10] sm:$0x1] %vm346_vm1, %v1418_v25 }
 0x189   : > { %v471_v30 = vsub.f32 %v1415_v23, %v1421_v27  ;;  %626 = vst.msk [vmem:[#allocation2] sm:$0xff] %vm343_vm4, %v1421_v27  ;;  %482 = vperm.xlu1 %1236, %v1421_v27  }
 0x18a   : > { %v463_v31 = vpop.xlane.xlu0 %462 }
 0x18b   : > { %v1435_v32 = vmax.f32 %v1427_v29, %v463_v31 }
 0x18d   : > { %v472_v33 = vsub.f32 %v1427_v29, %v1435_v32  ;;  %627 = vst.msk [vmem:[#allocation2 + $0x8] sm:$0xff] %vm343_vm4, %v1435_v32  ;;  %492 = vperm.xlu1 %1236, %v1418_v25   ;;  %487 = vperm.xlu0 %1237, %v1435_v32  }
 0x18f   : > { %v476_v21 = vmul.f32 1.442695, %v472_v33 }
 0x191   : > { %633 = vrot.lane.b32.xlu1 %v1355_v0, %s1305_s26 }
 0x195   : > { %635 = vrot.lane.b32.xlu1 %v1357_v1, %s1305_s26 }
 0x199   : > { %629 = vrot.lane.b32.xlu1 %v1365_v7, %s1305_s26  ;;  %v699_v7 = vld [vmem:[#allocation2 + $0x20] sm:$0xff] }
 0x19d   : > { %631 = vrot.lane.b32.xlu1 %v1371_v11, %s1305_s26 }
 0x208   : > { %v483_v38 = vpop.permute.xlu1 %482 }
 0x209   : > { %v495_v39 = vsub.f32 %v1379_v14, %v483_v38 }
 0x20b   : > { %v498_v40 = vmul.f32 1.442695, %v495_v39 }
 0x20c   : > { %v493_v41 = vpop.permute.xlu1 %492  ;;  %v488_v42 = vpop.permute.xlu0 %487 }
 0x20d   : > { %v497_v43 = vsub.f32 %v1377_v13, %v493_v41  ;;  %v496_v44 = vsub.f32 %v1385_v18, %v488_v42  ;;  %1242 = vpow2.f32 %v498_v40 }
 0x20f   : > { %v502_v45 = vmul.f32 1.442695, %v497_v43  ;;  %v500_v46 = vmul.f32 1.442695, %v496_v44 }
 0x210   : > { %v634_v47 = vpop.permute.xlu1 %633 }
 0x211   : > { %1244 = vpow2.f32 %v502_v45  ;;  %1204 = vmatprep.subr.msk.bf16.mxu1 %vm357_vm0, %v634_v47  ;;  %v644_v54 = vsel %vm357_vm0, %v634_v47, 0 }
 0x212   : > { %1246 = vpow2.f32 %v500_v46 }
 0x214   : > { %v636_v48 = vpop.permute.xlu1 %635 }
 0x215   : > { %v647_v56 = vsel %vm357_vm0, %v636_v48, 0 }
 0x217   : > { %v1469_v49 = vpop.eup %1242 }
 0x218   : > { %v630_v55 = vpop.permute.xlu1 %629 }
 0x21b   : > { %v1471_v50 = vpop.eup %1244 }
 0x21c   : > { %v1473_v51 = vpop.eup %1246  ;;  %v549_v52 = vpack.c.bf16 %v1471_v50, %v1471_v50  ;;  %v632_v57 = vpop.permute.xlu1 %631  ;;  %v516_v47 = vsel %vm464_vm2, %v1471_v50, 0.0 }
 0x21d   : > { %v548_v53 = vpack.c.bf16 %v1473_v51, %v1469_v49 }
 0x21f   : > { %1182 = vmatprep.mubr.msk.bf16.mxu1 %vm457_vm3, %v548_v53 }
 0x220   : > { %1183 = vmatmul.mubr.msk.bf16.vlgmr.msra.gmra.mrb[0].mxu1 %vm457_vm3, %v549_v52  ;;  %v513_v52 = vsel %vm457_vm3, %v1473_v51, 0.0  ;;  %v478_v51 = vmul.f32 1.442695, %v473_v28 }
 0x221   : > { %1187 = vmatpush3.bf16.xpose.msra.mxu1 %v644_v54  ;;  %1190 = vmatprep.mubr.msk.bf16.mxu1 %vm357_vm0, %v630_v55 }
 0x222   : > { %1205 = vmatprep.subr.msk.bf16.mxu1 %vm357_vm0, %v636_v48  ;;  %v510_v48 = vsel %vm457_vm3, %v1469_v49, 0.0 }
 0x229   : > { %1189 = vmatpush3.bf16.xpose.msra.mxu1 %v647_v56 }
 0x230   : > { %1191 = vmatmul.mubr.msk.bf16.vlgmr.msra.gmra.mrb[4].mxu1 %vm357_vm0, %v632_v57  ;;  %v474_v57 = vmul.f32 1.442695, %v471_v30  ;;  %v506_v30 = vld [vmem:[#allocation3 + $0x10] sm:$0x1] }
 0x2f3   : > { %v1486_v58 = vpop.f32.mrb[0].mxu1 }
 0x2f4   : > { %v1488_v59 = vpop.f32.mrb[1].mxu1 }
 0x2f5   : > { %v1185_v60 = vpop.f32.mrb[2].mxu1 }
 0x2f6   : > { %v1490_v61 = vpop.f32.mrb[3].mxu1  ;;  %v747_v60 = vld [vmem:[#allocation3 + $0x18] sm:$0xff] }
 0x303   : > { %v1192_v62 = vpop.f32.mrb[4].mxu1 }
 0x304   : > { %v683_v63 = vpop.f32.mrb[5].mxu1  ;;  %v707_v4 = vsel %vm464_vm2, %v1192_v62, -inf }
 0x305   : > { %v1193_v0 = vpop.f32.mrb[6].mxu1  ;;  %v701_v1 = vsel %vm457_vm3, %v683_v63, -inf }
 0x306   : > { %702 = vmax.xlane.f32.xlu1 %v701_v1  ;;  %v686_v2 = vpop.f32.mrb[7].mxu1  ;;  %v749_v0 = vld [vmem:[#allocation3 + $0x28] sm:$0x1]  ;;  %v748_v1 = vld [vmem:[#allocation3 + $0x20] sm:$0xff] }
 0x307   : > { %v704_v3 = vsel %vm457_vm3, %v686_v2, -inf }
 0x308   : > { %705 = vmax.xlane.f32.xlu0 %v704_v3 }
 0x30a   : > { %708 = vmax.xlane.f32.xlu1 %v707_v4  ;;  %v504_v4 = vld [vmem:[#allocation3] sm:$0xff] }
 0x393   : > { %v703_v6 = vpop.xlane.xlu1 %702 }
 0x394   : > { %v710_v8 = vmax.f32 %v698_v5, %v703_v6 }
 0x395   : > { %v706_v9 = vpop.xlane.xlu0 %705 }
 0x396   : > { %v713_v11 = vsub.f32 %v698_v5, %v710_v8  ;;  %860 = vst.msk [vmem:[#allocation2 + $0x18] sm:$0xff] %vm343_vm4, %v710_v8  ;;  %v711_v12 = vmax.f32 %v699_v7, %v706_v9  ;;  %724 = vperm.xlu1 %1236, %v710_v8   ;;  %v505_v9 = vld [vmem:[#allocation3 + $0x8] sm:$0xff] }
 0x397   : > { %v709_v13 = vpop.xlane.xlu1 %708 }
 0x398   : > { %v714_v14 = vsub.f32 %v699_v7, %v711_v12  ;;  %861 = vst.msk [vmem:[#allocation2 + $0x20] sm:$0xff] %vm343_vm4, %v711_v12  ;;  %v712_v15 = vmax.f32 %v700_v10, %v709_v13  ;;  %729 = vperm.xlu0 %1237, %v711_v12   ;;  %v716_v53 = vmul.f32 1.442695, %v713_v11 }
 0x39a   : > { %v715_v16 = vsub.f32 %v700_v10, %v712_v15  ;;  %862 = vst.msk [vmem:[#allocation2 + $0x28] sm:$0x1] %vm346_vm1, %v712_v15  ;;  %734 = vperm.xlu1 %1236, %v712_v15   ;;  %v718_v55 = vmul.f32 1.442695, %v714_v14 }
 0x39c   : > { %794 = vrot.lane.b32.xlu0 %v1454_v36, %s1305_s26  ;;  %v720_v54 = vmul.f32 1.442695, %v715_v16 }
 0x39e   : > { %792 = vrot.lane.b32.xlu1 %v1447_v34, %s1305_s26 }
 0x415   : > { %v725_v17 = vpop.permute.xlu1 %724 }
 0x416   : > { %v737_v18 = vsub.f32 %v683_v63, %v725_v17 }
 0x417   : > { %v730_v19 = vpop.permute.xlu0 %729 }
 0x418   : > { %v740_v20 = vmul.f32 1.442695, %v737_v18  ;;  %v738_v24 = vsub.f32 %v686_v2, %v730_v19 }
 0x419   : > { %v735_v26 = vpop.permute.xlu1 %734 }
 0x41a   : > { %1248 = vpow2.f32 %v740_v20  ;;  %v742_v31 = vmul.f32 1.442695, %v738_v24  ;;  %v739_v37 = vsub.f32 %v1192_v62, %v735_v26  ;;  %v771_v26 = vld [vmem:[#allocation4 + $0x28] sm:$0x1] }
 0x41b   : > { %v795_v38 = vpop.permute.xlu0 %794 }
 0x41c   : > { %1250 = vpow2.f32 %v742_v31  ;;  %v744_v39 = vmul.f32 1.442695, %v739_v37  ;;  %v804_v40 = vand.u32 %v795_v38, %v1449_v35  ;;  %v769_v37 = vld [vmem:[#allocation4 + $0x18] sm:$0xff] }
 0x41d   : > { %v793_v41 = vpop.permute.xlu1 %792 }
 0x41e   : > { %1252 = vpow2.f32 %v744_v39  ;;  %1194 = vmatprep.subr.bf16.mxu0 %v793_v41  ;;  %v770_v39 = vld [vmem:[#allocation4 + $0x20] sm:$0xff] }
 0x41f   : > { %1195 = vmatpush3.bf16.msra.mxu0 %v793_v41  ;;  %1254 = vpow2.f32 %v716_v53 }
 0x420   : > { %1196 = vmatprep.subr.bf16.mxu0 %v804_v40  ;;  %1256 = vpow2.f32 %v720_v54 }
 0x421   : > { %1258 = vpow2.f32 %v718_v55  ;;  %v527_v55 = vld [vmem:[#allocation4] sm:$0xff] }
 0x422   : > { %1260 = vpow2.f32 %v478_v51 }
 0x423   : > { %1197 = vmatpush3.bf16.msra.mxu0 %v804_v40  ;;  %1262 = vpow2.f32 %v474_v57 }
 0x424   : > { %v1249_v34 = vpop.eup %1248  ;;  %1264 = vpow2.f32 %v476_v21 }
 0x425   : > { %v753_v36 = vsel %vm457_vm3, %v1249_v34, 0.0 }
 0x426   : > { %v1251_v42 = vpop.eup %1250  ;;  %754 = vadd.xlane.f32.xlu0 %v753_v36 }
 0x427   : > { %v790_v43 = vpack.c.bf16 %v1251_v42, %v1249_v34  ;;  %v756_v46 = vsel %vm457_vm3, %v1251_v42, 0.0 }
 0x428   : > { %v1253_v44 = vpop.eup %1252 }
 0x429   : > { %1198 = vmatprep.mubr.msk.bf16.mxu0 %vm457_vm3, %v790_v43  ;;  %v759_v45 = vsel %vm464_vm2, %v1253_v44, 0.0  ;;  %v791_v35 = vpack.c.bf16 %v1253_v44, %v1253_v44  ;;  %v1255_v49 = vpop.eup %1254 }
 0x42a   : > { %760 = vadd.xlane.f32.xlu1 %v759_v45  ;;  %757 = vadd.xlane.f32.xlu0 %v756_v46  ;;  %v1257_v50 = vpop.eup %1256  ;;  %v750_v62 = vmul.f32 %v1255_v49, %v747_v60 }
 0x42b   : > { %1199 = vmatmul.mubr.msk.bf16.vlgmr.msra.gmra.mrb[4].mxu0 %vm457_vm3, %v791_v35  ;;  %v1259_v56 = vpop.eup %1258  ;;  %v752_v22 = vmul.f32 %v1257_v50, %v749_v0 }
 0x42c   : > { %v1261_v3 = vpop.eup %1260  ;;  %v751_v25 = vmul.f32 %v1259_v56, %v748_v1  ;;  %v528_v1 = vld [vmem:[#allocation4 + $0x8] sm:$0xff] }
 0x42d   : > { %v1263_v23 = vpop.eup %1262  ;;  %v509_v32 = vmul.f32 %v1261_v3, %v506_v30 }
 0x42e   : > { %517 = vadd.xlane.f32.xlu1 %v516_v47  ;;  %511 = vadd.xlane.f32.xlu0 %v510_v48  ;;  %v507_v33 = vmul.f32 %v1263_v23, %v504_v4  ;;  %v1265_v6 = vpop.eup %1264  ;;  %v529_v48 = vld [vmem:[#allocation4 + $0x10] sm:$0x1] }
 0x42f   : > { %v508_v13 = vmul.f32 %v1265_v6, %v505_v9  ;;  %v912_v9 = vld [vmem:[%s1546_s30 + $0x8] sm:$0x1] }
 0x432   : > { %514 = vadd.xlane.f32.xlu1 %v513_v52 }
 0x443   : > { %774 = vperm.xlu1 %1236, %v1255_v49  }
 0x444   : > { %784 = vperm.xlu0 %1237, %v1257_v50  }
 0x447   : > { %779 = vperm.xlu1 %1236, %v1259_v56  }
 0x4b3   : > { %v755_v63 = vpop.xlane.xlu0 %754 }
 0x4b4   : > { %v762_v2 = vadd.f32 %v755_v63, %v750_v62 }
 0x4b6   : > { %765 = vst.msk [vmem:[#allocation3 + $0x18] sm:$0xff] %vm343_vm4, %v762_v2 }
 0x4b7   : > { %v761_v27 = vpop.xlane.xlu1 %760  ;;  %v758_v28 = vpop.xlane.xlu0 %757 }
 0x4b8   : > { %v764_v5 = vadd.f32 %v761_v27, %v752_v22  ;;  %v763_v29 = vadd.f32 %v758_v28, %v751_v25 }
 0x4ba   : > { %767 = vst.msk [vmem:[#allocation3 + $0x28] sm:$0x1] %vm346_vm1, %v764_v5 }
 0x4bb   : > { %766 = vst.msk [vmem:[#allocation3 + $0x20] sm:$0xff] %vm343_vm4, %v763_v29  ;;  %v518_v7 = vpop.xlane.xlu1 %517  ;;  %v512_v8 = vpop.xlane.xlu0 %511 }
 0x4bc   : > { %v521_v10 = vadd.f32 %v518_v7, %v509_v32  ;;  %v519_v11 = vadd.f32 %v512_v8, %v507_v33 }
 0x4bd   : > { %v918_v12 = vld [vmem:[#allocation3 + $0x18] sm:$0xff] }
 0x4be   : > { %526 = vst.msk [vmem:[#allocation3 + $0x10] sm:$0x1] %vm346_vm1, %v521_v10  ;;  %923 = vperm.xlu1 %1236, %v918_v12  }
 0x4bf   : > { %523 = vst.msk [vmem:[#allocation3] sm:$0xff] %vm343_vm4, %v519_v11  ;;  %v515_v14 = vpop.xlane.xlu1 %514 }
 0x4c0   : > { %v520_v15 = vadd.f32 %v515_v14, %v508_v13 }
 0x4c1   : > { %v920_v16 = vld [vmem:[#allocation3 + $0x28] sm:$0x1] }
 0x4c2   : > { %524 = vst.msk [vmem:[#allocation3 + $0x8] sm:$0xff] %vm343_vm4, %v520_v15  ;;  %933 = vperm.xlu0 %1237, %v920_v16   ;;  %542 = vperm.xlu1 %1236, %v1261_v3   ;;  %v919_v17 = vld [vmem:[#allocation3 + $0x20] sm:$0xff] }
 0x4c3   : > { %v775_v24 = vpop.permute.xlu1 %774  ;;  %v785_v31 = vpop.permute.xlu0 %784 }
 0x4c4   : > { %v789_v38 = vmul.f32 %v785_v31, %v771_v26  ;;  %v787_v41 = vmul.f32 %v775_v24, %v769_v37 }
 0x4c5   : > { %v871_v18 = vld [vmem:[#allocation3 + $0x10] sm:$0x1] }
 0x4c6   : > { %928 = vperm.xlu0 %1237, %v919_v17   ;;  %532 = vperm.xlu1 %1236, %v1263_v23   ;;  %v869_v19 = vld [vmem:[#allocation3] sm:$0xff] }
 0x4c7   : > { %v780_v40 = vpop.permute.xlu1 %779 }
 0x4c8   : > { %v788_v43 = vmul.f32 %v780_v40, %v770_v39 }
 0x4c9   : > { %v870_v20 = vld [vmem:[#allocation3 + $0x8] sm:$0xff] }
 0x4ca   : > { %884 = vperm.xlu0 %1237, %v871_v18   ;;  %874 = vperm.xlu1 %1236, %v869_v19  }
 0x4ce   : > { %537 = vperm.xlu0 %1237, %v1265_v6  }
 0x4d2   : > { %879 = vperm.xlu0 %1237, %v870_v20  }
 0x4fe   : > { %v1200_v34 = vpop.f32.mrb[4].mxu0 }
 0x4ff   : > { %v856_v36 = vadd.f32 %v1200_v34, %v789_v38  ;;  %v840_v42 = vpop.f32.mrb[5].mxu0 }
 0x500   : > { %v854_v44 = vadd.f32 %v840_v42, %v787_v41  ;;  %v1201_v45 = vpop.f32.mrb[6].mxu0 }
 0x501   : > { %859 = vst.msk [vmem:[#allocation4 + $0x28] sm:$0x1] %vm360_vm6, %v856_v36  ;;  %v843_v46 = vpop.f32.mrb[7].mxu0 }
 0x502   : > { %857 = vst.msk [vmem:[#allocation4 + $0x18] sm:$0xff] %vm357_vm0, %v854_v44  ;;  %v855_v35 = vadd.f32 %v843_v46, %v788_v43 }
 0x504   : > { %858 = vst.msk [vmem:[#allocation4 + $0x20] sm:$0xff] %vm357_vm0, %v855_v35 }
 0x508   : > { %v917_v3 = vld [vmem:[#allocation4 + $0x28] sm:$0x1] }
 0x509   : > { %v915_v60 = vld [vmem:[#allocation4 + $0x18] sm:$0xff] }
 0x50b   : > { %v916_v30 = vld [vmem:[#allocation4 + $0x20] sm:$0xff] }
 0x53d   : > { %v924_v47 = vpop.permute.xlu1 %923 }
 0x53e   : > { %1266 = vrcp.f32 %v924_v47 }
 0x541   : > { %v934_v52 = vpop.permute.xlu0 %933  ;;  %v543_v53 = vpop.permute.xlu1 %542 }
 0x542   : > { %1268 = vrcp.f32 %v934_v52  ;;  %v547_v54 = vmul.f32 %v543_v53, %v529_v48 }
 0x544   : > { %v621_v49 = vadd.f32 %v1486_v58, %v547_v54 }
 0x545   : > { %v929_v50 = vpop.permute.xlu0 %928  ;;  %v533_v56 = vpop.permute.xlu1 %532 }
 0x546   : > { %625 = vst.msk [vmem:[#allocation4 + $0x10] sm:$0x1] %vm360_vm6, %v621_v49  ;;  %1270 = vrcp.f32 %v929_v50  ;;  %v545_v51 = vmul.f32 %v533_v56, %v527_v55 }
 0x548   : > { %v1267_v57 = vpop.eup %1266  ;;  %v619_v21 = vadd.f32 %v1488_v59, %v545_v51 }
 0x549   : > { %v885_v62 = vpop.permute.xlu0 %884  ;;  %v875_v63 = vpop.permute.xlu1 %874  ;;  %v937_v0 = vmul.f32 %v1267_v57, %v915_v60 }
 0x54a   : > { %622 = vst.msk [vmem:[#allocation4] sm:$0xff] %vm357_vm0, %v619_v21  ;;  %1272 = vrcp.f32 %v885_v62 }
 0x54b   : > { %1274 = vrcp.f32 %v875_v63  ;;  %v1151_v2 = vpack.c.bf16 %v937_v0, %v937_v0 }
 0x54c   : > { %v1269_v58 = vpop.eup %1268 }
 0x54d   : > { %v538_v22 = vpop.permute.xlu0 %537  ;;  %952 = vrot.lane.b32.xlu0 %v1151_v2, %s1306_s27  ;;  %v941_v25 = vmul.f32 %v1269_v58, %v917_v3  ;;  %v868_v33 = vld [vmem:[#allocation4 + $0x10] sm:$0x1] }
 0x54e   : > { %v546_v23 = vmul.f32 %v538_v22, %v528_v1 }
 0x54f   : > { %v1153_v27 = vpack.c.bf16 %v941_v25, %v941_v25 }
 0x550   : > { %v1271_v59 = vpop.eup %1270  ;;  %v620_v28 = vadd.f32 %v1490_v61, %v546_v23 }
 0x551   : > { %956 = vrot.lane.b32.xlu1 %v1153_v27, %s1306_s27  ;;  %v880_v4 = vpop.permute.xlu0 %879  ;;  %v939_v5 = vmul.f32 %v1271_v59, %v916_v30  ;;  %v866_v7 = vld [vmem:[#allocation4] sm:$0xff] }
 0x552   : > { %623 = vst.msk [vmem:[#allocation4 + $0x8] sm:$0xff] %vm357_vm0, %v620_v28  ;;  %1276 = vrcp.f32 %v880_v4 }
 0x553   : > { %v1152_v29 = vpack.c.bf16 %v939_v5, %v939_v5 }
 0x554   : > { %v1273_v32 = vpop.eup %1272 }
 0x555   : > { %v1275_v61 = vpop.eup %1274  ;;  %v892_v6 = vmul.f32 %v1273_v32, %v868_v33  ;;  %954 = vrot.lane.b32.xlu1 %v1152_v29, %s1306_s27 }
 0x556   : > { %v888_v8 = vmul.f32 %v1275_v61, %v866_v7 }
 0x557   : > { %v1150_v10 = vpack.c.bf16 %v892_v6, %v892_v6 }
 0x558   : > { %v1148_v11 = vpack.c.bf16 %v888_v8, %v888_v8 }
 0x559   : > { %v913_v12 = vsel %vm911_vm8, %v1150_v10, %v912_v9  ;;  %v867_v14 = vld [vmem:[#allocation4 + $0x8] sm:$0xff] }
 0x55a   : > { %907 = vst.msk [vmem:[%s1546_s30] sm:$0xf] %vm906_vm9, %v1148_v11  ;;  %914 = vst [vmem:[%s1546_s30 + $0x8] sm:$0x1] %v913_v12 }
 0x55c   : > { %v1277_v13 = vpop.eup %1276 }
 0x55d   : > { %v890_v15 = vmul.f32 %v1277_v13, %v867_v14 }
 0x55f   : > { %v1149_v16 = vpack.c.bf16 %v890_v15, %v890_v15 }
 0x561   : > { %908 = vst.msk [vmem:[%s1546_s30 + $0x4] sm:$0xf] %vm906_vm9, %v1149_v16  ;;  %v966_v18 = vld [vmem:[%s1546_s30 + $0x8] sm:$0x1] }
 0x5bf   : > { %v953_v17 = vpop.permute.xlu0 %952 }
 0x5c0   : > { %962 = vst.msk [vmem:[%s1546_s30] sm:$0xf] %vm961_vm10, %v953_v17 }
 0x5c3   : > { %v957_v19 = vpop.permute.xlu1 %956 }
 0x5c4   : > { %v967_v20 = vsel %vm965_vm12, %v957_v19, %v966_v18 }
 0x5c5   : > { %968 = vst [vmem:[%s1546_s30 + $0x8] sm:$0x1] %v967_v20 }
 0x5c7   : > { %v955_v24 = vpop.permute.xlu1 %954 }
 0x5c8   : > { %963 = vst.msk [vmem:[%s1546_s30 + $0x4] sm:$0xf] %vm961_vm10, %v955_v24 }
 0x5c9 PF: > { %s13_s14 = sadd.s32 1, %s1300_s14   ;;  %s1572_s12 = smov %s1296_s13 }
 0x5ca   : > { %p10_p5 = scmp.ge.s32.totalorder %s13_s14, 4   ;;  %s1573_s13 = smov %s1575_s15 }
 0x5cc   :  { %12 = sbr.rel (!%p10_p5) target bundleno = 2 (0x2), region = 79 }

// kernel: pooling_transformer_forward.30
= control target key start
LH: loop header
LB: loop body
LE: loop exit
PB: predicated region body
PF: predicated region fallthrough
CT: control target
= control target key end

     0   :  { %v220_v0 = vmov 0.0   ;;  %vm221_vm0 = vmmov 0   ;;  %vm68_vm1 = vcmask 261120   ;;  %s281_s1 = inlined_call_operand.vmem [shape: bf16[32,128], index: 1, kind: input, shape index: {}]   ;;  %s282_s0 = inlined_call_operand.vmem [shape: bf16[48,32], index: 0, kind: input, shape index: {}]   ;;  %s283_s2 = inlined_call_operand.vmem [shape: f32[1,128], index: 2, kind: input, shape index: {}]   ;;  %s284_s3 = inlined_call_operand.vmem [shape: f32[48,128], index: 3, kind: output, shape index: {}]  }
   0x1   :  { %209 = vmatprep.subr.bf16.mxu1 %v220_v0  ;;  %v215_v1 = vld [vmem:[%s281_s1] sm:$0xff]   ;;  %193 = vmatprep.subr.bf16.mxu0 %v220_v0  ;;  %v216_v2 = vld [vmem:[%s281_s1 + $0x8] sm:$0xff]   ;;  %v219_v5 = vld [vmem:[%s282_s0 + $0x10] sm:$0xff]  }
   0x2   :  { %201 = vmatprep.mubr.msk.bf16.mxu1 %vm221_vm0, %v220_v0  ;;  %197 = vmatprep.mubr.msk.bf16.mxu0 %vm221_vm0, %v220_v0  ;;  %v217_v3 = vld [vmem:[%s282_s0 + $0x8] sm:$0xff]   ;;  %v218_v4 = vld [vmem:[%s282_s0] sm:$0xff]  }
   0x3   :  { %211 = vmatpush3.bf16.msra.mxu1 %v215_v1  ;;  %194 = vmatpush3.bf16.msra.mxu0 %v215_v1  ;;  %v187_v6 = vld [vmem:[%s283_s2] ss:$0 sm:$0xff] }
   0x4   :  { %210 = vmatprep.subr.bf16.mxu1 %v220_v0  ;;  %195 = vmatprep.subr.bf16.mxu0 %v220_v0 }
   0x7   :  { %212 = vmatpush3.bf16.msra.mxu1 %v216_v2  ;;  %196 = vmatpush3.bf16.msra.mxu0 %v216_v2 }
   0xa   :  { %202 = vmatmul.mubr.msk.bf16.vlgmr.msra.gmra.mrb[0].mxu1 %vm68_vm1, %v217_v3  ;;  %198 = vmatmul.mubr.msk.bf16.vlgmr.msra.gmra.mrb[0].mxu0 %vm68_vm1, %v218_v4 }
   0xb   :  { %205 = vmatprep.mubr.msk.bf16.mxu1 %vm221_vm0, %v220_v0 }
  0x12   :  { %206 = vmatmul.mubr.msk.bf16.gmra.mrb[4].mxu1 %vm68_vm1, %v219_v5 }
  0xdd   :  { %v120_v7 = vpop.f32.mrb[0].mxu1  ;;  %v112_v8 = vpop.f32.mrb[0].mxu0 }
  0xde   :  { %v165_v9 = vadd.f32 %v187_v6, %v120_v7  ;;  %v203_v10 = vpop.f32.mrb[1].mxu1  ;;  %v163_v11 = vadd.f32 %v187_v6, %v112_v8  ;;  %v199_v12 = vpop.f32.mrb[1].mxu0 }
  0xdf   :  { %v123_v13 = vpop.f32.mrb[2].mxu1  ;;  %v115_v14 = vpop.f32.mrb[2].mxu0 }
  0xe0   :  { %171 = vst [vmem:[%s284_s3 + $0x10] sm:$0xff] %v165_v9  ;;  %v166_v15 = vadd.f32 %v187_v6, %v123_v13  ;;  %v204_v16 = vpop.f32.mrb[3].mxu1  ;;  %169 = vst [vmem:[%s284_s3] sm:$0xff] %v163_v11  ;;  %v164_v17 = vadd.f32 %v187_v6, %v115_v14  ;;  %v200_v18 = vpop.f32.mrb[3].mxu0 }
  0xe2   :  { %172 = vst [vmem:[%s284_s3 + $0x18] sm:$0xff] %v166_v15  ;;  %170 = vst [vmem:[%s284_s3 + $0x8] sm:$0xff] %v164_v17 }
  0xe5   :  { %v128_v19 = vpop.f32.mrb[4].mxu1 }
  0xe6   :  { %v167_v20 = vadd.f32 %v187_v6, %v128_v19  ;;  %v207_v21 = vpop.f32.mrb[5].mxu1 }
  0xe7   :  { %v131_v22 = vpop.f32.mrb[6].mxu1 }
  0xe8   :  { %173 = vst [vmem:[%s284_s3 + $0x20] sm:$0xff] %v167_v20  ;;  %v168_v23 = vadd.f32 %v187_v6, %v131_v22  ;;  %v208_v24 = vpop.f32.mrb[7].mxu1 }
  0xea   :  { %174 = vst [vmem:[%s284_s3 + $0x28] sm:$0xff] %v168_v23 }

// kernel: pooling_transformer_forward.32
= control target key start
LH: loop header
LB: loop body
LE: loop exit
PB: predicated region body
PF: predicated region fallthrough
CT: control target
= control target key end

     0   :  { %v123_v0 = vmov 0.0   ;;  %vm124_vm0 = vmmov 0   ;;  %vm38_vm1 = vcmask 130048   ;;  %s160_s1 = inlined_call_operand.vmem [shape: bf16[16,128], index: 1, kind: input, shape index: {}]   ;;  %s161_s0 = inlined_call_operand.vmem [shape: bf16[16,16], index: 0, kind: input, shape index: {}]   ;;  %s162_s2 = inlined_call_operand.vmem [shape: f32[1,128], index: 2, kind: input, shape index: {}]   ;;  %s163_s3 = inlined_call_operand.vmem [shape: f32[16,128], index: 3, kind: output, shape index: {}]  }
   0x1   :  { %113 = vmatprep.subr.bf16.mxu0 %v123_v0  ;;  %v121_v1 = vld [vmem:[%s160_s1] sm:$0xff]   ;;  %115 = vmatprep.mubr.msk.bf16.mxu0 %vm124_vm0, %v123_v0 }
   0x2   :  { %v122_v2 = vld [vmem:[%s161_s0] sm:$0xff]   ;;  %114 = vmatpush3.bf16.msra.mxu0 %v121_v1 }
   0x3   :  { %v110_v3 = vld [vmem:[%s162_s2] ss:$0 sm:$0xff] }
   0x5   :  { %116 = vmatmul.mubr.msk.bf16.vlgmr.msra.gmra.mrb[0].mxu0 %vm38_vm1, %v122_v2 }
  0xd8   :  { %v76_v4 = vpop.f32.mrb[0].mxu0 }
  0xd9   :  { %v99_v5 = vadd.f32 %v110_v3, %v76_v4  ;;  %v117_v6 = vpop.f32.mrb[1].mxu0 }
  0xda   :  { %v79_v7 = vpop.f32.mrb[2].mxu0 }
  0xdb   :  { %101 = vst [vmem:[%s163_s3] sm:$0xff] %v99_v5  ;;  %v100_v8 = vadd.f32 %v110_v3, %v79_v7  ;;  %v118_v9 = vpop.f32.mrb[3].mxu0 }
  0xdd   :  { %102 = vst [vmem:[%s163_s3 + $0x8] sm:$0xff] %v100_v8 }

// kernel: pooling_transformer_forward.33
= control target key start
LH: loop header
LB: loop body
LE: loop exit
PB: predicated region body
PF: predicated region fallthrough
CT: control target
= control target key end

     0   :  { %vm16_vm0 = vcmask 261120   ;;  %vm70_vm1 = vcmask 257024   ;;  %s129_s0 = inlined_call_operand.vmem [shape: f32[16,32], index: 0, kind: input, shape index: {}]   ;;  %s130_s1 = inlined_call_operand.vmem [shape: f32[1,32], index: 1, kind: input, shape index: {}]   ;;  %s131_s2 = inlined_call_operand.vmem [shape: f32[1,32], index: 2, kind: input, shape index: {}]   ;;  %s132_s3 = inlined_call_operand.vmem [shape: bf16[16,32], index: 3, kind: output, shape index: {}]  }
   0x1   :  { %v14_v0 = vld [vmem:[%s129_s0] sm:$0xff]  ;;  %v15_v1 = vld [vmem:[%s129_s0 + $0x8] sm:$0xff] }
   0x2   :  { %v17_v2 = vsel %vm16_vm0, %v14_v0, 0.0  ;;  %v20_v3 = vsel %vm16_vm0, %v15_v1, 0.0  ;;  %v77_v21 = vld [vmem:[%s130_s1] ss:$0 sm:$0xff] }
   0x3   :  { %18 = vadd.xlane.f32.xlu0 %v17_v2  ;;  %v78_v23 = vld [vmem:[%s131_s2] ss:$0 sm:$0xff] }
   0x7   :  { %21 = vadd.xlane.f32.xlu0 %v20_v3 }
  0x90   :  { %v19_v4 = vpop.xlane.xlu0 %18 }
  0x91   :  { %v24_v5 = vmul.f32 0.03125, %v19_v4 }
  0x93   :  { %v26_v6 = vsub.f32 %v14_v0, %v24_v5 }
  0x94   :  { %v22_v7 = vpop.xlane.xlu0 %21 }
  0x95   :  { %v25_v8 = vmul.f32 0.03125, %v22_v7  ;;  %v28_v9 = vmul.f32 %v26_v6, %v26_v6 }
  0x97   :  { %v27_v10 = vsub.f32 %v15_v1, %v25_v8  ;;  %v30_v11 = vsel %vm16_vm0, %v28_v9, 0.0 }
  0x98   :  { %31 = vadd.xlane.f32.xlu1 %v30_v11 }
  0x99   :  { %v29_v12 = vmul.f32 %v27_v10, %v27_v10 }
  0x9b   :  { %v33_v13 = vsel %vm16_vm0, %v29_v12, 0.0 }
  0x9c   :  { %34 = vadd.xlane.f32.xlu1 %v33_v13 }
 0x125   :  { %v32_v14 = vpop.xlane.xlu1 %31 }
 0x126   :  { %v36_v15 = vmul.f32 0.03125, %v32_v14 }
 0x128   :  { %v38_v16 = vadd.f32 1e-06, %v36_v15 }
 0x129   :  { %v35_v17 = vpop.xlane.xlu1 %34 }
 0x12a   :  { %83 = vrsqrt.f32 %v38_v16  ;;  %v37_v18 = vmul.f32 0.03125, %v35_v17 }
 0x12c   :  { %v39_v19 = vadd.f32 1e-06, %v37_v18 }
 0x12e   :  { %85 = vrsqrt.f32 %v39_v19 }
 0x134   :  { %v84_v20 = vpop.eup %83 }
 0x135   :  { %v42_v22 = vmul.f32 %v84_v20, %v26_v6 }
 0x137   :  { %v51_v24 = vmul.f32 %v77_v21, %v42_v22 }
 0x138   :  { %v86_v25 = vpop.eup %85 }
 0x139   :  { %v60_v26 = vadd.f32 %v78_v23, %v51_v24  ;;  %v43_v27 = vmul.f32 %v86_v25, %v27_v10 }
 0x13b   :  { %v81_v28 = vpack.c.bf16 %v60_v26, %v60_v26  ;;  %v52_v29 = vmul.f32 %v77_v21, %v43_v27 }
 0x13d   :  { %71 = vst.msk [vmem:[%s132_s3] sm:$0xf] %vm70_vm1, %v81_v28  ;;  %v61_v30 = vadd.f32 %v78_v23, %v52_v29 }
 0x13f   :  { %v82_v31 = vpack.c.bf16 %v61_v30, %v61_v30 }
 0x141   :  { %72 = vst.msk [vmem:[%s132_s3 + $0x4] sm:$0xf] %vm70_vm1, %v82_v31 }

// kernel: pooling_transformer_forward.34
= control target key start
LH: loop header
LB: loop body
LE: loop exit
PB: predicated region body
PF: predicated region fallthrough
CT: control target
= control target key end

     0   :  { %v153_v0 = vmov 0.0   ;;  %vm154_vm0 = vmmov 0   ;;  %vm46_vm1 = vcmask 261120   ;;  %s190_s1 = inlined_call_operand.vmem [shape: bf16[32,128], index: 1, kind: input, shape index: {}]   ;;  %s191_s0 = inlined_call_operand.vmem [shape: bf16[16,32], index: 0, kind: input, shape index: {}]   ;;  %s192_s2 = inlined_call_operand.vmem [shape: f32[1,128], index: 2, kind: input, shape index: {}]   ;;  %s193_s3 = inlined_call_operand.vmem [shape: bf16[16,128], index: 3, kind: output, shape index: {}]  }
   0x1   :  { %140 = vmatprep.subr.bf16.mxu0 %v153_v0  ;;  %v150_v1 = vld [vmem:[%s190_s1] sm:$0xff]   ;;  %144 = vmatprep.mubr.msk.bf16.mxu0 %vm154_vm0, %v153_v0  ;;  %v151_v2 = vld [vmem:[%s190_s1 + $0x8] sm:$0xff]  }
   0x2   :  { %141 = vmatpush3.bf16.msra.mxu0 %v150_v1  ;;  %v152_v3 = vld [vmem:[%s191_s0] sm:$0xff]  }
   0x3   :  { %142 = vmatprep.subr.bf16.mxu0 %v153_v0  ;;  %v127_v5 = vld [vmem:[%s192_s2] ss:$0 sm:$0xff] }
   0x6   :  { %143 = vmatpush3.bf16.msra.mxu0 %v151_v2 }
   0x9   :  { %145 = vmatmul.mubr.msk.bf16.vlgmr.msra.gmra.mrb[0].mxu0 %vm46_vm1, %v152_v3 }
  0xdc   :  { %v84_v4 = vpop.f32.mrb[0].mxu0 }
  0xdd   :  { %v146_v6 = vpop.f32.mrb[1].mxu0  ;;  %v107_v8 = vadd.f32 %v127_v5, %v84_v4 }
  0xde   :  { %v87_v7 = vpop.f32.mrb[2].mxu0 }
  0xdf   :  { %v108_v9 = vadd.f32 %v127_v5, %v87_v7  ;;  %v147_v10 = vpop.f32.mrb[3].mxu0 }
  0xe1   :  { %v135_v11 = vpack.c.bf16 %v108_v9, %v107_v8 }
  0xe3   :  { %136 = vst [vmem:[%s193_s3] sm:$0xff] %v135_v11  }

// kernel: pooling_transformer_forward.31
= control target key start
LH: loop header
LB: loop body
LE: loop exit
PB: predicated region body
PF: predicated region fallthrough
CT: control target
= control target key end

     0   :  { %s1944_s12 = smov 0   ;;  %s3107_s0 = inlined_call_operand.vmem [shape: f32[2,16,9,128], index: 0, kind: input, shape index: {}]   ;;  %s3108_s1 = inlined_call_operand.vmem [shape: f32[16,2,9], index: 1, kind: input, shape index: {}]   ;;  %s3109_s2 = inlined_call_operand.vmem [shape: f32[16,2,1], index: 2, kind: input, shape index: {}]   ;;  %s3110_s3 = inlined_call_operand.vmem [shape: f32[2,16,2,128], index: 3, kind: output, shape index: {}]  }
   0x1 LB: > { %s1842_s13 = sadd.s32 4294967295, %s1913_s12   ;;  %p1846_p0 = scmp.ge.s32.totalorder %s1913_s12, 1  ;;  %s1913_s12 = sphi %s1944_s12, %s13_s12  }
   0x2   : > { %p137_p1 = scmp.lt.s32.totalorder %s1913_s12, 3 }
   0x4   : > { %p138_p2 = pnand %p1846_p0, %p137_p1 }
   0x6   : > { %141 = sbr.rel (%p138_p2) target bundleno = 487 (0x1e7), region = 32 }
   0xd   : > { %v1955_v0 = vld [vmem:[%s3108_s1 + $0x4] sm:$0x3]  ;;  %v1960_v1 = vld [vmem:[%s3108_s1] sm:$0x3]  ;;  %v1915_v2 = vmov 1   ;;  %v3111_v3 = vmov 0  }
   0xe   : > { %1889 = vset.pattern.permute.xlu0 %v1915_v2  ;;  %1888 = vset.pattern.permute.xlu1 %v3111_v3  ;;  %v1968_v4 = vld [vmem:[%s3108_s1 + $0x6] sm:$0x3]  ;;  %v1975_v5 = vld [vmem:[%s3108_s1 + $0xa] sm:$0x3]  ;;  %v1982_v6 = vld [vmem:[%s3108_s1 + $0xe] sm:$0x3] }
   0xf   : > { %295 = vperm.xlu1 %1888, %v1955_v0   ;;  %444 = vperm.xlu0 %1889, %v1960_v1   ;;  %3125 = vst [vmem:[#allocation2_spill] sm:$0xff] %v1975_v5  ;;  %3126 = vst [vmem:[#allocation3_spill] sm:$0xff] %v1982_v6  ;;  %v1989_v7 = vld [vmem:[%s3108_s1 + $0x12] sm:$0x3]  ;;  %v1996_v8 = vld [vmem:[%s3108_s1 + $0x16] sm:$0x3] }
  0x10   : > { %3127 = vst [vmem:[#allocation4_spill] sm:$0xff] %v1989_v7  ;;  %3128 = vst [vmem:[#allocation5_spill] sm:$0xff] %v1996_v8  ;;  %v2003_v9 = vld [vmem:[%s3108_s1 + $0x1a] sm:$0x3]  ;;  %v2010_v10 = vld [vmem:[%s3108_s1 + $0x1e] sm:$0x3] }
  0x11   : > { %3129 = vst [vmem:[#allocation6_spill] sm:$0xff] %v2003_v9  ;;  %3130 = vst [vmem:[#allocation7_spill] sm:$0xff] %v2010_v10  ;;  %v2017_v11 = vld [vmem:[%s3108_s1 + $0x2] sm:$0x3]  ;;  %v1917_v12 = vmov 2   ;;  %v1918_v19 = vmov 3  }
  0x12   : > { %v2024_v13 = vld [vmem:[%s3108_s1 + $0x8] sm:$0x3]  ;;  %v2031_v14 = vld [vmem:[%s3108_s1 + $0xc] sm:$0x3]  ;;  %v2038_v15 = vld [vmem:[%s3108_s1 + $0x10] sm:$0x3] }
  0x13   : > { %300 = vperm.xlu1 %1888, %v1968_v4   ;;  %456 = vperm.xlu0 %1889, %v1968_v4   ;;  %v2045_v16 = vld [vmem:[%s3108_s1 + $0x14] sm:$0x3]  ;;  %v2052_v17 = vld [vmem:[%s3108_s1 + $0x18] sm:$0x3]  ;;  %v2059_v18 = vld [vmem:[%s3108_s1 + $0x1c] sm:$0x3] }
  0x14   : > { %v1919_v20 = vmov 4   ;;  %v1920_v21 = vmov 5   ;;  %v1921_v38 = vmov 6   ;;  %v1922_v53 = vmov 7   ;;  %p161_p3 = scmp.lt.s32.totalorder %s1842_s13, 1 }
  0x15   : > { %v3113_v3 = vmov 8  }
  0x16   : > { %s3296_s13 = smov (!%p161_p3, %s1842_s13), 1 }
  0x17   : > { %310 = vperm.xlu1 %1888, %v1975_v5   ;;  %464 = vperm.xlu0 %1889, %v1975_v5   ;;  %s1869_s21 = sshll.u32 %s3296_s13, 8  ;;  %s1870_s6 = sshll.u32 %s3296_s13, 5 }
  0x18   : > { %s2295_s24 = scalar_lea.vmem %s3107_s0, %s1869_s21  ;;  %s3023_s8 = scalar_lea.vmem %s3110_s3, %s1870_s6 }
  0x1b   : > { %320 = vperm.xlu1 %1888, %v1982_v6   ;;  %472 = vperm.xlu0 %1889, %v1982_v6  }
  0x1f   : > { %330 = vperm.xlu1 %1888, %v1989_v7   ;;  %480 = vperm.xlu0 %1889, %v1989_v7  }
  0x23   : > { %340 = vperm.xlu1 %1888, %v1996_v8   ;;  %488 = vperm.xlu0 %1889, %v1996_v8  }
  0x27   : > { %350 = vperm.xlu1 %1888, %v2003_v9   ;;  %496 = vperm.xlu0 %1889, %v2003_v9  }
  0x2b   : > { %360 = vperm.xlu1 %1888, %v2010_v10   ;;  %504 = vperm.xlu0 %1889, %v2010_v10  }
  0x2f   : > { %1890 = vset.pattern.permute.xlu1 %v1915_v2  ;;  %1892 = vset.pattern.permute.xlu0 %v1917_v12 }
  0x30   : > { %448 = vperm.xlu1 %1890, %v2017_v11   ;;  %608 = vperm.xlu0 %1892, %v2017_v11  }
  0x34   : > { %452 = vperm.xlu1 %1890, %v1955_v0   ;;  %620 = vperm.xlu0 %1892, %v2024_v13  }
  0x38   : > { %460 = vperm.xlu1 %1890, %v2024_v13   ;;  %628 = vperm.xlu0 %1892, %v2031_v14  }
  0x3c   : > { %468 = vperm.xlu1 %1890, %v2031_v14   ;;  %636 = vperm.xlu0 %1892, %v2038_v15  }
  0x40   : > { %476 = vperm.xlu1 %1890, %v2038_v15   ;;  %644 = vperm.xlu0 %1892, %v2045_v16  }
  0x44   : > { %484 = vperm.xlu1 %1890, %v2045_v16   ;;  %652 = vperm.xlu0 %1892, %v2052_v17  }
  0x48   : > { %492 = vperm.xlu1 %1890, %v2052_v17   ;;  %660 = vperm.xlu0 %1892, %v2059_v18  }
  0x4c   : > { %500 = vperm.xlu1 %1890, %v2059_v18   ;;  %1893 = vset.pattern.permute.xlu0 %v1918_v19 }
  0x4d   : > { %764 = vperm.xlu0 %1893, %v1960_v1  }
  0x50   : > { %1891 = vset.pattern.permute.xlu1 %v1917_v12 }
  0x51   : > { %604 = vperm.xlu1 %1891, %v1960_v1   ;;  %776 = vperm.xlu0 %1893, %v1968_v4  }
  0x55   : > { %612 = vperm.xlu1 %1891, %v1955_v0   ;;  %784 = vperm.xlu0 %1893, %v1975_v5  }
  0x59   : > { %616 = vperm.xlu1 %1891, %v1968_v4   ;;  %792 = vperm.xlu0 %1893, %v1982_v6  }
  0x5d   : > { %624 = vperm.xlu1 %1891, %v1975_v5   ;;  %800 = vperm.xlu0 %1893, %v1989_v7  }
  0x61   : > { %632 = vperm.xlu1 %1891, %v1982_v6   ;;  %808 = vperm.xlu0 %1893, %v1996_v8  }
  0x65   : > { %640 = vperm.xlu1 %1891, %v1989_v7   ;;  %816 = vperm.xlu0 %1893, %v2003_v9  }
  0x69   : > { %648 = vperm.xlu1 %1891, %v1996_v8   ;;  %824 = vperm.xlu0 %1893, %v2010_v10  }
  0x6d   : > { %656 = vperm.xlu1 %1891, %v2003_v9   ;;  %1896 = vset.pattern.permute.xlu0 %v1919_v20 }
  0x6e   : > { %928 = vperm.xlu0 %1896, %v2017_v11  }
  0x71   : > { %664 = vperm.xlu1 %1891, %v2010_v10  }
  0x72   : > { %940 = vperm.xlu0 %1896, %v2024_v13  }
  0x75   : > { %1894 = vset.pattern.permute.xlu1 %v1918_v19 }
  0x76   : > { %768 = vperm.xlu1 %1894, %v2017_v11   ;;  %948 = vperm.xlu0 %1896, %v2031_v14  }
  0x7a   : > { %772 = vperm.xlu1 %1894, %v1955_v0   ;;  %956 = vperm.xlu0 %1896, %v2038_v15  }
  0x7e   : > { %780 = vperm.xlu1 %1894, %v2024_v13   ;;  %964 = vperm.xlu0 %1896, %v2045_v16  }
  0x82   : > { %788 = vperm.xlu1 %1894, %v2031_v14   ;;  %972 = vperm.xlu0 %1896, %v2052_v17  }
  0x86   : > { %796 = vperm.xlu1 %1894, %v2038_v15   ;;  %980 = vperm.xlu0 %1896, %v2059_v18  }
  0x8a   : > { %804 = vperm.xlu1 %1894, %v2045_v16   ;;  %1897 = vset.pattern.permute.xlu0 %v1920_v21 }
  0x8b   : > { %1084 = vperm.xlu0 %1897, %v1960_v1  }
  0x8e   : > { %v2095_v22 = vpop.permute.xlu1 %295  ;;  %812 = vperm.xlu1 %1894, %v2052_v17   ;;  %v2098_v23 = vpop.permute.xlu0 %444 }
  0x8f   : > { %3131 = vst [vmem:[#allocation8_spill] sm:$0xff] %v2095_v22  ;;  %3132 = vst [vmem:[#allocation9_spill] sm:$0xff] %v2098_v23  ;;  %1096 = vperm.xlu0 %1897, %v1968_v4  }
  0x92   : > { %v2101_v24 = vpop.permute.xlu1 %300  ;;  %820 = vperm.xlu1 %1894, %v2059_v18   ;;  %v2104_v25 = vpop.permute.xlu0 %456 }
  0x93   : > { %1104 = vperm.xlu0 %1897, %v1975_v5  }
  0x96   : > { %v2107_v26 = vpop.permute.xlu1 %310  ;;  %1895 = vset.pattern.permute.xlu1 %v1919_v20  ;;  %v2109_v27 = vpop.permute.xlu0 %464 }
  0x97   : > { %924 = vperm.xlu1 %1895, %v1960_v1   ;;  %1112 = vperm.xlu0 %1897, %v1982_v6  }
  0x9a   : > { %v2113_v28 = vpop.permute.xlu1 %320  ;;  %v2115_v29 = vpop.permute.xlu0 %472 }
  0x9b   : > { %932 = vperm.xlu1 %1895, %v1955_v0   ;;  %1120 = vperm.xlu0 %1897, %v1989_v7  }
  0x9e   : > { %v2119_v30 = vpop.permute.xlu1 %330  ;;  %v2121_v31 = vpop.permute.xlu0 %480 }
  0x9f   : > { %936 = vperm.xlu1 %1895, %v1968_v4   ;;  %1128 = vperm.xlu0 %1897, %v1996_v8  }
  0xa2   : > { %v2125_v32 = vpop.permute.xlu1 %340  ;;  %v2127_v33 = vpop.permute.xlu0 %488 }
  0xa3   : > { %944 = vperm.xlu1 %1895, %v1975_v5   ;;  %1136 = vperm.xlu0 %1897, %v2003_v9  }
  0xa6   : > { %v2131_v34 = vpop.permute.xlu1 %350  ;;  %v2133_v35 = vpop.permute.xlu0 %496 }
  0xa7   : > { %952 = vperm.xlu1 %1895, %v1982_v6   ;;  %1144 = vperm.xlu0 %1897, %v2010_v10  }
  0xaa   : > { %v2137_v36 = vpop.permute.xlu1 %360  ;;  %v2139_v37 = vpop.permute.xlu0 %504 }
  0xab   : > { %960 = vperm.xlu1 %1895, %v1989_v7   ;;  %1900 = vset.pattern.permute.xlu0 %v1921_v38 }
  0xac   : > { %1248 = vperm.xlu0 %1900, %v2017_v11  }
  0xaf   : > { %v2143_v39 = vpop.permute.xlu1 %448  ;;  %968 = vperm.xlu1 %1895, %v1996_v8   ;;  %v2146_v40 = vpop.permute.xlu0 %608 }
  0xb0   : > { %3133 = vst [vmem:[#allocation10_spill] sm:$0xff] %v2143_v39  ;;  %3134 = vst [vmem:[#allocation11_spill] sm:$0xff] %v2146_v40  ;;  %1260 = vperm.xlu0 %1900, %v2024_v13   ;;  %v2338_v39 = vld [vmem:[%s2295_s24 + $0x70] sm:$0xff] }
  0xb3   : > { %v2149_v41 = vpop.permute.xlu1 %452  ;;  %976 = vperm.xlu1 %1895, %v2003_v9   ;;  %v2152_v42 = vpop.permute.xlu0 %620 }
  0xb4   : > { %3135 = vst [vmem:[#allocation12_spill] sm:$0xff] %v2149_v41  ;;  %3136 = vst [vmem:[#allocation13_spill] sm:$0xff] %v2152_v42  ;;  %1268 = vperm.xlu0 %1900, %v2031_v14  }
  0xb7   : > { %v2155_v43 = vpop.permute.xlu1 %460  ;;  %984 = vperm.xlu1 %1895, %v2010_v10   ;;  %v2158_v44 = vpop.permute.xlu0 %628 }
  0xb8   : > { %3137 = vst [vmem:[#allocation14_spill] sm:$0xff] %v2155_v43  ;;  %3138 = vst [vmem:[#allocation15_spill] sm:$0xff] %v2158_v44  ;;  %1276 = vperm.xlu0 %1900, %v2038_v15  }
  0xbb   : > { %v2161_v45 = vpop.permute.xlu1 %468  ;;  %1898 = vset.pattern.permute.xlu1 %v1920_v21  ;;  %v2163_v46 = vpop.permute.xlu0 %636 }
  0xbc   : > { %3139 = vst [vmem:[#allocation16_spill] sm:$0xff] %v2161_v45  ;;  %3140 = vst [vmem:[#allocation17_spill] sm:$0xff] %v2163_v46  ;;  %1088 = vperm.xlu1 %1898, %v2017_v11   ;;  %1284 = vperm.xlu0 %1900, %v2045_v16   ;;  %v2317_v46 = vld [vmem:[%s2295_s24 + $0x50] sm:$0xff] }
  0xbf   : > { %v2167_v47 = vpop.permute.xlu1 %476  ;;  %v2169_v48 = vpop.permute.xlu0 %644 }
  0xc0   : > { %3141 = vst [vmem:[#allocation18_spill] sm:$0xff] %v2167_v47  ;;  %3142 = vst [vmem:[#allocation19_spill] sm:$0xff] %v2169_v48  ;;  %1092 = vperm.xlu1 %1898, %v1955_v0   ;;  %1292 = vperm.xlu0 %1900, %v2052_v17  }
  0xc3   : > { %v2173_v49 = vpop.permute.xlu1 %484  ;;  %v2175_v50 = vpop.permute.xlu0 %652 }
  0xc4   : > { %3143 = vst [vmem:[#allocation20_spill] sm:$0xff] %v2173_v49  ;;  %3144 = vst [vmem:[#allocation21_spill] sm:$0xff] %v2175_v50  ;;  %1100 = vperm.xlu1 %1898, %v2024_v13   ;;  %1300 = vperm.xlu0 %1900, %v2059_v18  }
  0xc7   : > { %v2179_v51 = vpop.permute.xlu1 %492  ;;  %v2181_v52 = vpop.permute.xlu0 %660 }
  0xc8   : > { %3145 = vst [vmem:[#allocation22_spill] sm:$0xff] %v2179_v51  ;;  %3146 = vst [vmem:[#allocation23_spill] sm:$0xff] %v2181_v52  ;;  %1108 = vperm.xlu1 %1898, %v2031_v14   ;;  %1901 = vset.pattern.permute.xlu0 %v1922_v53 }
  0xc9   : > { %1404 = vperm.xlu0 %1901, %v1960_v1  }
  0xcb   : > { %v2185_v54 = vpop.permute.xlu1 %500 }
  0xcc   : > { %3147 = vst [vmem:[#allocation24_spill] sm:$0xff] %v2185_v54  ;;  %1116 = vperm.xlu1 %1898, %v2038_v15   ;;  %v2188_v55 = vpop.permute.xlu0 %764 }
  0xcd   : > { %3148 = vst [vmem:[#allocation25_spill] sm:$0xff] %v2188_v55  ;;  %1416 = vperm.xlu0 %1901, %v1968_v4  }
  0xd0   : > { %1124 = vperm.xlu1 %1898, %v2045_v16   ;;  %v2192_v56 = vpop.permute.xlu1 %604  ;;  %v2194_v57 = vpop.permute.xlu0 %776 }
  0xd1   : > { %3149 = vst [vmem:[#allocation26_spill] sm:$0xff] %v2192_v56  ;;  %1424 = vperm.xlu0 %1901, %v1975_v5  }
  0xd4   : > { %1132 = vperm.xlu1 %1898, %v2052_v17   ;;  %v2198_v58 = vpop.permute.xlu1 %612  ;;  %v2200_v59 = vpop.permute.xlu0 %784 }
  0xd5   : > { %3150 = vst [vmem:[#allocation27_spill] sm:$0xff] %v2198_v58  ;;  %1432 = vperm.xlu0 %1901, %v1982_v6   ;;  %v2346_v58 = vld [vmem:[%s2295_s24 + $0xb0] sm:$0xff] }
  0xd8   : > { %1140 = vperm.xlu1 %1898, %v2059_v18   ;;  %v2204_v60 = vpop.permute.xlu1 %616  ;;  %v2206_v61 = vpop.permute.xlu0 %792 }
  0xd9   : > { %1440 = vperm.xlu0 %1901, %v1989_v7  }
  0xdc   : > { %1899 = vset.pattern.permute.xlu1 %v1921_v38  ;;  %v2209_v62 = vpop.permute.xlu1 %624  ;;  %v2211_v63 = vpop.permute.xlu0 %800 }
  0xdd   : > { %1244 = vperm.xlu1 %1899, %v1960_v1   ;;  %1448 = vperm.xlu0 %1901, %v1996_v8  }
  0xe0   : > { %v2215_v2 = vpop.permute.xlu1 %632  ;;  %v2217_v12 = vpop.permute.xlu0 %808 }
  0xe1   : > { %1252 = vperm.xlu1 %1899, %v1955_v0   ;;  %1456 = vperm.xlu0 %1901, %v2003_v9  }
  0xe4   : > { %v2221_v19 = vpop.permute.xlu1 %640  ;;  %v2223_v20 = vpop.permute.xlu0 %816 }
  0xe5   : > { %3151 = vst [vmem:[#allocation28_spill] sm:$0xff] %v2223_v20  ;;  %1256 = vperm.xlu1 %1899, %v1968_v4   ;;  %1464 = vperm.xlu0 %1901, %v2010_v10  }
  0xe8   : > { %v2227_v21 = vpop.permute.xlu1 %648  ;;  %v2229_v38 = vpop.permute.xlu0 %824 }
  0xe9   : > { %3152 = vst [vmem:[#allocation29_spill] sm:$0xff] %v2229_v38  ;;  %1264 = vperm.xlu1 %1899, %v1975_v5   ;;  %1904 = vset.pattern.permute.xlu0 %v3113_v3 }
  0xea   : > { %1568 = vperm.xlu0 %1904, %v2017_v11  }
  0xec   : > { %v2234_v54 = vpop.permute.xlu1 %656 }
  0xed   : > { %1272 = vperm.xlu1 %1899, %v1982_v6   ;;  %v2237_v52 = vpop.permute.xlu0 %928 }
  0xee   : > { %3153 = vst [vmem:[#allocation30_spill] sm:$0xff] %v2237_v52  ;;  %1580 = vperm.xlu0 %1904, %v2024_v13  }
  0xf0   : > { %v2240_v51 = vpop.permute.xlu1 %664 }
  0xf1   : > { %3154 = vst [vmem:[#allocation31_spill] sm:$0xff] %v2240_v51  ;;  %1280 = vperm.xlu1 %1899, %v1989_v7   ;;  %v2243_v55 = vpop.permute.xlu0 %940 }
  0xf2   : > { %3155 = vst [vmem:[#allocation32_spill] sm:$0xff] %v2243_v55  ;;  %1588 = vperm.xlu0 %1904, %v2031_v14  }
  0xf5   : > { %1288 = vperm.xlu1 %1899, %v1996_v8   ;;  %v2247_v3 = vpop.permute.xlu1 %768  ;;  %v2249_v50 = vpop.permute.xlu0 %948 }
  0xf6   : > { %3156 = vst [vmem:[#allocation33_spill] sm:$0xff] %v2247_v3  ;;  %3157 = vst [vmem:[#allocation34_spill] sm:$0xff] %v2249_v50  ;;  %1596 = vperm.xlu0 %1904, %v2038_v15  }
  0xf9   : > { %1296 = vperm.xlu1 %1899, %v2003_v9   ;;  %v2253_v52 = vpop.permute.xlu1 %772  ;;  %v2255_v49 = vpop.permute.xlu0 %956 }
  0xfa   : > { %3158 = vst [vmem:[#allocation35_spill] sm:$0xff] %v2253_v52  ;;  %3159 = vst [vmem:[#allocation36_spill] sm:$0xff] %v2255_v49  ;;  %1604 = vperm.xlu0 %1904, %v2045_v16   ;;  %v2343_v52 = vld [vmem:[%s2295_s24 + $0x90] sm:$0xff] }
  0xfd   : > { %1304 = vperm.xlu1 %1899, %v2010_v10   ;;  %v2259_v55 = vpop.permute.xlu1 %780  ;;  %v2261_v56 = vpop.permute.xlu0 %964 }
  0xfe   : > { %3160 = vst [vmem:[#allocation37_spill] sm:$0xff] %v2259_v55  ;;  %3161 = vst [vmem:[#allocation38_spill] sm:$0xff] %v2261_v56  ;;  %1612 = vperm.xlu0 %1904, %v2052_v17   ;;  %v219_v56 = vlaneseq  ;;  %v2303_v55 = vld [vmem:[%s2295_s24 + $0x30] sm:$0xff] }
  0xff   : > { %3171 = vst [vmem:[#allocation47_spill] sm:$0xff] %v2303_v55 }
 0x101   : > { %1902 = vset.pattern.permute.xlu1 %v1922_v53  ;;  %v2264_v50 = vpop.permute.xlu1 %788  ;;  %v2266_v3 = vpop.permute.xlu0 %972  ;;  %v3166_v53 = vmov 0  }
 0x102   : > { %3162 = vst [vmem:[#allocation39_spill] sm:$0xff] %v2264_v50  ;;  %3163 = vst [vmem:[#allocation40_spill] sm:$0xff] %v2266_v3  ;;  %1408 = vperm.xlu1 %1902, %v2017_v11   ;;  %1620 = vperm.xlu0 %1904, %v2059_v18  }
 0x105   : > { %v2272_v49 = vpop.permute.xlu1 %796  ;;  %v2274_v48 = vpop.permute.xlu0 %980 }
 0x106   : > { %3164 = vst [vmem:[#allocation41_spill] sm:$0xff] %v2272_v49  ;;  %3165 = vst [vmem:[#allocation42_spill] sm:$0xff] %v2274_v48  ;;  %1412 = vperm.xlu1 %1902, %v1955_v0   ;;  %1905 = vset.pattern.permute.xlu0 %v3166_v53  ;;  %v2289_v49 = vshrl.u32 %v219_v56, 7 }
 0x107   : > { %285 = vperm.xlu0 %1905, %v1960_v1  }
 0x108   : > { %3169 = vst [vmem:[#allocation45_spill] sm:$0xff] %v2289_v49  ;;  %v2298_v48 = vsub.s32 1, %v2289_v49  ;;  %v2320_v47 = vsub.s32 2, %v2289_v49 }
 0x109   : > { %v2283_v3 = vpop.permute.xlu1 %804 }
 0x10a   : > { %3167 = vst [vmem:[#allocation43_spill] sm:$0xff] %v2283_v3  ;;  %1420 = vperm.xlu1 %1902, %v2024_v13   ;;  %v2287_v50 = vpop.permute.xlu0 %1084  ;;  %v554_v43 = vrot.slane %v2303_v55, %v2320_v47  ;;  %v402_v40 = vrot.slane %v2317_v46, %v2298_v48  ;;  %v562_v22 = vrot.slane %v2317_v46, %v2320_v47 }
 0x10b   : > { %3168 = vst [vmem:[#allocation44_spill] sm:$0xff] %v2287_v50  ;;  %290 = vperm.xlu0 %1905, %v2017_v11   ;;  %v2309_v11 = vsub.s32 0, %v2289_v49  ;;  %v410_v10 = vrot.slane %v2338_v39, %v2298_v48  ;;  %v418_v7 = vrot.slane %v2343_v52, %v2298_v48 }
 0x10d   : > { %v2300_v3 = vpop.permute.xlu1 %812  ;;  %v234_v50 = vrot.slane %v2303_v55, %v2309_v11  ;;  %v242_v42 = vrot.slane %v2317_v46, %v2309_v11  ;;  %v258_v9 = vrot.slane %v2343_v52, %v2309_v11  ;;  %v514_v20 = vmul.f32 %v2115_v29, %v410_v10 }
 0x10e   : > { %3170 = vst [vmem:[#allocation46_spill] sm:$0xff] %v2300_v3  ;;  %1428 = vperm.xlu1 %1902, %v2031_v14   ;;  %v2306_v56 = vpop.permute.xlu0 %1096  ;;  %v394_v3 = vrot.slane %v2303_v55, %v2298_v48 }
 0x10f   : > { %305 = vperm.xlu0 %1905, %v2024_v13   ;;  %v2328_v13 = vsub.s32 3, %v2289_v49  ;;  %v368_v53 = vmul.f32 %v2107_v26, %v242_v42  ;;  %v426_v26 = vrot.slane %v2346_v58, %v2298_v48  ;;  %v570_v42 = vrot.slane %v2338_v39, %v2320_v47 }
 0x110   : > { %v510_v23 = vmul.f32 %v2104_v25, %v394_v3  ;;  %v670_v25 = vmul.f32 %v2204_v60, %v554_v43  ;;  %v266_v43 = vrot.slane %v2346_v58, %v2309_v11  ;;  %v2375_v60 = vld [vmem:[%s2295_s24 + $0xd0] sm:$0xff] }
 0x111   : > { %v2322_v45 = vpop.permute.xlu1 %820  ;;  %v714_v3 = vrot.slane %v2303_v55, %v2328_v13  ;;  %v674_v10 = vmul.f32 %v2215_v2, %v570_v42  ;;  %v372_v2 = vmul.f32 %v2119_v30, %v258_v9  ;;  %v738_v42 = vrot.slane %v2343_v52, %v2328_v13 }
 0x112   : > { %3172 = vst [vmem:[#allocation48_spill] sm:$0xff] %v2322_v45  ;;  %1436 = vperm.xlu1 %1902, %v2038_v15   ;;  %v2325_v44 = vpop.permute.xlu0 %1104  ;;  %v366_v45 = vmul.f32 %v2101_v24, %v234_v50  ;;  %v250_v24 = vrot.slane %v2338_v39, %v2309_v11  ;;  %v2361_v50 = vsub.s32 5, %v2289_v49  ;;  %v3175_v30 = vmov 8  }
 0x113   : > { %315 = vperm.xlu0 %1905, %v2031_v14  }
 0x114   : > { %v526_v8 = vadd.f32 %v510_v23, %v366_v45  ;;  %v672_v23 = vmul.f32 %v2209_v62, %v562_v22  ;;  %v1034_v5 = vrot.slane %v2303_v55, %v2361_v50  ;;  %v370_v51 = vmul.f32 %v2113_v28, %v250_v24 }
 0x115   : > { %v1042_v29 = vrot.slane %v2317_v46, %v2361_v50 }
 0x116   : > { %1444 = vperm.xlu1 %1902, %v2045_v16   ;;  %v2351_v14 = vpop.permute.xlu1 %924  ;;  %v2353_v41 = vpop.permute.xlu0 %1112  ;;  %v686_v6 = vadd.f32 %v670_v25, %v526_v8  ;;  %v1150_v25 = vmul.f32 %v2306_v56, %v1034_v5  ;;  %v1050_v5 = vrot.slane %v2338_v39, %v2361_v50 }
 0x117   : > { %3173 = vst [vmem:[#allocation49_spill] sm:$0xff] %v2351_v14  ;;  %325 = vperm.xlu0 %1905, %v2038_v15   ;;  %v512_v14 = vmul.f32 %v2109_v27, %v402_v40  ;;  %v2378_v15 = vsub.s32 4, %v2289_v49  ;;  %v2383_v27 = vld [vmem:[%s2295_s24 + $0xf0] sm:$0xff]  ;;  %v722_v40 = vrot.slane %v2317_v46, %v2328_v13  ;;  %v830_v49 = vmul.f32 %v2194_v57, %v714_v3 }
 0x118   : > { %v434_v57 = vrot.slane %v2375_v60, %v2298_v48  ;;  %v578_v3 = vrot.slane %v2343_v52, %v2320_v47  ;;  %v1152_v56 = vmul.f32 %v2325_v44, %v1042_v29  ;;  %v594_v44 = vrot.slane %v2375_v60, %v2320_v47 }
 0x119   : > { %v874_v22 = vrot.slane %v2303_v55, %v2378_v15  ;;  %v528_v62 = vadd.f32 %v512_v14, %v368_v53  ;;  %v832_v53 = vmul.f32 %v2200_v59, %v722_v40  ;;  %v846_v8 = vadd.f32 %v830_v49, %v686_v6 }
 0x11a   : > { %1452 = vperm.xlu1 %1902, %v2052_v17   ;;  %v2391_v45 = vpop.permute.xlu1 %932  ;;  %v2393_v38 = vpop.permute.xlu0 %1120  ;;  %v882_v59 = vrot.slane %v2317_v46, %v2378_v15  ;;  %v530_v40 = vadd.f32 %v514_v20, %v370_v51  ;;  %v676_v9 = vmul.f32 %v2221_v19, %v578_v3  ;;  %v518_v19 = vmul.f32 %v2127_v33, %v426_v26  ;;  %v1659_v3 = vld [vmem:[%s3109_s2] sm:$0x3] }
 0x11b   : > { %3174 = vst [vmem:[#allocation50_spill] sm:$0xff] %v2391_v45  ;;  %335 = vperm.xlu0 %1905, %v2045_v16   ;;  %v274_v45 = vrot.slane %v2375_v60, %v2309_v11  ;;  %v730_v16 = vrot.slane %v2338_v39, %v2328_v13  ;;  %v688_v28 = vadd.f32 %v672_v23, %v528_v62 }
 0x11c   : > { %v516_v23 = vmul.f32 %v2121_v31, %v418_v7  ;;  %v586_v62 = vrot.slane %v2346_v58, %v2320_v47  ;;  %v690_v51 = vadd.f32 %v674_v10, %v530_v40  ;;  %v1154_v29 = vmul.f32 %v2353_v41, %v1050_v5 }
 0x11d   : > { %v834_v49 = vmul.f32 %v2206_v61, %v730_v16  ;;  %v848_v31 = vadd.f32 %v832_v53, %v688_v28  ;;  %v374_v61 = vmul.f32 %v2125_v32, %v266_v43  ;;  %v746_v16 = vrot.slane %v2346_v58, %v2328_v13 }
 0x11e   : > { %1460 = vperm.xlu1 %1902, %v2059_v18   ;;  %v937_v14 = vpop.permute.xlu1 %936  ;;  %v2418_v24 = vpop.permute.xlu0 %1128  ;;  %v898_v53 = vrot.slane %v2343_v52, %v2378_v15  ;;  %v836_v32 = vmul.f32 %v2211_v63, %v738_v42  ;;  %v678_v43 = vmul.f32 %v2227_v21, %v586_v62  ;;  %v376_v40 = vmul.f32 %v2131_v34, %v274_v45 }
 0x11f   : > { %v990_v55 = vmul.f32 %v937_v14, %v874_v22  ;;  %345 = vperm.xlu0 %1905, %v2052_v17   ;;  %v890_v17 = vrot.slane %v2338_v39, %v2378_v15  ;;  %v850_v28 = vadd.f32 %v834_v49, %v690_v51  ;;  %v520_v63 = vmul.f32 %v2133_v35, %v434_v57 }
 0x120   : > { %v442_v21 = vrot.slane %v2383_v27, %v2298_v48  ;;  %v754_v41 = vrot.slane %v2375_v60, %v2328_v13  ;;  %v906_v42 = vrot.slane %v2346_v58, %v2378_v15  ;;  %v838_v34 = vmul.f32 %v2217_v12, %v746_v16  ;;  %v1664_v12 = vld [vmem:[%s3109_s2 + $0xa] sm:$0x3] }
 0x121   : > { %v1006_v6 = vadd.f32 %v990_v55, %v846_v8  ;;  %v532_v8 = vadd.f32 %v516_v23, %v372_v2  ;;  %v1662_v2 = vld [vmem:[%s3109_s2 + $0x6] sm:$0x3]  ;;  %v680_v45 = vmul.f32 %v2234_v54, %v594_v44  ;;  %v536_v51 = vadd.f32 %v520_v63, %v376_v40  ;;  %v3180_v40 = vld [vmem:[#allocation3_spill] sm:$0xff] }
 0x122   : > { %1903 = vset.pattern.permute.xlu1 %v3175_v30  ;;  %v945_v7 = vpop.permute.xlu1 %944  ;;  %v2437_v20 = vpop.permute.xlu0 %1136  ;;  %v3176_v54 = vrot.slane %v2383_v27, %v2309_v11  ;;  %v3179_v44 = vld [vmem:[#allocation2_spill] sm:$0xff] }
 0x123   : > { %v992_v22 = vmul.f32 %v945_v7, %v882_v59  ;;  %1564 = vperm.xlu1 %1903, %v1960_v1   ;;  %355 = vperm.xlu0 %1905, %v2059_v18   ;;  %v2442_v55 = vadd.f32 %v1150_v25, %v1006_v6  ;;  %v1058_v1 = vrot.slane %v2343_v52, %v2361_v50  ;;  %v3177_v7 = vld [vmem:[#allocation28_spill] sm:$0xff] }
 0x124   : > { %v692_v33 = vadd.f32 %v676_v9, %v532_v8  ;;  %v534_v59 = vadd.f32 %v518_v19, %v374_v61  ;;  %v378_v9 = vmul.f32 %v2137_v36, %v3176_v54  ;;  %v914_v61 = vrot.slane %v2375_v60, %v2378_v15  ;;  %v3178_v19 = vld [vmem:[#allocation31_spill] sm:$0xff] }
 0x125   : > { %v1008_v18 = vadd.f32 %v992_v22, %v848_v31  ;;  %v1156_v5 = vmul.f32 %v2393_v38, %v1058_v1  ;;  %v522_v38 = vmul.f32 %v2139_v37, %v442_v21  ;;  %v840_v31 = vmul.f32 %v3177_v7, %v754_v41 }
 0x126   : > { %v953_v26 = vpop.permute.xlu1 %952  ;;  %v2459_v10 = vpop.permute.xlu0 %1144  ;;  %v694_v35 = vadd.f32 %v678_v43, %v534_v59  ;;  %v852_v62 = vadd.f32 %v836_v32, %v692_v33  ;;  %v762_v1 = vrot.slane %v2383_v27, %v2328_v13  ;;  %v1074_v33 = vrot.slane %v2375_v60, %v2361_v50 }
 0x127   : > { %v994_v14 = vmul.f32 %v953_v26, %v890_v17  ;;  %1572 = vperm.xlu1 %1903, %v1955_v0   ;;  %1677 = vperm.xlu0 %1905, %v1659_v3   ;;  %v2463_v25 = vadd.f32 %v1152_v56, %v1008_v18  ;;  %v602_v0 = vrot.slane %v2383_v27, %v2320_v47  ;;  %v1666_v18 = vld [vmem:[%s3109_s2 + $0xe] sm:$0x3] }
 0x128   : > { %v696_v56 = vadd.f32 %v680_v45, %v536_v51  ;;  %v854_v8 = vadd.f32 %v838_v34, %v694_v35 }
 0x129   : > { %v1010_v23 = vadd.f32 %v994_v14, %v850_v28  ;;  %v682_v16 = vmul.f32 %v3178_v19, %v602_v0  ;;  %v1160_v0 = vmul.f32 %v2437_v20, %v1074_v33  ;;  %v3189_v19 = vmov 0   ;;  %v2576_v33 = vld [vmem:[%s2295_s24 + $0x20] sm:$0xff] }
 0x12a   : > { %v961_v57 = vpop.permute.xlu1 %960  ;;  %v856_v28 = vadd.f32 %v840_v31, %v696_v56  ;;  %v3187_v56 = vld [vmem:[#allocation7_spill] sm:$0xff] }
 0x12b   : > { %v996_v6 = vmul.f32 %v961_v57, %v898_v53  ;;  %1576 = vperm.xlu1 %1903, %v1968_v4   ;;  %1692 = vperm.xlu0 %1905, %v1662_v2   ;;  %v2482_v17 = vpop.permute.xlu0 %1248  ;;  %v2484_v49 = vadd.f32 %v1154_v29, %v1010_v23  ;;  %v1066_v4 = vrot.slane %v2346_v58, %v2361_v50  ;;  %v3181_v2 = vld [vmem:[#allocation29_spill] sm:$0xff]  ;;  %v3182_v57 = vld [vmem:[#allocation4_spill] sm:$0xff] }
 0x12c   : > { %v538_v53 = vadd.f32 %v522_v38, %v378_v9  ;;  %v922_v29 = vrot.slane %v2383_v27, %v2378_v15  ;;  %v842_v41 = vmul.f32 %v3181_v2, %v762_v1  ;;  %v1082_v23 = vrot.slane %v2383_v27, %v2361_v50  ;;  %3191 = vst [vmem:[#allocation29_spill] sm:$0xff] %v2576_v33 }
 0x12d   : > { %v1012_v30 = vadd.f32 %v996_v6, %v852_v62  ;;  %v1158_v32 = vmul.f32 %v2418_v24, %v1066_v4  ;;  %v1668_v24 = vld [vmem:[%s3109_s2 + $0x12] sm:$0x3]  ;;  %v1670_v6 = vld [vmem:[%s3109_s2 + $0x16] sm:$0x3]  ;;  %v1672_v4 = vld [vmem:[%s3109_s2 + $0x1a] sm:$0x3] }
 0x12e   : > { %v969_v22 = vpop.permute.xlu1 %968  ;;  %v698_v14 = vadd.f32 %v682_v16, %v538_v53  ;;  %v1162_v20 = vmul.f32 %v2459_v10, %v1082_v23  ;;  %v1674_v10 = vld [vmem:[%s3109_s2 + $0x1e] sm:$0x3]  ;;  %v1663_v53 = vld [vmem:[%s3109_s2 + $0x8] sm:$0x3]  ;;  %v3194_v23 = vld [vmem:[#allocation8_spill] sm:$0xff] }
 0x12f   : > { %v998_v3 = vmul.f32 %v969_v22, %v906_v42  ;;  %1584 = vperm.xlu1 %1903, %v3179_v44   ;;  %1702 = vperm.xlu0 %1905, %v1664_v12   ;;  %v2501_v36 = vpop.permute.xlu0 %1260  ;;  %v2503_v37 = vadd.f32 %v1156_v5, %v1012_v30  ;;  %v3183_v12 = vld [vmem:[#allocation5_spill] sm:$0xff]  ;;  %v3185_v30 = vld [vmem:[#allocation6_spill] sm:$0xff] }
 0x130   : > { %v858_v35 = vadd.f32 %v842_v41, %v698_v14  ;;  %v1661_v44 = vld [vmem:[%s3109_s2 + $0x4] sm:$0x3]  ;;  %v550_v14 = vrot.slane %v2576_v33, %v2320_v47  ;;  %v710_v41 = vrot.slane %v2576_v33, %v2328_v13 }
 0x131   : > { %v1014_v43 = vadd.f32 %v998_v3, %v854_v8 }
 0x132   : > { %v977_v26 = vpop.permute.xlu1 %976 }
 0x133   : > { %v1000_v59 = vmul.f32 %v977_v26, %v914_v61  ;;  %1592 = vperm.xlu1 %1903, %v3180_v40   ;;  %1712 = vperm.xlu0 %1905, %v1666_v18   ;;  %v2516_v63 = vpop.permute.xlu0 %1268  ;;  %v2518_v21 = vadd.f32 %v1158_v32, %v1014_v43  ;;  %v1660_v61 = vld [vmem:[%s3109_s2 + $0x2] sm:$0x3]  ;;  %v390_v26 = vrot.slane %v2576_v33, %v2298_v48 }
 0x135   : > { %v1016_v42 = vadd.f32 %v1000_v59, %v856_v28  ;;  %v1665_v28 = vld [vmem:[%s3109_s2 + $0xc] sm:$0x3] }
 0x136   : > { %v985_v34 = vpop.permute.xlu1 %984 }
 0x137   : > { %v1002_v45 = vmul.f32 %v985_v34, %v922_v29  ;;  %1600 = vperm.xlu1 %1903, %v3182_v57   ;;  %1722 = vperm.xlu0 %1905, %v1668_v24   ;;  %v2528_v62 = vpop.permute.xlu0 %1276  ;;  %v2530_v5 = vadd.f32 %v1160_v0, %v1016_v42  ;;  %v230_v29 = vrot.slane %v2576_v33, %v2309_v11  ;;  %v3193_v24 = vld [vmem:[#allocation12_spill] sm:$0xff]  ;;  %v3195_v34 = vld [vmem:[#allocation27_spill] sm:$0xff] }
 0x138   : > { %v509_v2 = vmul.f32 %v3193_v24, %v390_v26  ;;  %v1667_v0 = vld [vmem:[%s3109_s2 + $0x10] sm:$0x3]  ;;  %v1671_v24 = vld [vmem:[%s3109_s2 + $0x18] sm:$0x3] }
 0x139   : > { %v1018_v51 = vadd.f32 %v1002_v45, %v858_v35  ;;  %v365_v42 = vmul.f32 %v3194_v23, %v230_v29  ;;  %v669_v35 = vmul.f32 %v3195_v34, %v550_v14  ;;  %v870_v45 = vrot.slane %v2576_v33, %v2378_v15  ;;  %v3200_v34 = vld [vmem:[#allocation47_spill] sm:$0xff] }
 0x13b   : > { %1608 = vperm.xlu1 %1903, %v3183_v12   ;;  %v2537_v54 = vpop.permute.xlu1 %1088  ;;  %1732 = vperm.xlu0 %1905, %v1670_v6   ;;  %v2539_v9 = vpop.permute.xlu0 %1284  ;;  %v2541_v38 = vadd.f32 %v1162_v20, %v1018_v51  ;;  %v525_v20 = vadd.f32 %v509_v2, %v365_v42  ;;  %v3197_v51 = vld [vmem:[#allocation35_spill] sm:$0xff] }
 0x13c   : > { %3184 = vst [vmem:[#allocation28_spill] sm:$0xff] %v2539_v9  ;;  %v829_v12 = vmul.f32 %v3197_v51, %v710_v41  ;;  %v3225_v9 = vld [vmem:[#allocation26_spill] sm:$0xff] }
 0x13f   : > { %1616 = vperm.xlu1 %1903, %v3185_v30   ;;  %v1093_v7 = vpop.permute.xlu1 %1092  ;;  %1742 = vperm.xlu0 %1905, %v1672_v4   ;;  %v2547_v31 = vpop.permute.xlu0 %1292  ;;  %v1030_v4 = vrot.slane %v2576_v33, %v2361_v50  ;;  %v1669_v30 = vld [vmem:[%s3109_s2 + $0x14] sm:$0x3] }
 0x140   : > { %3186 = vst [vmem:[#allocation31_spill] sm:$0xff] %v2547_v31 }
 0x141   : > { %v1149_v29 = vmul.f32 %v1093_v7, %v1030_v4 }
 0x143   : > { %1624 = vperm.xlu1 %1903, %v3187_v56   ;;  %v2553_v22 = vpop.permute.xlu1 %1100  ;;  %1752 = vperm.xlu0 %1905, %v1674_v10   ;;  %v2555_v8 = vpop.permute.xlu0 %1300  ;;  %v685_v10 = vadd.f32 %v669_v35, %v525_v20  ;;  %v3198_v56 = vld [vmem:[#allocation50_spill] sm:$0xff] }
 0x144   : > { %3188 = vst [vmem:[#allocation2_spill] sm:$0xff] %v2555_v8 }
 0x147   : > { %1906 = vset.pattern.permute.xlu1 %v3189_v19  ;;  %v2561_v16 = vpop.permute.xlu1 %1108  ;;  %v3199_v19 = vld [vmem:[#allocation45_spill] sm:$0xff] }
 0x148   : > { %1682 = vperm.xlu1 %1906, %v1660_v61   ;;  %v2563_v3 = vpop.permute.xlu0 %1404  ;;  %v989_v61 = vmul.f32 %v3198_v56, %v870_v45  ;;  %v2614_v14 = vsub.s32 7, %v3199_v19  ;;  %v1673_v45 = vld [vmem:[%s3109_s2 + $0x1c] sm:$0x3] }
 0x14a   : > { %v1354_v35 = vrot.slane %v3200_v34, %v2614_v14 }
 0x14b   : > { %v2568_v1 = vpop.permute.xlu1 %1116 }
 0x14c   : > { %1687 = vperm.xlu1 %1906, %v1661_v44   ;;  %v1417_v18 = vpop.permute.xlu0 %1416  ;;  %v2609_v44 = vsub.s32 6, %v3199_v19 }
 0x14e   : > { %v1190_v2 = vrot.slane %v2576_v33, %v2609_v44  ;;  %v1194_v20 = vrot.slane %v3200_v34, %v2609_v44 }
 0x14f   : > { %v2573_v32 = vpop.permute.xlu1 %1124 }
 0x150   : > { %3190 = vst [vmem:[#allocation3_spill] sm:$0xff] %v2573_v32  ;;  %1697 = vperm.xlu1 %1906, %v1663_v53   ;;  %v1425_v43 = vpop.permute.xlu0 %1424 }
 0x153   : > { %v2587_v59 = vpop.permute.xlu1 %1132 }
 0x154   : > { %3192 = vst [vmem:[#allocation4_spill] sm:$0xff] %v2587_v59  ;;  %1707 = vperm.xlu1 %1906, %v1665_v28   ;;  %v1433_v40 = vpop.permute.xlu0 %1432  ;;  %v845_v28 = vadd.f32 %v829_v12, %v685_v10  ;;  %v1362_v10 = vrot.slane %v2317_v46, %v2614_v14  ;;  %v3220_v59 = vld [vmem:[#allocation15_spill] sm:$0xff] }
 0x156   : > { %v1005_v41 = vadd.f32 %v989_v61, %v845_v28  ;;  %v1202_v61 = vrot.slane %v2317_v46, %v2609_v44 }
 0x157   : > { %v2599_v57 = vpop.permute.xlu1 %1140 }
 0x158   : > { %3196 = vst [vmem:[#allocation5_spill] sm:$0xff] %v2599_v57  ;;  %1717 = vperm.xlu1 %1906, %v1667_v0   ;;  %v1441_v6 = vpop.permute.xlu0 %1440  ;;  %v1165_v42 = vadd.f32 %v1149_v29, %v1005_v41  ;;  %v1472_v29 = vmul.f32 %v1425_v43, %v1362_v10  ;;  %v1210_v41 = vrot.slane %v2338_v39, %v2609_v44 }
 0x15c   : > { %1727 = vperm.xlu1 %1906, %v1669_v30   ;;  %v2611_v53 = vpop.permute.xlu1 %1244  ;;  %v1449_v26 = vpop.permute.xlu0 %1448  ;;  %v1470_v30 = vmul.f32 %v1417_v18, %v1354_v35  ;;  %v1370_v18 = vrot.slane %v2338_v39, %v2614_v14 }
 0x160   : > { %1737 = vperm.xlu1 %1906, %v1671_v24   ;;  %v1253_v0 = vpop.permute.xlu1 %1252  ;;  %v2621_v23 = vpop.permute.xlu0 %1456 }
 0x161   : > { %v1309_v7 = vmul.f32 %v1253_v0, %v1190_v2 }
 0x163   : > { %v2630_v51 = vadd.f32 %v1309_v7, %v1165_v42  ;;  %v1474_v7 = vmul.f32 %v1433_v40, %v1370_v18  ;;  %v1386_v40 = vrot.slane %v2346_v58, %v2614_v14 }
 0x164   : > { %1747 = vperm.xlu1 %1906, %v1673_v45   ;;  %v1257_v12 = vpop.permute.xlu1 %1256  ;;  %v2632_v4 = vpop.permute.xlu0 %1464  ;;  %v1378_v45 = vrot.slane %v2343_v52, %v2614_v14 }
 0x165   : > { %3201 = vst [vmem:[#allocation6_spill] sm:$0xff] %v2630_v51  ;;  %v1310_v56 = vmul.f32 %v1257_v12, %v1194_v20 }
 0x167   : > { %v1326_v19 = vadd.f32 %v1310_v56, %v2442_v55  ;;  %v1218_v55 = vrot.slane %v2343_v52, %v2609_v44  ;;  %v1476_v56 = vmul.f32 %v1441_v6, %v1378_v45  ;;  %v2679_v6 = vld [vmem:[%s2295_s24 + $0x40] sm:$0xff]  ;;  %v1242_v45 = vrot.slane %v2383_v27, %v2609_v44 }
 0x168   : > { %v1265_v28 = vpop.permute.xlu1 %1264 }
 0x169   : > { %v1312_v24 = vmul.f32 %v1265_v28, %v1202_v61  ;;  %v2639_v2 = vpop.permute.xlu0 %1568  ;;  %v2643_v0 = vadd.f32 %v1470_v30, %v1326_v19  ;;  %v1226_v30 = vrot.slane %v2346_v58, %v2609_v44  ;;  %v1234_v28 = vrot.slane %v2375_v60, %v2609_v44 }
 0x16a   : > { %v1478_v58 = vmul.f32 %v1449_v26, %v1386_v40 }
 0x16b   : > { %3202 = vst [vmem:[#allocation7_spill] sm:$0xff] %v2643_v0  ;;  %v1328_v42 = vadd.f32 %v1312_v24, %v2463_v25  ;;  %v2673_v24 = vld [vmem:[%s2295_s24] sm:$0xff] }
 0x16c   : > { %v1273_v34 = vpop.permute.xlu1 %1272  ;;  %v382_v26 = vrot.slane %v2673_v24, %v2298_v48  ;;  %v1022_v0 = vrot.slane %v2673_v24, %v2361_v50 }
 0x16d   : > { %v1314_v35 = vmul.f32 %v1273_v34, %v1210_v41  ;;  %v2648_v46 = vpop.permute.xlu0 %1580  ;;  %v2652_v43 = vadd.f32 %v1472_v29, %v1328_v42  ;;  %v2676_v41 = vld [vmem:[%s2295_s24 + $0x10] sm:$0xff]  ;;  %v2685_v34 = vld [vmem:[%s2295_s24 + $0x60] sm:$0xff] }
 0x16f   : > { %3203 = vst [vmem:[#allocation12_spill] sm:$0xff] %v2652_v43  ;;  %v1330_v20 = vadd.f32 %v1314_v35, %v2484_v49  ;;  %v2688_v35 = vld [vmem:[%s2295_s24 + $0x80] sm:$0xff]  ;;  %v706_v43 = vrot.slane %v2676_v41, %v2328_v13 }
 0x170   : > { %v1281_v39 = vpop.permute.xlu1 %1280 }
 0x171   : > { %v1316_v25 = vmul.f32 %v1281_v39, %v1218_v55  ;;  %v2657_v12 = vpop.permute.xlu0 %1588  ;;  %v2661_v10 = vadd.f32 %v1474_v7, %v1330_v20  ;;  %v2703_v39 = vld [vmem:[%s2295_s24 + $0xa0] sm:$0xff] }
 0x172   : > { %3204 = vst [vmem:[#allocation8_spill] sm:$0xff] %v2657_v12  ;;  %v582_v51 = vrot.slane %v2703_v39, %v2320_v47 }
 0x173   : > { %3205 = vst [vmem:[#allocation27_spill] sm:$0xff] %v2661_v10  ;;  %v1332_v52 = vadd.f32 %v1316_v25, %v2503_v37  ;;  %v1394_v37 = vrot.slane %v2375_v60, %v2614_v14  ;;  %v386_v60 = vrot.slane %v2676_v41, %v2298_v48  ;;  %v546_v25 = vrot.slane %v2676_v41, %v2320_v47 }
 0x174   : > { %v1289_v61 = vpop.permute.xlu1 %1288 }
 0x175   : > { %v1318_v49 = vmul.f32 %v1289_v61, %v1226_v30  ;;  %v2666_v19 = vpop.permute.xlu0 %1596  ;;  %v2670_v29 = vadd.f32 %v1476_v56, %v1332_v52  ;;  %v2708_v30 = vld [vmem:[%s2295_s24 + $0xc0] sm:$0xff]  ;;  %v1480_v40 = vmul.f32 %v2621_v23, %v1394_v37  ;;  %v1402_v52 = vrot.slane %v2383_v27, %v2614_v14 }
 0x176   : > { %3206 = vst [vmem:[#allocation35_spill] sm:$0xff] %v2666_v19  ;;  %v2711_v56 = vld [vmem:[%s2295_s24 + $0xe0] sm:$0xff]  ;;  %v574_v23 = vrot.slane %v2688_v35, %v2320_v47  ;;  %v422_v27 = vrot.slane %v2703_v39, %v2298_v48  ;;  %v430_v33 = vrot.slane %v2708_v30, %v2298_v48 }
 0x177   : > { %3207 = vst [vmem:[#allocation50_spill] sm:$0xff] %v2670_v29  ;;  %v1334_v18 = vadd.f32 %v1318_v49, %v2518_v21  ;;  %v398_v21 = vrot.slane %v2679_v6, %v2298_v48  ;;  %v558_v49 = vrot.slane %v2679_v6, %v2320_v47  ;;  %v598_v10 = vrot.slane %v2711_v56, %v2320_v47 }
 0x178   : > { %v1297_v42 = vpop.permute.xlu1 %1296 }
 0x179   : > { %v1320_v55 = vmul.f32 %v1297_v42, %v1234_v28  ;;  %v2690_v7 = vpop.permute.xlu0 %1604  ;;  %v2694_v20 = vadd.f32 %v1478_v58, %v1334_v18  ;;  %v406_v28 = vrot.slane %v2685_v34, %v2298_v48  ;;  %v566_v58 = vrot.slane %v2685_v34, %v2320_v47 }
 0x17a   : > { %3208 = vst [vmem:[#allocation45_spill] sm:$0xff] %v2690_v7  ;;  %v414_v18 = vrot.slane %v2688_v35, %v2298_v48  ;;  %v3217_v7 = vld [vmem:[#allocation13_spill] sm:$0xff] }
 0x17b   : > { %3209 = vst [vmem:[#allocation47_spill] sm:$0xff] %v2694_v20  ;;  %v1336_v61 = vadd.f32 %v1320_v55, %v2530_v5  ;;  %v590_v20 = vrot.slane %v2708_v30, %v2320_v47  ;;  %v2801_v19 = vmul.f32 %v3220_v59, %v566_v58  ;;  %v3222_v58 = vld [vmem:[#allocation18_spill] sm:$0xff] }
 0x17c   : > { %v1305_v42 = vpop.permute.xlu1 %1304 }
 0x17d   : > { %v1322_v5 = vmul.f32 %v1305_v42, %v1242_v45  ;;  %v2729_v37 = vpop.permute.xlu0 %1612  ;;  %v2731_v55 = vadd.f32 %v1480_v40, %v1336_v61  ;;  %v542_v45 = vrot.slane %v2673_v24, %v2320_v47  ;;  %v1482_v40 = vmul.f32 %v2632_v4, %v1402_v52  ;;  %v3223_v47 = vld [vmem:[#allocation17_spill] sm:$0xff] }
 0x17e   : > { %3210 = vst [vmem:[#allocation51_spill] sm:$0xff] %v2729_v37  ;;  %v702_v42 = vrot.slane %v2673_v24, %v2328_v13  ;;  %v2818_v57 = vmul.f32 %v3223_v47, %v574_v23  ;;  %v1038_v47 = vrot.slane %v2679_v6, %v2361_v50 }
 0x17f   : > { %3211 = vst [vmem:[#allocation52_spill] sm:$0xff] %v2731_v55  ;;  %v1338_v61 = vadd.f32 %v1322_v5, %v2541_v38  ;;  %v3214_v55 = vld [vmem:[#allocation9_spill] sm:$0xff]  ;;  %v862_v38 = vrot.slane %v2673_v24, %v2378_v15  ;;  %v667_v12 = vmul.f32 %v3225_v9, %v542_v45 }
 0x180   : > { %v507_v29 = vmul.f32 %v3214_v55, %v382_v26  ;;  %v3219_v55 = vld [vmem:[#allocation14_spill] sm:$0xff]  ;;  %v3229_v9 = vld [vmem:[#allocation25_spill] sm:$0xff] }
 0x181   : > { %v2761_v4 = vpop.permute.xlu1 %1408  ;;  %v2763_v52 = vpop.permute.xlu0 %1620  ;;  %v2765_v5 = vadd.f32 %v1482_v40, %v1338_v61  ;;  %v222_v61 = vrot.slane %v2673_v24, %v2309_v11  ;;  %v2793_v40 = vmul.f32 %v3217_v7, %v558_v49  ;;  %v511_v31 = vmul.f32 %v3219_v55, %v398_v21 }
 0x182   : > { %3212 = vst [vmem:[#allocation53_spill] sm:$0xff] %v2763_v52  ;;  %v3216_v52 = vld [vmem:[#allocation11_spill] sm:$0xff]  ;;  %v1026_v49 = vrot.slane %v2676_v41, %v2361_v50  ;;  %v226_v21 = vrot.slane %v2676_v41, %v2309_v11  ;;  %v2815_v55 = vmul.f32 %v3222_v58, %v414_v18  ;;  %v827_v45 = vmul.f32 %v3229_v9, %v702_v42  ;;  %v3236_v9 = vld [vmem:[#allocation33_spill] sm:$0xff] }
 0x183   : > { %3213 = vst [vmem:[#allocation54_spill] sm:$0xff] %v2765_v5  ;;  %v3215_v5 = vld [vmem:[#allocation10_spill] sm:$0xff]  ;;  %v668_v8 = vmul.f32 %v3216_v52, %v546_v25 }
 0x184   : > { %v508_v37 = vmul.f32 %v3215_v5, %v386_v60  ;;  %v3221_v5 = vld [vmem:[#allocation16_spill] sm:$0xff] }
 0x185   : > { %v2797_v26 = vpop.permute.xlu1 %1412  ;;  %v513_v59 = vmul.f32 %v3221_v5, %v406_v28  ;;  %v3226_v28 = vld [vmem:[#allocation20_spill] sm:$0xff]  ;;  %v3227_v5 = vld [vmem:[#allocation21_spill] sm:$0xff] }
 0x186   : > { %3218 = vst [vmem:[#allocation9_spill] sm:$0xff] %v2797_v26  ;;  %v286_v25 = vpop.permute.xlu0 %285  ;;  %v3224_v26 = vld [vmem:[#allocation19_spill] sm:$0xff]  ;;  %v2831_v18 = vmul.f32 %v3226_v28, %v422_v27  ;;  %v2834_v23 = vmul.f32 %v3227_v5, %v590_v20  ;;  %v1342_v5 = vrot.slane %v2673_v24, %v2614_v14 }
 0x187   : > { %v363_v52 = vmul.f32 %v286_v25, %v222_v61  ;;  %v2823_v7 = vmul.f32 %v3224_v26, %v582_v51  ;;  %v3231_v28 = vld [vmem:[#allocation23_spill] sm:$0xff]  ;;  %v3233_v51 = vld [vmem:[#allocation49_spill] sm:$0xff] }
 0x188   : > { %3228 = vst [vmem:[#allocation10_spill] sm:$0xff] %v2834_v23  ;;  %v2847_v20 = vmul.f32 %v3231_v28, %v598_v10  ;;  %v987_v23 = vmul.f32 %v3233_v51, %v862_v38  ;;  %v3235_v10 = vld [vmem:[#allocation24_spill] sm:$0xff]  ;;  %v1062_v38 = vrot.slane %v2703_v39, %v2361_v50 }
 0x189   : > { %v523_v25 = vadd.f32 %v507_v29, %v363_v52  ;;  %v2828_v32 = vpop.permute.xlu1 %1420  ;;  %v238_v29 = vrot.slane %v2679_v6, %v2309_v11  ;;  %v3230_v52 = vld [vmem:[#allocation22_spill] sm:$0xff]  ;;  %v3237_v28 = vld [vmem:[#allocation44_spill] sm:$0xff] }
 0x18a   : > { %v291_v26 = vpop.permute.xlu0 %290  ;;  %v2844_v27 = vmul.f32 %v3230_v52, %v430_v33  ;;  %3232 = vst [vmem:[#allocation11_spill] sm:$0xff] %v2847_v20  ;;  %v3234_v33 = vrot.slane %v2711_v56, %v2298_v48  ;;  %v828_v52 = vmul.f32 %v3236_v9, %v706_v43  ;;  %v1147_v20 = vmul.f32 %v3237_v28, %v1022_v0 }
 0x18b   : > { %v683_v58 = vadd.f32 %v667_v12, %v523_v25  ;;  %v364_v61 = vmul.f32 %v291_v26, %v226_v21  ;;  %v1182_v12 = vrot.slane %v2673_v24, %v2609_v44  ;;  %v3238_v48 = vrot.slane %v2676_v41, %v2378_v15 }
 0x18c   : > { %v2862_v26 = vmul.f32 %v3235_v10, %v3234_v33  ;;  %v3240_v43 = vrot.slane %v2679_v6, %v2328_v13  ;;  %v3241_v33 = vld [vmem:[#allocation37_spill] sm:$0xff]  ;;  %v1070_v10 = vrot.slane %v2708_v30, %v2361_v50  ;;  %v1148_v28 = vmul.f32 %v2537_v54, %v1026_v49 }
 0x18d   : > { %v843_v42 = vadd.f32 %v827_v45, %v683_v58  ;;  %v524_v21 = vadd.f32 %v508_v37, %v364_v61  ;;  %v2856_v25 = vpop.permute.xlu1 %1428  ;;  %v246_v37 = vrot.slane %v2685_v34, %v2309_v11  ;;  %v3239_v61 = vld [vmem:[#allocation30_spill] sm:$0xff]  ;;  %v3244_v54 = vrot.slane %v2685_v34, %v2378_v15 }
 0x18e   : > { %v306_v51 = vpop.permute.xlu0 %305  ;;  %v988_v58 = vmul.f32 %v3239_v61, %v3238_v48  ;;  %v831_v0 = vmul.f32 %v3241_v33, %v3240_v43  ;;  %v1346_v48 = vrot.slane %v2676_v41, %v2614_v14  ;;  %v254_v43 = vrot.slane %v2688_v35, %v2309_v11 }
 0x18f   : > { %v1003_v60 = vadd.f32 %v987_v23, %v843_v42  ;;  %v684_v24 = vadd.f32 %v668_v8, %v524_v21  ;;  %v367_v45 = vmul.f32 %v306_v51, %v238_v29  ;;  %v1078_v8 = vrot.slane %v2711_v56, %v2361_v50 }
 0x190   : > { %v1307_v23 = vmul.f32 %v2611_v53, %v1182_v12  ;;  %v1467_v51 = vmul.f32 %v2563_v3, %v1342_v5  ;;  %v3245_v3 = vld [vmem:[#allocation34_spill] sm:$0xff]  ;;  %v3246_v5 = vrot.slane %v2688_v35, %v2378_v15 }
 0x191   : > { %v844_v29 = vadd.f32 %v828_v52, %v684_v24  ;;  %v527_v42 = vadd.f32 %v511_v31, %v367_v45  ;;  %v2883_v21 = vpop.permute.xlu1 %1436  ;;  %v1163_v9 = vadd.f32 %v1147_v20, %v1003_v60  ;;  %v3242_v52 = vrot.slane %v2679_v6, %v2378_v15  ;;  %v3243_v60 = vld [vmem:[#allocation32_spill] sm:$0xff] }
 0x192   : > { %v316_v61 = vpop.permute.xlu0 %315  ;;  %v993_v49 = vmul.f32 %v3245_v3, %v3244_v54  ;;  %v3247_v24 = vld [vmem:[#allocation36_spill] sm:$0xff]  ;;  %v1151_v3 = vmul.f32 %v2553_v22, %v1038_v47  ;;  %v3253_v22 = vrot.slane %v2688_v35, %v2328_v13  ;;  %v3254_v47 = vld [vmem:[#allocation41_spill] sm:$0xff] }
 0x193   : > { %v1004_v33 = vadd.f32 %v988_v58, %v844_v29  ;;  %v687_v53 = vadd.f32 %v2793_v40, %v527_v42  ;;  %v369_v12 = vmul.f32 %v316_v61, %v246_v37  ;;  %v1323_v31 = vadd.f32 %v1307_v23, %v1163_v9  ;;  %v1852_v58 = vld [vmem:[%s2295_s24 + $0x18] ss:$0 sm:$0xff] }
 0x194   : > { %v991_v20 = vmul.f32 %v3243_v60, %v3242_v52  ;;  %v995_v45 = vmul.f32 %v3247_v24, %v3246_v5  ;;  %v3248_v40 = vrot.slane %v2676_v41, %v2609_v44  ;;  %v3249_v52 = vrot.slane %v2685_v34, %v2328_v13  ;;  %v3250_v60 = vld [vmem:[#allocation39_spill] sm:$0xff] }
 0x195   : > { %v847_v23 = vadd.f32 %v831_v0, %v687_v53  ;;  %v529_v29 = vadd.f32 %v513_v59, %v369_v12  ;;  %v2909_v42 = vpop.permute.xlu1 %1444  ;;  %v2911_v9 = vadd.f32 %v1467_v51, %v1323_v31  ;;  %v1164_v61 = vadd.f32 %v1148_v28, %v1004_v33  ;;  %v3252_v33 = vld [vmem:[#allocation38_spill] sm:$0xff] }
 0x196   : > { %v1308_v37 = vmul.f32 %v2482_v17, %v3248_v40  ;;  %v833_v54 = vmul.f32 %v3250_v60, %v3249_v52  ;;  %v1468_v5 = vmul.f32 %v2761_v4, %v1346_v48  ;;  %v326_v41 = vpop.permute.xlu0 %325  ;;  %v262_v17 = vrot.slane %v2703_v39, %v2309_v11  ;;  %v1855_v52 = vld [vmem:[%s2295_s24 + $0x48] ss:$0 sm:$0xff] }
 0x197   : > { %v1007_v0 = vadd.f32 %v991_v20, %v847_v23  ;;  %v689_v59 = vadd.f32 %v2801_v19, %v529_v29  ;;  %v371_v53 = vmul.f32 %v326_v41, %v254_v43  ;;  %v3251_v28 = vrot.slane %v2703_v39, %v2378_v15 }
 0x198   : > { %v1324_v51 = vadd.f32 %v1308_v37, %v1164_v61  ;;  %v835_v4 = vmul.f32 %v3254_v47, %v3253_v22  ;;  %v1628_v48 = vmul.f32 %v1852_v58, %v2639_v2  ;;  %v1358_v31 = vrot.slane %v2679_v6, %v2614_v14 }
 0x199   : > { %v997_v12 = vmul.f32 %v3252_v33, %v3251_v28  ;;  %v849_v20 = vadd.f32 %v833_v54, %v689_v59  ;;  %v531_v19 = vadd.f32 %v2815_v55, %v371_v53  ;;  %v2934_v43 = vpop.permute.xlu1 %1452  ;;  %v1167_v40 = vadd.f32 %v1151_v3, %v1007_v0 }
 0x19a   : > { %v1484_v24 = vadd.f32 %v1468_v5, %v1324_v51  ;;  %v3255_v37 = vrot.slane %v2679_v6, %v2609_v44  ;;  %v3256_v29 = vrot.slane %v2685_v34, %v2361_v50  ;;  %v1366_v58 = vrot.slane %v2685_v34, %v2614_v14  ;;  %v336_v61 = vpop.permute.xlu0 %335  ;;  %v3258_v5 = vld [vmem:[#allocation43_spill] sm:$0xff] }
 0x19b   : > { %v270_v55 = vrot.slane %v2708_v30, %v2309_v11  ;;  %v1009_v60 = vadd.f32 %v993_v49, %v849_v20  ;;  %v691_v54 = vadd.f32 %v2818_v57, %v531_v19  ;;  %v373_v3 = vmul.f32 %v336_v61, %v262_v17  ;;  %v3262_v19 = vld [vmem:[#allocation40_spill] sm:$0xff] }
 0x19c   : > { %v1311_v23 = vmul.f32 %v2501_v36, %v3255_v37  ;;  %v1153_v2 = vmul.f32 %v2561_v16, %v3256_v29  ;;  %v2950_v6 = vadd.f32 %v1628_v48, %v1484_v24  ;;  %v3257_v36 = vrot.slane %v2703_v39, %v2328_v13  ;;  %v1857_v48 = vld [vmem:[%s2295_s24 + $0x68] ss:$0 sm:$0xff]  ;;  %v3266_v61 = vld [vmem:[#allocation48_spill] sm:$0xff] }
 0x19d   : > { %v1471_v41 = vmul.f32 %v2828_v32, %v1358_v31  ;;  %v278_v0 = vrot.slane %v2711_v56, %v2309_v11  ;;  %v3259_v49 = vrot.slane %v2685_v34, %v2609_v44  ;;  %v851_v17 = vadd.f32 %v835_v4, %v691_v54  ;;  %v2964_v51 = vpop.permute.xlu1 %1460  ;;  %v1851_v37 = vld [vmem:[%s2295_s24 + $0x8] ss:$0 sm:$0xff] }
 0x19e   : > { %v837_v16 = vmul.f32 %v3258_v5, %v3257_v36  ;;  %v1327_v59 = vadd.f32 %v1311_v23, %v1167_v40  ;;  %v533_v53 = vadd.f32 %v2831_v18, %v373_v3  ;;  %v1169_v28 = vadd.f32 %v1153_v2, %v1009_v60  ;;  %v346_v47 = vpop.permute.xlu0 %345  ;;  %v3268_v54 = vld [vmem:[#allocation3_spill] sm:$0xff]  ;;  %v3269_v36 = vld [vmem:[#allocation8_spill] sm:$0xff] }
 0x19f   : > { %v1313_v57 = vmul.f32 %v2516_v63, %v3259_v49  ;;  %v3260_v33 = vrot.slane %v2688_v35, %v2361_v50  ;;  %v1631_v11 = vmul.f32 %v1855_v52, %v2648_v46  ;;  %v1473_v22 = vmul.f32 %v2856_v25, %v1366_v58  ;;  %v3264_v46 = vld [vmem:[#allocation46_spill] sm:$0xff] }
 0x1a0   : > { %v1487_v34 = vadd.f32 %v1471_v41, %v1327_v59  ;;  %v1011_v63 = vadd.f32 %v995_v45, %v851_v17  ;;  %v693_v4 = vadd.f32 %v2823_v7, %v533_v53  ;;  %v375_v18 = vmul.f32 %v346_v47, %v270_v55  ;;  %v1859_v41 = vld [vmem:[%s2295_s24 + $0x88] ss:$0 sm:$0xff]  ;;  %v3270_v49 = vld [vmem:[#allocation10_spill] sm:$0xff] }
 0x1a1   : > { %v1155_v32 = vmul.f32 %v2568_v1, %v3260_v33  ;;  %v1329_v31 = vadd.f32 %v1313_v57, %v1169_v28  ;;  %v3261_v20 = vrot.slane %v2708_v30, %v2378_v15  ;;  %v3263_v1 = vrot.slane %v2708_v30, %v2328_v13 }
 0x1a2   : > { %v1374_v25 = vrot.slane %v2688_v35, %v2614_v14  ;;  %v2985_v45 = vadd.f32 %v1631_v11, %v1487_v34  ;;  %v853_v7 = vadd.f32 %v837_v16, %v693_v4  ;;  %v535_v23 = vadd.f32 %v2844_v27, %v375_v18  ;;  %v1565_v27 = vpop.permute.xlu1 %1564  ;;  %v356_v16 = vpop.permute.xlu0 %355  ;;  %v3272_v11 = vld [vmem:[#allocation28_spill] sm:$0xff]  ;;  %v1861_v4 = vld [vmem:[%s2295_s24 + $0xa8] ss:$0 sm:$0xff] }
 0x1a3   : > { %v999_v24 = vmul.f32 %v3262_v19, %v3261_v20  ;;  %v839_v40 = vmul.f32 %v3264_v46, %v3263_v1  ;;  %v1489_v29 = vadd.f32 %v1473_v22, %v1329_v31  ;;  %v1171_v2 = vadd.f32 %v1155_v32, %v1011_v63  ;;  %v3275_v31 = vld [vmem:[#allocation11_spill] sm:$0xff] }
 0x1a4   : > { %v3265_v58 = vrot.slane %v2711_v56, %v2328_v13  ;;  %v3267_v52 = vrot.slane %v2688_v35, %v2609_v44  ;;  %v1157_v3 = vmul.f32 %v3268_v54, %v1062_v38  ;;  %v1633_v5 = vmul.f32 %v1857_v48, %v3269_v36 }
 0x1a5   : > { %v1013_v59 = vadd.f32 %v997_v12, %v853_v7  ;;  %v695_v13 = vadd.f32 %v3270_v49, %v535_v23  ;;  %v1627_v57 = vmul.f32 %v1851_v37, %v1565_v27  ;;  %v377_v17 = vmul.f32 %v356_v16, %v278_v0  ;;  %v3277_v23 = vld [vmem:[#allocation42_spill] sm:$0xff]  ;;  %v3283_v49 = vld [vmem:[#allocation51_spill] sm:$0xff] }
 0x1a6   : > { %v841_v55 = vmul.f32 %v3266_v61, %v3265_v58  ;;  %v1315_v60 = vmul.f32 %v2528_v62, %v3267_v52  ;;  %v1475_v35 = vmul.f32 %v2883_v21, %v1374_v25  ;;  %v1382_v62 = vrot.slane %v2703_v39, %v2614_v14  ;;  %v3273_v21 = vld [vmem:[#allocation35_spill] sm:$0xff]  ;;  %v3018_v48 = vpop.permute.xlu1 %1572  ;;  %v1678_v63 = vpop.permute.xlu0 %1677 }
 0x1a7   : > { %v3007_v53 = vadd.f32 %v1633_v5, %v1489_v29  ;;  %v855_v28 = vadd.f32 %v839_v40, %v695_v13  ;;  %v537_v33 = vadd.f32 %v2862_v26, %v377_v17  ;;  %v1643_v32 = vadd.f32 %v1627_v57, %v2911_v9  ;;  %v1854_v40 = vld [vmem:[%s2295_s24 + $0x38] ss:$0 sm:$0xff]  ;;  %v3279_v29 = vld [vmem:[#allocation31_spill] sm:$0xff] }
 0x1a8   : > { %v1331_v38 = vadd.f32 %v1315_v60, %v1171_v2  ;;  %v1173_v12 = vadd.f32 %v1157_v3, %v1013_v59  ;;  %v3271_v0 = vrot.slane %v2703_v39, %v2609_v44  ;;  %v1635_v47 = vmul.f32 %v1859_v41, %v3273_v21  ;;  %v3274_v39 = vld [vmem:[#allocation4_spill] sm:$0xff]  ;;  %v3281_v60 = vld [vmem:[#allocation45_spill] sm:$0xff]  ;;  %v1863_v3 = vld [vmem:[%s2295_s24 + $0xc8] ss:$0 sm:$0xff] }
 0x1a9   : > { %v1390_v34 = vrot.slane %v2708_v30, %v2614_v14  ;;  %v1159_v9 = vmul.f32 %v3274_v39, %v1070_v10  ;;  %v1015_v18 = vadd.f32 %v999_v24, %v855_v28  ;;  %v697_v20 = vadd.f32 %v3275_v31, %v537_v33  ;;  %v3282_v41 = vld [vmem:[#allocation2_spill] sm:$0xff]  ;;  %v1856_v59 = vld [vmem:[%s2295_s24 + $0x58] ss:$0 sm:$0xff]  ;;  %v3284_v57 = vld [vmem:[#allocation7_spill] sm:$0xff] }
 0x1aa   : > { %v1317_v22 = vmul.f32 %v3272_v11, %v3271_v0  ;;  %v1491_v26 = vadd.f32 %v1475_v35, %v1331_v38  ;;  %v1755_v19 = vadd.f32 %v1678_v63, %v1643_v32  ;;  %v1238_v1 = vrot.slane %v2711_v56, %v2609_v44  ;;  %v1577_v36 = vpop.permute.xlu1 %1576  ;;  %v1858_v11 = vld [vmem:[%s2295_s24 + $0x78] ss:$0 sm:$0xff]  ;;  %v3287_v31 = vld [vmem:[#allocation27_spill] sm:$0xff] }
 0x1ab   : > { %v1477_v46 = vmul.f32 %v2909_v42, %v1382_v62  ;;  %v3276_v7 = vrot.slane %v2711_v56, %v2378_v15  ;;  %v3278_v24 = vrot.slane %v2708_v30, %v2609_v44  ;;  %v857_v58 = vadd.f32 %v841_v55, %v697_v20  ;;  %v3280_v42 = vld [vmem:[#allocation5_spill] sm:$0xff]  ;;  %v1693_v44 = vpop.permute.xlu0 %1692  ;;  %v1865_v62 = vld [vmem:[%s2295_s24 + $0xe8] ss:$0 sm:$0xff] }
 0x1ac   : > { %v3035_v25 = vadd.f32 %v1635_v47, %v1491_v26  ;;  %v1333_v37 = vadd.f32 %v1317_v22, %v1173_v12  ;;  %1771 = vst [vmem:[%s3023_s8] sm:$0x3] %v1755_v19  ;;  %v1175_v61 = vadd.f32 %v1159_v9, %v1015_v18  ;;  %v1161_v52 = vmul.f32 %v3280_v42, %v1078_v8  ;;  %v3285_v22 = vld [vmem:[#allocation53_spill] sm:$0xff]  ;;  %v3286_v47 = vld [vmem:[#allocation12_spill] sm:$0xff] }
 0x1ad   : > { %v1001_v10 = vmul.f32 %v3277_v23, %v3276_v7  ;;  %v1319_v2 = vmul.f32 %v3279_v29, %v3278_v24  ;;  %v1637_v54 = vmul.f32 %v1861_v4, %v3281_v60  ;;  %v1398_v15 = vrot.slane %v2711_v56, %v2614_v14  ;;  %v1860_v18 = vld [vmem:[%s2295_s24 + $0x98] ss:$0 sm:$0xff]  ;;  %v3288_v7 = vld [vmem:[#allocation50_spill] sm:$0xff] }
 0x1ae   : > { %v1493_v30 = vadd.f32 %v1477_v46, %v1333_v37  ;;  %v1479_v5 = vmul.f32 %v2934_v43, %v1390_v34  ;;  %v1630_v27 = vmul.f32 %v1854_v40, %v1577_v36  ;;  %v1321_v50 = vmul.f32 %v3282_v41, %v1238_v1  ;;  %v1585_v43 = vpop.permute.xlu1 %1584  ;;  %v1862_v37 = vld [vmem:[%s2295_s24 + $0xb8] ss:$0 sm:$0xff] }
 0x1af   : > { %v1017_v55 = vadd.f32 %v1001_v10, %v857_v58  ;;  %v1335_v16 = vadd.f32 %v1319_v2, %v1175_v61  ;;  %v1639_v13 = vmul.f32 %v1863_v3, %v3283_v49  ;;  %v1481_v38 = vmul.f32 %v2964_v51, %v1398_v15  ;;  %v1703_v28 = vpop.permute.xlu0 %1702  ;;  %v1864_v58 = vld [vmem:[%s2295_s24 + $0xd8] ss:$0 sm:$0xff]  ;;  %v3289_v61 = vld [vmem:[#allocation47_spill] sm:$0xff]  ;;  %v3293_v49 = vld [vmem:[#allocation54_spill] sm:$0xff] }
 0x1b0   : > { %v3057_v8 = vadd.f32 %v1637_v54, %v1493_v30  ;;  %v1646_v17 = vadd.f32 %v1630_v27, %v3284_v57  ;;  %v1632_v32 = vmul.f32 %v1856_v59, %v1585_v43  ;;  %v1641_v21 = vmul.f32 %v1865_v62, %v3285_v22  ;;  %v3290_v3 = vld [vmem:[#allocation29_spill] sm:$0xff]  ;;  %v3291_v30 = vld [vmem:[#allocation52_spill] sm:$0xff]  ;;  %v1853_v27 = vld [vmem:[%s2295_s24 + $0x28] ss:$0 sm:$0xff] }
 0x1b1   : > { %v1495_v56 = vadd.f32 %v1479_v5, %v1335_v16  ;;  %v1177_v35 = vadd.f32 %v1161_v52, %v1017_v55  ;;  %v1350_v15 = vrot.slane %v3290_v3, %v2614_v14  ;;  %v1629_v14 = vmul.f32 %v1853_v27, %v3018_v48 }
 0x1b2   : > { %v1758_v33 = vadd.f32 %v1693_v44, %v1646_v17  ;;  %v1648_v34 = vadd.f32 %v1632_v32, %v3286_v47  ;;  %v1593_v26 = vpop.permute.xlu1 %1592  ;;  %v1866_v44 = vld [vmem:[%s2295_s24 + $0xf8] ss:$0 sm:$0xff] }
 0x1b3   : > { %v3063_v12 = vadd.f32 %v1639_v13, %v1495_v56  ;;  %v1337_v0 = vadd.f32 %v1321_v50, %v1177_v35  ;;  %v1713_v51 = vpop.permute.xlu0 %1712  ;;  %v1634_v9 = vmul.f32 %v1858_v11, %v1593_v26  ;;  %v3292_v50 = vld [vmem:[#allocation9_spill] sm:$0xff]  ;;  %v3294_v35 = vld [vmem:[#allocation6_spill] sm:$0xff] }
 0x1b4   : > { %1774 = vst [vmem:[%s3023_s8 + $0x6] sm:$0x3] %v1758_v33  ;;  %v1760_v39 = vadd.f32 %v1703_v28, %v1648_v34  ;;  %v1469_v59 = vmul.f32 %v3292_v50, %v1350_v15 }
 0x1b5   : > { %v1497_v63 = vadd.f32 %v1481_v38, %v1337_v0  ;;  %v1650_v20 = vadd.f32 %v1634_v9, %v3287_v31 }
 0x1b6   : > { %1776 = vst [vmem:[%s3023_s8 + $0xa] sm:$0x3] %v1760_v39  ;;  %v1601_v19 = vpop.permute.xlu1 %1600  ;;  %v1485_v62 = vadd.f32 %v1469_v59, %v3294_v35 }
 0x1b7   : > { %v1657_v4 = vadd.f32 %v1641_v21, %v1497_v63  ;;  %v1723_v1 = vpop.permute.xlu0 %1722  ;;  %v1762_v46 = vadd.f32 %v1713_v51, %v1650_v20  ;;  %v1636_v40 = vmul.f32 %v1860_v18, %v1601_v19 }
 0x1b8   : > { %v1645_v43 = vadd.f32 %v1629_v14, %v1485_v62 }
 0x1b9   : > { %1778 = vst [vmem:[%s3023_s8 + $0xe] sm:$0x3] %v1762_v46  ;;  %v1652_v23 = vadd.f32 %v1636_v40, %v3288_v7 }
 0x1ba   : > { %v1609_v10 = vpop.permute.xlu1 %1608 }
 0x1bb   : > { %v1733_v24 = vpop.permute.xlu0 %1732  ;;  %v1764_v29 = vadd.f32 %v1723_v1, %v1652_v23  ;;  %v1638_v2 = vmul.f32 %v1862_v37, %v1609_v10 }
 0x1bd   : > { %1780 = vst [vmem:[%s3023_s8 + $0x12] sm:$0x3] %v1764_v29  ;;  %v1654_v42 = vadd.f32 %v1638_v2, %v3289_v61 }
 0x1be   : > { %v1617_v52 = vpop.permute.xlu1 %1616 }
 0x1bf   : > { %v1766_v60 = vadd.f32 %v1733_v24, %v1654_v42  ;;  %v1640_v54 = vmul.f32 %v1864_v58, %v1617_v52  ;;  %v1743_v36 = vpop.permute.xlu0 %1742 }
 0x1c1   : > { %1782 = vst [vmem:[%s3023_s8 + $0x16] sm:$0x3] %v1766_v60  ;;  %v1656_v5 = vadd.f32 %v1640_v54, %v3291_v30 }
 0x1c2   : > { %v1625_v55 = vpop.permute.xlu1 %1624 }
 0x1c3   : > { %v1768_v16 = vadd.f32 %v1743_v36, %v1656_v5  ;;  %v1642_v41 = vmul.f32 %v1866_v44, %v1625_v55  ;;  %v1753_v57 = vpop.permute.xlu0 %1752 }
 0x1c5   : > { %1784 = vst [vmem:[%s3023_s8 + $0x1a] sm:$0x3] %v1768_v16  ;;  %v1658_v13 = vadd.f32 %v1642_v41, %v3293_v49 }
 0x1c7   : > { %v1770_v17 = vadd.f32 %v1753_v57, %v1658_v13  ;;  %v1683_v56 = vpop.permute.xlu1 %1682 }
 0x1c8   : > { %v1756_v38 = vadd.f32 %v1683_v56, %v2950_v6 }
 0x1c9   : > { %1786 = vst [vmem:[%s3023_s8 + $0x1e] sm:$0x3] %v1770_v17 }
 0x1ca   : > { %1772 = vst [vmem:[%s3023_s8 + $0x2] sm:$0x3] %v1756_v38 }
 0x1cb   : > { %v1688_v28 = vpop.permute.xlu1 %1687 }
 0x1cc   : > { %v1757_v33 = vadd.f32 %v1688_v28, %v1645_v43 }
 0x1ce   : > { %1773 = vst [vmem:[%s3023_s8 + $0x4] sm:$0x3] %v1757_v33 }
 0x1cf   : > { %v1698_v32 = vpop.permute.xlu1 %1697 }
 0x1d0   : > { %v1759_v48 = vadd.f32 %v1698_v32, %v2985_v45 }
 0x1d2   : > { %1775 = vst [vmem:[%s3023_s8 + $0x8] sm:$0x3] %v1759_v48 }
 0x1d3   : > { %v1708_v0 = vpop.permute.xlu1 %1707 }
 0x1d4   : > { %v1761_v11 = vadd.f32 %v1708_v0, %v3007_v53 }
 0x1d6   : > { %1777 = vst [vmem:[%s3023_s8 + $0xc] sm:$0x3] %v1761_v11 }
 0x1d7   : > { %v1718_v22 = vpop.permute.xlu1 %1717 }
 0x1d8   : > { %v1763_v6 = vadd.f32 %v1718_v22, %v3035_v25 }
 0x1da   : > { %1779 = vst [vmem:[%s3023_s8 + $0x10] sm:$0x3] %v1763_v6 }
 0x1db   : > { %v1728_v21 = vpop.permute.xlu1 %1727 }
 0x1dc   : > { %v1765_v47 = vadd.f32 %v1728_v21, %v3057_v8 }
 0x1de   : > { %1781 = vst [vmem:[%s3023_s8 + $0x14] sm:$0x3] %v1765_v47 }
 0x1df   : > { %v1738_v34 = vpop.permute.xlu1 %1737 }
 0x1e0   : > { %v1767_v63 = vadd.f32 %v1738_v34, %v3063_v12 }
 0x1e2   : > { %1783 = vst [vmem:[%s3023_s8 + $0x18] sm:$0x3] %v1767_v63 }
 0x1e3   : > { %v1748_v26 = vpop.permute.xlu1 %1747 }
 0x1e4   : > { %v1769_v45 = vadd.f32 %v1748_v26, %v1657_v4 }
 0x1e6   : > { %1785 = vst [vmem:[%s3023_s8 + $0x1c] sm:$0x3] %v1769_v45 }
 0x1e7 PF: > { %s13_s12 = sadd.s32 1, %s1913_s12  }
 0x1e8   : > { %p10_p4 = scmp.ge.s32.totalorder %s13_s12, 4  }
 0x1ea   :  { %12 = sbr.rel (!%p10_p4) target bundleno = 1 (0x1), region = 62 }

// kernel: pooling_transformer_forward.36
= control target key start
LH: loop header
LB: loop body
LE: loop exit
PB: predicated region body
PF: predicated region fallthrough
CT: control target
= control target key end

     0   :  { %v136_v0 = vmov 0.0   ;;  %vm137_vm0 = vmmov 0   ;;  %vm46_vm1 = vcmask 261120   ;;  %s176_s1 = inlined_call_operand.vmem [shape: bf16[32,128], index: 1, kind: input, shape index: {}]   ;;  %s177_s0 = inlined_call_operand.vmem [shape: bf16[16,32], index: 0, kind: input, shape index: {}]   ;;  %s178_s2 = inlined_call_operand.vmem [shape: f32[1,128], index: 2, kind: input, shape index: {}]   ;;  %s179_s3 = inlined_call_operand.vmem [shape: f32[16,128], index: 3, kind: output, shape index: {}]  }
   0x1   :  { %123 = vmatprep.subr.bf16.mxu0 %v136_v0  ;;  %v133_v1 = vld [vmem:[%s176_s1] sm:$0xff]   ;;  %127 = vmatprep.mubr.msk.bf16.mxu0 %vm137_vm0, %v136_v0  ;;  %v134_v2 = vld [vmem:[%s176_s1 + $0x8] sm:$0xff]  }
   0x2   :  { %124 = vmatpush3.bf16.msra.mxu0 %v133_v1  ;;  %v135_v3 = vld [vmem:[%s177_s0] sm:$0xff]  }
   0x3   :  { %125 = vmatprep.subr.bf16.mxu0 %v136_v0  ;;  %v119_v4 = vld [vmem:[%s178_s2] ss:$0 sm:$0xff] }
   0x6   :  { %126 = vmatpush3.bf16.msra.mxu0 %v134_v2 }
   0x9   :  { %128 = vmatmul.mubr.msk.bf16.vlgmr.msra.gmra.mrb[0].mxu0 %vm46_vm1, %v135_v3 }
  0xdc   :  { %v84_v5 = vpop.f32.mrb[0].mxu0 }
  0xdd   :  { %v107_v6 = vadd.f32 %v119_v4, %v84_v5  ;;  %v129_v7 = vpop.f32.mrb[1].mxu0 }
  0xde   :  { %v87_v8 = vpop.f32.mrb[2].mxu0 }
  0xdf   :  { %109 = vst [vmem:[%s179_s3] sm:$0xff] %v107_v6  ;;  %v108_v9 = vadd.f32 %v119_v4, %v87_v8  ;;  %v130_v10 = vpop.f32.mrb[3].mxu0 }
  0xe1   :  { %110 = vst [vmem:[%s179_s3 + $0x8] sm:$0xff] %v108_v9 }

// kernel: pooling_transformer_forward.38
= control target key start
LH: loop header
LB: loop body
LE: loop exit
PB: predicated region body
PF: predicated region fallthrough
CT: control target
= control target key end

     0   :  { %v136_v0 = vmov 0.0   ;;  %vm137_vm0 = vmmov 0   ;;  %vm46_vm1 = vcmask 261120   ;;  %s176_s1 = inlined_call_operand.vmem [shape: bf16[32,128], index: 1, kind: input, shape index: {}]   ;;  %s177_s0 = inlined_call_operand.vmem [shape: bf16[16,32], index: 0, kind: input, shape index: {}]   ;;  %s178_s2 = inlined_call_operand.vmem [shape: f32[1,128], index: 2, kind: input, shape index: {}]   ;;  %s179_s3 = inlined_call_operand.vmem [shape: f32[16,128], index: 3, kind: output, shape index: {}]  }
   0x1   :  { %123 = vmatprep.subr.bf16.mxu0 %v136_v0  ;;  %v133_v1 = vld [vmem:[%s176_s1] sm:$0xff]   ;;  %127 = vmatprep.mubr.msk.bf16.mxu0 %vm137_vm0, %v136_v0  ;;  %v134_v2 = vld [vmem:[%s176_s1 + $0x8] sm:$0xff]  }
   0x2   :  { %124 = vmatpush3.bf16.msra.mxu0 %v133_v1  ;;  %v135_v3 = vld [vmem:[%s177_s0] sm:$0xff]  }
   0x3   :  { %125 = vmatprep.subr.bf16.mxu0 %v136_v0  ;;  %v119_v4 = vld [vmem:[%s178_s2] ss:$0 sm:$0xff] }
   0x6   :  { %126 = vmatpush3.bf16.msra.mxu0 %v134_v2 }
   0x9   :  { %128 = vmatmul.mubr.msk.bf16.vlgmr.msra.gmra.mrb[0].mxu0 %vm46_vm1, %v135_v3 }
  0xdc   :  { %v84_v5 = vpop.f32.mrb[0].mxu0 }
  0xdd   :  { %v107_v6 = vadd.f32 %v119_v4, %v84_v5  ;;  %v129_v7 = vpop.f32.mrb[1].mxu0 }
  0xde   :  { %v87_v8 = vpop.f32.mrb[2].mxu0 }
  0xdf   :  { %109 = vst [vmem:[%s179_s3] sm:$0xff] %v107_v6  ;;  %v108_v9 = vadd.f32 %v119_v4, %v87_v8  ;;  %v130_v10 = vpop.f32.mrb[3].mxu0 }
  0xe1   :  { %110 = vst [vmem:[%s179_s3 + $0x8] sm:$0xff] %v108_v9 }

// kernel: pooling_transformer_forward.35
= control target key start
LH: loop header
LB: loop body
LE: loop exit
PB: predicated region body
PF: predicated region fallthrough
CT: control target
= control target key end

     0   :  { %s1302_s12 = smov 0   ;;  %s1304_s13 = smov 0   ;;  %s1486_s0 = inlined_call_operand.vmem [shape: bf16[2,5,32], index: 0, kind: input, shape index: {}]   ;;  %s1487_s1 = inlined_call_operand.vmem [shape: bf16[2,5,32], index: 1, kind: input, shape index: {}]   ;;  %s1488_s2 = inlined_call_operand.vmem [shape: bf16[2,5,32], index: 2, kind: input, shape index: {}]   ;;  %s1489_s3 = inlined_call_operand.vmem [shape: bf16[2,5,32], index: 3, kind: output, shape index: {}]  }
   0x1   :  { %s1306_s14 = smov 0  }
   0x2 LB: > { %s39_s15 = sadd.s32 1, %s1265_s13  ;;  %p1096_p0 = scmp.ge.s32.totalorder %s1269_s14, 1  ;;  %s1269_s14 = sphi %s1306_s14, %s13_s14   ;;  %s1265_s13 = sphi %s1304_s13, %s1491_s13   ;;  %s1261_s12 = sphi %s1302_s12, %s1490_s12  }
   0x3   : > { %p41_p1 = scmp.ge.s32.totalorder %s39_s15, 2  ;;  %p214_p2 = scmp.lt.s32.totalorder %s1269_s14, 3 }
   0x5   : > { %s1493_s15 = smov (%p41_p1, %s39_s15), 0  ;;  %p215_p3 = pnand %p1096_p0, %p214_p2 }
   0x6   : > { %p268_p4 = scmp.lt.s32.totalorder (!%p215_p3), %s1261_s12, 1  ;;  %v1271_v0 = vmov (!%p215_p3), 0.0   ;;  %vm1272_vm0 = vmmov (!%p215_p3), 0   ;;  %vm332_vm1 = vcmask (!%p215_p3), 64512   ;;  %vm314_vm2 = vcmask (!%p215_p3), 4096   ;;  %s1275_s23 = smov (!%p215_p3), 120  }
   0x7   : > { %218 = sbr.rel (%p215_p3) target bundleno = 1467 (0x5bb), region = 32  ;;  %1136 = vmatprep.subr.bf16.mxu0 (!%p215_p3), %v1271_v0  ;;  %1138 = vmatprep.mubr.msk.bf16.mxu0 (!%p215_p3), %vm1272_vm0, %v1271_v0  ;;  %v1273_v5 = vmov (!%p215_p3), -inf   ;;  %319 = vst.msk [vmem:[#allocation3] sm:$0x1f] (!%p215_p3), %vm314_vm2, %v1271_v0  ;;  %320 = vst.msk [vmem:[#allocation3 + $0x8] sm:$0x1f] (!%p215_p3), %vm314_vm2, %v1271_v0 }
   0x8   : > { %1142 = vmatprep.subr.bf16.mxu1 (!%p215_p3), %v1271_v0  ;;  %1144 = vmatprep.mubr.msk.bf16.mxu1 (!%p215_p3), %vm1272_vm0, %v1271_v0  ;;  %315 = vst.msk [vmem:[#allocation2] sm:$0x1f] (!%p215_p3), %vm314_vm2, %v1273_v5  ;;  %316 = vst.msk [vmem:[#allocation2 + $0x8] sm:$0x1f] (!%p215_p3), %vm314_vm2, %v1273_v5  ;;  %vm380_vm3 = vcmask (!%p215_p3), 36864   ;;  %v1274_v11 = vmov (!%p215_p3), 0  }
   0x9   : > { %317 = vst.msk [vmem:[#allocation2 + $0x10] sm:$0x1f] (!%p215_p3), %vm314_vm2, %v1273_v5  ;;  %318 = vst.msk [vmem:[#allocation2 + $0x18] sm:$0x1f] (!%p215_p3), %vm314_vm2, %v1273_v5  ;;  %1219 = vset.pattern.permute.xlu0 (!%p215_p3), %v1274_v11  ;;  %1220 = vset.pattern.permute.xlu1 (!%p215_p3), %v1274_v11  ;;  %s1276_s24 = smov (!%p215_p3), 112   ;;  %s1277_s25 = smov (!%p215_p3), 104  }
   0xa   : > { %321 = vst.msk [vmem:[#allocation3 + $0x10] sm:$0x1f] (!%p215_p3), %vm314_vm2, %v1271_v0  ;;  %322 = vst.msk [vmem:[#allocation3 + $0x18] sm:$0x1f] (!%p215_p3), %vm314_vm2, %v1271_v0  ;;  %vm416_vm4 = vcmask (!%p215_p3), 1041408   ;;  %vm417_vm5 = vcmask (!%p215_p3), 1042432  }
   0xb   : > { %v1278_v19 = vmov (!%p215_p3), 65535   ;;  %vm412_vm6 = vcmask (!%p215_p3), 39936   ;;  %vm323_vm7 = vcmask (!%p215_p3), 61440   ;;  %vm894_vm8 = vcmask (!%p215_p3), 59392   ;;  %s1279_s5 = smov (!%p215_p3), 8   ;;  %s1280_s6 = smov (!%p215_p3), 16  }
   0xc   : > { %v418_v20 = vsel (!%p215_p3), %vm416_vm4, 4294967295, %v1278_v19  ;;  %325 = vst.msk [vmem:[#allocation4 + $0x8] sm:$0x1f] (!%p215_p3), %vm323_vm7, %v1271_v0  ;;  %324 = vst.msk [vmem:[#allocation4] sm:$0x1f] (!%p215_p3), %vm323_vm7, %v1271_v0  ;;  %s1281_s7 = smov (!%p215_p3), 24  }
   0xd   : > { %v1376_v21 = vsel (!%p215_p3), %vm417_vm5, %v418_v20, 0  ;;  %326 = vst.msk [vmem:[#allocation4 + $0x10] sm:$0x1f] (!%p215_p3), %vm323_vm7, %v1271_v0  ;;  %327 = vst.msk [vmem:[#allocation4 + $0x18] sm:$0x1f] (!%p215_p3), %vm323_vm7, %v1271_v0  ;;  %vm916_vm11 = vcmask (!%p215_p3), 124992  }
   0xe   : > { %s1495_s12 = smov (!%p268_p4, %s1261_s12), 1  ;;  %vm895_vm9 = vsmask.f32 2304  ;;  %vm937_vm13 = vcmask 190592   ;;  %vm958_vm15 = vcmask 256192  }
   0xf   : > { %s1326_s16 = sshll.u32 %s1495_s12, 2  ;;  %v1360_v14 = vld [vmem:[#allocation2] sm:$0x1f]  ;;  %v524_v56 = vld [vmem:[#allocation2 + $0x8] sm:$0x1f]  ;;  %vm896_vm10 = vmand %vm894_vm8, %vm895_vm9 }
  0x10   : > { %s287_s19 = scalar_lea.vmem %s1487_s1, %s1326_s16  ;;  %s277_s22 = scalar_lea.vmem %s1486_s0, %s1326_s16  ;;  %v662_v60 = vld [vmem:[#allocation2 + $0x10] sm:$0x1f]  ;;  %vm917_vm12 = vmand %vm916_vm11, %vm895_vm9 }
  0x11   : > { %v330_v1 = vld [vmem:[%s287_s19] sm:$0x7]  ;;  %s297_s28 = scalar_lea.vmem %s1488_s2, %s1326_s16  ;;  %s1463_s4 = scalar_lea.vmem %s1489_s3, %s1326_s16  ;;  %vm938_vm14 = vmand %vm937_vm13, %vm895_vm9 }
  0x12   : > { %v337_v2 = vsel %vm332_vm1, %v330_v1, 0  ;;  %v328_v3 = vld [vmem:[%s277_s22] sm:$0x7]  ;;  %v1104_v12 = vcombine.low %v330_v1, %v330_v1  ;;  %v1407_v1 = vld [vmem:[#allocation2 + $0x18] sm:$0x1f] }
  0x13   : > { %1137 = vmatpush3.bf16.xpose.msra.mxu0 %v337_v2  ;;  %v329_v4 = vmul.bf16 1052065461, %v328_v3  ;;  %v1374_v18 = vld [vmem:[%s297_s28] sm:$0x7] }
  0x14   : > { %1154 = vmatprep.subr.bf16.mxu0 %v1271_v0  ;;  %475 = vrot.lane.b32.xlu1 %v1104_v12, %s1275_s23  ;;  %v421_v22 = vand.u32 %v1376_v21, %v1374_v18 }
  0x15   : > { %v1103_v13 = vcombine.low %v329_v4, %v329_v4 }
  0x16   : > { %1143 = vmatpush3.bf16.msra.mxu1 %v421_v22 }
  0x17   : > { %1148 = vmatprep.subr.bf16.mxu1 %v1271_v0 }
  0x18   : > { %470 = vrot.lane.b32.xlu1 %v1103_v13, %s1275_s23 }
  0x1a   : > { %1139 = vmatmul.mubr.msk.bf16.vlgmr.msra.gmra.mrb[0].mxu0 %vm332_vm1, %v329_v4  ;;  %v1106_v4 = vcombine.low %v1374_v18, %v1374_v18 }
  0x1b   : > { %1156 = vmatprep.mubr.msk.bf16.mxu0 %vm1272_vm0, %v1271_v0 }
  0x1c   : > { %613 = vrot.lane.b32.xlu1 %v1104_v12, %s1276_s24 }
  0x20   : > { %611 = vrot.lane.b32.xlu1 %v1103_v13, %s1276_s24 }
  0x24   : > { %748 = vrot.lane.b32.xlu1 %v1104_v12, %s1277_s25 }
  0x28   : > { %746 = vrot.lane.b32.xlu1 %v1103_v13, %s1277_s25 }
  0x86   : > { %v476_v26 = vpop.permute.xlu1 %475 }
  0x87   : > { %v481_v29 = vsel %vm332_vm1, %v476_v26, 0 }
  0x8a   : > { %v471_v27 = vpop.permute.xlu1 %470 }
  0x8e   : > { %v614_v31 = vpop.permute.xlu1 %613 }
  0x8f   : > { %v619_v33 = vsel %vm332_vm1, %v614_v31, 0 }
  0x92   : > { %v612_v32 = vpop.permute.xlu1 %611 }
  0x96   : > { %v749_v34 = vpop.permute.xlu1 %748 }
  0x97   : > { %v754_v35 = vsel %vm332_vm1, %v749_v34, 0 }
  0x9a   : > { %v747_v36 = vpop.permute.xlu1 %746 }
  0xed   : > { %v373_v6 = vpop.f32.mrb[0].mxu0 }
  0xee   : > { %v1140_v7 = vpop.f32.mrb[1].mxu0  ;;  %v381_v8 = vsel %vm380_vm3, %v373_v6, -inf }
  0xef   : > { %382 = vmax.xlane.f32.xlu0 %v381_v8  ;;  %v376_v9 = vpop.f32.mrb[2].mxu0 }
  0xf0   : > { %v1141_v10 = vpop.f32.mrb[3].mxu0 }
 0x17c   : > { %v383_v15 = vpop.xlane.xlu0 %382 }
 0x17d   : > { %v1363_v16 = vmax.f32 %v1360_v14, %v383_v15 }
 0x17f   : > { %v385_v17 = vsub.f32 %v1360_v14, %v1363_v16  ;;  %466 = vst.msk [vmem:[#allocation2] sm:$0x1f] %vm314_vm2, %v1363_v16  ;;  %390 = vperm.xlu0 %1219, %v1363_v16  }
 0x1fe   : > { %v391_v23 = vpop.permute.xlu0 %390 }
 0x1ff   : > { %v393_v24 = vsub.f32 %v373_v6, %v391_v23 }
 0x201   : > { %v394_v25 = vmul.f32 1.442695, %v393_v24 }
 0x203   : > { %1223 = vpow2.f32 %v394_v25 }
 0x20d   : > { %v1381_v28 = vpop.eup %1223 }
 0x20e   : > { %v411_v30 = vpack.c.bf16 %v1381_v28, %v1381_v28  ;;  %v398_v22 = vsel %vm380_vm3, %v1381_v28, 0.0 }
 0x210   : > { %1145 = vmatmul.mubr.msk.bf16.vlgmr.msra.gmra.mrb[0].mxu1 %vm412_vm6, %v411_v30 }
 0x211   : > { %1149 = vmatpush3.bf16.xpose.msra.mxu1 %v481_v29  ;;  %1150 = vmatprep.mubr.msk.bf16.mxu1 %vm1272_vm0, %v1271_v0 }
 0x212   : > { %1160 = vmatprep.subr.bf16.mxu1 %v1271_v0 }
 0x218   : > { %1151 = vmatmul.mubr.msk.bf16.vlgmr.msra.gmra.mrb[4].mxu1 %vm332_vm1, %v471_v27 }
 0x219   : > { %1161 = vmatpush3.bf16.xpose.msra.mxu1 %v619_v33  ;;  %1162 = vmatprep.mubr.msk.bf16.mxu1 %vm1272_vm0, %v1271_v0 }
 0x21a   : > { %1172 = vmatprep.subr.bf16.mxu1 %v1271_v0 }
 0x220   : > { %1163 = vmatmul.mubr.msk.bf16.vlgmr.msra.gmra.mrb[8].mxu1 %vm332_vm1, %v612_v32 }
 0x221   : > { %1173 = vmatpush3.bf16.xpose.msra.mxu1 %v754_v35  ;;  %1174 = vmatprep.mubr.msk.bf16.mxu1 %vm1272_vm0, %v1271_v0 }
 0x228   : > { %1175 = vmatmul.mubr.msk.bf16.vlgmr.msra.gmra.mrb[12].mxu1 %vm332_vm1, %v747_v36  ;;  %v386_v36 = vmul.f32 1.442695, %v385_v17  ;;  %v679_v17 = vld [vmem:[#allocation3 + $0x10] sm:$0x1f] }
 0x2e3   : > { %v1400_v37 = vpop.f32.mrb[0].mxu1 }
 0x2e4   : > { %v1146_v38 = vpop.f32.mrb[1].mxu1 }
 0x2e5   : > { %v460_v39 = vpop.f32.mrb[2].mxu1 }
 0x2e6   : > { %v1147_v40 = vpop.f32.mrb[3].mxu1 }
 0x2eb   : > { %v517_v41 = vpop.f32.mrb[4].mxu1 }
 0x2ec   : > { %v1152_v42 = vpop.f32.mrb[5].mxu1  ;;  %v525_v43 = vsel %vm380_vm3, %v517_v41, -inf }
 0x2ed   : > { %526 = vmax.xlane.f32.xlu1 %v525_v43  ;;  %v520_v44 = vpop.f32.mrb[6].mxu1  ;;  %v541_v43 = vld [vmem:[#allocation3 + $0x8] sm:$0x1f] }
 0x2ee   : > { %v1153_v45 = vpop.f32.mrb[7].mxu1 }
 0x2ef   : > { %v396_v45 = vld [vmem:[#allocation3] sm:$0x1f] }
 0x2f3   : > { %v655_v46 = vpop.f32.mrb[8].mxu1 }
 0x2f4   : > { %v1164_v47 = vpop.f32.mrb[9].mxu1  ;;  %v663_v48 = vsel %vm380_vm3, %v655_v46, -inf }
 0x2f5   : > { %664 = vmax.xlane.f32.xlu0 %v663_v48  ;;  %v658_v49 = vpop.f32.mrb[10].mxu1 }
 0x2f6   : > { %v1165_v50 = vpop.f32.mrb[11].mxu1 }
 0x2fb   : > { %v790_v51 = vpop.f32.mrb[12].mxu1 }
 0x2fc   : > { %v1176_v52 = vpop.f32.mrb[13].mxu1  ;;  %v798_v53 = vsel %vm380_vm3, %v790_v51, -inf }
 0x2fd   : > { %799 = vmax.xlane.f32.xlu1 %v798_v53  ;;  %v793_v54 = vpop.f32.mrb[14].mxu1  ;;  %v814_v52 = vld [vmem:[#allocation3 + $0x18] sm:$0x1f] }
 0x2fe   : > { %v1177_v55 = vpop.f32.mrb[15].mxu1 }
 0x37a   : > { %v527_v57 = vpop.xlane.xlu1 %526 }
 0x37b   : > { %v528_v58 = vmax.f32 %v524_v56, %v527_v57 }
 0x37d   : > { %v529_v59 = vsub.f32 %v524_v56, %v528_v58  ;;  %610 = vst.msk [vmem:[#allocation2 + $0x8] sm:$0x1f] %vm314_vm2, %v528_v58  ;;  %534 = vperm.xlu1 %1220, %v528_v58   ;;  %v404_v58 = vld [vmem:[#allocation4] sm:$0x1f] }
 0x37f   : > { %v530_v25 = vmul.f32 1.442695, %v529_v59 }
 0x382   : > { %v665_v61 = vpop.xlane.xlu0 %664 }
 0x383   : > { %v666_v62 = vmax.f32 %v662_v60, %v665_v61 }
 0x385   : > { %v667_v63 = vsub.f32 %v662_v60, %v666_v62  ;;  %745 = vst.msk [vmem:[#allocation2 + $0x10] sm:$0x1f] %vm314_vm2, %v666_v62  ;;  %672 = vperm.xlu0 %1219, %v666_v62  }
 0x387   : > { %v668_v28 = vmul.f32 1.442695, %v667_v63  ;;  %v549_v63 = vld [vmem:[#allocation4 + $0x8] sm:$0x1f] }
 0x38a   : > { %v800_v2 = vpop.xlane.xlu1 %799 }
 0x38b   : > { %v1410_v3 = vmax.f32 %v1407_v1, %v800_v2 }
 0x38d   : > { %v802_v5 = vsub.f32 %v1407_v1, %v1410_v3  ;;  %880 = vst.msk [vmem:[#allocation2 + $0x18] sm:$0x1f] %vm314_vm2, %v1410_v3  ;;  %807 = vperm.xlu1 %1220, %v1410_v3  }
 0x38f   : > { %v803_v40 = vmul.f32 1.442695, %v802_v5 }
 0x391   : > { %560 = vrot.lane.b32.xlu1 %v1106_v4, %s1275_s23 }
 0x395   : > { %695 = vrot.lane.b32.xlu1 %v1106_v4, %s1276_s24 }
 0x399   : > { %830 = vrot.lane.b32.xlu1 %v1106_v4, %s1277_s25 }
 0x3fc   : > { %v535_v6 = vpop.permute.xlu1 %534 }
 0x3fd   : > { %v537_v7 = vsub.f32 %v517_v41, %v535_v6 }
 0x3ff   : > { %v538_v8 = vmul.f32 1.442695, %v537_v7 }
 0x401   : > { %1225 = vpow2.f32 %v538_v8  ;;  %v687_v8 = vld [vmem:[#allocation4 + $0x10] sm:$0x1f] }
 0x404   : > { %v673_v9 = vpop.permute.xlu0 %672 }
 0x405   : > { %v675_v10 = vsub.f32 %v655_v46, %v673_v9 }
 0x407   : > { %v676_v11 = vmul.f32 1.442695, %v675_v10 }
 0x409   : > { %1227 = vpow2.f32 %v676_v11 }
 0x40b   : > { %v1226_v12 = vpop.eup %1225 }
 0x40c   : > { %v808_v13 = vpop.permute.xlu1 %807  ;;  %v543_v15 = vsel %vm380_vm3, %v1226_v12, 0.0  ;;  %v556_v27 = vpack.c.bf16 %v1226_v12, %v1226_v12 }
 0x40d   : > { %v810_v18 = vsub.f32 %v790_v51, %v808_v13  ;;  %544 = vadd.xlane.f32.xlu1 %v543_v15 }
 0x40f   : > { %v811_v19 = vmul.f32 1.442695, %v810_v18  ;;  %v822_v18 = vld [vmem:[#allocation4 + $0x18] sm:$0x1f] }
 0x410   : > { %v561_v20 = vpop.permute.xlu1 %560 }
 0x411   : > { %1229 = vpow2.f32 %v811_v19  ;;  %v566_v23 = vand.u32 %v561_v20, %v1376_v21  ;;  %399 = vadd.xlane.f32.xlu1 %v398_v22 }
 0x412   : > { %1231 = vpow2.f32 %v530_v25 }
 0x413   : > { %v1228_v24 = vpop.eup %1227  ;;  %1155 = vmatpush3.bf16.msra.mxu0 %v566_v23  ;;  %1233 = vpow2.f32 %v668_v28 }
 0x414   : > { %v681_v26 = vsel %vm380_vm3, %v1228_v24, 0.0  ;;  %v696_v29 = vpop.permute.xlu1 %695  ;;  %1166 = vmatprep.subr.bf16.mxu0 %v1271_v0  ;;  %v694_v35 = vpack.c.bf16 %v1228_v24, %v1228_v24  ;;  %1235 = vpow2.f32 %v386_v36 }
 0x415   : > { %682 = vadd.xlane.f32.xlu0 %v681_v26  ;;  %v701_v30 = vand.u32 %v696_v29, %v1376_v21  ;;  %1237 = vpow2.f32 %v803_v40 }
 0x416   : > { %1157 = vmatmul.mubr.msk.bf16.vlgmr.msra.gmra.mrb[4].mxu0 %vm412_vm6, %v556_v27 }
 0x417   : > { %1167 = vmatpush3.bf16.msra.mxu0 %v701_v30  ;;  %1168 = vmatprep.mubr.msk.bf16.mxu0 %vm1272_vm0, %v1271_v0 }
 0x418   : > { %v831_v31 = vpop.permute.xlu1 %830  ;;  %1178 = vmatprep.subr.bf16.mxu0 %v1271_v0 }
 0x419   : > { %v836_v33 = vand.u32 %v831_v31, %v1376_v21 }
 0x41b   : > { %v1230_v32 = vpop.eup %1229 }
 0x41c   : > { %v816_v34 = vsel %vm380_vm3, %v1230_v32, 0.0  ;;  %v1232_v21 = vpop.eup %1231  ;;  %v829_v38 = vpack.c.bf16 %v1230_v32, %v1230_v32 }
 0x41d   : > { %817 = vadd.xlane.f32.xlu0 %v816_v34  ;;  %v1234_v39 = vpop.eup %1233 }
 0x41e   : > { %1169 = vmatmul.mubr.msk.bf16.vlgmr.msra.gmra.mrb[8].mxu0 %vm412_vm6, %v694_v35  ;;  %v1236_v41 = vpop.eup %1235  ;;  %v680_v48 = vmul.f32 %v1234_v39, %v679_v17 }
 0x41f   : > { %1179 = vmatpush3.bf16.msra.mxu0 %v836_v33  ;;  %1180 = vmatprep.mubr.msk.bf16.mxu0 %vm1272_vm0, %v1271_v0  ;;  %v1238_v42 = vpop.eup %1237  ;;  %v542_v0 = vmul.f32 %v1232_v21, %v541_v43  ;;  %v397_v14 = vmul.f32 %v1236_v41, %v396_v45  ;;  %vm959_vm0 = vmand %vm958_vm15, %vm895_vm9 }
 0x420   : > { %v815_v54 = vmul.f32 %v1238_v42, %v814_v52 }
 0x422   : > { %552 = vperm.xlu1 %1220, %v1232_v21  }
 0x426   : > { %1181 = vmatmul.mubr.msk.bf16.vlgmr.msra.gmra.mrb[12].mxu0 %vm412_vm6, %v829_v38  ;;  %690 = vperm.xlu1 %1220, %v1234_v39   ;;  %v897_v38 = vld [vmem:[%s1463_s4] sm:$0x7] }
 0x433   : > { %407 = vperm.xlu0 %1219, %v1236_v41  }
 0x437   : > { %825 = vperm.xlu0 %1219, %v1238_v42  }
 0x49a   : > { %v545_v44 = vpop.xlane.xlu1 %544 }
 0x49b   : > { %v546_v46 = vadd.f32 %v545_v44, %v542_v0 }
 0x49d   : > { %547 = vst.msk [vmem:[#allocation3 + $0x8] sm:$0x1f] %vm314_vm2, %v546_v46 }
 0x49e   : > { %v400_v16 = vpop.xlane.xlu1 %399 }
 0x49f   : > { %v401_v47 = vadd.f32 %v400_v16, %v397_v14 }
 0x4a1   : > { %403 = vst.msk [vmem:[#allocation3] sm:$0x1f] %vm314_vm2, %v401_v47 }
 0x4a2   : > { %v683_v49 = vpop.xlane.xlu0 %682  ;;  %v553_v1 = vpop.permute.xlu1 %552 }
 0x4a3   : > { %v684_v50 = vadd.f32 %v683_v49, %v680_v48  ;;  %v555_v2 = vmul.f32 %v553_v1, %v549_v63 }
 0x4a4   : > { %v901_v51 = vld [vmem:[#allocation3 + $0x8] sm:$0x1f] }
 0x4a5   : > { %685 = vst.msk [vmem:[#allocation3 + $0x10] sm:$0x1f] %vm314_vm2, %v684_v50  ;;  %904 = vperm.xlu0 %1219, %v901_v51  }
 0x4a6   : > { %v691_v9 = vpop.permute.xlu1 %690 }
 0x4a7   : > { %v693_v10 = vmul.f32 %v691_v9, %v687_v8 }
 0x4a8   : > { %v885_v53 = vld [vmem:[#allocation3] sm:$0x1f] }
 0x4a9   : > { %888 = vperm.xlu1 %1220, %v885_v53  }
 0x4aa   : > { %v818_v55 = vpop.xlane.xlu0 %817 }
 0x4ab   : > { %v819_v56 = vadd.f32 %v818_v55, %v815_v54 }
 0x4ac   : > { %v922_v57 = vld [vmem:[#allocation3 + $0x10] sm:$0x1f] }
 0x4ad   : > { %820 = vst.msk [vmem:[#allocation3 + $0x18] sm:$0x1f] %vm314_vm2, %v819_v56  ;;  %925 = vperm.xlu0 %1219, %v922_v57  }
 0x4b2   : > { %v408_v59 = vpop.permute.xlu0 %407 }
 0x4b3   : > { %v410_v60 = vmul.f32 %v408_v59, %v404_v58 }
 0x4b4   : > { %v943_v61 = vld [vmem:[#allocation3 + $0x18] sm:$0x1f] }
 0x4b5   : > { %v463_v62 = vadd.f32 %v1400_v37, %v410_v60  ;;  %946 = vperm.xlu0 %1219, %v943_v61  }
 0x4b6   : > { %v826_v19 = vpop.permute.xlu0 %825 }
 0x4b7   : > { %465 = vst.msk [vmem:[#allocation4] sm:$0x1f] %vm323_vm7, %v463_v62  ;;  %v828_v20 = vmul.f32 %v826_v19, %v822_v18 }
 0x4be   : > { %v884_v35 = vld [vmem:[#allocation4] sm:$0x1f] }
 0x4e9   : > { %v602_v3 = vpop.f32.mrb[4].mxu0 }
 0x4ea   : > { %v608_v4 = vadd.f32 %v602_v3, %v555_v2  ;;  %v1158_v5 = vpop.f32.mrb[5].mxu0 }
 0x4eb   : > { %v605_v6 = vpop.f32.mrb[6].mxu0 }
 0x4ec   : > { %609 = vst.msk [vmem:[#allocation4 + $0x8] sm:$0x1f] %vm323_vm7, %v608_v4  ;;  %v1159_v7 = vpop.f32.mrb[7].mxu0 }
 0x4f1   : > { %v737_v11 = vpop.f32.mrb[8].mxu0 }
 0x4f2   : > { %v743_v12 = vadd.f32 %v737_v11, %v693_v10  ;;  %v1170_v13 = vpop.f32.mrb[9].mxu0 }
 0x4f3   : > { %v740_v37 = vpop.f32.mrb[10].mxu0  ;;  %v900_v31 = vld [vmem:[#allocation4 + $0x8] sm:$0x1f] }
 0x4f4   : > { %744 = vst.msk [vmem:[#allocation4 + $0x10] sm:$0x1f] %vm323_vm7, %v743_v12  ;;  %v1171_v15 = vpop.f32.mrb[11].mxu0 }
 0x4f9   : > { %v872_v22 = vpop.f32.mrb[12].mxu0 }
 0x4fa   : > { %v878_v23 = vadd.f32 %v872_v22, %v828_v20  ;;  %v1182_v24 = vpop.f32.mrb[13].mxu0 }
 0x4fb   : > { %v875_v25 = vpop.f32.mrb[14].mxu0  ;;  %v921_v41 = vld [vmem:[#allocation4 + $0x10] sm:$0x1f] }
 0x4fc   : > { %879 = vst.msk [vmem:[#allocation4 + $0x18] sm:$0x1f] %vm323_vm7, %v878_v23  ;;  %v1183_v26 = vpop.f32.mrb[15].mxu0 }
 0x503   : > { %v942_v45 = vld [vmem:[#allocation4 + $0x18] sm:$0x1f] }
 0x524   : > { %v905_v27 = vpop.permute.xlu0 %904 }
 0x525   : > { %1239 = vrcp.f32 %v905_v27 }
 0x528   : > { %v889_v29 = vpop.permute.xlu1 %888 }
 0x529   : > { %1241 = vrcp.f32 %v889_v29 }
 0x52c   : > { %v926_v30 = vpop.permute.xlu0 %925 }
 0x52d   : > { %1243 = vrcp.f32 %v926_v30 }
 0x52f   : > { %v1240_v28 = vpop.eup %1239 }
 0x530   : > { %v908_v32 = vmul.f32 %v1240_v28, %v900_v31 }
 0x532   : > { %v1117_v33 = vpack.c.bf16 %v908_v32, %v908_v32 }
 0x533   : > { %v1242_v34 = vpop.eup %1241 }
 0x534   : > { %v892_v21 = vmul.f32 %v1242_v34, %v884_v35  ;;  %v947_v36 = vpop.permute.xlu0 %946  ;;  %913 = vrot.lane.b32.xlu1 %v1117_v33, %s1279_s5 }
 0x535   : > { %1245 = vrcp.f32 %v947_v36 }
 0x536   : > { %v893_v39 = vpack.c.bf16 %v892_v21, %v892_v21 }
 0x537   : > { %v1244_v40 = vpop.eup %1243 }
 0x538   : > { %v929_v42 = vmul.f32 %v1244_v40, %v921_v41  ;;  %v898_v43 = vsel %vm896_vm10, %v893_v39, %v897_v38 }
 0x539   : > { %899 = vst [vmem:[%s1463_s4] sm:$0x7] %v898_v43 }
 0x53a   : > { %v1118_v0 = vpack.c.bf16 %v929_v42, %v929_v42 }
 0x53c   : > { %934 = vrot.lane.b32.xlu1 %v1118_v0, %s1280_s6 }
 0x53f   : > { %v1246_v44 = vpop.eup %1245 }
 0x540   : > { %v950_v46 = vmul.f32 %v1246_v44, %v942_v45  ;;  %v918_v16 = vld [vmem:[%s1463_s4] sm:$0x7] }
 0x542   : > { %v1119_v14 = vpack.c.bf16 %v950_v46, %v950_v46 }
 0x544   : > { %955 = vrot.lane.b32.xlu1 %v1119_v14, %s1281_s7 }
 0x5a6   : > { %v914_v17 = vpop.permute.xlu1 %913 }
 0x5a7   : > { %v919_v47 = vsel %vm917_vm12, %v914_v17, %v918_v16 }
 0x5a8   : > { %920 = vst [vmem:[%s1463_s4] sm:$0x7] %v919_v47 }
 0x5ae   : > { %v935_v48 = vpop.permute.xlu1 %934 }
 0x5af   : > { %v939_v49 = vld [vmem:[%s1463_s4] sm:$0x7] }
 0x5b0   : > { %v940_v50 = vsel %vm938_vm14, %v935_v48, %v939_v49 }
 0x5b1   : > { %941 = vst [vmem:[%s1463_s4] sm:$0x7] %v940_v50 }
 0x5b6   : > { %v956_v52 = vpop.permute.xlu1 %955 }
 0x5b8   : > { %v960_v51 = vld [vmem:[%s1463_s4] sm:$0x7] }
 0x5b9   : > { %v961_v53 = vsel %vm959_vm0, %v956_v52, %v960_v51 }
 0x5ba   : > { %962 = vst [vmem:[%s1463_s4] sm:$0x7] %v961_v53 }
 0x5bb PF: > { %s13_s14 = sadd.s32 1, %s1269_s14   ;;  %s1490_s12 = smov %s1265_s13 }
 0x5bc   : > { %p10_p5 = scmp.ge.s32.totalorder %s13_s14, 4   ;;  %s1491_s13 = smov %s1493_s15 }
 0x5be   :  { %12 = sbr.rel (!%p10_p5) target bundleno = 2 (0x2), region = 85 }

// kernel: pooling_transformer_forward.39
= control target key start
LH: loop header
LB: loop body
LE: loop exit
PB: predicated region body
PF: predicated region fallthrough
CT: control target
= control target key end

     0   :  { %v162_v0 = vmov 0.0   ;;  %vm163_vm0 = vmmov 0   ;;  %vm62_vm1 = vcmask 523264   ;;  %s208_s1 = inlined_call_operand.vmem [shape: bf16[64,128], index: 1, kind: input, shape index: {}]   ;;  %s209_s0 = inlined_call_operand.vmem [shape: bf16[16,64], index: 0, kind: input, shape index: {}]   ;;  %s210_s2 = inlined_call_operand.vmem [shape: f32[1,128], index: 2, kind: input, shape index: {}]   ;;  %s211_s3 = inlined_call_operand.vmem [shape: f32[16,128], index: 3, kind: output, shape index: {}]  }
   0x1   :  { %143 = vmatprep.subr.bf16.mxu0 %v162_v0  ;;  %v157_v1 = vld [vmem:[%s208_s1] sm:$0xff]   ;;  %151 = vmatprep.mubr.msk.bf16.mxu0 %vm163_vm0, %v162_v0  ;;  %v158_v2 = vld [vmem:[%s208_s1 + $0x8] sm:$0xff]   ;;  %v159_v3 = vld [vmem:[%s208_s1 + $0x10] sm:$0xff]  }
   0x2   :  { %144 = vmatpush3.bf16.msra.mxu0 %v157_v1  ;;  %v160_v4 = vld [vmem:[%s208_s1 + $0x18] sm:$0xff]   ;;  %v161_v5 = vld [vmem:[%s209_s0] sm:$0xff]  }
   0x3   :  { %145 = vmatprep.subr.bf16.mxu0 %v162_v0  ;;  %v137_v6 = vld [vmem:[%s210_s2] ss:$0 sm:$0xff] }
   0x6   :  { %146 = vmatpush3.bf16.msra.mxu0 %v158_v2 }
   0x7   :  { %147 = vmatprep.subr.bf16.mxu0 %v162_v0 }
   0xa   :  { %148 = vmatpush3.bf16.msra.mxu0 %v159_v3 }
   0xb   :  { %149 = vmatprep.subr.bf16.mxu0 %v162_v0 }
   0xe   :  { %150 = vmatpush3.bf16.msra.mxu0 %v160_v4 }
  0x11   :  { %152 = vmatmul.mubr.msk.bf16.vlgmr.msra.gmra.mrb[0].mxu0 %vm62_vm1, %v161_v5 }
  0xe4   :  { %v100_v7 = vpop.f32.mrb[0].mxu0 }
  0xe5   :  { %v123_v8 = vadd.f32 %v137_v6, %v100_v7  ;;  %v153_v9 = vpop.f32.mrb[1].mxu0 }
  0xe6   :  { %v103_v10 = vpop.f32.mrb[2].mxu0 }
  0xe7   :  { %125 = vst [vmem:[%s211_s3] sm:$0xff] %v123_v8  ;;  %v124_v11 = vadd.f32 %v137_v6, %v103_v10  ;;  %v154_v12 = vpop.f32.mrb[3].mxu0 }
  0xe9   :  { %126 = vst [vmem:[%s211_s3 + $0x8] sm:$0xff] %v124_v11 }

// kernel: pooling_transformer_forward.40
= control target key start
LH: loop header
LB: loop body
LE: loop exit
PB: predicated region body
PF: predicated region fallthrough
CT: control target
= control target key end

     0   :  { %vm15_vm0 = vcmask 261120   ;;  %s90_s0 = inlined_call_operand.vmem [shape: f32[8,32], index: 0, kind: input, shape index: {}]   ;;  %s91_s1 = inlined_call_operand.vmem [shape: f32[1,32], index: 1, kind: input, shape index: {}]   ;;  %s92_s2 = inlined_call_operand.vmem [shape: f32[1,32], index: 2, kind: input, shape index: {}]   ;;  %s93_s3 = inlined_call_operand.vmem [shape: f32[8,32], index: 3, kind: output, shape index: {}]  }
   0x1   :  { %v14_v0 = vld [vmem:[%s90_s0] sm:$0xff] }
   0x2   :  { %v16_v1 = vsel %vm15_vm0, %v14_v0, 0.0  ;;  %v51_v11 = vld [vmem:[%s91_s1] ss:$0 sm:$0xff] }
   0x3   :  { %17 = vadd.xlane.f32.xlu0 %v16_v1  ;;  %v52_v13 = vld [vmem:[%s92_s2] ss:$0 sm:$0xff] }
  0x90   :  { %v18_v2 = vpop.xlane.xlu0 %17 }
  0x91   :  { %v20_v3 = vmul.f32 0.03125, %v18_v2 }
  0x93   :  { %v21_v4 = vsub.f32 %v14_v0, %v20_v3 }
  0x95   :  { %v22_v5 = vmul.f32 %v21_v4, %v21_v4 }
  0x97   :  { %v23_v6 = vsel %vm15_vm0, %v22_v5, 0.0 }
  0x98   :  { %24 = vadd.xlane.f32.xlu0 %v23_v6 }
 0x125   :  { %v25_v7 = vpop.xlane.xlu0 %24 }
 0x126   :  { %v26_v8 = vmul.f32 0.03125, %v25_v7 }
 0x128   :  { %v27_v9 = vadd.f32 1e-06, %v26_v8 }
 0x12a   :  { %53 = vrsqrt.f32 %v27_v9 }
 0x134   :  { %v54_v10 = vpop.eup %53 }
 0x135   :  { %v29_v12 = vmul.f32 %v54_v10, %v21_v4 }
 0x137   :  { %v37_v14 = vmul.f32 %v51_v11, %v29_v12 }
 0x139   :  { %v45_v15 = vadd.f32 %v52_v13, %v37_v14 }
 0x13b   :  { %46 = vst.msk [vmem:[%s93_s3] sm:$0xff] %vm15_vm0, %v45_v15 }

// kernel: pooling_transformer_forward.41
= control target key start
LH: loop header
LB: loop body
LE: loop exit
PB: predicated region body
PF: predicated region fallthrough
CT: control target
= control target key end

     0   :  { %v136_v0 = vmov 0.0   ;;  %vm137_vm0 = vmmov 0   ;;  %vm46_vm1 = vcmask 261120   ;;  %s176_s1 = inlined_call_operand.vmem [shape: bf16[32,128], index: 1, kind: input, shape index: {}]   ;;  %s177_s0 = inlined_call_operand.vmem [shape: bf16[16,32], index: 0, kind: input, shape index: {}]   ;;  %s178_s2 = inlined_call_operand.vmem [shape: f32[1,128], index: 2, kind: input, shape index: {}]   ;;  %s179_s3 = inlined_call_operand.vmem [shape: f32[16,128], index: 3, kind: output, shape index: {}]  }
   0x1   :  { %123 = vmatprep.subr.bf16.mxu0 %v136_v0  ;;  %v133_v1 = vld [vmem:[%s176_s1] sm:$0xff]   ;;  %127 = vmatprep.mubr.msk.bf16.mxu0 %vm137_vm0, %v136_v0  ;;  %v134_v2 = vld [vmem:[%s176_s1 + $0x8] sm:$0xff]  }
   0x2   :  { %124 = vmatpush3.bf16.msra.mxu0 %v133_v1  ;;  %v135_v3 = vld [vmem:[%s177_s0] sm:$0xff]  }
   0x3   :  { %125 = vmatprep.subr.bf16.mxu0 %v136_v0  ;;  %v119_v4 = vld [vmem:[%s178_s2] ss:$0 sm:$0xff] }
   0x6   :  { %126 = vmatpush3.bf16.msra.mxu0 %v134_v2 }
   0x9   :  { %128 = vmatmul.mubr.msk.bf16.vlgmr.msra.gmra.mrb[0].mxu0 %vm46_vm1, %v135_v3 }
  0xdc   :  { %v84_v5 = vpop.f32.mrb[0].mxu0 }
  0xdd   :  { %v107_v6 = vadd.f32 %v119_v4, %v84_v5  ;;  %v129_v7 = vpop.f32.mrb[1].mxu0 }
  0xde   :  { %v87_v8 = vpop.f32.mrb[2].mxu0 }
  0xdf   :  { %109 = vst [vmem:[%s179_s3] sm:$0xff] %v107_v6  ;;  %v108_v9 = vadd.f32 %v119_v4, %v87_v8  ;;  %v130_v10 = vpop.f32.mrb[3].mxu0 }
  0xe1   :  { %110 = vst [vmem:[%s179_s3 + $0x8] sm:$0xff] %v108_v9 }

// kernel: pooling_transformer_forward.44
= control target key start
LH: loop header
LB: loop body
LE: loop exit
PB: predicated region body
PF: predicated region fallthrough
CT: control target
= control target key end

     0   :  { %v94_v0 = vmov 0   ;;  %v31_v3 = vlaneseq  ;;  %vm67_vm0 = vcmask 253952   ;;  %s147_s3 = inlined_call_operand.<no memory space> [shape: f32[1,1], index: 3, kind: input, shape index: {}]   ;;  %s148_s0 = inlined_call_operand.vmem [shape: f32[2,1,32], index: 0, kind: input, shape index: {}]   ;;  %s149_s1 = inlined_call_operand.vmem [shape: f32[2,1,32], index: 1, kind: input, shape index: {}]   ;;  %s150_s2 = inlined_call_operand.vmem [shape: f32[2,1,32], index: 2, kind: input, shape index: {}]   ;;  %s151_s4 = inlined_call_operand.vmem [shape: f32[2,1,32], index: 4, kind: output, shape index: {}]  }
   0x1   :  { %77 = vset.pattern.permute.xlu0 %v94_v0  ;;  %v9_v1 = vstv %s147_s3  ;;  %v19_v5 = vld [vmem:[%s148_s0] sm:$0x1]  ;;  %v20_v6 = vld [vmem:[%s148_s0 + $0x1] sm:$0x1] }
   0x2   :  { %10 = vst [vmem:[#allocation2] sm:$0x1] %v9_v1  ;;  %v32_v4 = vshrl.u32 %v31_v3, 7  ;;  %v74_v8 = vmul.f32 -1.442695, %v19_v5 }
   0x3   :  { %v75_v9 = vmul.f32 -1.442695, %v20_v6  ;;  %v21_v11 = vld [vmem:[%s149_s1] sm:$0x1]  ;;  %v22_v12 = vld [vmem:[%s149_s1 + $0x1] sm:$0x1] }
   0x4   :  { %v33_v7 = vsub.s32 0, %v32_v4  ;;  %78 = vpow2.f32 %v74_v8  ;;  %v23_v26 = vld [vmem:[%s150_s2] sm:$0x1]  ;;  %v24_v27 = vld [vmem:[%s150_s2 + $0x1] sm:$0x1] }
   0x5   :  { %80 = vpow2.f32 %v75_v9 }
   0x9   :  { %v25_v2 = vld [vmem:[#allocation2] sm:$0x1] }
   0xa   :  { %28 = vperm.xlu0 %77, %v25_v2  }
   0xe   :  { %v79_v20 = vpop.eup %78 }
   0xf   :  { %v81_v21 = vpop.eup %80  ;;  %v55_v22 = vadd.f32 1.0, %v79_v20 }
  0x10   :  { %v56_v23 = vadd.f32 1.0, %v81_v21 }
  0x89   :  { %v29_v10 = vpop.permute.xlu0 %28 }
  0x8a   :  { %v34_v13 = vrot.slane %v29_v10, %v33_v7 }
  0x8c   :  { %v35_v14 = vadd.f32 %v34_v13, %v21_v11  ;;  %v36_v15 = vadd.f32 %v34_v13, %v22_v12 }
  0x8e   :  { %v37_v16 = vsub.f32 %v35_v14, %v35_v14  ;;  %v38_v17 = vsub.f32 %v36_v15, %v36_v15 }
  0x90   :  { %v39_v18 = vmul.f32 1.442695, %v37_v16  ;;  %v41_v19 = vmul.f32 1.442695, %v38_v17 }
  0x92   :  { %82 = vpow2.f32 %v39_v18 }
  0x93   :  { %84 = vpow2.f32 %v41_v19 }
  0x94   :  { %86 = vrcp.f32 %v55_v22 }
  0x95   :  { %88 = vrcp.f32 %v56_v23 }
  0x9c   :  { %v83_v24 = vpop.eup %82 }
  0x9d   :  { %v85_v25 = vpop.eup %84  ;;  %90 = vrcp.f32 %v83_v24  ;;  %v43_v30 = vmul.f32 %v83_v24, %v23_v26 }
  0x9e   :  { %92 = vrcp.f32 %v85_v25  ;;  %v87_v28 = vpop.eup %86  ;;  %v44_v32 = vmul.f32 %v85_v25, %v24_v27 }
  0x9f   :  { %v89_v29 = vpop.eup %88 }
  0xa7   :  { %v91_v31 = vpop.eup %90 }
  0xa8   :  { %v93_v33 = vpop.eup %92  ;;  %v62_v34 = vmul.f32 %v91_v31, %v43_v30 }
  0xa9   :  { %v64_v35 = vmul.f32 %v93_v33, %v44_v32 }
  0xaa   :  { %v65_v36 = vmul.f32 %v87_v28, %v62_v34 }
  0xab   :  { %v66_v37 = vmul.f32 %v89_v29, %v64_v35 }
  0xac   :  { %68 = vst.msk [vmem:[%s151_s4] sm:$0x1] %vm67_vm0, %v65_v36 }
  0xad   :  { %69 = vst.msk [vmem:[%s151_s4 + $0x1] sm:$0x1] %vm67_vm0, %v66_v37 }

// kernel: pooling_transformer_forward.45
= control target key start
LH: loop header
LB: loop body
LE: loop exit
PB: predicated region body
PF: predicated region fallthrough
CT: control target
= control target key end

     0   :  { %v136_v0 = vmov 0.0   ;;  %vm137_vm0 = vmmov 0   ;;  %vm46_vm1 = vcmask 261120   ;;  %s176_s1 = inlined_call_operand.vmem [shape: bf16[32,128], index: 1, kind: input, shape index: {}]   ;;  %s177_s0 = inlined_call_operand.vmem [shape: bf16[16,32], index: 0, kind: input, shape index: {}]   ;;  %s178_s2 = inlined_call_operand.vmem [shape: f32[1,128], index: 2, kind: input, shape index: {}]   ;;  %s179_s3 = inlined_call_operand.vmem [shape: f32[16,128], index: 3, kind: output, shape index: {}]  }
   0x1   :  { %123 = vmatprep.subr.bf16.mxu0 %v136_v0  ;;  %v133_v1 = vld [vmem:[%s176_s1] sm:$0xff]   ;;  %127 = vmatprep.mubr.msk.bf16.mxu0 %vm137_vm0, %v136_v0  ;;  %v134_v2 = vld [vmem:[%s176_s1 + $0x8] sm:$0xff]  }
   0x2   :  { %124 = vmatpush3.bf16.msra.mxu0 %v133_v1  ;;  %v135_v3 = vld [vmem:[%s177_s0] sm:$0xff]  }
   0x3   :  { %125 = vmatprep.subr.bf16.mxu0 %v136_v0  ;;  %v119_v4 = vld [vmem:[%s178_s2] ss:$0 sm:$0xff] }
   0x6   :  { %126 = vmatpush3.bf16.msra.mxu0 %v134_v2 }
   0x9   :  { %128 = vmatmul.mubr.msk.bf16.vlgmr.msra.gmra.mrb[0].mxu0 %vm46_vm1, %v135_v3 }
  0xdc   :  { %v84_v5 = vpop.f32.mrb[0].mxu0 }
  0xdd   :  { %v107_v6 = vadd.f32 %v119_v4, %v84_v5  ;;  %v129_v7 = vpop.f32.mrb[1].mxu0 }
  0xde   :  { %v87_v8 = vpop.f32.mrb[2].mxu0 }
  0xdf   :  { %109 = vst [vmem:[%s179_s3] sm:$0xff] %v107_v6  ;;  %v108_v9 = vadd.f32 %v119_v4, %v87_v8  ;;  %v130_v10 = vpop.f32.mrb[3].mxu0 }
  0xe1   :  { %110 = vst [vmem:[%s179_s3 + $0x8] sm:$0xff] %v108_v9 }

</bundles_post_ra>
